<compile_context>
chip_gen: v7x
topology: tpu7x:2x2x1
jax: 0.10.0
libtpu: 0.0.40
codegen_flags: <defaults>
</compile_context>

<pallas_src>
import functools

import jax
import jax.numpy as jnp
from jax.experimental import pallas as pl
from jax.experimental.pallas import tpu as pltpu

CIN = 896    # block input / output channels
CMID = 128   # branch channels
CCAT = 256   # concatenated channels
K = 7        # asymmetric kernel length
PAD = 3      # padding for the 1x7 / 7x1 convs
BN_EPS = 1e-5


# ----------------------------------------------------------------------------- kernel
def block17_kernel(x_ref,
                   w01_ref, s01_ref, b01_ref,     # fused branch0 + branch1[0] 1x1
                   w11_ref, s11_ref, b11_ref,     # (1,7) conv, weights flattened (7*128, 128)
                   w12_ref, s12_ref, b12_ref,     # (7,1) conv, weights flattened (7*128, 128)
                   w2_ref, b2_ref,                # final 1x1 (256 -> 896) + bias
                   o_ref, *, scale, nb, H, W, compute_dtype):
    M = nb * H * W

    x = x_ref[...]                                        # (nb, H, W, 896) f32
    x2d = x.reshape(M, CIN)
    xc = x2d.astype(compute_dtype)                        # bf16 operands, f32 accumulation

    # ---- fused branch0 + branch1 step1: one (M,896) x (896,256) matmul
    y = jnp.dot(xc, w01_ref[...], preferred_element_type=jnp.float32)
    y = jnp.maximum(y * s01_ref[...] + b01_ref[...], 0.0)  # (M, 256) f32, BN+ReLU in f32
    b0 = y[:, :CMID].astype(compute_dtype)                 # branch0 output (M, 128)
    b1 = y[:, CMID:].astype(compute_dtype)                 # branch1 intermediate (M, 128)

    # ---- branch1 step 2: (1,7) conv along W, pad (0,3)
    # im2col over the 7 W-taps -> single K=896 matmul (full MXU depth).
    b1v = b1.reshape(nb, H, W, CMID)
    zw = jnp.zeros((nb, H, PAD, CMID), compute_dtype)
    p = jnp.concatenate([zw, b1v, zw], axis=2)              # (nb, H, W+6, 128)
    cols = jnp.concatenate(
        [p[:, :, k:k + W, :].reshape(M, CMID) for k in range(K)], axis=1)  # (M, 896)
    y = jnp.dot(cols, w11_ref[...], preferred_element_type=jnp.float32)
    b1 = jnp.maximum(y * s11_ref[...] + b11_ref[...], 0.0).astype(compute_dtype)

    # ---- branch1 step 3: (7,1) conv along H, pad (3,0)
    # Shifts along the leading (untiled) axis -> tile-aligned slices, then one K=896 matmul.
    b1v = b1.reshape(nb, H, W, CMID)
    zh = jnp.zeros((nb, PAD, W, CMID), compute_dtype)
    p = jnp.concatenate([zh, b1v, zh], axis=1)              # (nb, H+6, W, 128)
    cols = jnp.concatenate(
        [p[:, k:k + H, :, :].reshape(M, CMID) for k in range(K)], axis=1)  # (M, 896)
    y = jnp.dot(cols, w12_ref[...], preferred_element_type=jnp.float32)
    b1 = jnp.maximum(y * s12_ref[...] + b12_ref[...], 0.0).astype(compute_dtype)

    # ---- concat(channel) + final 1x1 (256 -> 896): single K=256 matmul
    cat = jnp.concatenate([b0, b1], axis=1)                 # (M, 256)
    out = jnp.dot(cat, w2_ref[...], preferred_element_type=jnp.float32) + b2_ref[...]

    # ---- residual scaling + ReLU (f32)
    out = jnp.maximum(out * scale + x2d, 0.0)
    o_ref[...] = out.reshape(nb, H, W, CIN)


# ----------------------------------------------------------------------------- wrapper
def _pick_block_n(N, H, W, target_rows=256):
    """Smallest divisor of N whose block gives >= target_rows matmul rows."""
    for nb in range(1, N + 1):
        if N % nb == 0 and nb * H * W >= target_rows:
            return nb
    return N


def block17(x_nchw, kernel_params, scale=0.17, block_n=None,
            vmem_limit_bytes=64 * 1024 * 1024):
    N, C, H, W = x_nchw.shape
    assert C == CIN
    x = jnp.transpose(x_nchw, (0, 2, 3, 1)).astype(jnp.float32)    # NHWC

    if block_n is None:
        block_n = _pick_block_n(N, H, W)
    assert N % block_n == 0
    compute_dtype = kernel_params[0].dtype          # bf16 fast path / f32 check path

    kernel = functools.partial(block17_kernel, scale=scale, nb=block_n,
                               H=H, W=W, compute_dtype=compute_dtype)

    def full_spec(shape):
        return pl.BlockSpec(shape, lambda n, _nd=len(shape): (0,) * _nd)

    in_specs = [pl.BlockSpec((block_n, H, W, CIN), lambda n: (n, 0, 0, 0))]
    in_specs += [full_spec(p.shape) for p in kernel_params]

    out = pl.pallas_call(
        kernel,
        out_shape=jax.ShapeDtypeStruct((N, H, W, CIN), jnp.float32),
        grid=(N // block_n,),
        in_specs=in_specs,
        out_specs=pl.BlockSpec((block_n, H, W, CIN), lambda n: (n, 0, 0, 0)),
        compiler_params=pltpu.CompilerParams(
            dimension_semantics=("parallel",),
            vmem_limit_bytes=vmem_limit_bytes),
    )(x, *kernel_params)

    return jnp.transpose(out, (0, 3, 1, 2))                        # back to NCHW


# ----------------------------------------------------------------------------- params
def init_raw_params(key):
    """Deterministic synthetic parameters in PyTorch layouts."""
    ks = list(jax.random.split(key, 32))
    nk = lambda: ks.pop()

    def conv_w(shape):
        return 0.05 * jax.random.normal(nk(), shape, jnp.float32)

    def bn(c):
        gamma = 1.0 + 0.1 * jax.random.normal(nk(), (c,), jnp.float32)
        beta = 0.1 * jax.random.normal(nk(), (c,), jnp.float32)
        mean = 0.1 * jax.random.normal(nk(), (c,), jnp.float32)
        var = 0.5 + jax.random.uniform(nk(), (c,), jnp.float32)
        return gamma, beta, mean, var

    raw = {
        "b0_w": conv_w((CMID, CIN, 1, 1)),   "b0_bn": bn(CMID),
        "b10_w": conv_w((CMID, CIN, 1, 1)),  "b10_bn": bn(CMID),
        "b11_w": conv_w((CMID, CMID, 1, K)), "b11_bn": bn(CMID),
        "b12_w": conv_w((CMID, CMID, K, 1)), "b12_bn": bn(CMID),
        "c2_w": conv_w((CIN, CCAT, 1, 1)),
        "c2_b": 0.05 * jax.random.normal(nk(), (CIN,), jnp.float32),
    }
    return raw


def prepare_kernel_params(raw, compute_dtype=jnp.bfloat16):
    """Fold eval-mode BN, fuse/flatten weights for the kernel's matmul layouts."""
    def fold(bn_params):
        gamma, beta, mean, var = bn_params
        s = gamma / jnp.sqrt(var + BN_EPS)
        b = beta - mean * s
        return s.reshape(1, -1), b.reshape(1, -1)

    # fused branch0 + branch1[0] 1x1: (896, 256)
    w_b0 = raw["b0_w"].reshape(CMID, CIN).T
    w_b10 = raw["b10_w"].reshape(CMID, CIN).T
    w01 = jnp.concatenate([w_b0, w_b10], axis=1).astype(compute_dtype)
    s_b0, b_b0 = fold(raw["b0_bn"])
    s_b10, b_b10 = fold(raw["b10_bn"])
    s01 = jnp.concatenate([s_b0, s_b10], axis=1)
    b01 = jnp.concatenate([b_b0, b_b10], axis=1)

    # (co, ci, 1, 7) -> (k, ci, co) -> (7*ci, co) : matches im2col tap ordering
    w11 = jnp.transpose(raw["b11_w"][:, :, 0, :], (2, 1, 0)).reshape(K * CMID, CMID)
    w11 = w11.astype(compute_dtype)
    s11, b11 = fold(raw["b11_bn"])

    # (co, ci, 7, 1) -> (k, ci, co) -> (7*ci, co)
    w12 = jnp.transpose(raw["b12_w"][:, :, :, 0], (2, 1, 0)).reshape(K * CMID, CMID)
    w12 = w12.astype(compute_dtype)
    s12, b12 = fold(raw["b12_bn"])

    w2 = raw["c2_w"].reshape(CIN, CCAT).T.astype(compute_dtype)        # (256, 896)
    b2 = raw["c2_b"].reshape(1, CIN)

    return (w01, s01, b01, w11, s11, b11, w12, s12, b12, w2, b2)


# ----------------------------------------------------------------------------- reference
def ref_block17(x, raw, scale):
    """Pure-JAX NCHW reference mirroring the PyTorch module (eval-mode BN)."""
    def conv(x, w, padding, bias=None):
        y = jax.lax.conv_general_dilated(
            x, w, window_strides=(1, 1), padding=padding,
            dimension_numbers=("NCHW", "OIHW", "NCHW"))
        if bias is not None:
            y = y + bias[None, :, None, None]
        return y

    def bn(x, p):
        gamma, beta, mean, var = p
        inv = gamma / jnp.sqrt(var + BN_EPS)
        return x * inv[None, :, None, None] + (beta - mean * inv)[None, :, None, None]

    relu = lambda t: jnp.maximum(t, 0.0)

    x0 = relu(bn(conv(x, raw["b0_w"], [(0, 0), (0, 0)]), raw["b0_bn"]))
    x1 = relu(bn(conv(x, raw["b10_w"], [(0, 0), (0, 0)]), raw["b10_bn"]))
    x1 = relu(bn(conv(x1, raw["b11_w"], [(0, 0), (3, 3)]), raw["b11_bn"]))
    x1 = relu(bn(conv(x1, raw["b12_w"], [(3, 3), (0, 0)]), raw["b12_bn"]))
    out = conv(jnp.concatenate([x0, x1], axis=1), raw["c2_w"],
               [(0, 0), (0, 0)], bias=raw["c2_b"])
    return relu(out * scale + x)


# ----------------------------------------------------------------------------- main
if __name__ == "__main__":
    key = jax.random.PRNGKey(0)
    kx, kp = jax.random.split(key)

    # Block17 requires 896 input channels; N=16 gives 4 batch-blocks of M=256 rows.
    N, H, W = 16, 8, 8
    x = jax.random.normal(kx, (N, CIN, H, W), jnp.float32)

    raw = init_raw_params(kp)
    scale = 0.17

    ref = jax.block_until_ready(ref_block17(x, raw, scale))

    # 1) f32-operand path: verifies the fused/im2col structure at tight tolerance.
    params_f32 = prepare_kernel_params(raw, compute_dtype=jnp.float32)
    out_f32 = jax.block_until_ready(block17(x, params_f32, scale=scale))
    assert out_f32.shape == x.shape
    err32 = float(jnp.max(jnp.abs(out_f32 - ref)))
    assert jnp.allclose(out_f32, ref, atol=1e-3, rtol=1e-3), err32

    # 2) bf16-operand fast path (f32 accumulation): looser, bf16-appropriate tolerance
    #    for a 4-matmul chain.
    params_bf16 = prepare_kernel_params(raw, compute_dtype=jnp.bfloat16)
    out_bf16 = jax.block_until_ready(block17(x, params_bf16, scale=scale))
    assert out_bf16.shape == x.shape
    errbf = float(jnp.max(jnp.abs(out_bf16 - ref)))
    assert jnp.allclose(out_bf16, ref, atol=5e-2, rtol=5e-2), errbf

    print("KERNEL_OK")
</pallas_src>

<mosaic_0001>
module attributes {stable_mosaic.version = 11 : i64} {
  func.func @block17_kernel(%arg0: i32, %arg1: memref<4x8x8x896xf32, #tpu.memory_space<vmem>>, %arg2: memref<896x256xf32, #tpu.memory_space<vmem>>, %arg3: memref<1x256xf32, #tpu.memory_space<vmem>>, %arg4: memref<1x256xf32, #tpu.memory_space<vmem>>, %arg5: memref<896x128xf32, #tpu.memory_space<vmem>>, %arg6: memref<1x128xf32, #tpu.memory_space<vmem>>, %arg7: memref<1x128xf32, #tpu.memory_space<vmem>>, %arg8: memref<896x128xf32, #tpu.memory_space<vmem>>, %arg9: memref<1x128xf32, #tpu.memory_space<vmem>>, %arg10: memref<1x128xf32, #tpu.memory_space<vmem>>, %arg11: memref<256x896xf32, #tpu.memory_space<vmem>>, %arg12: memref<1x896xf32, #tpu.memory_space<vmem>>, %arg13: memref<4x8x8x896xf32, #tpu.memory_space<vmem>>) attributes {dimension_semantics = [#tpu.dimension_semantics<parallel>], iteration_bounds = array<i64: 4>, scalar_prefetch = 0 : i64, scratch_operands = 0 : i64, tpu.core_type = #tpu.core_type<tc>, window_params = [{transform_indices = @transform_0, window_bounds = array<i64: 4, 8, 8, 896>}, {pipeline_mode = #tpu.pipeline_mode<synchronous>, transform_indices = @transform_1, window_bounds = array<i64: 896, 256>}, {pipeline_mode = #tpu.pipeline_mode<synchronous>, transform_indices = @transform_2, window_bounds = array<i64: 1, 256>}, {pipeline_mode = #tpu.pipeline_mode<synchronous>, transform_indices = @transform_3, window_bounds = array<i64: 1, 256>}, {pipeline_mode = #tpu.pipeline_mode<synchronous>, transform_indices = @transform_4, window_bounds = array<i64: 896, 128>}, {pipeline_mode = #tpu.pipeline_mode<synchronous>, transform_indices = @transform_5, window_bounds = array<i64: 1, 128>}, {pipeline_mode = #tpu.pipeline_mode<synchronous>, transform_indices = @transform_6, window_bounds = array<i64: 1, 128>}, {pipeline_mode = #tpu.pipeline_mode<synchronous>, transform_indices = @transform_7, window_bounds = array<i64: 896, 128>}, {pipeline_mode = #tpu.pipeline_mode<synchronous>, transform_indices = @transform_8, window_bounds = array<i64: 1, 128>}, {pipeline_mode = #tpu.pipeline_mode<synchronous>, transform_indices = @transform_9, window_bounds = array<i64: 1, 128>}, {pipeline_mode = #tpu.pipeline_mode<synchronous>, transform_indices = @transform_10, window_bounds = array<i64: 256, 896>}, {pipeline_mode = #tpu.pipeline_mode<synchronous>, transform_indices = @transform_11, window_bounds = array<i64: 1, 896>}, {transform_indices = @transform_12, window_bounds = array<i64: 4, 8, 8, 896>}]} {
    %c0 = arith.constant 0 : index
    %c0_0 = arith.constant 0 : index
    %c0_1 = arith.constant 0 : index
    %c0_2 = arith.constant 0 : index
    %0 = vector.load %arg1[%c0, %c0_0, %c0_1, %c0_2] : memref<4x8x8x896xf32, #tpu.memory_space<vmem>>, vector<4x8x8x896xf32>
    %1 = vector.shape_cast %0 : vector<4x8x8x896xf32> to vector<256x896xf32>
    %c0_3 = arith.constant 0 : index
    %c0_4 = arith.constant 0 : index
    %2 = vector.load %arg2[%c0_3, %c0_4] : memref<896x256xf32, #tpu.memory_space<vmem>>, vector<896x256xf32>
    %cst = arith.constant dense<0.000000e+00> : vector<256x256xf32>
    %3 = tpu.matmul %1, %2, %cst {dimension_numbers = #tpu.dot_dimension_numbers<[1], [0], [0], [1], [0, 0, 1, 1], [], []>} : vector<256x896xf32>, vector<896x256xf32>, vector<256x256xf32> -> vector<256x256xf32>
    %c0_5 = arith.constant 0 : index
    %c0_6 = arith.constant 0 : index
    %4 = vector.load %arg3[%c0_5, %c0_6] : memref<1x256xf32, #tpu.memory_space<vmem>>, vector<1x256xf32>
    %5 = vector.broadcast %4 : vector<1x256xf32> to vector<256x256xf32>
    %6 = arith.mulf %3, %5 : vector<256x256xf32>
    %c0_7 = arith.constant 0 : index
    %c0_8 = arith.constant 0 : index
    %7 = vector.load %arg4[%c0_7, %c0_8] : memref<1x256xf32, #tpu.memory_space<vmem>>, vector<1x256xf32>
    %8 = vector.broadcast %7 : vector<1x256xf32> to vector<256x256xf32>
    %9 = arith.addf %6, %8 : vector<256x256xf32>
    %cst_9 = arith.constant 0.000000e+00 : f32
    %10 = vector.broadcast %cst_9 : f32 to vector<256x256xf32>
    %11 = arith.maximumf %9, %10 : vector<256x256xf32>
    %12 = vector.extract_strided_slice %11 {offsets = [0, 0], sizes = [256, 128], strides = [1, 1]} : vector<256x256xf32> to vector<256x128xf32>
    %13 = vector.extract_strided_slice %11 {offsets = [0, 128], sizes = [256, 128], strides = [1, 1]} : vector<256x256xf32> to vector<256x128xf32>
    %14 = vector.shape_cast %13 : vector<256x128xf32> to vector<4x8x8x128xf32>
    %cst_10 = arith.constant 0.000000e+00 : f32
    %15 = vector.broadcast %cst_10 : f32 to vector<4x8x3x128xf32>
    %16 = tpu.concatenate %15, %14, %15 in 2 : vector<4x8x3x128xf32>, vector<4x8x8x128xf32>, vector<4x8x3x128xf32> -> vector<4x8x14x128xf32>
    %17 = vector.extract_strided_slice %16 {offsets = [0, 0, 0, 0], sizes = [4, 8, 8, 128], strides = [1, 1, 1, 1]} : vector<4x8x14x128xf32> to vector<4x8x8x128xf32>
    %18 = vector.shape_cast %17 : vector<4x8x8x128xf32> to vector<256x128xf32>
    %19 = vector.extract_strided_slice %16 {offsets = [0, 0, 1, 0], sizes = [4, 8, 8, 128], strides = [1, 1, 1, 1]} : vector<4x8x14x128xf32> to vector<4x8x8x128xf32>
    %20 = vector.shape_cast %19 : vector<4x8x8x128xf32> to vector<256x128xf32>
    %21 = vector.extract_strided_slice %16 {offsets = [0, 0, 2, 0], sizes = [4, 8, 8, 128], strides = [1, 1, 1, 1]} : vector<4x8x14x128xf32> to vector<4x8x8x128xf32>
    %22 = vector.shape_cast %21 : vector<4x8x8x128xf32> to vector<256x128xf32>
    %23 = vector.extract_strided_slice %16 {offsets = [0, 0, 3, 0], sizes = [4, 8, 8, 128], strides = [1, 1, 1, 1]} : vector<4x8x14x128xf32> to vector<4x8x8x128xf32>
    %24 = vector.shape_cast %23 : vector<4x8x8x128xf32> to vector<256x128xf32>
    %25 = vector.extract_strided_slice %16 {offsets = [0, 0, 4, 0], sizes = [4, 8, 8, 128], strides = [1, 1, 1, 1]} : vector<4x8x14x128xf32> to vector<4x8x8x128xf32>
    %26 = vector.shape_cast %25 : vector<4x8x8x128xf32> to vector<256x128xf32>
    %27 = vector.extract_strided_slice %16 {offsets = [0, 0, 5, 0], sizes = [4, 8, 8, 128], strides = [1, 1, 1, 1]} : vector<4x8x14x128xf32> to vector<4x8x8x128xf32>
    %28 = vector.shape_cast %27 : vector<4x8x8x128xf32> to vector<256x128xf32>
    %29 = vector.extract_strided_slice %16 {offsets = [0, 0, 6, 0], sizes = [4, 8, 8, 128], strides = [1, 1, 1, 1]} : vector<4x8x14x128xf32> to vector<4x8x8x128xf32>
    %30 = vector.shape_cast %29 : vector<4x8x8x128xf32> to vector<256x128xf32>
    %31 = tpu.concatenate %18, %20, %22, %24, %26, %28, %30 in 1 : vector<256x128xf32>, vector<256x128xf32>, vector<256x128xf32>, vector<256x128xf32>, vector<256x128xf32>, vector<256x128xf32>, vector<256x128xf32> -> vector<256x896xf32>
    %c0_11 = arith.constant 0 : index
    %c0_12 = arith.constant 0 : index
    %32 = vector.load %arg5[%c0_11, %c0_12] : memref<896x128xf32, #tpu.memory_space<vmem>>, vector<896x128xf32>
    %cst_13 = arith.constant dense<0.000000e+00> : vector<256x128xf32>
    %33 = tpu.matmul %31, %32, %cst_13 {dimension_numbers = #tpu.dot_dimension_numbers<[1], [0], [0], [1], [0, 0, 1, 1], [], []>} : vector<256x896xf32>, vector<896x128xf32>, vector<256x128xf32> -> vector<256x128xf32>
    %c0_14 = arith.constant 0 : index
    %c0_15 = arith.constant 0 : index
    %34 = vector.load %arg6[%c0_14, %c0_15] : memref<1x128xf32, #tpu.memory_space<vmem>>, vector<1x128xf32>
    %35 = vector.broadcast %34 : vector<1x128xf32> to vector<256x128xf32>
    %36 = arith.mulf %33, %35 : vector<256x128xf32>
    %c0_16 = arith.constant 0 : index
    %c0_17 = arith.constant 0 : index
    %37 = vector.load %arg7[%c0_16, %c0_17] : memref<1x128xf32, #tpu.memory_space<vmem>>, vector<1x128xf32>
    %38 = vector.broadcast %37 : vector<1x128xf32> to vector<256x128xf32>
    %39 = arith.addf %36, %38 : vector<256x128xf32>
    %cst_18 = arith.constant 0.000000e+00 : f32
    %40 = vector.broadcast %cst_18 : f32 to vector<256x128xf32>
    %41 = arith.maximumf %39, %40 : vector<256x128xf32>
    %42 = vector.shape_cast %41 : vector<256x128xf32> to vector<4x8x8x128xf32>
    %cst_19 = arith.constant 0.000000e+00 : f32
    %43 = vector.broadcast %cst_19 : f32 to vector<4x3x8x128xf32>
    %44 = tpu.concatenate %43, %42, %43 in 1 : vector<4x3x8x128xf32>, vector<4x8x8x128xf32>, vector<4x3x8x128xf32> -> vector<4x14x8x128xf32>
    %45 = vector.extract_strided_slice %44 {offsets = [0, 0, 0, 0], sizes = [4, 8, 8, 128], strides = [1, 1, 1, 1]} : vector<4x14x8x128xf32> to vector<4x8x8x128xf32>
    %46 = vector.shape_cast %45 : vector<4x8x8x128xf32> to vector<256x128xf32>
    %47 = vector.extract_strided_slice %44 {offsets = [0, 1, 0, 0], sizes = [4, 8, 8, 128], strides = [1, 1, 1, 1]} : vector<4x14x8x128xf32> to vector<4x8x8x128xf32>
    %48 = vector.shape_cast %47 : vector<4x8x8x128xf32> to vector<256x128xf32>
    %49 = vector.extract_strided_slice %44 {offsets = [0, 2, 0, 0], sizes = [4, 8, 8, 128], strides = [1, 1, 1, 1]} : vector<4x14x8x128xf32> to vector<4x8x8x128xf32>
    %50 = vector.shape_cast %49 : vector<4x8x8x128xf32> to vector<256x128xf32>
    %51 = vector.extract_strided_slice %44 {offsets = [0, 3, 0, 0], sizes = [4, 8, 8, 128], strides = [1, 1, 1, 1]} : vector<4x14x8x128xf32> to vector<4x8x8x128xf32>
    %52 = vector.shape_cast %51 : vector<4x8x8x128xf32> to vector<256x128xf32>
    %53 = vector.extract_strided_slice %44 {offsets = [0, 4, 0, 0], sizes = [4, 8, 8, 128], strides = [1, 1, 1, 1]} : vector<4x14x8x128xf32> to vector<4x8x8x128xf32>
    %54 = vector.shape_cast %53 : vector<4x8x8x128xf32> to vector<256x128xf32>
    %55 = vector.extract_strided_slice %44 {offsets = [0, 5, 0, 0], sizes = [4, 8, 8, 128], strides = [1, 1, 1, 1]} : vector<4x14x8x128xf32> to vector<4x8x8x128xf32>
    %56 = vector.shape_cast %55 : vector<4x8x8x128xf32> to vector<256x128xf32>
    %57 = vector.extract_strided_slice %44 {offsets = [0, 6, 0, 0], sizes = [4, 8, 8, 128], strides = [1, 1, 1, 1]} : vector<4x14x8x128xf32> to vector<4x8x8x128xf32>
    %58 = vector.shape_cast %57 : vector<4x8x8x128xf32> to vector<256x128xf32>
    %59 = tpu.concatenate %46, %48, %50, %52, %54, %56, %58 in 1 : vector<256x128xf32>, vector<256x128xf32>, vector<256x128xf32>, vector<256x128xf32>, vector<256x128xf32>, vector<256x128xf32>, vector<256x128xf32> -> vector<256x896xf32>
    %c0_20 = arith.constant 0 : index
    %c0_21 = arith.constant 0 : index
    %60 = vector.load %arg8[%c0_20, %c0_21] : memref<896x128xf32, #tpu.memory_space<vmem>>, vector<896x128xf32>
    %cst_22 = arith.constant dense<0.000000e+00> : vector<256x128xf32>
    %61 = tpu.matmul %59, %60, %cst_22 {dimension_numbers = #tpu.dot_dimension_numbers<[1], [0], [0], [1], [0, 0, 1, 1], [], []>} : vector<256x896xf32>, vector<896x128xf32>, vector<256x128xf32> -> vector<256x128xf32>
    %c0_23 = arith.constant 0 : index
    %c0_24 = arith.constant 0 : index
    %62 = vector.load %arg9[%c0_23, %c0_24] : memref<1x128xf32, #tpu.memory_space<vmem>>, vector<1x128xf32>
    %63 = vector.broadcast %62 : vector<1x128xf32> to vector<256x128xf32>
    %64 = arith.mulf %61, %63 : vector<256x128xf32>
    %c0_25 = arith.constant 0 : index
    %c0_26 = arith.constant 0 : index
    %65 = vector.load %arg10[%c0_25, %c0_26] : memref<1x128xf32, #tpu.memory_space<vmem>>, vector<1x128xf32>
    %66 = vector.broadcast %65 : vector<1x128xf32> to vector<256x128xf32>
    %67 = arith.addf %64, %66 : vector<256x128xf32>
    %cst_27 = arith.constant 0.000000e+00 : f32
    %68 = vector.broadcast %cst_27 : f32 to vector<256x128xf32>
    %69 = arith.maximumf %67, %68 : vector<256x128xf32>
    %70 = tpu.concatenate %12, %69 in 1 : vector<256x128xf32>, vector<256x128xf32> -> vector<256x256xf32>
    %c0_28 = arith.constant 0 : index
    %c0_29 = arith.constant 0 : index
    %71 = vector.load %arg11[%c0_28, %c0_29] : memref<256x896xf32, #tpu.memory_space<vmem>>, vector<256x896xf32>
    %cst_30 = arith.constant dense<0.000000e+00> : vector<256x896xf32>
    %72 = tpu.matmul %70, %71, %cst_30 {dimension_numbers = #tpu.dot_dimension_numbers<[1], [0], [0], [1], [0, 0, 1, 1], [], []>} : vector<256x256xf32>, vector<256x896xf32>, vector<256x896xf32> -> vector<256x896xf32>
    %c0_31 = arith.constant 0 : index
    %c0_32 = arith.constant 0 : index
    %73 = vector.load %arg12[%c0_31, %c0_32] : memref<1x896xf32, #tpu.memory_space<vmem>>, vector<1x896xf32>
    %74 = vector.broadcast %73 : vector<1x896xf32> to vector<256x896xf32>
    %75 = arith.addf %72, %74 : vector<256x896xf32>
    %cst_33 = arith.constant 1.700000e-01 : f32
    %76 = vector.broadcast %cst_33 : f32 to vector<256x896xf32>
    %77 = arith.mulf %75, %76 : vector<256x896xf32>
    %78 = arith.addf %77, %1 : vector<256x896xf32>
    %cst_34 = arith.constant 0.000000e+00 : f32
    %79 = vector.broadcast %cst_34 : f32 to vector<256x896xf32>
    %80 = arith.maximumf %78, %79 : vector<256x896xf32>
    %81 = vector.shape_cast %80 : vector<256x896xf32> to vector<4x8x8x896xf32>
    %c0_35 = arith.constant 0 : index
    %c0_36 = arith.constant 0 : index
    %c0_37 = arith.constant 0 : index
    %c0_38 = arith.constant 0 : index
    %82 = vector.load %arg13[%c0_35, %c0_36, %c0_37, %c0_38] : memref<4x8x8x896xf32, #tpu.memory_space<vmem>>, vector<4x8x8x896xf32>
    tpu.vector_store %arg13[%c0_35, %c0_36, %c0_37, %c0_38], %81 {strides = array<i32>} : memref<4x8x8x896xf32, #tpu.memory_space<vmem>>, vector<4x8x8x896xf32>,
    return
  }
  func.func @transform_0(%arg0: i32) -> (i32, i32, i32, i32) {
    %c0_i32 = arith.constant 0 : i32
    %c0_i32_0 = arith.constant 0 : i32
    %c0_i32_1 = arith.constant 0 : i32
    %c0_i32_2 = arith.constant 0 : i32
    return %arg0, %c0_i32, %c0_i32_0, %c0_i32_1 : i32, i32, i32, i32
  }
  func.func @transform_1(%arg0: i32) -> (i32, i32) {
    %c0_i32 = arith.constant 0 : i32
    %c0_i32_0 = arith.constant 0 : i32
    %c0_i32_1 = arith.constant 0 : i32
    return %c0_i32, %c0_i32_0 : i32, i32
  }
  func.func @transform_2(%arg0: i32) -> (i32, i32) {
    %c0_i32 = arith.constant 0 : i32
    %c0_i32_0 = arith.constant 0 : i32
    %c0_i32_1 = arith.constant 0 : i32
    return %c0_i32, %c0_i32_0 : i32, i32
  }
  func.func @transform_3(%arg0: i32) -> (i32, i32) {
    %c0_i32 = arith.constant 0 : i32
    %c0_i32_0 = arith.constant 0 : i32
    %c0_i32_1 = arith.constant 0 : i32
    return %c0_i32, %c0_i32_0 : i32, i32
  }
  func.func @transform_4(%arg0: i32) -> (i32, i32) {
    %c0_i32 = arith.constant 0 : i32
    %c0_i32_0 = arith.constant 0 : i32
    %c0_i32_1 = arith.constant 0 : i32
    return %c0_i32, %c0_i32_0 : i32, i32
  }
  func.func @transform_5(%arg0: i32) -> (i32, i32) {
    %c0_i32 = arith.constant 0 : i32
    %c0_i32_0 = arith.constant 0 : i32
    %c0_i32_1 = arith.constant 0 : i32
    return %c0_i32, %c0_i32_0 : i32, i32
  }
  func.func @transform_6(%arg0: i32) -> (i32, i32) {
    %c0_i32 = arith.constant 0 : i32
    %c0_i32_0 = arith.constant 0 : i32
    %c0_i32_1 = arith.constant 0 : i32
    return %c0_i32, %c0_i32_0 : i32, i32
  }
  func.func @transform_7(%arg0: i32) -> (i32, i32) {
    %c0_i32 = arith.constant 0 : i32
    %c0_i32_0 = arith.constant 0 : i32
    %c0_i32_1 = arith.constant 0 : i32
    return %c0_i32, %c0_i32_0 : i32, i32
  }
  func.func @transform_8(%arg0: i32) -> (i32, i32) {
    %c0_i32 = arith.constant 0 : i32
    %c0_i32_0 = arith.constant 0 : i32
    %c0_i32_1 = arith.constant 0 : i32
    return %c0_i32, %c0_i32_0 : i32, i32
  }
  func.func @transform_9(%arg0: i32) -> (i32, i32) {
    %c0_i32 = arith.constant 0 : i32
    %c0_i32_0 = arith.constant 0 : i32
    %c0_i32_1 = arith.constant 0 : i32
    return %c0_i32, %c0_i32_0 : i32, i32
  }
  func.func @transform_10(%arg0: i32) -> (i32, i32) {
    %c0_i32 = arith.constant 0 : i32
    %c0_i32_0 = arith.constant 0 : i32
    %c0_i32_1 = arith.constant 0 : i32
    return %c0_i32, %c0_i32_0 : i32, i32
  }
  func.func @transform_11(%arg0: i32) -> (i32, i32) {
    %c0_i32 = arith.constant 0 : i32
    %c0_i32_0 = arith.constant 0 : i32
    %c0_i32_1 = arith.constant 0 : i32
    return %c0_i32, %c0_i32_0 : i32, i32
  }
  func.func @transform_12(%arg0: i32) -> (i32, i32, i32, i32) {
    %c0_i32 = arith.constant 0 : i32
    %c0_i32_0 = arith.constant 0 : i32
    %c0_i32_1 = arith.constant 0 : i32
    %c0_i32_2 = arith.constant 0 : i32
    return %arg0, %c0_i32, %c0_i32_0, %c0_i32_1 : i32, i32, i32, i32
  }
}

</mosaic_0001>

<bundles_post_ra>
// kernel: tpu_custom_call.1
= control target key start
LH: loop header
LB: loop body
LE: loop exit
PB: predicated region body
PF: predicated region fallthrough
CT: control target
= control target key end

     0   :  { %s14005_s0 = inlined_call_operand.hbm [shape: f32[16,8,8,896], index: 0, kind: input, shape index: {}]   ;;  %s14006_s1 = inlined_call_operand.hbm [shape: f32[896,256], index: 1, kind: input, shape index: {}]   ;;  %s14007_s2 = inlined_call_operand.hbm [shape: f32[1,256], index: 2, kind: input, shape index: {}]   ;;  %s14008_s3 = inlined_call_operand.hbm [shape: f32[1,256], index: 3, kind: input, shape index: {}]   ;;  %s14009_s4 = inlined_call_operand.hbm [shape: f32[896,128], index: 4, kind: input, shape index: {}]   ;;  %s14010_s5 = inlined_call_operand.hbm [shape: f32[1,128], index: 5, kind: input, shape index: {}]   ;;  %s14011_s6 = inlined_call_operand.hbm [shape: f32[1,128], index: 6, kind: input, shape index: {}]   ;;  %s14012_s7 = inlined_call_operand.hbm [shape: f32[896,128], index: 7, kind: input, shape index: {}]   ;;  %s14013_s8 = inlined_call_operand.hbm [shape: f32[1,128], index: 8, kind: input, shape index: {}]   ;;  %s14014_s9 = inlined_call_operand.hbm [shape: f32[1,128], index: 9, kind: input, shape index: {}]   ;;  %s14015_s10 = inlined_call_operand.hbm [shape: f32[256,896], index: 10, kind: input, shape index: {}]   ;;  %s14016_s11 = inlined_call_operand.hbm [shape: f32[1,896], index: 11, kind: input, shape index: {}]   ;;  %s14017_s12 = inlined_call_operand.hbm [shape: f32[16,8,8,896], index: 12, kind: output, shape index: {}]  }
   0x1   :  { %14159 = sst [smem:[#allocation91_spill]] %s14005_s0 }
   0x2   :  { %14160 = sst [smem:[#allocation92_spill]] %s14006_s1 }
   0x3   :  { %14161 = sst [smem:[#allocation93_spill]] %s14007_s2 }
   0x4   :  { %14162 = sst [smem:[#allocation94_spill]] %s14008_s3 }
   0x5   :  { %14163 = sst [smem:[#allocation95_spill]] %s14017_s12 }
   0x6   :  { %17 = vsyncpa [#allocation3], 0 }
   0x7   :  { %19 = vsyncpa [#allocation3 + $0x1], 0 }
   0x8   :  { %20 = vsyncpa [#allocation6], 0 }
   0x9   :  { %21 = vsyncpa [#allocation9], 0 }
   0xa   :  { %22 = vsyncpa [#allocation12], 0 }
   0xb   :  { %23 = vsyncpa [#allocation15], 0 }
   0xc   :  { %24 = vsyncpa [#allocation18], 0 }
   0xd   :  { %25 = vsyncpa [#allocation21], 0 }
   0xe   :  { %26 = vsyncpa [#allocation4], 0 }
   0xf   :  { %28 = vsyncpa [#allocation4 + $0x1], 0  ;;  %s10401_s21 = smov 0   ;;  %s10403_s22 = smov 0  }
  0x10   :  { %s10405_s23 = smov 0   ;;  %s10407_s24 = smov 0  }
  0x11 LB: > { %s10313_s25 = smov [#allocation5]   ;;  %s10422_s27 = sadd.s32 4294967295, %s10311_s24   ;;  %s10311_s24 = sphi %s10407_s24, %s14436_s24   ;;  %s10307_s23 = sphi %s10405_s23, %s14435_s23   ;;  %s10303_s22 = sphi %s10403_s22, %s14434_s22   ;;  %s10299_s21 = sphi %s10401_s21, %s14433_s21  }
  0x12   : > { %s334_s26 = sshll.u32 %s10313_s25, 4  ;;  %14164 = sst [smem:[#allocation31_spill]] %s10422_s27  ;;  %s10427_s26 = int_to_ptr.vmem [resolvable:$true] %s334_s26 }
  0x13   : > { %p7862_p0 = scmp.ge.s32.totalorder %s10311_s24, 1  ;;  %p14024_p1 = scmp.eq.s32.totalorder %s10422_s27, 0 }
  0x14   : > { %p322_p2 = scmp.lt.s32.totalorder %s10311_s24, 5  ;;  %s10314_s29 = smov [#allocation8]  }
  0x15   : > { %s359_s30 = sshll.u32 %s10314_s29, 4  ;;  %s10315_s14 = smov [#allocation11]   ;;  %s10441_s30 = int_to_ptr.vmem [resolvable:$true] %s359_s30 }
  0x16   : > { %p10429_p3 = pnand %p7862_p0, %p322_p2  ;;  %s383_s15 = sshll.u32 %s10315_s14, 4  ;;  %s10443_s15 = int_to_ptr.vmem [resolvable:$true] %s383_s15 }
  0x17   : > { %s14168_s1 = sld [smem:[#allocation92_spill]] }
  0x18   : > { %s14165_s28 = scalar_select %p10429_p3, 1, 0 }
  0x19   : > { %p9535_p4 = pneg %p10429_p3 }
  0x1a   : > { %14166 = sst [smem:[#allocation32_spill]] %s14165_s28 }
  0x1b   : > { %p10437_p5 = pnand %p9535_p4, %p14024_p1 }
  0x1d   : > { %s9883_s18 = scalar_lea.hbm %s14168_s1, 28672  ;;  %p10453_p7 = pneg %p10437_p5 }
  0x1e   : > { %p9884_p6 = scmp.ne.s32.totalorder %s14168_s1, %s9883_s18  ;;  %p9890_p10 = scmp.lt.u32.totalorder %s9883_s18, %s14168_s1 }
  0x20   : > { %p9886_p8 = pnand %p10453_p7, %p9884_p6 }
  0x22   : > { %p9887_p9 = pneg %p9886_p8 }
  0x24   : > { %p9892_p11 = pnand %p9890_p10, %p9887_p9 }
  0x26   : > { %9895 = shalt.err (!%p9892_p11)
}
  0x27   : > { %s9896_s16 = scalar_lea.vmem %s10427_s26, 28672  ;;  %p9904_p2 = scmp.lt.s32.totalorder %s10427_s26, %s10427_s26 }
  0x28   : > { %p9897_p12 = scmp.ne.s32.totalorder %s10427_s26, %s9896_s16  ;;  %p9905_p4 = scmp.lt.s32.totalorder %s9896_s16, %s9896_s16 }
  0x2a   : > { %p9899_p13 = pnand %p9897_p12, %p10453_p7  ;;  %p9906_p6 = por %p9905_p4, %p9904_p2 }
  0x2c   : > { %p9900_p0 = pneg %p9899_p13 }
  0x2e   : > { %p9907_p8 = pnand %p9906_p6, %p9900_p0 }
  0x30   : > { %9910 = shalt.err (!%p9907_p8)
}
  0x31   : > { %s10316_s17 = smov 256   ;;  %s10317_s18 = smov 16  }
  0x32   : > { %9538 = dma.hbm_to_vmem [thread:$0]  (!%p10437_p5), %s14168_s1, 28672, %s10427_s26, [#allocation6], %s10316_s17, %s10316_s17, %s10317_s18  }
  0x33   : > { %s14170_s3 = sld [smem:[#allocation94_spill]] }
  0x39   : > { %s9911_s12 = scalar_lea.hbm %s14170_s3, 32 }
  0x3a   : > { %p9912_p9 = scmp.ne.s32.totalorder %s14170_s3, %s9911_s12  ;;  %p9918_p12 = scmp.lt.u32.totalorder %s9911_s12, %s14170_s3 }
  0x3c   : > { %p9914_p10 = pnand %p9912_p9, %p10453_p7 }
  0x3e   : > { %p9915_p11 = pneg %p9914_p10 }
  0x40   : > { %p9920_p13 = pnand %p9918_p12, %p9915_p11 }
  0x42   : > { %9923 = shalt.err (!%p9920_p13)
}
  0x43   : > { %s9924_s26 = scalar_lea.vmem %s10441_s30, 32  ;;  %p9932_p6 = scmp.lt.s32.totalorder %s10441_s30, %s10441_s30 }
  0x44   : > { %p9925_p0 = scmp.ne.s32.totalorder %s10441_s30, %s9924_s26  ;;  %p9933_p8 = scmp.lt.s32.totalorder %s9924_s26, %s9924_s26 }
  0x46   : > { %p9927_p2 = pnand %p9925_p0, %p10453_p7  ;;  %p9934_p9 = por %p9933_p8, %p9932_p6 }
  0x48   : > { %p9928_p4 = pneg %p9927_p2 }
  0x4a   : > { %p9935_p10 = pnand %p9934_p9, %p9928_p4 }
  0x4c   : > { %9938 = shalt.err (!%p9935_p10)
}
  0x4d   : > { %9544 = dma.hbm_to_vmem [thread:$0]  (!%p10437_p5), %s14170_s3, 32, %s10441_s30, [#allocation9]  }
  0x4e   : > { %s9939_s17 = scalar_lea.hbm %s14010_s5, 16 }
  0x4f   : > { %p9940_p11 = scmp.ne.s32.totalorder %s14010_s5, %s9939_s17  ;;  %p9946_p0 = scmp.lt.u32.totalorder %s9939_s17, %s14010_s5 }
  0x51   : > { %p9942_p12 = pnand %p9940_p11, %p10453_p7 }
  0x53   : > { %p9943_p13 = pneg %p9942_p12 }
  0x55   : > { %p9948_p2 = pnand %p9946_p0, %p9943_p13 }
  0x57   : > { %9951 = shalt.err (!%p9948_p2)
}
  0x58   : > { %s9952_s30 = scalar_lea.vmem %s10443_s15, 16  ;;  %s9959_s14 = scalar_lea.vmem %s10443_s15, 32 }
  0x59   : > { %p9953_p4 = scmp.ne.s32.totalorder %s10443_s15, %s9952_s30  ;;  %p9960_p9 = scmp.lt.s32.totalorder %s10443_s15, %s10443_s15 }
  0x5a   : > { %p9961_p10 = scmp.lt.s32.totalorder %s9959_s14, %s9952_s30 }
  0x5b   : > { %p9955_p6 = pnand %p9953_p4, %p10453_p7 }
  0x5c   : > { %p9962_p11 = por %p9961_p10, %p9960_p9 }
  0x5d   : > { %p9956_p8 = pneg %p9955_p6 }
  0x5f   : > { %p9963_p12 = pnand %p9962_p11, %p9956_p8 }
  0x61   : > { %9966 = shalt.err (!%p9963_p12)
}
  0x62   : > { %9550 = dma.hbm_to_vmem [thread:$0]  (!%p10437_p5), %s14010_s5, 16, %s10443_s15, [#allocation12]  }
  0x63   : > { %s10318_s0 = smov [#allocation14]   ;;  %s10319_s27 = smov [#allocation17]  }
  0x64   : > { %s404_s12 = sshll.u32 %s10318_s0, 4  ;;  %s429_s28 = sshll.u32 %s10319_s27, 4  ;;  %s405_s12 = int_to_ptr.vmem [resolvable:$true] %s404_s12  ;;  %s430_s28 = int_to_ptr.vmem [resolvable:$true] %s429_s28 }
  0x65   : > { %s9967_s19 = scalar_lea.hbm %s14012_s7, 14336 }
  0x66   : > { %p9968_p13 = scmp.ne.s32.totalorder %s14012_s7, %s9967_s19  ;;  %p9974_p4 = scmp.lt.u32.totalorder %s9967_s19, %s14012_s7 }
  0x68   : > { %p9970_p0 = pnand %p9968_p13, %p10453_p7 }
  0x6a   : > { %p9971_p2 = pneg %p9970_p0 }
  0x6c   : > { %p9976_p6 = pnand %p9974_p4, %p9971_p2 }
  0x6e   : > { %9979 = shalt.err (!%p9976_p6)
}
  0x6f   : > { %s9980_s15 = scalar_lea.vmem %s405_s12, 14336  ;;  %p9988_p11 = scmp.lt.s32.totalorder %s405_s12, %s405_s12 }
  0x70   : > { %p9981_p8 = scmp.ne.s32.totalorder %s405_s12, %s9980_s15  ;;  %p9989_p12 = scmp.lt.s32.totalorder %s9980_s15, %s9980_s15 }
  0x72   : > { %p9983_p9 = pnand %p9981_p8, %p10453_p7  ;;  %p9990_p1 = por %p9989_p12, %p9988_p11 }
  0x74   : > { %p9984_p10 = pneg %p9983_p9 }
  0x76   : > { %p9991_p3 = pnand %p9990_p1, %p9984_p10 }
  0x78   : > { %9994 = shalt.err (!%p9991_p3)
}
  0x79   : > { %s14026_s16 = smov 128   ;;  %s10321_s26 = smov 8  }
  0x7a   : > { %9556 = dma.hbm_to_vmem [thread:$0]  (!%p10437_p5), %s14012_s7, 14336, %s405_s12, [#allocation15], %s14026_s16, %s14026_s16, %s10321_s26  }
  0x7b   : > { %s9995_s19 = scalar_lea.hbm %s14014_s9, 16 }
  0x7c   : > { %p9996_p1 = scmp.ne.s32.totalorder %s14014_s9, %s9995_s19  ;;  %p10002_p0 = scmp.lt.u32.totalorder %s9995_s19, %s14014_s9 }
  0x7e   : > { %p9998_p3 = pnand %p9996_p1, %p10453_p7 }
  0x80   : > { %p9999_p13 = pneg %p9998_p3 }
  0x82   : > { %p10004_p2 = pnand %p10002_p0, %p9999_p13 }
  0x84   : > { %10007 = shalt.err (!%p10004_p2)
}
  0x85   : > { %s10008_s15 = scalar_lea.vmem %s430_s28, 16  ;;  %s10015_s12 = scalar_lea.vmem %s430_s28, 32 }
  0x86   : > { %p10009_p4 = scmp.ne.s32.totalorder %s430_s28, %s10008_s15  ;;  %p10016_p9 = scmp.lt.s32.totalorder %s430_s28, %s430_s28 }
  0x87   : > { %p10017_p10 = scmp.lt.s32.totalorder %s10015_s12, %s10008_s15 }
  0x88   : > { %p10011_p6 = pnand %p10009_p4, %p10453_p7 }
  0x89   : > { %p10018_p11 = por %p10017_p10, %p10016_p9 }
  0x8a   : > { %p10012_p8 = pneg %p10011_p6 }
  0x8c   : > { %p10019_p12 = pnand %p10018_p11, %p10012_p8 }
  0x8e   : > { %10022 = shalt.err (!%p10019_p12)
}
  0x8f   : > { %9562 = dma.hbm_to_vmem [thread:$0]  (!%p10437_p5), %s14014_s9, 16, %s430_s28, [#allocation18]  }
  0x90   : > { %s10322_s17 = smov [#allocation7]   ;;  %s10323_s19 = smov [#allocation10]  }
  0x91   : > { %s348_s18 = sshll.u32 %s10322_s17, 4  ;;  %s369_s20 = sshll.u32 %s10323_s19, 4  ;;  %s349_s18 = int_to_ptr.vmem [resolvable:$true] %s348_s18  ;;  %s370_s20 = int_to_ptr.vmem [resolvable:$true] %s369_s20 }
  0x92   : > { %s14171_s2 = sld [smem:[#allocation93_spill]] }
  0x98   : > { %s10023_s14 = scalar_lea.hbm %s14171_s2, 32 }
  0x99   : > { %p10024_p1 = scmp.ne.s32.totalorder %s14171_s2, %s10023_s14  ;;  %p10030_p0 = scmp.lt.u32.totalorder %s10023_s14, %s14171_s2 }
  0x9b   : > { %p10026_p3 = pnand %p10024_p1, %p10453_p7 }
  0x9d   : > { %p10027_p13 = pneg %p10026_p3 }
  0x9f   : > { %p10032_p2 = pnand %p10030_p0, %p10027_p13 }
  0xa1   : > { %10035 = shalt.err (!%p10032_p2)
}
  0xa2   : > { %s10036_s28 = scalar_lea.vmem %s349_s18, 32  ;;  %p10044_p9 = scmp.lt.s32.totalorder %s349_s18, %s349_s18 }
  0xa3   : > { %p10037_p4 = scmp.ne.s32.totalorder %s349_s18, %s10036_s28  ;;  %p10045_p10 = scmp.lt.s32.totalorder %s10036_s28, %s10036_s28 }
  0xa5   : > { %p10039_p6 = pnand %p10037_p4, %p10453_p7  ;;  %p10046_p11 = por %p10045_p10, %p10044_p9 }
  0xa7   : > { %p10040_p8 = pneg %p10039_p6 }
  0xa9   : > { %p10047_p12 = pnand %p10046_p11, %p10040_p8 }
  0xab   : > { %10050 = shalt.err (!%p10047_p12)
}
  0xac   : > { %9541 = dma.hbm_to_vmem [thread:$0]  (!%p10437_p5), %s14171_s2, 32, %s349_s18, [#allocation6]  }
  0xad   : > { %s10051_s29 = scalar_lea.hbm %s14009_s4, 14336 }
  0xae   : > { %p10052_p1 = scmp.ne.s32.totalorder %s14009_s4, %s10051_s29  ;;  %p10058_p0 = scmp.lt.u32.totalorder %s10051_s29, %s14009_s4 }
  0xb0   : > { %p10054_p3 = pnand %p10052_p1, %p10453_p7 }
  0xb2   : > { %p10055_p13 = pneg %p10054_p3 }
  0xb4   : > { %p10060_p2 = pnand %p10058_p0, %p10055_p13 }
  0xb6   : > { %10063 = shalt.err (!%p10060_p2)
}
  0xb7   : > { %s10064_s0 = scalar_lea.vmem %s370_s20, 14336  ;;  %p10072_p9 = scmp.lt.s32.totalorder %s370_s20, %s370_s20 }
  0xb8   : > { %p10065_p4 = scmp.ne.s32.totalorder %s370_s20, %s10064_s0  ;;  %p10073_p10 = scmp.lt.s32.totalorder %s10064_s0, %s10064_s0 }
  0xba   : > { %p10067_p6 = pnand %p10065_p4, %p10453_p7  ;;  %p10074_p11 = por %p10073_p10, %p10072_p9 }
  0xbc   : > { %p10068_p8 = pneg %p10067_p6 }
  0xbe   : > { %p10075_p12 = pnand %p10074_p11, %p10068_p8 }
  0xc0   : > { %10078 = shalt.err (!%p10075_p12)
}
  0xc1   : > { %s14172_s18 = smov 128   ;;  %s10324_s17 = smov [#allocation13]  }
  0xc2   : > { %9547 = dma.hbm_to_vmem [thread:$0]  (!%p10437_p5), %s14009_s4, 14336, %s370_s20, [#allocation9], %s14172_s18, %s14172_s18, %s10321_s26  }
  0xc3   : > { %s394_s16 = sshll.u32 %s10324_s17, 4  ;;  %s10325_s19 = smov [#allocation16]   ;;  %s395_s16 = int_to_ptr.vmem [resolvable:$true] %s394_s16 }
  0xc4   : > { %s418_s29 = sshll.u32 %s10325_s19, 4  ;;  %s10079_s15 = scalar_lea.hbm %s14011_s6, 16  ;;  %s419_s29 = int_to_ptr.vmem [resolvable:$true] %s418_s29 }
  0xc5   : > { %p10080_p1 = scmp.ne.s32.totalorder %s14011_s6, %s10079_s15  ;;  %p10086_p0 = scmp.lt.u32.totalorder %s10079_s15, %s14011_s6 }
  0xc7   : > { %p10082_p3 = pnand %p10080_p1, %p10453_p7 }
  0xc9   : > { %p10083_p13 = pneg %p10082_p3 }
  0xcb   : > { %p10088_p2 = pnand %p10086_p0, %p10083_p13 }
  0xcd   : > { %10091 = shalt.err (!%p10088_p2)
}
  0xce   : > { %s10092_s26 = scalar_lea.vmem %s395_s16, 16  ;;  %s10099_s20 = scalar_lea.vmem %s395_s16, 32 }
  0xcf   : > { %p10093_p4 = scmp.ne.s32.totalorder %s395_s16, %s10092_s26  ;;  %p10100_p9 = scmp.lt.s32.totalorder %s395_s16, %s395_s16 }
  0xd0   : > { %p10101_p10 = scmp.lt.s32.totalorder %s10099_s20, %s10092_s26 }
  0xd1   : > { %p10095_p6 = pnand %p10093_p4, %p10453_p7 }
  0xd2   : > { %p10102_p11 = por %p10101_p10, %p10100_p9 }
  0xd3   : > { %p10096_p8 = pneg %p10095_p6 }
  0xd5   : > { %p10103_p12 = pnand %p10102_p11, %p10096_p8 }
  0xd7   : > { %10106 = shalt.err (!%p10103_p12)
}
  0xd8   : > { %9553 = dma.hbm_to_vmem [thread:$0]  (!%p10437_p5), %s14011_s6, 16, %s395_s16, [#allocation12]  }
  0xd9   : > { %s10107_s19 = scalar_lea.hbm %s14013_s8, 16 }
  0xda   : > { %p10108_p1 = scmp.ne.s32.totalorder %s14013_s8, %s10107_s19  ;;  %p10114_p0 = scmp.lt.u32.totalorder %s10107_s19, %s14013_s8 }
  0xdc   : > { %p10110_p3 = pnand %p10108_p1, %p10453_p7 }
  0xde   : > { %p10111_p13 = pneg %p10110_p3 }
  0xe0   : > { %p10116_p2 = pnand %p10114_p0, %p10111_p13 }
  0xe2   : > { %10119 = shalt.err (!%p10116_p2)
}
  0xe3   : > { %s10120_s0 = scalar_lea.vmem %s419_s29, 16  ;;  %s10127_s16 = scalar_lea.vmem %s419_s29, 32 }
  0xe4   : > { %p10121_p4 = scmp.ne.s32.totalorder %s419_s29, %s10120_s0  ;;  %p10128_p9 = scmp.lt.s32.totalorder %s419_s29, %s419_s29 }
  0xe5   : > { %p10129_p10 = scmp.lt.s32.totalorder %s10127_s16, %s10120_s0 }
  0xe6   : > { %p10123_p6 = pnand %p10121_p4, %p10453_p7 }
  0xe7   : > { %p10130_p11 = por %p10129_p10, %p10128_p9 }
  0xe8   : > { %p10124_p8 = pneg %p10123_p6 }
  0xea   : > { %p10131_p12 = pnand %p10130_p11, %p10124_p8 }
  0xec   : > { %10134 = shalt.err (!%p10131_p12)
}
  0xed   : > { %9559 = dma.hbm_to_vmem [thread:$0]  (!%p10437_p5), %s14013_s8, 16, %s419_s29, [#allocation15]  }
  0xee   : > { %s10326_s20 = smov [#allocation19]   ;;  %s10135_s17 = scalar_lea.hbm %s14015_s10, 28672 }
  0xef   : > { %s439_s18 = sshll.u32 %s10326_s20, 4  ;;  %p10136_p1 = scmp.ne.s32.totalorder %s14015_s10, %s10135_s17  ;;  %s440_s18 = int_to_ptr.vmem [resolvable:$true] %s439_s18 }
  0xf0   : > { %p10142_p0 = scmp.lt.u32.totalorder %s10135_s17, %s14015_s10 }
  0xf1   : > { %p10138_p3 = pnand %p10136_p1, %p10453_p7 }
  0xf3   : > { %p10139_p13 = pneg %p10138_p3 }
  0xf5   : > { %p10144_p2 = pnand %p10142_p0, %p10139_p13 }
  0xf7   : > { %10147 = shalt.err (!%p10144_p2)
}
  0xf8   : > { %s10148_s29 = scalar_lea.vmem %s440_s18, 28672  ;;  %p10156_p9 = scmp.lt.s32.totalorder %s440_s18, %s440_s18 }
  0xf9   : > { %p10149_p4 = scmp.ne.s32.totalorder %s440_s18, %s10148_s29  ;;  %p10157_p10 = scmp.lt.s32.totalorder %s10148_s29, %s10148_s29 }
  0xfb   : > { %p10151_p6 = pnand %p10149_p4, %p10453_p7  ;;  %p10158_p11 = por %p10157_p10, %p10156_p9 }
  0xfd   : > { %p10152_p8 = pneg %p10151_p6 }
  0xff   : > { %p10159_p12 = pnand %p10158_p11, %p10152_p8 }
 0x101   : > { %10162 = shalt.err (!%p10159_p12)
}
 0x102   : > { %s14027_s12 = smov 896   ;;  %s14028_s0 = smov 56  }
 0x103   : > { %9565 = dma.hbm_to_vmem [thread:$0]  (!%p10437_p5), %s14015_s10, 28672, %s440_s18, [#allocation18], %s14027_s12, %s14027_s12, %s14028_s0  }
 0x104   : > { %s10329_s26 = smov [#allocation20]   ;;  %s10163_s17 = scalar_lea.hbm %s14016_s11, 112 }
 0x105   : > { %s453_s20 = sshll.u32 %s10329_s26, 4  ;;  %p10164_p1 = scmp.ne.s32.totalorder %s14016_s11, %s10163_s17  ;;  %s454_s20 = int_to_ptr.vmem [resolvable:$true] %s453_s20 }
 0x106   : > { %p10170_p0 = scmp.lt.u32.totalorder %s10163_s17, %s14016_s11 }
 0x107   : > { %p10166_p3 = pnand %p10164_p1, %p10453_p7 }
 0x109   : > { %p10167_p13 = pneg %p10166_p3 }
 0x10b   : > { %p10172_p2 = pnand %p10170_p0, %p10167_p13 }
 0x10d   : > { %10175 = shalt.err (!%p10172_p2)
}
 0x10e   : > { %s10176_s18 = scalar_lea.vmem %s454_s20, 112  ;;  %s10183_s29 = scalar_lea.vmem %s454_s20, 128 }
 0x10f   : > { %p10177_p4 = scmp.ne.s32.totalorder %s454_s20, %s10176_s18  ;;  %p10184_p9 = scmp.lt.s32.totalorder %s454_s20, %s454_s20 }
 0x110   : > { %p10185_p10 = scmp.lt.s32.totalorder %s10183_s29, %s10176_s18 }
 0x111   : > { %p10179_p6 = pnand %p10177_p4, %p10453_p7 }
 0x112   : > { %p10186_p11 = por %p10185_p10, %p10184_p9 }
 0x113   : > { %p10180_p8 = pneg %p10179_p6 }
 0x115   : > { %p10187_p12 = pnand %p10186_p11, %p10180_p8 }
 0x117   : > { %10190 = shalt.err (!%p10187_p12)
}
 0x118   : > { %s14173_s25 = sld [smem:[#allocation31_spill]]  ;;  %s7861_s26 = sadd.s32 4294967294, %s10311_s24  }
 0x119   : > { %9568 = dma.hbm_to_vmem [thread:$0]  (!%p10437_p5), %s14016_s11, 112, %s454_s20, [#allocation21]  }
 0x11a   : > { %s10676_s13 = sadd.s32 1, %s10311_s24   ;;  %s41_s27 = sadd.s32 1, %s10307_s23 }
 0x11b   : > { %s38_s1 = ssub.s32 %s10311_s24, %s10676_s13  ;;  %p48_p7 = scmp.ne.s32.totalorder %s10307_s23, %s10303_s22 }
 0x11c   : > { %p39_p1 = scmp.eq.s32.totalorder %s38_s1, 0  ;;  %p49_p3 = scmp.eq.s32.totalorder %s10311_s24, 0 }
 0x11d   : > { %p54_p13 = scmp.ne.s32.totalorder %s10303_s22, %s10299_s21  ;;  %p315_p8 = scmp.eq.s32.totalorder %s7861_s26, 3 }
 0x11e   : > { %p309_p0 = scmp.eq.s32.totalorder %s14173_s25, 3  ;;  %p50_p2 = por %p49_p3, %p48_p7 }
 0x11f   : > { %s10688_s17 = scalar_select %p39_p1, %s10307_s23, %s41_s27  }
 0x120   : > { %p14174_p4 = scmp.eq.s32.totalorder %s14173_s25, 0  ;;  %p10696_p5 = por %p309_p0, %p48_p7 }
 0x121   : > { %p9588_p9 = scmp.lt.s32.totalorder %s10311_s24, 4  ;;  %s464_s30 = sand.u32 1, %s10307_s23  }
 0x122   : > { %p10692_p6 = por %p14174_p4, %p54_p13  ;;  %p10702_p10 = por %p315_p8, %p54_p13 }
 0x123   : > { %s14176_s20 = scalar_select %p10696_p5, 1, 0 }
 0x124   : > { %s14177_s14 = scalar_select %p10702_p10, 1, 0 }
 0x125   : > { %s9483_s15 = smul.u32 1792, %s464_s30  ;;  %p10706_p11 = pnand %p9588_p9, %p50_p2 }
 0x126   : > { %s9484_s29 = smul.u32 28672, %s10311_s24  ;;  %s14179_s25 = sld [smem:[#allocation91_spill]] }
 0x127   : > { %s468_s26 = scalar_lea.vmem [#allocation2], %s9483_s15  ;;  %s10718_s12 = scalar_lea.sflag [#allocation3], %s464_s30 }
 0x128   : > { %s476_s1 = sshll.u32 %s468_s26, 4  ;;  %p10193_p7 = pneg %p10706_p11  ;;  %s10716_s1 = int_to_ptr.vmem [resolvable:$true] %s476_s1 }
 0x12c   : > { %s10714_s27 = scalar_lea.hbm %s14179_s25, %s9484_s29  ;;  %s10196_s28 = scalar_lea.hbm %s14179_s25, 114688 }
 0x12d   : > { %s10191_s0 = scalar_lea.hbm %s10714_s27, 28672  ;;  %p10197_p13 = scmp.lt.u32.totalorder %s10714_s27, %s14179_s25 }
 0x12e   : > { %p10192_p12 = scmp.ne.s32.totalorder %s10714_s27, %s10191_s0  ;;  %p10198_p0 = scmp.lt.u32.totalorder %s10196_s28, %s10191_s0 }
 0x12f   : > { %p10200_p4 = scmp.lt.u32.totalorder %s10191_s0, %s10714_s27 }
 0x130   : > { %p10194_p1 = pnand %p10193_p7, %p10192_p12  ;;  %p10199_p2 = por %p10198_p0, %p10197_p13 }
 0x132   : > { %p10195_p3 = pneg %p10194_p1  ;;  %p10201_p8 = por %p10200_p4, %p10199_p2 }
 0x134   : > { %p10202_p9 = pnand %p10201_p8, %p10195_p3 }
 0x136   : > { %10205 = shalt.err (!%p10202_p9)
}
 0x137   : > { %s10206_s30 = scalar_lea.vmem %s10716_s1, 28672  ;;  %s10330_s15 = smov [#allocation2]  }
 0x138   : > { %p10207_p12 = scmp.ne.s32.totalorder %s10716_s1, %s10206_s30  ;;  %s10211_s26 = sshll.u32 %s10330_s15, 4  ;;  %s10212_s26 = int_to_ptr.vmem [resolvable:$false] %s10211_s26 }
 0x139   : > { %s10213_s2 = scalar_lea.vmem %s10212_s26, 57344  ;;  %p10214_p5 = scmp.lt.s32.totalorder %s10716_s1, %s10212_s26 }
 0x13a   : > { %p10209_p1 = pnand %p10207_p12, %p10193_p7  ;;  %p10215_p13 = scmp.lt.s32.totalorder %s10213_s2, %s10206_s30 }
 0x13c   : > { %p10210_p10 = pneg %p10209_p1  ;;  %p10216_p0 = por %p10215_p13, %p10214_p5 }
 0x13e   : > { %p10217_p2 = pnand %p10216_p0, %p10210_p10 }
 0x140   : > { %10220 = shalt.err (!%p10217_p2)
}
 0x141   : > { %s14180_s3 = smov 56   ;;  %s14181_s0 = smov 896  }
 0x142   : > { %9572 = dma.hbm_to_vmem [thread:$0]  (!%p10706_p11), %s10714_s27, 28672, %s10716_s1, %s10718_s12, %s14181_s0, %s14181_s0, %s14180_s3  }
 0x143   : > { %s14182_s29 = sld [smem:[#allocation32_spill]] }
 0x149   : > { %p14183_p7 = scmp.ne.s32.totalorder %s14182_s29, 0 }
 0x14b   : > { %488 = sbr.rel (%p14183_p7) target bundleno = 2738 (0xab2), region = 68 }
 0x152   : > { %s10752_s16 = sand.u32 1, %s10303_s22  }
 0x153   : > { %s9485_s28 = smul.u32 1792, %s10752_s16  ;;  %s491_s30 = scalar_lea.sflag [#allocation3], %s10752_s16 }
 0x155   : > { %s10758_s18 = scalar_lea.vmem [#allocation2], %s9485_s28 }
 0x156   : > { %10266 = dma.done.wait (%p10692_p6), %s491_s30, 28672  }
 0x157   : > { %10268 = vsyncadd (%p10692_p6), %s491_s30, 4294938624  ;;  %s14184_s12 = sld [smem:[#allocation31_spill]] }
 0x15d   : > { %p14185_p5 = scmp.eq.s32.totalorder %s14184_s12, 0 }
 0x15f   : > { %10270 = dma.done.wait (%p14185_p5), [#allocation6], 28704   ;;  %p14186_p10 = pmov %p14185_p5 }
 0x160   : > { %p14187_p11 = pmov %p14185_p5 }
 0x161   : > { %10272 = vsyncadd (%p14186_p10), [#allocation6], 4294938592 }
 0x162   : > { %10274 = dma.done.wait (%p14187_p11), [#allocation9], 14368   ;;  %p14188_p3 = pmov %p14185_p5 }
 0x164   : > { %10276 = vsyncadd (%p14188_p3), [#allocation9], 4294952928  ;;  %p14189_p4 = pmov %p14188_p3 }
 0x165   : > { %p14190_p8 = pmov %p14188_p3 }
 0x166   : > { %10278 = dma.done.wait (%p14189_p4), [#allocation12], 32  }
 0x167   : > { %10280 = vsyncadd (%p14190_p8), [#allocation12], 4294967264  ;;  %p14191_p6 = pmov %p14188_p3 }
 0x168   : > { %p14192_p9 = pmov %p14188_p3 }
 0x169   : > { %10282 = dma.done.wait (%p14191_p6), [#allocation15], 14352  }
 0x16a   : > { %10284 = vsyncadd (%p14192_p9), [#allocation15], 4294952944  ;;  %p14193_p12 = pmov %p14188_p3 }
 0x16b   : > { %p14194_p1 = pmov %p14188_p3 }
 0x16c   : > { %10286 = dma.done.wait (%p14193_p12), [#allocation18], 28688  }
 0x16d   : > { %10288 = vsyncadd (%p14194_p1), [#allocation18], 4294938608  ;;  %p14195_p13 = pmov %p14194_p1 }
 0x16e   : > { %p14196_p0 = pmov %p14194_p1 }
 0x16f   : > { %10290 = dma.done.wait (%p14195_p13), [#allocation21], 112  }
 0x170   : > { %10292 = vsyncadd (%p14196_p0), [#allocation21], 4294967184  ;;  %v806_v0 = vld [vmem:[#allocation5 + $0x8] sm:$0xff]  ;;  %v808_v1 = vld [vmem:[#allocation5 + $0x18] sm:$0xff]  ;;  %vm2369_vm0 = vcmask 1042432   ;;  %vm2498_vm1 = vcmask 1046528  }
 0x171   : > { %v805_v2 = vld [vmem:[#allocation5] sm:$0xff]  ;;  %v8219_v3 = vpack.c.bf16 %v808_v1, %v806_v0  ;;  %v807_v4 = vld [vmem:[#allocation5 + $0x10] sm:$0xff]  ;;  %v810_v5 = vld [vmem:[#allocation5 + $0x28] sm:$0xff]  ;;  %vm2756_vm3 = vcmask 1044480   ;;  %vm2627_vm4 = vcmask 1045504   ;;  %vm2885_vm5 = vcmask 1043456  }
 0x172   : > { %v812_v6 = vld [vmem:[#allocation5 + $0x38] sm:$0xff]  ;;  %v8221_v7 = vpack.c.bf16 %v807_v4, %v805_v2  ;;  %v809_v9 = vld [vmem:[#allocation5 + $0x20] sm:$0xff]  ;;  %v811_v10 = vld [vmem:[#allocation5 + $0x30] sm:$0xff]  ;;  %vm3142_vm6 = vcmask 1041408   ;;  %s13191_s19 = scalar_lea.vmem [#allocation22], %s9485_s28  ;;  %s9486_s27 = smul.u32 28672, %s14184_s12 }
 0x173   : > { %v8223_v8 = vpack.c.bf16 %v812_v6, %v810_v5  ;;  %v814_v11 = vld [vmem:[#allocation5 + $0x48] sm:$0xff]  ;;  %8220 = vmatprep.subr.bf16.mxu0 %v8219_v3  ;;  %v816_v12 = vld [vmem:[#allocation5 + $0x58] sm:$0xff]  ;;  %v8225_v13 = vpack.c.bf16 %v811_v10, %v809_v9  ;;  %v813_v15 = vld [vmem:[#allocation5 + $0x40] sm:$0xff]  ;;  %s7683_s1 = sshll.u32 %s13191_s19, 4  ;;  %s14430_s2 = sld [smem:[#allocation95_spill]]  ;;  %s13960_s1 = int_to_ptr.vmem [resolvable:$true] %s7683_s1 }
 0x174   : > { %8222 = vmatpush1.bf16.msra.mxu0 %v8221_v7  ;;  %v8227_v14 = vpack.c.bf16 %v816_v12, %v814_v11  ;;  %v815_v16 = vld [vmem:[#allocation5 + $0x50] sm:$0xff]  ;;  %v818_v17 = vld [vmem:[#allocation5 + $0x68] sm:$0xff]  ;;  %v820_v18 = vld [vmem:[#allocation5 + $0x78] sm:$0xff]  ;;  %s7669_s0 = scalar_lea.sflag [#allocation4], %s10752_s16  ;;  %s10221_s29 = scalar_lea.vmem %s13960_s1, 28672 }
 0x175   : > { %8224 = vmatprep.subr.bf16.mxu0 %v8223_v8  ;;  %v8229_v19 = vpack.c.bf16 %v815_v16, %v813_v15  ;;  %v8231_v20 = vpack.c.bf16 %v820_v18, %v818_v17  ;;  %v817_v21 = vld [vmem:[#allocation5 + $0x60] sm:$0xff]  ;;  %v819_v22 = vld [vmem:[#allocation5 + $0x70] sm:$0xff]  ;;  %v822_v23 = vld [vmem:[#allocation5 + $0x88] sm:$0xff]  ;;  %p10222_p2 = scmp.ne.s32.totalorder %s13960_s1, %s10221_s29  ;;  %p14431_p7 = scmp.ne.s32.totalorder %s14176_s20, 0 }
 0x176   : > { %v824_v24 = vld [vmem:[#allocation5 + $0x98] sm:$0xff]  ;;  %v8233_v25 = vpack.c.bf16 %v819_v22, %v817_v21  ;;  %v821_v27 = vld [vmem:[#allocation5 + $0x80] sm:$0xff]  ;;  %v823_v28 = vld [vmem:[#allocation5 + $0x90] sm:$0xff]  ;;  %s10333_s28 = smov [#allocation22]  }
 0x177   : > { %v8235_v26 = vpack.c.bf16 %v824_v24, %v822_v23  ;;  %v826_v29 = vld [vmem:[#allocation5 + $0xa8] sm:$0xff]  ;;  %v828_v30 = vld [vmem:[#allocation5 + $0xb8] sm:$0xff]  ;;  %v8237_v31 = vpack.c.bf16 %v823_v28, %v821_v27  ;;  %v825_v33 = vld [vmem:[#allocation5 + $0xa0] sm:$0xff]  ;;  %p10223_p5 = pnand %p10222_p2, %p14431_p7  ;;  %s10225_s30 = sshll.u32 %s10333_s28, 4  ;;  %s10226_s30 = int_to_ptr.vmem [resolvable:$false] %s10225_s30 }
 0x178   : > { %8226 = vmatpush1.bf16.msra.mxu0 %v8225_v13  ;;  %v8239_v32 = vpack.c.bf16 %v828_v30, %v826_v29  ;;  %v827_v34 = vld [vmem:[#allocation5 + $0xb0] sm:$0xff]  ;;  %v830_v35 = vld [vmem:[#allocation5 + $0xc8] sm:$0xff]  ;;  %v832_v36 = vld [vmem:[#allocation5 + $0xd8] sm:$0xff]  ;;  %p10228_p11 = scmp.lt.s32.totalorder %s13960_s1, %s10226_s30 }
 0x179   : > { %8228 = vmatprep.subr.bf16.mxu0 %v8227_v14  ;;  %v8241_v37 = vpack.c.bf16 %v827_v34, %v825_v33  ;;  %v8243_v38 = vpack.c.bf16 %v832_v36, %v830_v35  ;;  %v829_v39 = vld [vmem:[#allocation5 + $0xc0] sm:$0xff]  ;;  %v831_v40 = vld [vmem:[#allocation5 + $0xd0] sm:$0xff]  ;;  %v582_v41 = vld [vmem:[%s10758_s18 + $0x8] sm:$0xff]  ;;  %s13958_s3 = scalar_lea.hbm %s14430_s2, %s9486_s27  ;;  %p10224_p10 = pneg %p10223_p5 }
 0x17a   : > { %v834_v42 = vld [vmem:[#allocation5 + $0xe8] sm:$0xff]  ;;  %v836_v43 = vld [vmem:[#allocation5 + $0xf8] sm:$0xff]  ;;  %1093 = vmatprep.mubr.f32.mxu0 %v582_v41  ;;  %v8245_v44 = vpack.c.bf16 %v831_v40, %v829_v39  ;;  %v833_v46 = vld [vmem:[#allocation5 + $0xe0] sm:$0xff] }
 0x17b   : > { %v8247_v45 = vpack.c.bf16 %v836_v43, %v834_v42  ;;  %v835_v47 = vld [vmem:[#allocation5 + $0xf0] sm:$0xff]  ;;  %v838_v48 = vld [vmem:[#allocation5 + $0x108] sm:$0xff]  ;;  %v840_v49 = vld [vmem:[#allocation5 + $0x118] sm:$0xff] }
 0x17c   : > { %8230 = vmatpush1.bf16.msra.mxu0 %v8229_v19  ;;  %v8249_v50 = vpack.c.bf16 %v835_v47, %v833_v46  ;;  %v8251_v51 = vpack.c.bf16 %v840_v49, %v838_v48  ;;  %v837_v52 = vld [vmem:[#allocation5 + $0x100] sm:$0xff]  ;;  %v839_v53 = vld [vmem:[#allocation5 + $0x110] sm:$0xff]  ;;  %v842_v54 = vld [vmem:[#allocation5 + $0x128] sm:$0xff] }
 0x17d   : > { %8232 = vmatprep.subr.bf16.mxu0 %v8231_v20  ;;  %v844_v55 = vld [vmem:[#allocation5 + $0x138] sm:$0xff]  ;;  %v8253_v56 = vpack.c.bf16 %v839_v53, %v837_v52  ;;  %v841_v58 = vld [vmem:[#allocation5 + $0x120] sm:$0xff]  ;;  %v843_v59 = vld [vmem:[#allocation5 + $0x130] sm:$0xff] }
 0x17e   : > { %v8255_v57 = vpack.c.bf16 %v844_v55, %v842_v54  ;;  %v846_v60 = vld [vmem:[#allocation5 + $0x148] sm:$0xff]  ;;  %v848_v61 = vld [vmem:[#allocation5 + $0x158] sm:$0xff]  ;;  %v8257_v62 = vpack.c.bf16 %v843_v59, %v841_v58  ;;  %v845_v0 = vld [vmem:[#allocation5 + $0x140] sm:$0xff] }
 0x17f   : > { %v8259_v63 = vpack.c.bf16 %v848_v61, %v846_v60  ;;  %v847_v1 = vld [vmem:[#allocation5 + $0x150] sm:$0xff]  ;;  %v850_v2 = vld [vmem:[#allocation5 + $0x168] sm:$0xff]  ;;  %v852_v3 = vld [vmem:[#allocation5 + $0x178] sm:$0xff] }
 0x180   : > { %8234 = vmatpush1.bf16.msra.mxu0 %v8233_v25  ;;  %v8261_v4 = vpack.c.bf16 %v847_v1, %v845_v0  ;;  %v8263_v5 = vpack.c.bf16 %v852_v3, %v850_v2  ;;  %v849_v6 = vld [vmem:[#allocation5 + $0x160] sm:$0xff]  ;;  %v851_v7 = vld [vmem:[#allocation5 + $0x170] sm:$0xff]  ;;  %v854_v8 = vld [vmem:[#allocation5 + $0x188] sm:$0xff] }
 0x181   : > { %8236 = vmatprep.subr.bf16.mxu0 %v8235_v26  ;;  %v856_v9 = vld [vmem:[#allocation5 + $0x198] sm:$0xff]  ;;  %v8265_v10 = vpack.c.bf16 %v851_v7, %v849_v6  ;;  %v853_v12 = vld [vmem:[#allocation5 + $0x180] sm:$0xff]  ;;  %v855_v13 = vld [vmem:[#allocation5 + $0x190] sm:$0xff] }
 0x182   : > { %v8267_v11 = vpack.c.bf16 %v856_v9, %v854_v8  ;;  %v858_v14 = vld [vmem:[#allocation5 + $0x1a8] sm:$0xff]  ;;  %v860_v15 = vld [vmem:[#allocation5 + $0x1b8] sm:$0xff]  ;;  %v8269_v16 = vpack.c.bf16 %v855_v13, %v853_v12  ;;  %v857_v18 = vld [vmem:[#allocation5 + $0x1a0] sm:$0xff] }
 0x183   : > { %v8271_v17 = vpack.c.bf16 %v860_v15, %v858_v14  ;;  %v859_v19 = vld [vmem:[#allocation5 + $0x1b0] sm:$0xff]  ;;  %v862_v20 = vld [vmem:[#allocation5 + $0x1c8] sm:$0xff]  ;;  %v864_v21 = vld [vmem:[#allocation5 + $0x1d8] sm:$0xff] }
 0x184   : > { %8238 = vmatpush1.bf16.msra.mxu0 %v8237_v31  ;;  %v8273_v22 = vpack.c.bf16 %v859_v19, %v857_v18  ;;  %v8275_v23 = vpack.c.bf16 %v864_v21, %v862_v20  ;;  %v861_v24 = vld [vmem:[#allocation5 + $0x1c0] sm:$0xff]  ;;  %v863_v25 = vld [vmem:[#allocation5 + $0x1d0] sm:$0xff]  ;;  %v866_v26 = vld [vmem:[#allocation5 + $0x1e8] sm:$0xff] }
 0x185   : > { %8240 = vmatprep.subr.bf16.mxu0 %v8239_v32  ;;  %v868_v27 = vld [vmem:[#allocation5 + $0x1f8] sm:$0xff]  ;;  %v8277_v28 = vpack.c.bf16 %v863_v25, %v861_v24  ;;  %v865_v30 = vld [vmem:[#allocation5 + $0x1e0] sm:$0xff]  ;;  %v867_v31 = vld [vmem:[#allocation5 + $0x1f0] sm:$0xff] }
 0x186   : > { %v8279_v29 = vpack.c.bf16 %v868_v27, %v866_v26  ;;  %v870_v32 = vld [vmem:[#allocation5 + $0x208] sm:$0xff]  ;;  %v872_v33 = vld [vmem:[#allocation5 + $0x218] sm:$0xff]  ;;  %v8281_v34 = vpack.c.bf16 %v867_v31, %v865_v30  ;;  %v869_v36 = vld [vmem:[#allocation5 + $0x200] sm:$0xff] }
 0x187   : > { %v8283_v35 = vpack.c.bf16 %v872_v33, %v870_v32  ;;  %v876_v39 = vld [vmem:[#allocation5 + $0x238] sm:$0xff]  ;;  %v581_v40 = vld [vmem:[%s10758_s18] sm:$0xff]  ;;  %v878_v46 = vld [vmem:[#allocation5 + $0x248] sm:$0xff] }
 0x188   : > { %8242 = vmatpush1.bf16.msra.mxu0 %v8241_v37  ;;  %v871_v37 = vld [vmem:[#allocation5 + $0x210] sm:$0xff]  ;;  %v589_v42 = vld [vmem:[%s10758_s18 + $0x40] sm:$0xff]  ;;  %v880_v47 = vld [vmem:[#allocation5 + $0x258] sm:$0xff] }
 0x189   : > { %8244 = vmatprep.subr.bf16.mxu0 %v8243_v38  ;;  %v874_v38 = vld [vmem:[#allocation5 + $0x228] sm:$0xff]  ;;  %v8285_v41 = vpack.c.bf16 %v871_v37, %v869_v36  ;;  %v588_v48 = vld [vmem:[%s10758_s18 + $0x38] sm:$0xff]  ;;  %v877_v52 = vld [vmem:[#allocation5 + $0x240] sm:$0xff] }
 0x18a   : > { %v8287_v43 = vpack.c.bf16 %v876_v39, %v874_v38  ;;  %v879_v53 = vld [vmem:[#allocation5 + $0x250] sm:$0xff]  ;;  %v882_v54 = vld [vmem:[#allocation5 + $0x268] sm:$0xff]  ;;  %v884_v55 = vld [vmem:[#allocation5 + $0x278] sm:$0xff] }
 0x18b   : > { %v603_v58 = vld [vmem:[%s10758_s18 + $0xb0] sm:$0xff]  ;;  %v8295_v59 = vpack.c.bf16 %v884_v55, %v882_v54  ;;  %v881_v60 = vld [vmem:[#allocation5 + $0x260] sm:$0xff]  ;;  %v602_v0 = vld [vmem:[%s10758_s18 + $0xa8] sm:$0xff] }
 0x18c   : > { %8246 = vmatpush1.bf16.msra.mxu0 %v8245_v44  ;;  %v873_v44 = vld [vmem:[#allocation5 + $0x220] sm:$0xff]  ;;  %v883_v61 = vld [vmem:[#allocation5 + $0x270] sm:$0xff]  ;;  %v610_v2 = vld [vmem:[%s10758_s18 + $0xe8] sm:$0xff] }
 0x18d   : > { %8248 = vmatprep.subr.bf16.mxu0 %v8247_v45  ;;  %v875_v45 = vld [vmem:[#allocation5 + $0x230] sm:$0xff]  ;;  %v8297_v1 = vpack.c.bf16 %v883_v61, %v881_v60  ;;  %v890_v6 = vld [vmem:[#allocation5 + $0x2a8] sm:$0xff]  ;;  %v892_v7 = vld [vmem:[#allocation5 + $0x2b8] sm:$0xff] }
 0x18e   : > { %v8289_v49 = vpack.c.bf16 %v875_v45, %v873_v44  ;;  %v609_v8 = vld [vmem:[%s10758_s18 + $0xe0] sm:$0xff]  ;;  %v891_v13 = vld [vmem:[#allocation5 + $0x2b0] sm:$0xff]  ;;  %v894_v14 = vld [vmem:[#allocation5 + $0x2c8] sm:$0xff] }
 0x18f   : > { %v889_v12 = vld [vmem:[#allocation5 + $0x2a0] sm:$0xff]  ;;  %v896_v15 = vld [vmem:[#allocation5 + $0x2d8] sm:$0xff]  ;;  %v895_v21 = vld [vmem:[#allocation5 + $0x2d0] sm:$0xff] }
 0x190   : > { %8250 = vmatpush1.bf16.msra.mxu0 %v8249_v50  ;;  %v596_v50 = vld [vmem:[%s10758_s18 + $0x78] sm:$0xff]  ;;  %v8307_v19 = vpack.c.bf16 %v896_v15, %v894_v14  ;;  %v893_v20 = vld [vmem:[#allocation5 + $0x2c0] sm:$0xff]  ;;  %v623_v24 = vld [vmem:[%s10758_s18 + $0x150] sm:$0xff] }
 0x191   : > { %8252 = vmatprep.subr.bf16.mxu0 %v8251_v51  ;;  %v8291_v51 = vpack.c.bf16 %v880_v47, %v878_v46  ;;  %v624_v18 = vld [vmem:[%s10758_s18 + $0x158] sm:$0xff]  ;;  %v8309_v25 = vpack.c.bf16 %v895_v21, %v893_v20  ;;  %v631_v26 = vld [vmem:[%s10758_s18 + $0x190] sm:$0xff]  ;;  %v902_v30 = vld [vmem:[#allocation5 + $0x308] sm:$0xff] }
 0x192   : > { %v904_v31 = vld [vmem:[#allocation5 + $0x318] sm:$0xff]  ;;  %v630_v32 = vld [vmem:[%s10758_s18 + $0x188] sm:$0xff]  ;;  %v901_v36 = vld [vmem:[#allocation5 + $0x300] sm:$0xff] }
 0x193   : > { %v903_v37 = vld [vmem:[#allocation5 + $0x310] sm:$0xff]  ;;  %v906_v38 = vld [vmem:[#allocation5 + $0x328] sm:$0xff]  ;;  %v908_v39 = vld [vmem:[#allocation5 + $0x338] sm:$0xff] }
 0x194   : > { %8254 = vmatpush1.bf16.msra.mxu0 %v8253_v56  ;;  %v595_v56 = vld [vmem:[%s10758_s18 + $0x70] sm:$0xff]  ;;  %v905_v44 = vld [vmem:[#allocation5 + $0x320] sm:$0xff]  ;;  %v910_v46 = vld [vmem:[#allocation5 + $0x348] sm:$0xff] }
 0x195   : > { %8256 = vmatprep.subr.bf16.mxu0 %v8255_v57  ;;  %v8293_v57 = vpack.c.bf16 %v879_v53, %v877_v52  ;;  %v907_v45 = vld [vmem:[#allocation5 + $0x330] sm:$0xff]  ;;  %v912_v47 = vld [vmem:[#allocation5 + $0x358] sm:$0xff]  ;;  %v909_v52 = vld [vmem:[#allocation5 + $0x340] sm:$0xff] }
 0x196   : > { %v911_v53 = vld [vmem:[#allocation5 + $0x350] sm:$0xff]  ;;  %v914_v54 = vld [vmem:[#allocation5 + $0x368] sm:$0xff]  ;;  %v916_v55 = vld [vmem:[#allocation5 + $0x378] sm:$0xff] }
 0x197   : > { %v913_v60 = vld [vmem:[#allocation5 + $0x360] sm:$0xff]  ;;  %v915_v61 = vld [vmem:[#allocation5 + $0x370] sm:$0xff]  ;;  %v926_v14 = vld [vmem:[#allocation5 + $0x3c8] sm:$0xff] }
 0x198   : > { %8258 = vmatpush1.bf16.msra.mxu0 %v8257_v62  ;;  %v886_v62 = vld [vmem:[#allocation5 + $0x288] sm:$0xff]  ;;  %v928_v15 = vld [vmem:[#allocation5 + $0x3d8] sm:$0xff]  ;;  %v925_v20 = vld [vmem:[#allocation5 + $0x3c0] sm:$0xff] }
 0x199   : > { %8260 = vmatprep.subr.bf16.mxu0 %v8259_v63  ;;  %v888_v63 = vld [vmem:[#allocation5 + $0x298] sm:$0xff]  ;;  %v927_v21 = vld [vmem:[#allocation5 + $0x3d0] sm:$0xff]  ;;  %vm11095_vm2 = vmneg %vm2369_vm0 }
 0x19a   : > { %v8299_v3 = vpack.c.bf16 %v888_v63, %v886_v62  ;;  %v918_v62 = vld [vmem:[#allocation5 + $0x388] sm:$0xff]  ;;  %v920_v63 = vld [vmem:[#allocation5 + $0x398] sm:$0xff] }
 0x19c   : > { %8262 = vmatpush1.bf16.msra.mxu0 %v8261_v4  ;;  %v885_v4 = vld [vmem:[#allocation5 + $0x280] sm:$0xff] }
 0x19d   : > { %8264 = vmatprep.subr.bf16.mxu0 %v8263_v5  ;;  %v887_v5 = vld [vmem:[#allocation5 + $0x290] sm:$0xff] }
 0x19e   : > { %v8301_v9 = vpack.c.bf16 %v887_v5, %v885_v4  ;;  %v917_v4 = vld [vmem:[#allocation5 + $0x380] sm:$0xff]  ;;  %v919_v5 = vld [vmem:[#allocation5 + $0x390] sm:$0xff] }
 0x1a0   : > { %8266 = vmatpush1.bf16.msra.mxu0 %v8265_v10  ;;  %v617_v10 = vld [vmem:[%s10758_s18 + $0x120] sm:$0xff] }
 0x1a1   : > { %8268 = vmatprep.subr.bf16.mxu0 %v8267_v11  ;;  %v8303_v11 = vpack.c.bf16 %v892_v7, %v890_v6  ;;  %v922_v6 = vld [vmem:[#allocation5 + $0x3a8] sm:$0xff]  ;;  %v924_v7 = vld [vmem:[#allocation5 + $0x3b8] sm:$0xff] }
 0x1a4   : > { %8270 = vmatpush1.bf16.msra.mxu0 %v8269_v16  ;;  %v616_v16 = vld [vmem:[%s10758_s18 + $0x118] sm:$0xff] }
 0x1a5   : > { %8272 = vmatprep.subr.bf16.mxu0 %v8271_v17  ;;  %v8305_v17 = vpack.c.bf16 %v891_v13, %v889_v12  ;;  %v921_v12 = vld [vmem:[#allocation5 + $0x3a0] sm:$0xff]  ;;  %v923_v13 = vld [vmem:[#allocation5 + $0x3b0] sm:$0xff] }
 0x1a8   : > { %8274 = vmatpush1.bf16.msra.mxu0 %v8273_v22  ;;  %v898_v22 = vld [vmem:[#allocation5 + $0x2e8] sm:$0xff] }
 0x1a9   : > { %8276 = vmatprep.subr.bf16.mxu0 %v8275_v23  ;;  %v900_v23 = vld [vmem:[#allocation5 + $0x2f8] sm:$0xff] }
 0x1aa   : > { %v8311_v27 = vpack.c.bf16 %v900_v23, %v898_v22  ;;  %v930_v22 = vld [vmem:[#allocation5 + $0x3e8] sm:$0xff]  ;;  %v932_v23 = vld [vmem:[#allocation5 + $0x3f8] sm:$0xff] }
 0x1ac   : > { %8278 = vmatpush1.bf16.msra.mxu0 %v8277_v28  ;;  %v897_v28 = vld [vmem:[#allocation5 + $0x2e0] sm:$0xff] }
 0x1ad   : > { %8280 = vmatprep.subr.bf16.mxu0 %v8279_v29  ;;  %v899_v29 = vld [vmem:[#allocation5 + $0x2f0] sm:$0xff] }
 0x1ae   : > { %v8313_v33 = vpack.c.bf16 %v899_v29, %v897_v28  ;;  %v929_v28 = vld [vmem:[#allocation5 + $0x3e0] sm:$0xff]  ;;  %v931_v29 = vld [vmem:[#allocation5 + $0x3f0] sm:$0xff] }
 0x1b0   : > { %8282 = vmatpush1.bf16.msra.mxu0 %v8281_v34  ;;  %v638_v34 = vld [vmem:[%s10758_s18 + $0x1c8] sm:$0xff] }
 0x1b1   : > { %8284 = vmatprep.subr.bf16.mxu0 %v8283_v35  ;;  %v8315_v35 = vpack.c.bf16 %v904_v31, %v902_v30  ;;  %v934_v30 = vld [vmem:[#allocation5 + $0x408] sm:$0xff]  ;;  %v936_v31 = vld [vmem:[#allocation5 + $0x418] sm:$0xff] }
 0x1b3   : > { %1094 = vmatmul.mubr.f32.vlgmr.msra.gmra.mrb[0].mxu0 %v581_v40  ;;  %v637_v40 = vld [vmem:[%s10758_s18 + $0x1c0] sm:$0xff] }
 0x1b4   : > { %8286 = vmatpush1.bf16.msra.mxu0 %v8285_v41  ;;  %1099 = vmatprep.mubr.f32.mxu0 %v589_v42  ;;  %v8317_v41 = vpack.c.bf16 %v903_v37, %v901_v36  ;;  %v645_v42 = vld [vmem:[%s10758_s18 + $0x200] sm:$0xff] }
 0x1b5   : > { %8288 = vmatprep.subr.bf16.mxu0 %v8287_v43  ;;  %v8319_v43 = vpack.c.bf16 %v908_v39, %v906_v38  ;;  %v693_v36 = vld [vmem:[%s10758_s18 + $0x380] sm:$0xff]  ;;  %v700_v38 = vld [vmem:[%s10758_s18 + $0x3b8] sm:$0xff] }
 0x1b6   : > { %v701_v37 = vld [vmem:[%s10758_s18 + $0x3c0] sm:$0xff]  ;;  %v708_v39 = vld [vmem:[%s10758_s18 + $0x3f8] sm:$0xff] }
 0x1b7   : > { %1100 = vmatmul.mubr.f32.gmra.mrb[2].mxu0 %v588_v48  ;;  %v644_v48 = vld [vmem:[%s10758_s18 + $0x1f8] sm:$0xff] }
 0x1b8   : > { %1105 = vmatprep.mubr.f32.mxu0 %v596_v50  ;;  %8290 = vmatpush1.bf16.msra.mxu0 %v8289_v49  ;;  %v8321_v49 = vpack.c.bf16 %v907_v45, %v905_v44  ;;  %v652_v50 = vld [vmem:[%s10758_s18 + $0x238] sm:$0xff]  ;;  %v721_v44 = vld [vmem:[%s10758_s18 + $0x460] sm:$0xff] }
 0x1b9   : > { %8292 = vmatprep.subr.bf16.mxu0 %v8291_v51  ;;  %v8323_v51 = vpack.c.bf16 %v912_v47, %v910_v46  ;;  %v729_v45 = vld [vmem:[%s10758_s18 + $0x4a0] sm:$0xff]  ;;  %v728_v46 = vld [vmem:[%s10758_s18 + $0x498] sm:$0xff] }
 0x1ba   : > { %v736_v47 = vld [vmem:[%s10758_s18 + $0x4d8] sm:$0xff] }
 0x1bb   : > { %1106 = vmatmul.mubr.f32.gmra.mrb[4].mxu0 %v595_v56  ;;  %v651_v56 = vld [vmem:[%s10758_s18 + $0x230] sm:$0xff] }
 0x1bc   : > { %1111 = vmatprep.mubr.f32.mxu0 %v603_v58  ;;  %8294 = vmatpush1.bf16.msra.mxu0 %v8293_v57  ;;  %v8325_v57 = vpack.c.bf16 %v911_v53, %v909_v52  ;;  %v659_v58 = vld [vmem:[%s10758_s18 + $0x270] sm:$0xff]  ;;  %v749_v52 = vld [vmem:[%s10758_s18 + $0x540] sm:$0xff] }
 0x1bd   : > { %8296 = vmatprep.subr.bf16.mxu0 %v8295_v59  ;;  %v8327_v59 = vpack.c.bf16 %v916_v55, %v914_v54  ;;  %v757_v53 = vld [vmem:[%s10758_s18 + $0x580] sm:$0xff]  ;;  %v756_v54 = vld [vmem:[%s10758_s18 + $0x578] sm:$0xff] }
 0x1be   : > { %v764_v55 = vld [vmem:[%s10758_s18 + $0x5b8] sm:$0xff] }
 0x1bf   : > { %1112 = vmatmul.mubr.f32.gmra.mrb[6].mxu0 %v602_v0  ;;  %v658_v0 = vld [vmem:[%s10758_s18 + $0x268] sm:$0xff] }
 0x1c0   : > { %1117 = vmatprep.mubr.f32.mxu0 %v610_v2  ;;  %8298 = vmatpush1.bf16.msra.mxu0 %v8297_v1  ;;  %v8329_v1 = vpack.c.bf16 %v915_v61, %v913_v60  ;;  %v666_v2 = vld [vmem:[%s10758_s18 + $0x2a8] sm:$0xff]  ;;  %v777_v60 = vld [vmem:[%s10758_s18 + $0x620] sm:$0xff] }
 0x1c1   : > { %8300 = vmatprep.subr.bf16.mxu0 %v8299_v3  ;;  %v8331_v3 = vpack.c.bf16 %v920_v63, %v918_v62  ;;  %v785_v61 = vld [vmem:[%s10758_s18 + $0x660] sm:$0xff]  ;;  %v784_v62 = vld [vmem:[%s10758_s18 + $0x658] sm:$0xff] }
 0x1c2   : > { %v792_v63 = vld [vmem:[%s10758_s18 + $0x698] sm:$0xff] }
 0x1c3   : > { %1118 = vmatmul.mubr.f32.gmra.mrb[8].mxu0 %v609_v8  ;;  %v665_v8 = vld [vmem:[%s10758_s18 + $0x2a0] sm:$0xff] }
 0x1c4   : > { %1123 = vmatprep.mubr.f32.mxu0 %v617_v10  ;;  %8302 = vmatpush1.bf16.msra.mxu0 %v8301_v9  ;;  %v8333_v9 = vpack.c.bf16 %v919_v5, %v917_v4  ;;  %v673_v10 = vld [vmem:[%s10758_s18 + $0x2e0] sm:$0xff]  ;;  %v935_v5 = vld [vmem:[#allocation5 + $0x410] sm:$0xff] }
 0x1c5   : > { %8304 = vmatprep.subr.bf16.mxu0 %v8303_v11  ;;  %v8335_v11 = vpack.c.bf16 %v924_v7, %v922_v6  ;;  %v933_v4 = vld [vmem:[#allocation5 + $0x400] sm:$0xff]  ;;  %v938_v6 = vld [vmem:[#allocation5 + $0x428] sm:$0xff]  ;;  %v940_v7 = vld [vmem:[#allocation5 + $0x438] sm:$0xff] }
 0x1c7   : > { %1124 = vmatmul.mubr.f32.gmra.mrb[10].mxu0 %v616_v16  ;;  %v672_v16 = vld [vmem:[%s10758_s18 + $0x2d8] sm:$0xff] }
 0x1c8   : > { %1129 = vmatprep.mubr.f32.mxu0 %v624_v18  ;;  %8306 = vmatpush1.bf16.msra.mxu0 %v8305_v17  ;;  %v8337_v17 = vpack.c.bf16 %v923_v13, %v921_v12  ;;  %v680_v18 = vld [vmem:[%s10758_s18 + $0x318] sm:$0xff]  ;;  %v937_v12 = vld [vmem:[#allocation5 + $0x420] sm:$0xff]  ;;  %v939_v13 = vld [vmem:[#allocation5 + $0x430] sm:$0xff] }
 0x1c9   : > { %8308 = vmatprep.subr.bf16.mxu0 %v8307_v19  ;;  %v8339_v19 = vpack.c.bf16 %v928_v15, %v926_v14  ;;  %v942_v14 = vld [vmem:[#allocation5 + $0x448] sm:$0xff]  ;;  %v944_v15 = vld [vmem:[#allocation5 + $0x458] sm:$0xff] }
 0x1cb   : > { %1130 = vmatmul.mubr.f32.gmra.mrb[12].mxu0 %v623_v24  ;;  %v679_v24 = vld [vmem:[%s10758_s18 + $0x310] sm:$0xff] }
 0x1cc   : > { %1135 = vmatprep.mubr.f32.mxu0 %v631_v26  ;;  %8310 = vmatpush1.bf16.msra.mxu0 %v8309_v25  ;;  %v8341_v25 = vpack.c.bf16 %v927_v21, %v925_v20  ;;  %v687_v26 = vld [vmem:[%s10758_s18 + $0x350] sm:$0xff]  ;;  %v941_v20 = vld [vmem:[#allocation5 + $0x440] sm:$0xff] }
 0x1cd   : > { %8312 = vmatprep.subr.bf16.mxu0 %v8311_v27  ;;  %v8343_v27 = vpack.c.bf16 %v932_v23, %v930_v22  ;;  %v943_v21 = vld [vmem:[#allocation5 + $0x450] sm:$0xff]  ;;  %v946_v22 = vld [vmem:[#allocation5 + $0x468] sm:$0xff]  ;;  %v948_v23 = vld [vmem:[#allocation5 + $0x478] sm:$0xff] }
 0x1cf   : > { %1136 = vmatmul.mubr.f32.gmra.mrb[14].mxu0 %v630_v32  ;;  %v686_v32 = vld [vmem:[%s10758_s18 + $0x348] sm:$0xff] }
 0x1d0   : > { %1141 = vmatprep.mubr.f32.mxu0 %v638_v34  ;;  %8314 = vmatpush1.bf16.msra.mxu0 %v8313_v33  ;;  %v8345_v33 = vpack.c.bf16 %v931_v29, %v929_v28  ;;  %v694_v34 = vld [vmem:[%s10758_s18 + $0x388] sm:$0xff]  ;;  %v945_v28 = vld [vmem:[#allocation5 + $0x460] sm:$0xff]  ;;  %v947_v29 = vld [vmem:[#allocation5 + $0x470] sm:$0xff] }
 0x1d1   : > { %8316 = vmatprep.subr.bf16.mxu0 %v8315_v35  ;;  %v8347_v35 = vpack.c.bf16 %v936_v31, %v934_v30  ;;  %v950_v30 = vld [vmem:[#allocation5 + $0x488] sm:$0xff]  ;;  %v952_v31 = vld [vmem:[#allocation5 + $0x498] sm:$0xff] }
 0x1d3   : > { %1142 = vmatmul.mubr.f32.gmra.mrb[16].mxu0 %v637_v40  ;;  %v707_v40 = vld [vmem:[%s10758_s18 + $0x3f0] sm:$0xff] }
 0x1d4   : > { %1147 = vmatprep.mubr.f32.mxu0 %v645_v42  ;;  %8318 = vmatpush1.bf16.msra.mxu0 %v8317_v41  ;;  %v715_v41 = vld [vmem:[%s10758_s18 + $0x430] sm:$0xff]  ;;  %v714_v42 = vld [vmem:[%s10758_s18 + $0x428] sm:$0xff] }
 0x1d5   : > { %8320 = vmatprep.subr.bf16.mxu0 %v8319_v43  ;;  %v722_v43 = vld [vmem:[%s10758_s18 + $0x468] sm:$0xff] }
 0x1d7   : > { %1148 = vmatmul.mubr.f32.gmra.mrb[18].mxu0 %v644_v48  ;;  %v735_v48 = vld [vmem:[%s10758_s18 + $0x4d0] sm:$0xff] }
 0x1d8   : > { %1153 = vmatprep.mubr.f32.mxu0 %v652_v50  ;;  %8322 = vmatpush1.bf16.msra.mxu0 %v8321_v49  ;;  %v743_v49 = vld [vmem:[%s10758_s18 + $0x510] sm:$0xff]  ;;  %v742_v50 = vld [vmem:[%s10758_s18 + $0x508] sm:$0xff] }
 0x1d9   : > { %8324 = vmatprep.subr.bf16.mxu0 %v8323_v51  ;;  %v750_v51 = vld [vmem:[%s10758_s18 + $0x548] sm:$0xff] }
 0x1db   : > { %1154 = vmatmul.mubr.f32.gmra.mrb[20].mxu0 %v651_v56  ;;  %v763_v56 = vld [vmem:[%s10758_s18 + $0x5b0] sm:$0xff] }
 0x1dc   : > { %1159 = vmatprep.mubr.f32.mxu0 %v659_v58  ;;  %8326 = vmatpush1.bf16.msra.mxu0 %v8325_v57  ;;  %v771_v57 = vld [vmem:[%s10758_s18 + $0x5f0] sm:$0xff]  ;;  %v770_v58 = vld [vmem:[%s10758_s18 + $0x5e8] sm:$0xff] }
 0x1dd   : > { %8328 = vmatprep.subr.bf16.mxu0 %v8327_v59  ;;  %v778_v59 = vld [vmem:[%s10758_s18 + $0x628] sm:$0xff] }
 0x1df   : > { %1160 = vmatmul.mubr.f32.gmra.mrb[22].mxu0 %v658_v0  ;;  %v791_v0 = vld [vmem:[%s10758_s18 + $0x690] sm:$0xff] }
 0x1e0   : > { %1165 = vmatprep.mubr.f32.mxu0 %v666_v2  ;;  %8330 = vmatpush1.bf16.msra.mxu0 %v8329_v1  ;;  %v799_v1 = vld [vmem:[%s10758_s18 + $0x6d0] sm:$0xff]  ;;  %v798_v2 = vld [vmem:[%s10758_s18 + $0x6c8] sm:$0xff] }
 0x1e1   : > { %8332 = vmatprep.subr.bf16.mxu0 %v8331_v3  ;;  %v584_v3 = vld [vmem:[%s10758_s18 + $0x18] sm:$0xff] }
 0x1e3   : > { %1166 = vmatmul.mubr.f32.gmra.mrb[24].mxu0 %v665_v8  ;;  %v583_v8 = vld [vmem:[%s10758_s18 + $0x10] sm:$0xff] }
 0x1e4   : > { %1171 = vmatprep.mubr.f32.mxu0 %v673_v10  ;;  %8334 = vmatpush1.bf16.msra.mxu0 %v8333_v9  ;;  %v8349_v9 = vpack.c.bf16 %v935_v5, %v933_v4  ;;  %v591_v10 = vld [vmem:[%s10758_s18 + $0x50] sm:$0xff]  ;;  %v965_v4 = vld [vmem:[#allocation5 + $0x500] sm:$0xff] }
 0x1e5   : > { %8336 = vmatprep.subr.bf16.mxu0 %v8335_v11  ;;  %v8351_v11 = vpack.c.bf16 %v940_v7, %v938_v6  ;;  %v967_v5 = vld [vmem:[#allocation5 + $0x510] sm:$0xff]  ;;  %v970_v6 = vld [vmem:[#allocation5 + $0x528] sm:$0xff]  ;;  %v972_v7 = vld [vmem:[#allocation5 + $0x538] sm:$0xff] }
 0x1e7   : > { %1172 = vmatmul.mubr.f32.gmra.mrb[26].mxu0 %v672_v16  ;;  %v590_v16 = vld [vmem:[%s10758_s18 + $0x48] sm:$0xff] }
 0x1e8   : > { %1177 = vmatprep.mubr.f32.mxu0 %v680_v18  ;;  %8338 = vmatpush1.bf16.msra.mxu0 %v8337_v17  ;;  %v8353_v17 = vpack.c.bf16 %v939_v13, %v937_v12  ;;  %v598_v18 = vld [vmem:[%s10758_s18 + $0x88] sm:$0xff]  ;;  %v969_v12 = vld [vmem:[#allocation5 + $0x520] sm:$0xff]  ;;  %v971_v13 = vld [vmem:[#allocation5 + $0x530] sm:$0xff] }
 0x1e9   : > { %8340 = vmatprep.subr.bf16.mxu0 %v8339_v19  ;;  %v8355_v19 = vpack.c.bf16 %v944_v15, %v942_v14  ;;  %v974_v14 = vld [vmem:[#allocation5 + $0x548] sm:$0xff]  ;;  %v976_v15 = vld [vmem:[#allocation5 + $0x558] sm:$0xff] }
 0x1eb   : > { %1178 = vmatmul.mubr.f32.gmra.mrb[28].mxu0 %v679_v24  ;;  %v597_v24 = vld [vmem:[%s10758_s18 + $0x80] sm:$0xff] }
 0x1ec   : > { %1183 = vmatprep.mubr.f32.mxu0 %v687_v26  ;;  %8342 = vmatpush1.bf16.msra.mxu0 %v8341_v25  ;;  %v8357_v25 = vpack.c.bf16 %v943_v21, %v941_v20  ;;  %v605_v26 = vld [vmem:[%s10758_s18 + $0xc0] sm:$0xff]  ;;  %v975_v21 = vld [vmem:[#allocation5 + $0x550] sm:$0xff] }
 0x1ed   : > { %8344 = vmatprep.subr.bf16.mxu0 %v8343_v27  ;;  %v8359_v27 = vpack.c.bf16 %v948_v23, %v946_v22  ;;  %v973_v20 = vld [vmem:[#allocation5 + $0x540] sm:$0xff]  ;;  %v978_v22 = vld [vmem:[#allocation5 + $0x568] sm:$0xff]  ;;  %v980_v23 = vld [vmem:[#allocation5 + $0x578] sm:$0xff] }
 0x1ef   : > { %1184 = vmatmul.mubr.f32.gmra.mrb[30].mxu0 %v686_v32  ;;  %v604_v32 = vld [vmem:[%s10758_s18 + $0xb8] sm:$0xff] }
 0x1f0   : > { %1189 = vmatprep.mubr.f32.mxu0 %v694_v34  ;;  %8346 = vmatpush1.bf16.msra.mxu0 %v8345_v33  ;;  %v8361_v33 = vpack.c.bf16 %v947_v29, %v945_v28  ;;  %v612_v34 = vld [vmem:[%s10758_s18 + $0xf8] sm:$0xff]  ;;  %v977_v28 = vld [vmem:[#allocation5 + $0x560] sm:$0xff]  ;;  %v979_v29 = vld [vmem:[#allocation5 + $0x570] sm:$0xff] }
 0x1f1   : > { %8348 = vmatprep.subr.bf16.mxu0 %v8347_v35  ;;  %v8363_v35 = vpack.c.bf16 %v952_v31, %v950_v30  ;;  %v982_v30 = vld [vmem:[#allocation5 + $0x588] sm:$0xff]  ;;  %v984_v31 = vld [vmem:[#allocation5 + $0x598] sm:$0xff] }
 0x1f3   : > { %1190 = vmatmul.mubr.f32.gmra.mrb[32].mxu0 %v693_v36  ;;  %v949_v36 = vld [vmem:[#allocation5 + $0x480] sm:$0xff] }
 0x1f4   : > { %1195 = vmatprep.mubr.f32.mxu0 %v701_v37  ;;  %v951_v37 = vld [vmem:[#allocation5 + $0x490] sm:$0xff] }
 0x1f7   : > { %1196 = vmatmul.mubr.f32.gmra.mrb[34].mxu0 %v700_v38  ;;  %v954_v38 = vld [vmem:[#allocation5 + $0x4a8] sm:$0xff] }
 0x1f8   : > { %1201 = vmatprep.mubr.f32.mxu0 %v708_v39  ;;  %v956_v39 = vld [vmem:[#allocation5 + $0x4b8] sm:$0xff] }
 0x1fb   : > { %1202 = vmatmul.mubr.f32.gmra.mrb[36].mxu0 %v707_v40  ;;  %v611_v40 = vld [vmem:[%s10758_s18 + $0xf0] sm:$0xff] }
 0x1fc   : > { %1207 = vmatprep.mubr.f32.mxu0 %v715_v41  ;;  %v8365_v41 = vpack.c.bf16 %v951_v37, %v949_v36  ;;  %v981_v36 = vld [vmem:[#allocation5 + $0x580] sm:$0xff]  ;;  %v983_v37 = vld [vmem:[#allocation5 + $0x590] sm:$0xff] }
 0x1ff   : > { %1208 = vmatmul.mubr.f32.gmra.mrb[38].mxu0 %v714_v42  ;;  %v619_v42 = vld [vmem:[%s10758_s18 + $0x130] sm:$0xff] }
 0x200   : > { %1213 = vmatprep.mubr.f32.mxu0 %v722_v43  ;;  %v8367_v43 = vpack.c.bf16 %v956_v39, %v954_v38  ;;  %v986_v38 = vld [vmem:[#allocation5 + $0x5a8] sm:$0xff]  ;;  %v988_v39 = vld [vmem:[#allocation5 + $0x5b8] sm:$0xff] }
 0x203   : > { %1214 = vmatmul.mubr.f32.gmra.mrb[40].mxu0 %v721_v44  ;;  %v953_v44 = vld [vmem:[#allocation5 + $0x4a0] sm:$0xff] }
 0x204   : > { %1219 = vmatprep.mubr.f32.mxu0 %v729_v45  ;;  %v955_v45 = vld [vmem:[#allocation5 + $0x4b0] sm:$0xff] }
 0x207   : > { %1220 = vmatmul.mubr.f32.gmra.mrb[42].mxu0 %v728_v46  ;;  %v958_v46 = vld [vmem:[#allocation5 + $0x4c8] sm:$0xff] }
 0x208   : > { %1225 = vmatprep.mubr.f32.mxu0 %v736_v47  ;;  %v960_v47 = vld [vmem:[#allocation5 + $0x4d8] sm:$0xff] }
 0x20b   : > { %1226 = vmatmul.mubr.f32.gmra.mrb[44].mxu0 %v735_v48  ;;  %v618_v48 = vld [vmem:[%s10758_s18 + $0x128] sm:$0xff] }
 0x20c   : > { %1231 = vmatprep.mubr.f32.mxu0 %v743_v49  ;;  %v8369_v49 = vpack.c.bf16 %v955_v45, %v953_v44  ;;  %v985_v44 = vld [vmem:[#allocation5 + $0x5a0] sm:$0xff]  ;;  %v987_v45 = vld [vmem:[#allocation5 + $0x5b0] sm:$0xff] }
 0x20f   : > { %1232 = vmatmul.mubr.f32.gmra.mrb[46].mxu0 %v742_v50  ;;  %v626_v50 = vld [vmem:[%s10758_s18 + $0x168] sm:$0xff] }
 0x210   : > { %1237 = vmatprep.mubr.f32.mxu0 %v750_v51  ;;  %v8371_v51 = vpack.c.bf16 %v960_v47, %v958_v46  ;;  %v990_v46 = vld [vmem:[#allocation5 + $0x5c8] sm:$0xff]  ;;  %v992_v47 = vld [vmem:[#allocation5 + $0x5d8] sm:$0xff] }
 0x213   : > { %1238 = vmatmul.mubr.f32.gmra.mrb[48].mxu0 %v749_v52  ;;  %v957_v52 = vld [vmem:[#allocation5 + $0x4c0] sm:$0xff] }
 0x214   : > { %1243 = vmatprep.mubr.f32.mxu0 %v757_v53  ;;  %v959_v53 = vld [vmem:[#allocation5 + $0x4d0] sm:$0xff] }
 0x217   : > { %1244 = vmatmul.mubr.f32.gmra.mrb[50].mxu0 %v756_v54  ;;  %v962_v54 = vld [vmem:[#allocation5 + $0x4e8] sm:$0xff] }
 0x218   : > { %1249 = vmatprep.mubr.f32.mxu0 %v764_v55  ;;  %v964_v55 = vld [vmem:[#allocation5 + $0x4f8] sm:$0xff] }
 0x21b   : > { %1250 = vmatmul.mubr.f32.gmra.mrb[52].mxu0 %v763_v56  ;;  %v625_v56 = vld [vmem:[%s10758_s18 + $0x160] sm:$0xff] }
 0x21c   : > { %1255 = vmatprep.mubr.f32.mxu0 %v771_v57  ;;  %v8373_v57 = vpack.c.bf16 %v959_v53, %v957_v52  ;;  %v989_v52 = vld [vmem:[#allocation5 + $0x5c0] sm:$0xff]  ;;  %v991_v53 = vld [vmem:[#allocation5 + $0x5d0] sm:$0xff] }
 0x21f   : > { %1256 = vmatmul.mubr.f32.gmra.mrb[54].mxu0 %v770_v58  ;;  %v633_v58 = vld [vmem:[%s10758_s18 + $0x1a0] sm:$0xff] }
 0x220   : > { %1261 = vmatprep.mubr.f32.mxu0 %v778_v59  ;;  %v8375_v59 = vpack.c.bf16 %v964_v55, %v962_v54  ;;  %v994_v54 = vld [vmem:[#allocation5 + $0x5e8] sm:$0xff]  ;;  %v996_v55 = vld [vmem:[#allocation5 + $0x5f8] sm:$0xff] }
 0x223   : > { %1262 = vmatmul.mubr.f32.gmra.mrb[56].mxu0 %v777_v60  ;;  %v961_v60 = vld [vmem:[#allocation5 + $0x4e0] sm:$0xff] }
 0x224   : > { %1267 = vmatprep.mubr.f32.mxu0 %v785_v61  ;;  %v963_v61 = vld [vmem:[#allocation5 + $0x4f0] sm:$0xff] }
 0x227   : > { %1268 = vmatmul.mubr.f32.gmra.mrb[58].mxu0 %v784_v62  ;;  %v966_v62 = vld [vmem:[#allocation5 + $0x508] sm:$0xff] }
 0x228   : > { %1273 = vmatprep.mubr.f32.mxu0 %v792_v63  ;;  %v968_v63 = vld [vmem:[#allocation5 + $0x518] sm:$0xff] }
 0x22b   : > { %1274 = vmatmul.mubr.f32.gmra.mrb[60].mxu0 %v791_v0  ;;  %v632_v0 = vld [vmem:[%s10758_s18 + $0x198] sm:$0xff] }
 0x22c   : > { %1279 = vmatprep.mubr.f32.mxu0 %v799_v1  ;;  %v8377_v1 = vpack.c.bf16 %v963_v61, %v961_v60  ;;  %v993_v60 = vld [vmem:[#allocation5 + $0x5e0] sm:$0xff]  ;;  %v995_v61 = vld [vmem:[#allocation5 + $0x5f0] sm:$0xff] }
 0x22f   : > { %1280 = vmatmul.mubr.f32.gmra.mrb[62].mxu0 %v798_v2  ;;  %v640_v2 = vld [vmem:[%s10758_s18 + $0x1d8] sm:$0xff] }
 0x230   : > { %1350 = vmatprep.mubr.f32.mxu0 %v584_v3  ;;  %v8379_v3 = vpack.c.bf16 %v968_v63, %v966_v62  ;;  %v998_v62 = vld [vmem:[#allocation5 + $0x608] sm:$0xff]  ;;  %v1000_v63 = vld [vmem:[#allocation5 + $0x618] sm:$0xff] }
 0x233   : > { %1351 = vmatmul.mubr.f32.vlgmr.msra.gmra.mrb[0].mxu0 %v583_v8  ;;  %v639_v8 = vld [vmem:[%s10758_s18 + $0x1d0] sm:$0xff] }
 0x234   : > { %8350 = vmatpush1.bf16.msra.mxu0 %v8349_v9  ;;  %1356 = vmatprep.mubr.f32.mxu0 %v591_v10  ;;  %v8381_v9 = vpack.c.bf16 %v967_v5, %v965_v4  ;;  %v647_v10 = vld [vmem:[%s10758_s18 + $0x210] sm:$0xff] }
 0x235   : > { %8352 = vmatprep.subr.bf16.mxu0 %v8351_v11  ;;  %v8383_v11 = vpack.c.bf16 %v972_v7, %v970_v6  ;;  %v695_v4 = vld [vmem:[%s10758_s18 + $0x390] sm:$0xff]  ;;  %v702_v6 = vld [vmem:[%s10758_s18 + $0x3c8] sm:$0xff] }
 0x236   : > { %v703_v5 = vld [vmem:[%s10758_s18 + $0x3d0] sm:$0xff]  ;;  %v710_v7 = vld [vmem:[%s10758_s18 + $0x408] sm:$0xff] }
 0x237   : > { %1357 = vmatmul.mubr.f32.gmra.mrb[2].mxu0 %v590_v16  ;;  %v646_v16 = vld [vmem:[%s10758_s18 + $0x208] sm:$0xff] }
 0x238   : > { %1362 = vmatprep.mubr.f32.mxu0 %v598_v18  ;;  %8354 = vmatpush1.bf16.msra.mxu0 %v8353_v17  ;;  %v8385_v17 = vpack.c.bf16 %v971_v13, %v969_v12  ;;  %v654_v18 = vld [vmem:[%s10758_s18 + $0x248] sm:$0xff]  ;;  %v723_v12 = vld [vmem:[%s10758_s18 + $0x470] sm:$0xff] }
 0x239   : > { %8356 = vmatprep.subr.bf16.mxu0 %v8355_v19  ;;  %v8387_v19 = vpack.c.bf16 %v976_v15, %v974_v14  ;;  %v731_v13 = vld [vmem:[%s10758_s18 + $0x4b0] sm:$0xff]  ;;  %v730_v14 = vld [vmem:[%s10758_s18 + $0x4a8] sm:$0xff] }
 0x23a   : > { %v738_v15 = vld [vmem:[%s10758_s18 + $0x4e8] sm:$0xff] }
 0x23b   : > { %1363 = vmatmul.mubr.f32.gmra.mrb[4].mxu0 %v597_v24  ;;  %v653_v24 = vld [vmem:[%s10758_s18 + $0x240] sm:$0xff] }
 0x23c   : > { %1368 = vmatprep.mubr.f32.mxu0 %v605_v26  ;;  %8358 = vmatpush1.bf16.msra.mxu0 %v8357_v25  ;;  %v8389_v25 = vpack.c.bf16 %v975_v21, %v973_v20  ;;  %v661_v26 = vld [vmem:[%s10758_s18 + $0x280] sm:$0xff]  ;;  %v751_v20 = vld [vmem:[%s10758_s18 + $0x550] sm:$0xff] }
 0x23d   : > { %8360 = vmatprep.subr.bf16.mxu0 %v8359_v27  ;;  %v8391_v27 = vpack.c.bf16 %v980_v23, %v978_v22  ;;  %v759_v21 = vld [vmem:[%s10758_s18 + $0x590] sm:$0xff]  ;;  %v758_v22 = vld [vmem:[%s10758_s18 + $0x588] sm:$0xff] }
 0x23e   : > { %v766_v23 = vld [vmem:[%s10758_s18 + $0x5c8] sm:$0xff] }
 0x23f   : > { %1369 = vmatmul.mubr.f32.gmra.mrb[6].mxu0 %v604_v32  ;;  %v660_v32 = vld [vmem:[%s10758_s18 + $0x278] sm:$0xff] }
 0x240   : > { %1374 = vmatprep.mubr.f32.mxu0 %v612_v34  ;;  %8362 = vmatpush1.bf16.msra.mxu0 %v8361_v33  ;;  %v8393_v33 = vpack.c.bf16 %v979_v29, %v977_v28  ;;  %v668_v34 = vld [vmem:[%s10758_s18 + $0x2b8] sm:$0xff]  ;;  %v779_v28 = vld [vmem:[%s10758_s18 + $0x630] sm:$0xff] }
 0x241   : > { %8364 = vmatprep.subr.bf16.mxu0 %v8363_v35  ;;  %v8395_v35 = vpack.c.bf16 %v984_v31, %v982_v30  ;;  %v787_v29 = vld [vmem:[%s10758_s18 + $0x670] sm:$0xff]  ;;  %v786_v30 = vld [vmem:[%s10758_s18 + $0x668] sm:$0xff] }
 0x242   : > { %v794_v31 = vld [vmem:[%s10758_s18 + $0x6a8] sm:$0xff] }
 0x243   : > { %1375 = vmatmul.mubr.f32.gmra.mrb[8].mxu0 %v611_v40  ;;  %v667_v40 = vld [vmem:[%s10758_s18 + $0x2b0] sm:$0xff] }
 0x244   : > { %1380 = vmatprep.mubr.f32.mxu0 %v619_v42  ;;  %8366 = vmatpush1.bf16.msra.mxu0 %v8365_v41  ;;  %v8397_v41 = vpack.c.bf16 %v983_v37, %v981_v36  ;;  %v675_v42 = vld [vmem:[%s10758_s18 + $0x2f0] sm:$0xff]  ;;  %v997_v36 = vld [vmem:[#allocation5 + $0x600] sm:$0xff] }
 0x245   : > { %8368 = vmatprep.subr.bf16.mxu0 %v8367_v43  ;;  %v8399_v43 = vpack.c.bf16 %v988_v39, %v986_v38  ;;  %v999_v37 = vld [vmem:[#allocation5 + $0x610] sm:$0xff]  ;;  %v1002_v38 = vld [vmem:[#allocation5 + $0x628] sm:$0xff]  ;;  %v1004_v39 = vld [vmem:[#allocation5 + $0x638] sm:$0xff] }
 0x247   : > { %1381 = vmatmul.mubr.f32.gmra.mrb[10].mxu0 %v618_v48  ;;  %v674_v48 = vld [vmem:[%s10758_s18 + $0x2e8] sm:$0xff] }
 0x248   : > { %1386 = vmatprep.mubr.f32.mxu0 %v626_v50  ;;  %8370 = vmatpush1.bf16.msra.mxu0 %v8369_v49  ;;  %v8401_v49 = vpack.c.bf16 %v987_v45, %v985_v44  ;;  %v682_v50 = vld [vmem:[%s10758_s18 + $0x328] sm:$0xff]  ;;  %v1001_v44 = vld [vmem:[#allocation5 + $0x620] sm:$0xff]  ;;  %v1003_v45 = vld [vmem:[#allocation5 + $0x630] sm:$0xff] }
 0x249   : > { %8372 = vmatprep.subr.bf16.mxu0 %v8371_v51  ;;  %v8403_v51 = vpack.c.bf16 %v992_v47, %v990_v46  ;;  %v1006_v46 = vld [vmem:[#allocation5 + $0x648] sm:$0xff]  ;;  %v1008_v47 = vld [vmem:[#allocation5 + $0x658] sm:$0xff] }
 0x24b   : > { %1387 = vmatmul.mubr.f32.gmra.mrb[12].mxu0 %v625_v56  ;;  %v681_v56 = vld [vmem:[%s10758_s18 + $0x320] sm:$0xff] }
 0x24c   : > { %1392 = vmatprep.mubr.f32.mxu0 %v633_v58  ;;  %8374 = vmatpush1.bf16.msra.mxu0 %v8373_v57  ;;  %v8405_v57 = vpack.c.bf16 %v991_v53, %v989_v52  ;;  %v689_v58 = vld [vmem:[%s10758_s18 + $0x360] sm:$0xff]  ;;  %v1007_v53 = vld [vmem:[#allocation5 + $0x650] sm:$0xff] }
 0x24d   : > { %8376 = vmatprep.subr.bf16.mxu0 %v8375_v59  ;;  %v8407_v59 = vpack.c.bf16 %v996_v55, %v994_v54  ;;  %v1005_v52 = vld [vmem:[#allocation5 + $0x640] sm:$0xff]  ;;  %v1010_v54 = vld [vmem:[#allocation5 + $0x668] sm:$0xff]  ;;  %v1012_v55 = vld [vmem:[#allocation5 + $0x678] sm:$0xff] }
 0x24f   : > { %1393 = vmatmul.mubr.f32.gmra.mrb[14].mxu0 %v632_v0  ;;  %v688_v0 = vld [vmem:[%s10758_s18 + $0x358] sm:$0xff] }
 0x250   : > { %1398 = vmatprep.mubr.f32.mxu0 %v640_v2  ;;  %8378 = vmatpush1.bf16.msra.mxu0 %v8377_v1  ;;  %v8409_v1 = vpack.c.bf16 %v995_v61, %v993_v60  ;;  %v696_v2 = vld [vmem:[%s10758_s18 + $0x398] sm:$0xff]  ;;  %v1009_v60 = vld [vmem:[#allocation5 + $0x660] sm:$0xff]  ;;  %v1011_v61 = vld [vmem:[#allocation5 + $0x670] sm:$0xff] }
 0x251   : > { %8380 = vmatprep.subr.bf16.mxu0 %v8379_v3  ;;  %v8411_v3 = vpack.c.bf16 %v1000_v63, %v998_v62  ;;  %v1014_v62 = vld [vmem:[#allocation5 + $0x688] sm:$0xff]  ;;  %v1016_v63 = vld [vmem:[#allocation5 + $0x698] sm:$0xff] }
 0x253   : > { %1399 = vmatmul.mubr.f32.gmra.mrb[16].mxu0 %v639_v8  ;;  %v709_v8 = vld [vmem:[%s10758_s18 + $0x400] sm:$0xff] }
 0x254   : > { %1404 = vmatprep.mubr.f32.mxu0 %v647_v10  ;;  %8382 = vmatpush1.bf16.msra.mxu0 %v8381_v9  ;;  %v717_v9 = vld [vmem:[%s10758_s18 + $0x440] sm:$0xff]  ;;  %v716_v10 = vld [vmem:[%s10758_s18 + $0x438] sm:$0xff] }
 0x255   : > { %8384 = vmatprep.subr.bf16.mxu0 %v8383_v11  ;;  %v724_v11 = vld [vmem:[%s10758_s18 + $0x478] sm:$0xff] }
 0x257   : > { %1405 = vmatmul.mubr.f32.gmra.mrb[18].mxu0 %v646_v16  ;;  %v737_v16 = vld [vmem:[%s10758_s18 + $0x4e0] sm:$0xff] }
 0x258   : > { %1410 = vmatprep.mubr.f32.mxu0 %v654_v18  ;;  %8386 = vmatpush1.bf16.msra.mxu0 %v8385_v17  ;;  %v745_v17 = vld [vmem:[%s10758_s18 + $0x520] sm:$0xff]  ;;  %v744_v18 = vld [vmem:[%s10758_s18 + $0x518] sm:$0xff] }
 0x259   : > { %8388 = vmatprep.subr.bf16.mxu0 %v8387_v19  ;;  %v752_v19 = vld [vmem:[%s10758_s18 + $0x558] sm:$0xff] }
 0x25b   : > { %1411 = vmatmul.mubr.f32.gmra.mrb[20].mxu0 %v653_v24  ;;  %v765_v24 = vld [vmem:[%s10758_s18 + $0x5c0] sm:$0xff] }
 0x25c   : > { %1416 = vmatprep.mubr.f32.mxu0 %v661_v26  ;;  %8390 = vmatpush1.bf16.msra.mxu0 %v8389_v25  ;;  %v773_v25 = vld [vmem:[%s10758_s18 + $0x600] sm:$0xff]  ;;  %v772_v26 = vld [vmem:[%s10758_s18 + $0x5f8] sm:$0xff] }
 0x25d   : > { %8392 = vmatprep.subr.bf16.mxu0 %v8391_v27  ;;  %v780_v27 = vld [vmem:[%s10758_s18 + $0x638] sm:$0xff] }
 0x25f   : > { %1417 = vmatmul.mubr.f32.gmra.mrb[22].mxu0 %v660_v32  ;;  %v793_v32 = vld [vmem:[%s10758_s18 + $0x6a0] sm:$0xff] }
 0x260   : > { %1422 = vmatprep.mubr.f32.mxu0 %v668_v34  ;;  %8394 = vmatpush1.bf16.msra.mxu0 %v8393_v33  ;;  %v801_v33 = vld [vmem:[%s10758_s18 + $0x6e0] sm:$0xff]  ;;  %v800_v34 = vld [vmem:[%s10758_s18 + $0x6d8] sm:$0xff] }
 0x261   : > { %8396 = vmatprep.subr.bf16.mxu0 %v8395_v35  ;;  %v586_v35 = vld [vmem:[%s10758_s18 + $0x28] sm:$0xff] }
 0x263   : > { %1423 = vmatmul.mubr.f32.gmra.mrb[24].mxu0 %v667_v40  ;;  %v585_v40 = vld [vmem:[%s10758_s18 + $0x20] sm:$0xff] }
 0x264   : > { %1428 = vmatprep.mubr.f32.mxu0 %v675_v42  ;;  %8398 = vmatpush1.bf16.msra.mxu0 %v8397_v41  ;;  %v8413_v41 = vpack.c.bf16 %v999_v37, %v997_v36  ;;  %v593_v42 = vld [vmem:[%s10758_s18 + $0x60] sm:$0xff]  ;;  %v656_v36 = vld [vmem:[%s10758_s18 + $0x258] sm:$0xff]  ;;  %v655_v37 = vld [vmem:[%s10758_s18 + $0x250] sm:$0xff] }
 0x265   : > { %8400 = vmatprep.subr.bf16.mxu0 %v8399_v43  ;;  %v8415_v43 = vpack.c.bf16 %v1004_v39, %v1002_v38  ;;  %v663_v38 = vld [vmem:[%s10758_s18 + $0x290] sm:$0xff]  ;;  %v662_v39 = vld [vmem:[%s10758_s18 + $0x288] sm:$0xff] }
 0x267   : > { %1429 = vmatmul.mubr.f32.gmra.mrb[26].mxu0 %v674_v48  ;;  %v592_v48 = vld [vmem:[%s10758_s18 + $0x58] sm:$0xff] }
 0x268   : > { %1434 = vmatprep.mubr.f32.mxu0 %v682_v50  ;;  %8402 = vmatpush1.bf16.msra.mxu0 %v8401_v49  ;;  %v8417_v49 = vpack.c.bf16 %v1003_v45, %v1001_v44  ;;  %v600_v50 = vld [vmem:[%s10758_s18 + $0x98] sm:$0xff]  ;;  %v683_v45 = vld [vmem:[%s10758_s18 + $0x330] sm:$0xff] }
 0x269   : > { %8404 = vmatprep.subr.bf16.mxu0 %v8403_v51  ;;  %v8419_v51 = vpack.c.bf16 %v1008_v47, %v1006_v46  ;;  %v684_v44 = vld [vmem:[%s10758_s18 + $0x338] sm:$0xff]  ;;  %v691_v46 = vld [vmem:[%s10758_s18 + $0x370] sm:$0xff]  ;;  %v690_v47 = vld [vmem:[%s10758_s18 + $0x368] sm:$0xff] }
 0x26b   : > { %1435 = vmatmul.mubr.f32.gmra.mrb[28].mxu0 %v681_v56  ;;  %v599_v56 = vld [vmem:[%s10758_s18 + $0x90] sm:$0xff] }
 0x26c   : > { %1440 = vmatprep.mubr.f32.mxu0 %v689_v58  ;;  %8406 = vmatpush1.bf16.msra.mxu0 %v8405_v57  ;;  %v8421_v57 = vpack.c.bf16 %v1007_v53, %v1005_v52  ;;  %v607_v58 = vld [vmem:[%s10758_s18 + $0xd0] sm:$0xff]  ;;  %v712_v52 = vld [vmem:[%s10758_s18 + $0x418] sm:$0xff] }
 0x26d   : > { %8408 = vmatprep.subr.bf16.mxu0 %v8407_v59  ;;  %v8423_v59 = vpack.c.bf16 %v1012_v55, %v1010_v54  ;;  %v711_v53 = vld [vmem:[%s10758_s18 + $0x410] sm:$0xff]  ;;  %v718_v55 = vld [vmem:[%s10758_s18 + $0x448] sm:$0xff] }
 0x26e   : > { %v719_v54 = vld [vmem:[%s10758_s18 + $0x450] sm:$0xff] }
 0x26f   : > { %1441 = vmatmul.mubr.f32.gmra.mrb[30].mxu0 %v688_v0  ;;  %v606_v0 = vld [vmem:[%s10758_s18 + $0xc8] sm:$0xff] }
 0x270   : > { %1446 = vmatprep.mubr.f32.mxu0 %v696_v2  ;;  %8410 = vmatpush1.bf16.msra.mxu0 %v8409_v1  ;;  %v8425_v1 = vpack.c.bf16 %v1011_v61, %v1009_v60  ;;  %v614_v2 = vld [vmem:[%s10758_s18 + $0x108] sm:$0xff]  ;;  %v740_v60 = vld [vmem:[%s10758_s18 + $0x4f8] sm:$0xff]  ;;  %v739_v61 = vld [vmem:[%s10758_s18 + $0x4f0] sm:$0xff] }
 0x271   : > { %8412 = vmatprep.subr.bf16.mxu0 %v8411_v3  ;;  %v8427_v3 = vpack.c.bf16 %v1016_v63, %v1014_v62  ;;  %v747_v62 = vld [vmem:[%s10758_s18 + $0x530] sm:$0xff]  ;;  %v746_v63 = vld [vmem:[%s10758_s18 + $0x528] sm:$0xff] }
 0x273   : > { %1447 = vmatmul.mubr.f32.gmra.mrb[32].mxu0 %v695_v4  ;;  %v1013_v4 = vld [vmem:[#allocation5 + $0x680] sm:$0xff] }
 0x274   : > { %1452 = vmatprep.mubr.f32.mxu0 %v703_v5  ;;  %v1015_v5 = vld [vmem:[#allocation5 + $0x690] sm:$0xff] }
 0x277   : > { %1453 = vmatmul.mubr.f32.gmra.mrb[34].mxu0 %v702_v6  ;;  %v1018_v6 = vld [vmem:[#allocation5 + $0x6a8] sm:$0xff] }
 0x278   : > { %1458 = vmatprep.mubr.f32.mxu0 %v710_v7  ;;  %v1020_v7 = vld [vmem:[#allocation5 + $0x6b8] sm:$0xff] }
 0x27b   : > { %1459 = vmatmul.mubr.f32.gmra.mrb[36].mxu0 %v709_v8  ;;  %v613_v8 = vld [vmem:[%s10758_s18 + $0x100] sm:$0xff] }
 0x27c   : > { %1464 = vmatprep.mubr.f32.mxu0 %v717_v9  ;;  %v8429_v9 = vpack.c.bf16 %v1015_v5, %v1013_v4  ;;  %v768_v4 = vld [vmem:[%s10758_s18 + $0x5d8] sm:$0xff]  ;;  %v767_v5 = vld [vmem:[%s10758_s18 + $0x5d0] sm:$0xff] }
 0x27f   : > { %1465 = vmatmul.mubr.f32.gmra.mrb[38].mxu0 %v716_v10  ;;  %v621_v10 = vld [vmem:[%s10758_s18 + $0x140] sm:$0xff] }
 0x280   : > { %1470 = vmatprep.mubr.f32.mxu0 %v724_v11  ;;  %v8431_v11 = vpack.c.bf16 %v1020_v7, %v1018_v6  ;;  %v775_v6 = vld [vmem:[%s10758_s18 + $0x610] sm:$0xff]  ;;  %v774_v7 = vld [vmem:[%s10758_s18 + $0x608] sm:$0xff] }
 0x283   : > { %1471 = vmatmul.mubr.f32.gmra.mrb[40].mxu0 %v723_v12  ;;  %v1017_v12 = vld [vmem:[#allocation5 + $0x6a0] sm:$0xff] }
 0x284   : > { %1476 = vmatprep.mubr.f32.mxu0 %v731_v13  ;;  %v1019_v13 = vld [vmem:[#allocation5 + $0x6b0] sm:$0xff] }
 0x287   : > { %1477 = vmatmul.mubr.f32.gmra.mrb[42].mxu0 %v730_v14  ;;  %v1022_v14 = vld [vmem:[#allocation5 + $0x6c8] sm:$0xff] }
 0x288   : > { %1482 = vmatprep.mubr.f32.mxu0 %v738_v15  ;;  %v1024_v15 = vld [vmem:[#allocation5 + $0x6d8] sm:$0xff] }
 0x28b   : > { %1483 = vmatmul.mubr.f32.gmra.mrb[44].mxu0 %v737_v16  ;;  %v620_v16 = vld [vmem:[%s10758_s18 + $0x138] sm:$0xff] }
 0x28c   : > { %1488 = vmatprep.mubr.f32.mxu0 %v745_v17  ;;  %v8433_v17 = vpack.c.bf16 %v1019_v13, %v1017_v12  ;;  %v796_v12 = vld [vmem:[%s10758_s18 + $0x6b8] sm:$0xff]  ;;  %v795_v13 = vld [vmem:[%s10758_s18 + $0x6b0] sm:$0xff] }
 0x28f   : > { %1489 = vmatmul.mubr.f32.gmra.mrb[46].mxu0 %v744_v18  ;;  %v628_v18 = vld [vmem:[%s10758_s18 + $0x178] sm:$0xff] }
 0x290   : > { %1494 = vmatprep.mubr.f32.mxu0 %v752_v19  ;;  %v8435_v19 = vpack.c.bf16 %v1024_v15, %v1022_v14  ;;  %v803_v14 = vld [vmem:[%s10758_s18 + $0x6f0] sm:$0xff]  ;;  %v802_v15 = vld [vmem:[%s10758_s18 + $0x6e8] sm:$0xff] }
 0x293   : > { %1495 = vmatmul.mubr.f32.gmra.mrb[48].mxu0 %v751_v20  ;;  %v1021_v20 = vld [vmem:[#allocation5 + $0x6c0] sm:$0xff] }
 0x294   : > { %1500 = vmatprep.mubr.f32.mxu0 %v759_v21  ;;  %v1023_v21 = vld [vmem:[#allocation5 + $0x6d0] sm:$0xff] }
 0x297   : > { %1501 = vmatmul.mubr.f32.gmra.mrb[50].mxu0 %v758_v22  ;;  %v1026_v22 = vld [vmem:[#allocation5 + $0x6e8] sm:$0xff] }
 0x298   : > { %1506 = vmatprep.mubr.f32.mxu0 %v766_v23  ;;  %v1028_v23 = vld [vmem:[#allocation5 + $0x6f8] sm:$0xff] }
 0x29b   : > { %1507 = vmatmul.mubr.f32.gmra.mrb[52].mxu0 %v765_v24  ;;  %v627_v24 = vld [vmem:[%s10758_s18 + $0x170] sm:$0xff] }
 0x29c   : > { %1512 = vmatprep.mubr.f32.mxu0 %v773_v25  ;;  %v8437_v25 = vpack.c.bf16 %v1023_v21, %v1021_v20  ;;  %v587_v20 = vld [vmem:[%s10758_s18 + $0x30] sm:$0xff]  ;;  %v14033_v21 = vmov 0.0|0.0  }
 0x29d   : > { %8443 = vmatprep.subr.bf16.mxu1 %v14033_v21 }
 0x29f   : > { %1513 = vmatmul.mubr.f32.gmra.mrb[54].mxu0 %v772_v26  ;;  %v635_v26 = vld [vmem:[%s10758_s18 + $0x1b0] sm:$0xff] }
 0x2a0   : > { %1518 = vmatprep.mubr.f32.mxu0 %v780_v27  ;;  %v8439_v27 = vpack.c.bf16 %v1028_v23, %v1026_v22  ;;  %v3274_v23 = vld [vmem:[#allocation10 + $0x18] sm:$0xff] }
 0x2a3   : > { %1519 = vmatmul.mubr.f32.gmra.mrb[56].mxu0 %v779_v28  ;;  %v1025_v28 = vld [vmem:[#allocation5 + $0x6e0] sm:$0xff] }
 0x2a4   : > { %1524 = vmatprep.mubr.f32.mxu0 %v787_v29  ;;  %v1027_v29 = vld [vmem:[#allocation5 + $0x6f0] sm:$0xff] }
 0x2a7   : > { %1525 = vmatmul.mubr.f32.gmra.mrb[58].mxu0 %v786_v30  ;;  %v634_v30 = vld [vmem:[%s10758_s18 + $0x1a8] sm:$0xff] }
 0x2a8   : > { %1530 = vmatprep.mubr.f32.mxu0 %v794_v31  ;;  %v8441_v31 = vpack.c.bf16 %v1027_v29, %v1025_v28  ;;  %v3277_v29 = vld [vmem:[#allocation10 + $0x30] sm:$0xff] }
 0x2ab   : > { %1531 = vmatmul.mubr.f32.gmra.mrb[60].mxu0 %v793_v32  ;;  %v642_v32 = vld [vmem:[%s10758_s18 + $0x1e8] sm:$0xff] }
 0x2ac   : > { %1536 = vmatprep.mubr.f32.mxu0 %v801_v33  ;;  %v641_v33 = vld [vmem:[%s10758_s18 + $0x1e0] sm:$0xff] }
 0x2af   : > { %1537 = vmatmul.mubr.f32.gmra.mrb[62].mxu0 %v800_v34  ;;  %v649_v34 = vld [vmem:[%s10758_s18 + $0x220] sm:$0xff] }
 0x2b0   : > { %1607 = vmatprep.mubr.f32.mxu0 %v586_v35  ;;  %v648_v35 = vld [vmem:[%s10758_s18 + $0x218] sm:$0xff] }
 0x2b3   : > { %1608 = vmatmul.mubr.f32.vlgmr.msra.gmra.mrb[0].mxu0 %v585_v40  ;;  %v670_v40 = vld [vmem:[%s10758_s18 + $0x2c8] sm:$0xff] }
 0x2b4   : > { %8414 = vmatpush1.bf16.msra.mxu0 %v8413_v41  ;;  %1613 = vmatprep.mubr.f32.mxu0 %v593_v42  ;;  %v669_v41 = vld [vmem:[%s10758_s18 + $0x2c0] sm:$0xff] }
 0x2b5   : > { %8416 = vmatprep.subr.bf16.mxu0 %v8415_v43  ;;  %v677_v42 = vld [vmem:[%s10758_s18 + $0x300] sm:$0xff]  ;;  %v676_v43 = vld [vmem:[%s10758_s18 + $0x2f8] sm:$0xff] }
 0x2b7   : > { %1614 = vmatmul.mubr.f32.gmra.mrb[2].mxu0 %v592_v48  ;;  %v698_v48 = vld [vmem:[%s10758_s18 + $0x3a8] sm:$0xff] }
 0x2b8   : > { %1619 = vmatprep.mubr.f32.mxu0 %v600_v50  ;;  %8418 = vmatpush1.bf16.msra.mxu0 %v8417_v49  ;;  %v697_v49 = vld [vmem:[%s10758_s18 + $0x3a0] sm:$0xff] }
 0x2b9   : > { %8420 = vmatprep.subr.bf16.mxu0 %v8419_v51  ;;  %v705_v50 = vld [vmem:[%s10758_s18 + $0x3e0] sm:$0xff]  ;;  %v704_v51 = vld [vmem:[%s10758_s18 + $0x3d8] sm:$0xff] }
 0x2bb   : > { %1620 = vmatmul.mubr.f32.gmra.mrb[4].mxu0 %v599_v56  ;;  %v726_v56 = vld [vmem:[%s10758_s18 + $0x488] sm:$0xff] }
 0x2bc   : > { %1625 = vmatprep.mubr.f32.mxu0 %v607_v58  ;;  %8422 = vmatpush1.bf16.msra.mxu0 %v8421_v57  ;;  %v725_v57 = vld [vmem:[%s10758_s18 + $0x480] sm:$0xff] }
 0x2bd   : > { %8424 = vmatprep.subr.bf16.mxu0 %v8423_v59  ;;  %v733_v58 = vld [vmem:[%s10758_s18 + $0x4c0] sm:$0xff]  ;;  %v732_v59 = vld [vmem:[%s10758_s18 + $0x4b8] sm:$0xff] }
 0x2bf   : > { %1626 = vmatmul.mubr.f32.gmra.mrb[6].mxu0 %v606_v0  ;;  %v754_v0 = vld [vmem:[%s10758_s18 + $0x568] sm:$0xff] }
 0x2c0   : > { %1631 = vmatprep.mubr.f32.mxu0 %v614_v2  ;;  %8426 = vmatpush1.bf16.msra.mxu0 %v8425_v1  ;;  %v753_v1 = vld [vmem:[%s10758_s18 + $0x560] sm:$0xff] }
 0x2c1   : > { %8428 = vmatprep.subr.bf16.mxu0 %v8427_v3  ;;  %v761_v2 = vld [vmem:[%s10758_s18 + $0x5a0] sm:$0xff]  ;;  %v760_v3 = vld [vmem:[%s10758_s18 + $0x598] sm:$0xff] }
 0x2c3   : > { %1632 = vmatmul.mubr.f32.gmra.mrb[8].mxu0 %v613_v8  ;;  %v782_v8 = vld [vmem:[%s10758_s18 + $0x648] sm:$0xff] }
 0x2c4   : > { %1637 = vmatprep.mubr.f32.mxu0 %v621_v10  ;;  %8430 = vmatpush1.bf16.msra.mxu0 %v8429_v9  ;;  %v781_v9 = vld [vmem:[%s10758_s18 + $0x640] sm:$0xff] }
 0x2c5   : > { %8432 = vmatprep.subr.bf16.mxu0 %v8431_v11  ;;  %v789_v10 = vld [vmem:[%s10758_s18 + $0x680] sm:$0xff]  ;;  %v788_v11 = vld [vmem:[%s10758_s18 + $0x678] sm:$0xff] }
 0x2c7   : > { %1638 = vmatmul.mubr.f32.gmra.mrb[10].mxu0 %v620_v16  ;;  %v3271_v16 = vld [vmem:[#allocation10] sm:$0xff] }
 0x2c8   : > { %1643 = vmatprep.mubr.f32.mxu0 %v628_v18  ;;  %8434 = vmatpush1.bf16.msra.mxu0 %v8433_v17  ;;  %v3272_v17 = vld [vmem:[#allocation10 + $0x8] sm:$0xff]  ;;  %v3273_v18 = vld [vmem:[#allocation10 + $0x10] sm:$0xff] }
 0x2c9   : > { %8436 = vmatprep.subr.bf16.mxu0 %v8435_v19  ;;  %v14030_v19 = vmov 0.0   ;;  %v8444_v22 = vpack.c.bf16 %v3272_v17, %v3271_v16  ;;  %v3298_v16 = vld [vmem:[#allocation10 + $0xd8] sm:$0xff] }
 0x2ca   : > { %v741_v17 = vld [vmem:[%s10758_s18 + $0x500] sm:$0xff] }
 0x2cb   : > { %1644 = vmatmul.mubr.f32.gmra.mrb[12].mxu0 %v627_v24  ;;  %8445 = vmatpush1.bf16.msra.mxu1 %v8444_v22  ;;  %v8447_v24 = vpack.c.bf16 %v3274_v23, %v3273_v18  ;;  %v3300_v22 = vld [vmem:[#allocation10 + $0xe8] sm:$0xff]  ;;  %v748_v23 = vld [vmem:[%s10758_s18 + $0x538] sm:$0xff] }
 0x2cc   : > { %1649 = vmatprep.mubr.f32.mxu0 %v635_v26  ;;  %8438 = vmatpush1.bf16.msra.mxu0 %v8437_v25  ;;  %v3275_v25 = vld [vmem:[#allocation10 + $0x20] sm:$0xff]  ;;  %v3276_v26 = vld [vmem:[#allocation10 + $0x28] sm:$0xff] }
 0x2cd   : > { %8440 = vmatprep.subr.bf16.mxu0 %v8439_v27  ;;  %8446 = vmatprep.subr.bf16.mxu1 %v14033_v21  ;;  %v594_v27 = vld [vmem:[%s10758_s18 + $0x68] sm:$0xff]  ;;  %v8450_v28 = vpack.c.bf16 %v3276_v26, %v3275_v25  ;;  %v3301_v25 = vld [vmem:[#allocation10 + $0xf0] sm:$0xff]  ;;  %v3302_v26 = vld [vmem:[#allocation10 + $0xf8] sm:$0xff] }
 0x2cf   : > { %1650 = vmatmul.mubr.f32.gmra.mrb[14].mxu0 %v634_v30  ;;  %8448 = vmatpush1.bf16.msra.mxu1 %v8447_v24  ;;  %v3278_v30 = vld [vmem:[#allocation10 + $0x38] sm:$0xff] }
 0x2d0   : > { %1655 = vmatprep.mubr.f32.mxu0 %v642_v32  ;;  %8442 = vmatpush1.bf16.msra.mxu0 %v8441_v31  ;;  %v601_v31 = vld [vmem:[%s10758_s18 + $0xa0] sm:$0xff]  ;;  %v8453_v32 = vpack.c.bf16 %v3278_v30, %v3277_v29  ;;  %v762_v29 = vld [vmem:[%s10758_s18 + $0x5a8] sm:$0xff] }
 0x2d1   : > { %8449 = vmatprep.subr.bf16.mxu1 %v14033_v21  ;;  %v769_v30 = vld [vmem:[%s10758_s18 + $0x5e0] sm:$0xff] }
 0x2d3   : > { %1656 = vmatmul.mubr.f32.gmra.mrb[16].mxu0 %v641_v33  ;;  %8451 = vmatpush1.bf16.msra.mxu1 %v8450_v28  ;;  %v3279_v33 = vld [vmem:[#allocation10 + $0x40] sm:$0xff]  ;;  %v8489_v28 = vpack.c.bf16 %v3302_v26, %v3301_v25 }
 0x2d4   : > { %1661 = vmatprep.mubr.f32.mxu0 %v649_v34  ;;  %8452 = vmatprep.subr.bf16.mxu1 %v14033_v21  ;;  %v3280_v34 = vld [vmem:[#allocation10 + $0x48] sm:$0xff] }
 0x2d7   : > { %1662 = vmatmul.mubr.f32.gmra.mrb[18].mxu0 %v648_v35  ;;  %v608_v35 = vld [vmem:[%s10758_s18 + $0xd8] sm:$0xff]  ;;  %8454 = vmatpush1.bf16.msra.mxu1 %v8453_v32  ;;  %v783_v32 = vld [vmem:[%s10758_s18 + $0x650] sm:$0xff] }
 0x2d8   : > { %1667 = vmatprep.mubr.f32.mxu0 %v656_v36  ;;  %v8456_v36 = vpack.c.bf16 %v3280_v34, %v3279_v33  ;;  %8455 = vmatprep.subr.bf16.mxu1 %v14033_v21  ;;  %v790_v33 = vld [vmem:[%s10758_s18 + $0x688] sm:$0xff]  ;;  %v797_v34 = vld [vmem:[%s10758_s18 + $0x6c0] sm:$0xff] }
 0x2db   : > { %1668 = vmatmul.mubr.f32.gmra.mrb[20].mxu0 %v655_v37  ;;  %v3281_v37 = vld [vmem:[#allocation10 + $0x50] sm:$0xff]  ;;  %8457 = vmatpush1.bf16.msra.mxu1 %v8456_v36  ;;  %v2059_v36 = vlaneseq }
 0x2dc   : > { %1673 = vmatprep.mubr.f32.mxu0 %v663_v38  ;;  %v3282_v38 = vld [vmem:[#allocation10 + $0x58] sm:$0xff]  ;;  %8458 = vmatprep.subr.bf16.mxu1 %v14033_v21 }
 0x2df   : > { %1674 = vmatmul.mubr.f32.gmra.mrb[22].mxu0 %v662_v39  ;;  %v615_v39 = vld [vmem:[%s10758_s18 + $0x110] sm:$0xff] }
 0x2e0   : > { %1679 = vmatprep.mubr.f32.mxu0 %v670_v40  ;;  %v8459_v40 = vpack.c.bf16 %v3282_v38, %v3281_v37  ;;  %v11061_v37 = vshrl.u32 %v2059_v36, 7  ;;  %v3309_v36 = vld [vmem:[#allocation10 + $0x130] sm:$0xff] }
 0x2e2   : > { %8460 = vmatpush1.bf16.msra.mxu1 %v8459_v40  ;;  %14197 = vst [vmem:[#allocation33_spill] sm:$0xff] %v11061_v37  ;;  %v11064_v38 = vsub.s32 1, %v11061_v37  ;;  %v2133_v40 = vld [vmem:[#allocation8] sm:$0x3] }
 0x2e3   : > { %1680 = vmatmul.mubr.f32.gmra.mrb[24].mxu0 %v669_v41  ;;  %v3283_v41 = vld [vmem:[#allocation10 + $0x60] sm:$0xff]  ;;  %8461 = vmatprep.subr.bf16.mxu1 %v14033_v21 }
 0x2e4   : > { %1685 = vmatprep.mubr.f32.mxu0 %v677_v42  ;;  %v3284_v42 = vld [vmem:[#allocation10 + $0x68] sm:$0xff]  ;;  %14198 = vst [vmem:[#allocation34_spill] sm:$0xff] %v11064_v38 }
 0x2e7   : > { %1686 = vmatmul.mubr.f32.gmra.mrb[26].mxu0 %v676_v43  ;;  %v622_v43 = vld [vmem:[%s10758_s18 + $0x148] sm:$0xff] }
 0x2e8   : > { %1691 = vmatprep.mubr.f32.mxu0 %v684_v44  ;;  %v8462_v44 = vpack.c.bf16 %v3284_v42, %v3283_v41 }
 0x2ea   : > { %8463 = vmatpush1.bf16.msra.mxu1 %v8462_v44 }
 0x2eb   : > { %1692 = vmatmul.mubr.f32.gmra.mrb[28].mxu0 %v683_v45  ;;  %v3285_v45 = vld [vmem:[#allocation10 + $0x70] sm:$0xff]  ;;  %8464 = vmatprep.subr.bf16.mxu1 %v14033_v21 }
 0x2ec   : > { %1697 = vmatprep.mubr.f32.mxu0 %v691_v46  ;;  %v3286_v46 = vld [vmem:[#allocation10 + $0x78] sm:$0xff] }
 0x2ef   : > { %1698 = vmatmul.mubr.f32.gmra.mrb[30].mxu0 %v690_v47  ;;  %v629_v47 = vld [vmem:[%s10758_s18 + $0x180] sm:$0xff] }
 0x2f0   : > { %1703 = vmatprep.mubr.f32.mxu0 %v698_v48  ;;  %v8465_v48 = vpack.c.bf16 %v3286_v46, %v3285_v45 }
 0x2f2   : > { %8466 = vmatpush1.bf16.msra.mxu1 %v8465_v48 }
 0x2f3   : > { %1704 = vmatmul.mubr.f32.gmra.mrb[32].mxu0 %v697_v49  ;;  %v3287_v49 = vld [vmem:[#allocation10 + $0x80] sm:$0xff]  ;;  %8467 = vmatprep.subr.bf16.mxu1 %v14033_v21 }
 0x2f4   : > { %1709 = vmatprep.mubr.f32.mxu0 %v705_v50  ;;  %v3288_v50 = vld [vmem:[#allocation10 + $0x88] sm:$0xff] }
 0x2f7   : > { %1710 = vmatmul.mubr.f32.gmra.mrb[34].mxu0 %v704_v51  ;;  %v636_v51 = vld [vmem:[%s10758_s18 + $0x1b8] sm:$0xff] }
 0x2f8   : > { %1715 = vmatprep.mubr.f32.mxu0 %v712_v52  ;;  %v8468_v52 = vpack.c.bf16 %v3288_v50, %v3287_v49 }
 0x2fa   : > { %8469 = vmatpush1.bf16.msra.mxu1 %v8468_v52 }
 0x2fb   : > { %1716 = vmatmul.mubr.f32.gmra.mrb[36].mxu0 %v711_v53  ;;  %v3289_v53 = vld [vmem:[#allocation10 + $0x90] sm:$0xff]  ;;  %8470 = vmatprep.subr.bf16.mxu1 %v14033_v21 }
 0x2fc   : > { %1721 = vmatprep.mubr.f32.mxu0 %v719_v54  ;;  %v3290_v54 = vld [vmem:[#allocation10 + $0x98] sm:$0xff] }
 0x2ff   : > { %1722 = vmatmul.mubr.f32.gmra.mrb[38].mxu0 %v718_v55  ;;  %v643_v55 = vld [vmem:[%s10758_s18 + $0x1f0] sm:$0xff] }
 0x300   : > { %1727 = vmatprep.mubr.f32.mxu0 %v726_v56  ;;  %v8471_v56 = vpack.c.bf16 %v3290_v54, %v3289_v53 }
 0x302   : > { %8472 = vmatpush1.bf16.msra.mxu1 %v8471_v56  ;;  %v3304_v56 = vld [vmem:[#allocation10 + $0x108] sm:$0xff] }
 0x303   : > { %1728 = vmatmul.mubr.f32.gmra.mrb[40].mxu0 %v725_v57  ;;  %v3291_v57 = vld [vmem:[#allocation10 + $0xa0] sm:$0xff]  ;;  %8473 = vmatprep.subr.bf16.mxu1 %v14033_v21 }
 0x304   : > { %1733 = vmatprep.mubr.f32.mxu0 %v733_v58  ;;  %v3292_v58 = vld [vmem:[#allocation10 + $0xa8] sm:$0xff] }
 0x307   : > { %1734 = vmatmul.mubr.f32.gmra.mrb[42].mxu0 %v732_v59  ;;  %v650_v59 = vld [vmem:[%s10758_s18 + $0x228] sm:$0xff] }
 0x308   : > { %1739 = vmatprep.mubr.f32.mxu0 %v740_v60  ;;  %v8474_v60 = vpack.c.bf16 %v3292_v58, %v3291_v57 }
 0x30a   : > { %8475 = vmatpush1.bf16.msra.mxu1 %v8474_v60 }
 0x30b   : > { %1740 = vmatmul.mubr.f32.gmra.mrb[44].mxu0 %v739_v61  ;;  %v3293_v61 = vld [vmem:[#allocation10 + $0xb0] sm:$0xff]  ;;  %8476 = vmatprep.subr.bf16.mxu1 %v14033_v21 }
 0x30c   : > { %1745 = vmatprep.mubr.f32.mxu0 %v747_v62  ;;  %v3294_v62 = vld [vmem:[#allocation10 + $0xb8] sm:$0xff] }
 0x30f   : > { %1746 = vmatmul.mubr.f32.gmra.mrb[46].mxu0 %v746_v63  ;;  %v657_v63 = vld [vmem:[%s10758_s18 + $0x260] sm:$0xff] }
 0x310   : > { %1751 = vmatprep.mubr.f32.mxu0 %v754_v0  ;;  %v8477_v0 = vpack.c.bf16 %v3294_v62, %v3293_v61 }
 0x312   : > { %8478 = vmatpush1.bf16.msra.mxu1 %v8477_v0 }
 0x313   : > { %1752 = vmatmul.mubr.f32.gmra.mrb[48].mxu0 %v753_v1  ;;  %v664_v1 = vld [vmem:[%s10758_s18 + $0x298] sm:$0xff]  ;;  %8479 = vmatprep.subr.bf16.mxu1 %v14033_v21 }
 0x314   : > { %1757 = vmatprep.mubr.f32.mxu0 %v761_v2  ;;  %v671_v2 = vld [vmem:[%s10758_s18 + $0x2d0] sm:$0xff] }
 0x317   : > { %1758 = vmatmul.mubr.f32.gmra.mrb[50].mxu0 %v760_v3  ;;  %v678_v3 = vld [vmem:[%s10758_s18 + $0x308] sm:$0xff] }
 0x318   : > { %1763 = vmatprep.mubr.f32.mxu0 %v768_v4  ;;  %v685_v4 = vld [vmem:[%s10758_s18 + $0x340] sm:$0xff] }
 0x31b   : > { %1764 = vmatmul.mubr.f32.gmra.mrb[52].mxu0 %v767_v5  ;;  %v692_v5 = vld [vmem:[%s10758_s18 + $0x378] sm:$0xff] }
 0x31c   : > { %1769 = vmatprep.mubr.f32.mxu0 %v775_v6  ;;  %v699_v6 = vld [vmem:[%s10758_s18 + $0x3b0] sm:$0xff] }
 0x31f   : > { %1770 = vmatmul.mubr.f32.gmra.mrb[54].mxu0 %v774_v7  ;;  %v706_v7 = vld [vmem:[%s10758_s18 + $0x3e8] sm:$0xff] }
 0x320   : > { %1775 = vmatprep.mubr.f32.mxu0 %v782_v8  ;;  %v713_v8 = vld [vmem:[%s10758_s18 + $0x420] sm:$0xff] }
 0x323   : > { %1776 = vmatmul.mubr.f32.gmra.mrb[56].mxu0 %v781_v9  ;;  %v720_v9 = vld [vmem:[%s10758_s18 + $0x458] sm:$0xff] }
 0x324   : > { %1781 = vmatprep.mubr.f32.mxu0 %v789_v10  ;;  %v727_v10 = vld [vmem:[%s10758_s18 + $0x490] sm:$0xff] }
 0x327   : > { %1782 = vmatmul.mubr.f32.gmra.mrb[58].mxu0 %v788_v11  ;;  %v3295_v11 = vld [vmem:[#allocation10 + $0xc0] sm:$0xff] }
 0x328   : > { %1787 = vmatprep.mubr.f32.mxu0 %v796_v12  ;;  %v3296_v12 = vld [vmem:[#allocation10 + $0xc8] sm:$0xff] }
 0x32b   : > { %1788 = vmatmul.mubr.f32.gmra.mrb[60].mxu0 %v795_v13  ;;  %v734_v13 = vld [vmem:[%s10758_s18 + $0x4c8] sm:$0xff] }
 0x32c   : > { %1793 = vmatprep.mubr.f32.mxu0 %v803_v14  ;;  %v8480_v14 = vpack.c.bf16 %v3296_v12, %v3295_v11 }
 0x32e   : > { %8481 = vmatpush1.bf16.msra.mxu1 %v8480_v14 }
 0x32f   : > { %1794 = vmatmul.mubr.f32.gmra.mrb[62].mxu0 %v802_v15  ;;  %8482 = vmatprep.subr.bf16.mxu1 %v14033_v21  ;;  %v3297_v15 = vld [vmem:[#allocation10 + $0xd0] sm:$0xff] }
 0x330   : > { %1864 = vmatprep.mubr.f32.mxu0 %v14030_v19  ;;  %v8483_v18 = vpack.c.bf16 %v3298_v16, %v3297_v15 }
 0x332   : > { %8484 = vmatpush1.bf16.msra.mxu1 %v8483_v18 }
 0x333   : > { %1865 = vmatmul.mubr.f32.vlgmr.msra.gmra.mrb[0].mxu0 %v587_v20  ;;  %8485 = vmatprep.subr.bf16.mxu1 %v14033_v21  ;;  %v3299_v20 = vld [vmem:[#allocation10 + $0xe0] sm:$0xff] }
 0x334   : > { %1870 = vmatprep.mubr.f32.mxu0 %v14030_v19  ;;  %v8486_v24 = vpack.c.bf16 %v3300_v22, %v3299_v20  ;;  %v3307_v22 = vld [vmem:[#allocation10 + $0x120] sm:$0xff] }
 0x336   : > { %8487 = vmatpush1.bf16.msra.mxu1 %v8486_v24 }
 0x337   : > { %1871 = vmatmul.mubr.f32.gmra.mrb[2].mxu0 %v594_v27  ;;  %8488 = vmatprep.subr.bf16.mxu1 %v14033_v21  ;;  %v755_v27 = vld [vmem:[%s10758_s18 + $0x570] sm:$0xff] }
 0x338   : > { %1876 = vmatprep.mubr.f32.mxu0 %v14030_v19 }
 0x33a   : > { %8490 = vmatpush1.bf16.msra.mxu1 %v8489_v28 }
 0x33b   : > { %1877 = vmatmul.mubr.f32.gmra.mrb[4].mxu0 %v601_v31  ;;  %8491 = vmatprep.subr.bf16.mxu1 %v14033_v21  ;;  %v776_v31 = vld [vmem:[%s10758_s18 + $0x618] sm:$0xff] }
 0x33c   : > { %1882 = vmatprep.mubr.f32.mxu0 %v14030_v19 }
 0x33f   : > { %1883 = vmatmul.mubr.f32.gmra.mrb[6].mxu0 %v608_v35  ;;  %v804_v35 = vld [vmem:[%s10758_s18 + $0x6f8] sm:$0xff] }
 0x340   : > { %1888 = vmatprep.mubr.f32.mxu0 %v14030_v19 }
 0x343   : > { %1889 = vmatmul.mubr.f32.gmra.mrb[8].mxu0 %v615_v39  ;;  %v2057_v39 = vld [vmem:[#allocation7] sm:$0x3] }
 0x344   : > { %1894 = vmatprep.mubr.f32.mxu0 %v14030_v19  ;;  %v11067_v41 = vrot.slane %v2057_v39, %v11064_v38  ;;  %v3310_v39 = vld [vmem:[#allocation10 + $0x138] sm:$0xff] }
 0x347   : > { %1895 = vmatmul.mubr.f32.gmra.mrb[10].mxu0 %v622_v43  ;;  %v11072_v43 = vrot.slane %v2133_v40, %v11064_v38 }
 0x348   : > { %1900 = vmatprep.mubr.f32.mxu0 %v14030_v19 }
 0x34b   : > { %1901 = vmatmul.mubr.f32.gmra.mrb[12].mxu0 %v629_v47 }
 0x34c   : > { %1906 = vmatprep.mubr.f32.mxu0 %v14030_v19 }
 0x34f   : > { %1907 = vmatmul.mubr.f32.gmra.mrb[14].mxu0 %v636_v51 }
 0x350   : > { %1912 = vmatprep.mubr.f32.mxu0 %v14030_v19 }
 0x353   : > { %1913 = vmatmul.mubr.f32.gmra.mrb[16].mxu0 %v643_v55  ;;  %v3303_v55 = vld [vmem:[#allocation10 + $0x100] sm:$0xff] }
 0x354   : > { %1918 = vmatprep.mubr.f32.mxu0 %v14030_v19 }
 0x357   : > { %1919 = vmatmul.mubr.f32.gmra.mrb[18].mxu0 %v650_v59 }
 0x358   : > { %1924 = vmatprep.mubr.f32.mxu0 %v14030_v19 }
 0x35b   : > { %1925 = vmatmul.mubr.f32.gmra.mrb[20].mxu0 %v657_v63 }
 0x35c   : > { %1930 = vmatprep.mubr.f32.mxu0 %v14030_v19 }
 0x35f   : > { %1931 = vmatmul.mubr.f32.gmra.mrb[22].mxu0 %v664_v1 }
 0x360   : > { %1936 = vmatprep.mubr.f32.mxu0 %v14030_v19 }
 0x363   : > { %1937 = vmatmul.mubr.f32.gmra.mrb[24].mxu0 %v671_v2 }
 0x364   : > { %1942 = vmatprep.mubr.f32.mxu0 %v14030_v19 }
 0x367   : > { %1943 = vmatmul.mubr.f32.gmra.mrb[26].mxu0 %v678_v3  ;;  %v8492_v3 = vpack.c.bf16 %v3304_v56, %v3303_v55 }
 0x368   : > { %1948 = vmatprep.mubr.f32.mxu0 %v14030_v19 }
 0x36b   : > { %1949 = vmatmul.mubr.f32.gmra.mrb[28].mxu0 %v685_v4 }
 0x36c   : > { %1954 = vmatprep.mubr.f32.mxu0 %v14030_v19 }
 0x36f   : > { %1955 = vmatmul.mubr.f32.gmra.mrb[30].mxu0 %v692_v5 }
 0x370   : > { %1960 = vmatprep.mubr.f32.mxu0 %v14030_v19 }
 0x373   : > { %1961 = vmatmul.mubr.f32.gmra.mrb[32].mxu0 %v699_v6  ;;  %v3305_v6 = vld [vmem:[#allocation10 + $0x110] sm:$0xff] }
 0x374   : > { %1966 = vmatprep.mubr.f32.mxu0 %v14030_v19 }
 0x377   : > { %1967 = vmatmul.mubr.f32.gmra.mrb[34].mxu0 %v706_v7  ;;  %v3306_v7 = vld [vmem:[#allocation10 + $0x118] sm:$0xff] }
 0x378   : > { %1972 = vmatprep.mubr.f32.mxu0 %v14030_v19 }
 0x37b   : > { %1973 = vmatmul.mubr.f32.gmra.mrb[36].mxu0 %v713_v8 }
 0x37c   : > { %1978 = vmatprep.mubr.f32.mxu0 %v14030_v19 }
 0x37f   : > { %1979 = vmatmul.mubr.f32.gmra.mrb[38].mxu0 %v720_v9 }
 0x380   : > { %1984 = vmatprep.mubr.f32.mxu0 %v14030_v19 }
 0x383   : > { %1985 = vmatmul.mubr.f32.gmra.mrb[40].mxu0 %v727_v10 }
 0x384   : > { %1990 = vmatprep.mubr.f32.mxu0 %v14030_v19 }
 0x387   : > { %1991 = vmatmul.mubr.f32.gmra.mrb[42].mxu0 %v734_v13 }
 0x388   : > { %1996 = vmatprep.mubr.f32.mxu0 %v14030_v19 }
 0x38b   : > { %1997 = vmatmul.mubr.f32.gmra.mrb[44].mxu0 %v741_v17  ;;  %v8495_v17 = vpack.c.bf16 %v3306_v7, %v3305_v6 }
 0x38c   : > { %2002 = vmatprep.mubr.f32.mxu0 %v14030_v19 }
 0x38f   : > { %2003 = vmatmul.mubr.f32.gmra.mrb[46].mxu0 %v748_v23  ;;  %v3308_v23 = vld [vmem:[#allocation10 + $0x128] sm:$0xff] }
 0x390   : > { %2008 = vmatprep.mubr.f32.mxu0 %v14030_v19 }
 0x393   : > { %2009 = vmatmul.mubr.f32.gmra.mrb[48].mxu0 %v755_v27 }
 0x394   : > { %2014 = vmatprep.mubr.f32.mxu0 %v14030_v19 }
 0x397   : > { %2015 = vmatmul.mubr.f32.gmra.mrb[50].mxu0 %v762_v29 }
 0x398   : > { %2020 = vmatprep.mubr.f32.mxu0 %v14030_v19 }
 0x39b   : > { %2021 = vmatmul.mubr.f32.gmra.mrb[52].mxu0 %v769_v30 }
 0x39c   : > { %2026 = vmatprep.mubr.f32.mxu0 %v14030_v19 }
 0x39f   : > { %2027 = vmatmul.mubr.f32.gmra.mrb[54].mxu0 %v776_v31 }
 0x3a0   : > { %2032 = vmatprep.mubr.f32.mxu0 %v14030_v19 }
 0x3a3   : > { %2033 = vmatmul.mubr.f32.gmra.mrb[56].mxu0 %v783_v32 }
 0x3a4   : > { %2038 = vmatprep.mubr.f32.mxu0 %v14030_v19 }
 0x3a7   : > { %2039 = vmatmul.mubr.f32.gmra.mrb[58].mxu0 %v790_v33  ;;  %v8498_v33 = vpack.c.bf16 %v3308_v23, %v3307_v22 }
 0x3a8   : > { %2044 = vmatprep.mubr.f32.mxu0 %v14030_v19 }
 0x3ab   : > { %2045 = vmatmul.mubr.f32.gmra.mrb[60].mxu0 %v797_v34 }
 0x3ac   : > { %2050 = vmatprep.mubr.f32.mxu0 %v14030_v19 }
 0x3af   : > { %2051 = vmatmul.mubr.f32.gmra.mrb[62].mxu0 %v804_v35 }
 0x406   : > { %v11069_v42 = vpop.f32.mrb[0].mxu0 }
 0x407   : > { %14199 = vst [vmem:[#allocation35_spill] sm:$0xff] %v11069_v42  ;;  %v1868_v44 = vpop.f32.mrb[1].mxu0 }
 0x408   : > { %v2070_v45 = vmul.f32 %v11067_v41, %v1868_v44 }
 0x40a   : > { %v2146_v46 = vadd.f32 %v11072_v43, %v2070_v45  ;;  %v11076_v47 = vpop.f32.mrb[2].mxu0 }
 0x40b   : > { %14200 = vst [vmem:[#allocation36_spill] sm:$0xff] %v11076_v47  ;;  %v1874_v48 = vpop.f32.mrb[3].mxu0 }
 0x40c   : > { %v2210_v49 = vmax.f32 %v2146_v46, 0.0  ;;  %v2072_v50 = vmul.f32 %v11067_v41, %v1874_v48 }
 0x40e   : > { %v2305_v51 = vrot.slane %v2210_v49, 5  ;;  %v2148_v52 = vadd.f32 %v11072_v43, %v2072_v50  ;;  %v11080_v53 = vpop.f32.mrb[4].mxu0 }
 0x40f   : > { %14201 = vst [vmem:[#allocation37_spill] sm:$0xff] %v11080_v53  ;;  %v1880_v54 = vpop.f32.mrb[5].mxu0 }
 0x410   : > { %v11083_v57 = vsel %vm2369_vm0, 0.0, %v2305_v51  ;;  %v11086_v58 = vsel %vm2369_vm0, %v2305_v51, 0.0  ;;  %v2212_v59 = vmax.f32 %v2148_v52, 0.0  ;;  %v2074_v60 = vmul.f32 %v11067_v41, %v1880_v54 }
 0x411   : > { %14202 = vst [vmem:[#allocation38_spill] sm:$0xff] %v11083_v57  ;;  %14203 = vst [vmem:[#allocation39_spill] sm:$0xff] %v11086_v58  ;;  %v2499_v61 = vrot.slane %v11083_v57, 1  ;;  %v2500_v62 = vrot.slane %v11086_v58, 1  ;;  %v8501_v54 = vpack.c.bf16 %v3310_v39, %v3309_v36 }
 0x412   : > { %v2306_v63 = vrot.slane %v2212_v59, 5  ;;  %v2150_v0 = vadd.f32 %v11072_v43, %v2074_v60  ;;  %v11092_v1 = vpop.f32.mrb[6].mxu0  ;;  %v3311_v59 = vld [vmem:[#allocation10 + $0x140] sm:$0xff]  ;;  %v3312_v60 = vld [vmem:[#allocation10 + $0x148] sm:$0xff] }
 0x413   : > { %14204 = vst [vmem:[#allocation40_spill] sm:$0xff] %v11092_v1  ;;  %v1886_v4 = vpop.f32.mrb[7].mxu0  ;;  %v2501_v5 = vsel %vm2498_vm1, %v2499_v61, %v2500_v62 }
 0x414   : > { %v11101_v8 = vsel %vm2369_vm0, 0.0, %v2306_v63  ;;  %v11104_v9 = vsel %vm2369_vm0, %v2306_v63, 0.0  ;;  %v2214_v10 = vmax.f32 %v2150_v0, 0.0  ;;  %v2076_v11 = vmul.f32 %v11067_v41, %v1886_v4  ;;  %3447 = vmatprep.mubr.f32.mxu1 %v2501_v5 }
 0x415   : > { %14207 = vst [vmem:[#allocation41_spill] sm:$0xff] %v11104_v9  ;;  %7891 = vmatmul.mubr.msk.f32.vlgmr.msra.gmra.mrb[0].mxu1 %vm11095_vm2, %v2305_v51  ;;  %v2502_v12 = vrot.slane %v11101_v8, 1  ;;  %v2503_v13 = vrot.slane %v11104_v9, 1 }
 0x416   : > { %v2307_v14 = vrot.slane %v2214_v10, 5  ;;  %v2152_v15 = vadd.f32 %v11072_v43, %v2076_v11  ;;  %v11112_v16 = vpop.f32.mrb[8].mxu0  ;;  %8493 = vmatpush1.bf16.msra.mxu1 %v8492_v3  ;;  %v8504_v10 = vpack.c.bf16 %v3312_v60, %v3311_v59  ;;  %v3317_v59 = vld [vmem:[#allocation10 + $0x170] sm:$0xff]  ;;  %v3318_v60 = vld [vmem:[#allocation10 + $0x178] sm:$0xff] }
 0x417   : > { %14208 = vst [vmem:[#allocation42_spill] sm:$0xff] %v11112_v16  ;;  %v1892_v18 = vpop.f32.mrb[9].mxu0  ;;  %v2504_v20 = vsel %vm2498_vm1, %v2502_v12, %v2503_v13  ;;  %8494 = vmatprep.subr.bf16.mxu1 %v14033_v21  ;;  %v3313_v13 = vld [vmem:[#allocation10 + $0x150] sm:$0xff] }
 0x418   : > { %v11117_v24 = vsel %vm2369_vm0, 0.0, %v2307_v14  ;;  %v11120_v25 = vsel %vm2369_vm0, %v2307_v14, 0.0  ;;  %v2216_v26 = vmax.f32 %v2152_v15, 0.0  ;;  %v2078_v27 = vmul.f32 %v11067_v41, %v1892_v18  ;;  %3452 = vmatprep.mubr.f32.mxu1 %v2504_v20 }
 0x419   : > { %7893 = vmatmul.mubr.msk.f32.gmra.mrb[2].mxu1 %vm11095_vm2, %v2306_v63  ;;  %v2505_v28 = vrot.slane %v11117_v24, 1  ;;  %v2506_v29 = vrot.slane %v11120_v25, 1 }
 0x41a   : > { %v2308_v30 = vrot.slane %v2216_v26, 5  ;;  %v2154_v31 = vadd.f32 %v11072_v43, %v2078_v27  ;;  %v11128_v32 = vpop.f32.mrb[10].mxu0  ;;  %8496 = vmatpush1.bf16.msra.mxu1 %v8495_v17 }
 0x41b   : > { %14209 = vst [vmem:[#allocation43_spill] sm:$0xff] %v11128_v32  ;;  %v1898_v34 = vpop.f32.mrb[11].mxu0  ;;  %v2507_v35 = vsel %vm2498_vm1, %v2505_v28, %v2506_v29  ;;  %8497 = vmatprep.subr.bf16.mxu1 %v14033_v21 }
 0x41c   : > { %v11133_v40 = vsel %vm2369_vm0, 0.0, %v2308_v30  ;;  %v11136_v44 = vsel %vm2369_vm0, %v2308_v30, 0.0  ;;  %v2218_v45 = vmax.f32 %v2154_v31, 0.0  ;;  %v2080_v46 = vmul.f32 %v11067_v41, %v1898_v34  ;;  %3457 = vmatprep.mubr.f32.mxu1 %v2507_v35  ;;  %v3316_v34 = vld [vmem:[#allocation10 + $0x168] sm:$0xff] }
 0x41d   : > { %7895 = vmatmul.mubr.msk.f32.gmra.mrb[4].mxu1 %vm11095_vm2, %v2307_v14  ;;  %v2508_v48 = vrot.slane %v11133_v40, 1  ;;  %v2509_v49 = vrot.slane %v11136_v44, 1  ;;  %v3314_v14 = vld [vmem:[#allocation10 + $0x158] sm:$0xff] }
 0x41e   : > { %v2309_v50 = vrot.slane %v2218_v45, 5  ;;  %v2156_v51 = vadd.f32 %v11072_v43, %v2080_v46  ;;  %v11144_v52 = vpop.f32.mrb[12].mxu0  ;;  %8499 = vmatpush1.bf16.msra.mxu1 %v8498_v33  ;;  %v8507_v29 = vpack.c.bf16 %v3314_v14, %v3313_v13  ;;  %v3315_v33 = vld [vmem:[#allocation10 + $0x160] sm:$0xff]  ;;  %v8513_v13 = vpack.c.bf16 %v3318_v60, %v3317_v59 }
 0x41f   : > { %14210 = vst [vmem:[#allocation44_spill] sm:$0xff] %v11144_v52  ;;  %v1904_v55 = vpop.f32.mrb[13].mxu0  ;;  %v2510_v56 = vsel %vm2498_vm1, %v2508_v48, %v2509_v49  ;;  %8500 = vmatprep.subr.bf16.mxu1 %v14033_v21 }
 0x420   : > { %v11149_v61 = vsel %vm2369_vm0, 0.0, %v2309_v50  ;;  %v11152_v62 = vsel %vm2369_vm0, %v2309_v50, 0.0  ;;  %v2220_v63 = vmax.f32 %v2156_v51, 0.0  ;;  %v2082_v0 = vmul.f32 %v11067_v41, %v1904_v55  ;;  %3462 = vmatprep.mubr.f32.mxu1 %v2510_v56 }
 0x421   : > { %7897 = vmatmul.mubr.msk.f32.gmra.mrb[6].mxu1 %vm11095_vm2, %v2308_v30  ;;  %v2511_v3 = vrot.slane %v11149_v61, 1  ;;  %v2512_v4 = vrot.slane %v11152_v62, 1 }
 0x422   : > { %v2310_v5 = vrot.slane %v2220_v63, 5  ;;  %v2158_v6 = vadd.f32 %v11072_v43, %v2082_v0  ;;  %v11160_v7 = vpop.f32.mrb[14].mxu0  ;;  %8502 = vmatpush1.bf16.msra.mxu1 %v8501_v54  ;;  %v8510_v54 = vpack.c.bf16 %v3316_v34, %v3315_v33 }
 0x423   : > { %14211 = vst [vmem:[#allocation45_spill] sm:$0xff] %v11160_v7  ;;  %v1910_v11 = vpop.f32.mrb[15].mxu0  ;;  %v2513_v12 = vsel %vm2498_vm1, %v2511_v3, %v2512_v4  ;;  %8503 = vmatprep.subr.bf16.mxu1 %v14033_v21 }
 0x424   : > { %v11165_v15 = vsel %vm2369_vm0, 0.0, %v2310_v5  ;;  %v11168_v17 = vsel %vm2369_vm0, %v2310_v5, 0.0  ;;  %v2222_v18 = vmax.f32 %v2158_v6, 0.0  ;;  %v2084_v20 = vmul.f32 %v11067_v41, %v1910_v11  ;;  %3467 = vmatprep.mubr.f32.mxu1 %v2513_v12 }
 0x425   : > { %7899 = vmatmul.mubr.msk.f32.gmra.mrb[8].mxu1 %vm11095_vm2, %v2309_v50  ;;  %v2514_v22 = vrot.slane %v11165_v15, 1  ;;  %v2515_v23 = vrot.slane %v11168_v17, 1 }
 0x426   : > { %v2311_v26 = vrot.slane %v2222_v18, 5  ;;  %v2160_v27 = vadd.f32 %v11072_v43, %v2084_v20  ;;  %v11176_v28 = vpop.f32.mrb[16].mxu0  ;;  %8505 = vmatpush1.bf16.msra.mxu1 %v8504_v10  ;;  %v3319_v20 = vld [vmem:[#allocation10 + $0x180] sm:$0xff] }
 0x427   : > { %14212 = vst [vmem:[#allocation46_spill] sm:$0xff] %v11176_v28  ;;  %v1916_v30 = vpop.f32.mrb[17].mxu0  ;;  %v2516_v31 = vsel %vm2498_vm1, %v2514_v22, %v2515_v23  ;;  %8506 = vmatprep.subr.bf16.mxu1 %v14033_v21  ;;  %v3320_v22 = vld [vmem:[#allocation10 + $0x188] sm:$0xff] }
 0x428   : > { %v11181_v35 = vsel %vm2369_vm0, 0.0, %v2311_v26  ;;  %v11184_v36 = vsel %vm2369_vm0, %v2311_v26, 0.0  ;;  %v2224_v39 = vmax.f32 %v2160_v27, 0.0  ;;  %v2086_v45 = vmul.f32 %v11067_v41, %v1916_v30  ;;  %3472 = vmatprep.mubr.f32.mxu1 %v2516_v31 }
 0x429   : > { %7901 = vmatmul.mubr.msk.f32.gmra.mrb[10].mxu1 %vm11095_vm2, %v2310_v5  ;;  %v2517_v46 = vrot.slane %v11181_v35, 1  ;;  %v2518_v48 = vrot.slane %v11184_v36, 1 }
 0x42a   : > { %v2312_v49 = vrot.slane %v2224_v39, 5  ;;  %v2162_v50 = vadd.f32 %v11072_v43, %v2086_v45  ;;  %v11192_v51 = vpop.f32.mrb[18].mxu0  ;;  %8508 = vmatpush1.bf16.msra.mxu1 %v8507_v29  ;;  %v8516_v45 = vpack.c.bf16 %v3320_v22, %v3319_v20  ;;  %v3324_v20 = vld [vmem:[#allocation10 + $0x1a8] sm:$0xff] }
 0x42b   : > { %14213 = vst [vmem:[#allocation47_spill] sm:$0xff] %v11192_v51  ;;  %v1922_v55 = vpop.f32.mrb[19].mxu0  ;;  %v2519_v56 = vsel %vm2498_vm1, %v2517_v46, %v2518_v48  ;;  %8509 = vmatprep.subr.bf16.mxu1 %v14033_v21 }
 0x42c   : > { %v11197_v63 = vsel %vm2369_vm0, 0.0, %v2312_v49  ;;  %v11200_v0 = vsel %vm2369_vm0, %v2312_v49, 0.0  ;;  %v2226_v3 = vmax.f32 %v2162_v50, 0.0  ;;  %v2088_v4 = vmul.f32 %v11067_v41, %v1922_v55  ;;  %3477 = vmatprep.mubr.f32.mxu1 %v2519_v56  ;;  %v3321_v50 = vld [vmem:[#allocation10 + $0x190] sm:$0xff] }
 0x42d   : > { %7903 = vmatmul.mubr.msk.f32.gmra.mrb[12].mxu1 %vm11095_vm2, %v2311_v26  ;;  %v2520_v5 = vrot.slane %v11197_v63, 1  ;;  %v2521_v6 = vrot.slane %v11200_v0, 1 }
 0x42e   : > { %v2313_v10 = vrot.slane %v2226_v3, 5  ;;  %v2164_v11 = vadd.f32 %v11072_v43, %v2088_v4  ;;  %v11208_v12 = vpop.f32.mrb[20].mxu0  ;;  %8511 = vmatpush1.bf16.msra.mxu1 %v8510_v54  ;;  %v3322_v54 = vld [vmem:[#allocation10 + $0x198] sm:$0xff] }
 0x42f   : > { %14214 = vst [vmem:[#allocation48_spill] sm:$0xff] %v11208_v12  ;;  %v1928_v14 = vpop.f32.mrb[21].mxu0  ;;  %v2522_v18 = vsel %vm2498_vm1, %v2520_v5, %v2521_v6  ;;  %8512 = vmatprep.subr.bf16.mxu1 %v14033_v21 }
 0x430   : > { %v11213_v23 = vsel %vm2369_vm0, 0.0, %v2313_v10  ;;  %v11216_v26 = vsel %vm2369_vm0, %v2313_v10, 0.0  ;;  %v2228_v27 = vmax.f32 %v2164_v11, 0.0  ;;  %v2090_v29 = vmul.f32 %v11067_v41, %v1928_v14  ;;  %3482 = vmatprep.mubr.f32.mxu1 %v2522_v18  ;;  %v3323_v18 = vld [vmem:[#allocation10 + $0x1a0] sm:$0xff] }
 0x431   : > { %7905 = vmatmul.mubr.msk.f32.gmra.mrb[14].mxu1 %vm11095_vm2, %v2312_v49  ;;  %v2523_v30 = vrot.slane %v11213_v23, 1  ;;  %v2524_v31 = vrot.slane %v11216_v26, 1  ;;  %v8519_v11 = vpack.c.bf16 %v3322_v54, %v3321_v50 }
 0x432   : > { %v2314_v33 = vrot.slane %v2228_v27, 5  ;;  %v2166_v34 = vadd.f32 %v11072_v43, %v2090_v29  ;;  %v11224_v39 = vpop.f32.mrb[22].mxu0  ;;  %8514 = vmatpush1.bf16.msra.mxu1 %v8513_v13 }
 0x433   : > { %14215 = vst [vmem:[#allocation49_spill] sm:$0xff] %v11224_v39  ;;  %v1934_v46 = vpop.f32.mrb[23].mxu0  ;;  %v2525_v48 = vsel %vm2498_vm1, %v2523_v30, %v2524_v31  ;;  %8515 = vmatprep.subr.bf16.mxu1 %v14033_v21 }
 0x434   : > { %v11229_v49 = vsel %vm2369_vm0, 0.0, %v2314_v33  ;;  %v11232_v55 = vsel %vm2369_vm0, %v2314_v33, 0.0  ;;  %v2230_v56 = vmax.f32 %v2166_v34, 0.0  ;;  %v2092_v59 = vmul.f32 %v11067_v41, %v1934_v46  ;;  %3487 = vmatprep.mubr.f32.mxu1 %v2525_v48 }
 0x435   : > { %7907 = vmatmul.mubr.msk.f32.gmra.mrb[16].mxu1 %vm11095_vm2, %v2313_v10  ;;  %v2526_v60 = vrot.slane %v11229_v49, 1  ;;  %v2527_v3 = vrot.slane %v11232_v55, 1  ;;  %v8522_v48 = vpack.c.bf16 %v3324_v20, %v3323_v18 }
 0x436   : > { %v2315_v4 = vrot.slane %v2230_v56, 5  ;;  %v2168_v5 = vadd.f32 %v11072_v43, %v2092_v59  ;;  %v11240_v6 = vpop.f32.mrb[24].mxu0  ;;  %8517 = vmatpush1.bf16.msra.mxu1 %v8516_v45  ;;  %v3325_v56 = vld [vmem:[#allocation10 + $0x1b0] sm:$0xff]  ;;  %v3326_v59 = vld [vmem:[#allocation10 + $0x1b8] sm:$0xff] }
 0x437   : > { %14216 = vst [vmem:[#allocation50_spill] sm:$0xff] %v11240_v6  ;;  %v1940_v13 = vpop.f32.mrb[25].mxu0  ;;  %v2528_v14 = vsel %vm2498_vm1, %v2526_v60, %v2527_v3  ;;  %8518 = vmatprep.subr.bf16.mxu1 %v14033_v21 }
 0x438   : > { %v11245_v10 = vsel %vm2369_vm0, 0.0, %v2315_v4  ;;  %v11248_v22 = vsel %vm2369_vm0, %v2315_v4, 0.0  ;;  %v2232_v27 = vmax.f32 %v2168_v5, 0.0  ;;  %v2094_v29 = vmul.f32 %v11067_v41, %v1940_v13  ;;  %3492 = vmatprep.mubr.f32.mxu1 %v2528_v14 }
 0x439   : > { %7909 = vmatmul.mubr.msk.f32.gmra.mrb[18].mxu1 %vm11095_vm2, %v2314_v33  ;;  %v2529_v30 = vrot.slane %v11245_v10, 1  ;;  %v2530_v31 = vrot.slane %v11248_v22, 1 }
 0x43a   : > { %v2316_v34 = vrot.slane %v2232_v27, 5  ;;  %v2170_v45 = vadd.f32 %v11072_v43, %v2094_v29  ;;  %v11256_v46 = vpop.f32.mrb[26].mxu0  ;;  %8520 = vmatpush1.bf16.msra.mxu1 %v8519_v11  ;;  %v8525_v27 = vpack.c.bf16 %v3326_v59, %v3325_v56 }
 0x43b   : > { %14217 = vst [vmem:[#allocation51_spill] sm:$0xff] %v11256_v46  ;;  %v1946_v50 = vpop.f32.mrb[27].mxu0  ;;  %v2531_v54 = vsel %vm2498_vm1, %v2529_v30, %v2530_v31  ;;  %8521 = vmatprep.subr.bf16.mxu1 %v14033_v21  ;;  %v3327_v31 = vld [vmem:[#allocation10 + $0x1c0] sm:$0xff] }
 0x43c   : > { %v11261_v33 = vsel %vm2369_vm0, 0.0, %v2316_v34  ;;  %v11264_v60 = vsel %vm2369_vm0, %v2316_v34, 0.0  ;;  %v2234_v3 = vmax.f32 %v2170_v45, 0.0  ;;  %v2096_v5 = vmul.f32 %v11067_v41, %v1946_v50  ;;  %3497 = vmatprep.mubr.f32.mxu1 %v2531_v54  ;;  %v3328_v45 = vld [vmem:[#allocation10 + $0x1c8] sm:$0xff] }
 0x43d   : > { %7911 = vmatmul.mubr.msk.f32.gmra.mrb[20].mxu1 %vm11095_vm2, %v2315_v4  ;;  %v2532_v11 = vrot.slane %v11261_v33, 1  ;;  %v2533_v13 = vrot.slane %v11264_v60, 1 }
 0x43e   : > { %v2317_v14 = vrot.slane %v2234_v3, 5  ;;  %v2172_v18 = vadd.f32 %v11072_v43, %v2096_v5  ;;  %v11272_v20 = vpop.f32.mrb[28].mxu0  ;;  %8523 = vmatpush1.bf16.msra.mxu1 %v8522_v48 }
 0x43f   : > { %14218 = vst [vmem:[#allocation52_spill] sm:$0xff] %v11272_v20  ;;  %v1952_v29 = vpop.f32.mrb[29].mxu0  ;;  %v2534_v30 = vsel %vm2498_vm1, %v2532_v11, %v2533_v13  ;;  %8524 = vmatprep.subr.bf16.mxu1 %v14033_v21  ;;  %v8528_v13 = vpack.c.bf16 %v3328_v45, %v3327_v31  ;;  %v14221_v20 = vmov 0.0|0.0  }
 0x440   : > { %v11277_v4 = vsel %vm2369_vm0, 0.0, %v2317_v14  ;;  %v11280_v50 = vsel %vm2369_vm0, %v2317_v14, 0.0  ;;  %v2236_v54 = vmax.f32 %v2172_v18, 0.0  ;;  %v2098_v3 = vmul.f32 %v11067_v41, %v1952_v29  ;;  %3502 = vmatprep.mubr.f32.mxu1 %v2534_v30  ;;  %v3329_v29 = vld [vmem:[#allocation10 + $0x1d0] sm:$0xff]  ;;  %v3330_v30 = vld [vmem:[#allocation10 + $0x1d8] sm:$0xff] }
 0x441   : > { %7913 = vmatmul.mubr.msk.f32.gmra.mrb[22].mxu1 %vm11095_vm2, %v2316_v34  ;;  %v2535_v48 = vrot.slane %v11277_v4, 1  ;;  %v2536_v56 = vrot.slane %v11280_v50, 1 }
 0x442   : > { %v2318_v59 = vrot.slane %v2236_v54, 5  ;;  %v2174_v5 = vadd.f32 %v11072_v43, %v2098_v3  ;;  %v11288_v11 = vpop.f32.mrb[30].mxu0  ;;  %8526 = vmatpush1.bf16.msra.mxu1 %v8525_v27 }
 0x443   : > { %14219 = vst [vmem:[#allocation53_spill] sm:$0xff] %v11288_v11  ;;  %v1958_v19 = vpop.f32.mrb[31].mxu0  ;;  %v2537_v18 = vsel %vm2498_vm1, %v2535_v48, %v2536_v56  ;;  %8527 = vmatprep.subr.bf16.mxu1 %v14033_v21  ;;  %v8531_v21 = vpack.c.bf16 %v3330_v30, %v3329_v29 }
 0x444   : > { %v11293_v34 = vsel %vm2369_vm0, 0.0, %v2318_v59  ;;  %v11296_v38 = vsel %vm2369_vm0, %v2318_v59, 0.0  ;;  %v2238_v54 = vmax.f32 %v2174_v5, 0.0  ;;  %v2100_v3 = vmul.f32 %v11067_v41, %v1958_v19  ;;  %3507 = vmatprep.mubr.f32.mxu1 %v2537_v18  ;;  %v3331_v19 = vld [vmem:[#allocation10 + $0x1e0] sm:$0xff]  ;;  %v3332_v18 = vld [vmem:[#allocation10 + $0x1e8] sm:$0xff] }
 0x445   : > { %7915 = vmatmul.mubr.msk.f32.gmra.mrb[24].mxu1 %vm11095_vm2, %v2317_v14  ;;  %v2538_v27 = vrot.slane %v11293_v34, 1  ;;  %v2539_v31 = vrot.slane %v11296_v38, 1 }
 0x446   : > { %v2319_v45 = vrot.slane %v2238_v54, 5  ;;  %v2176_v48 = vadd.f32 %v11072_v43, %v2100_v3  ;;  %v11304_v56 = vpop.f32.mrb[32].mxu0  ;;  %8529 = vmatpush1.bf16.msra.mxu1 %v8528_v13 }
 0x447   : > { %14220 = vst [vmem:[#allocation54_spill] sm:$0xff] %v11304_v56  ;;  %v1964_v11 = vpop.f32.mrb[33].mxu0  ;;  %v2540_v5 = vsel %vm2498_vm1, %v2538_v27, %v2539_v31  ;;  %8530 = vmatprep.subr.bf16.mxu1 %v14221_v20  ;;  %v8534_v56 = vpack.c.bf16 %v3332_v18, %v3331_v19 }
 0x448   : > { %v11309_v14 = vsel %vm2369_vm0, 0.0, %v2319_v45  ;;  %v11312_v46 = vsel %vm2369_vm0, %v2319_v45, 0.0  ;;  %v2240_v54 = vmax.f32 %v2176_v48, 0.0  ;;  %v2102_v3 = vmul.f32 %v11067_v41, %v1964_v11  ;;  %3512 = vmatprep.mubr.f32.mxu1 %v2540_v5  ;;  %v3333_v11 = vld [vmem:[#allocation10 + $0x1f0] sm:$0xff]  ;;  %v3334_v5 = vld [vmem:[#allocation10 + $0x1f8] sm:$0xff] }
 0x449   : > { %14222 = vst [vmem:[#allocation55_spill] sm:$0xff] %v11312_v46  ;;  %7917 = vmatmul.mubr.msk.f32.gmra.mrb[26].mxu1 %vm11095_vm2, %v2318_v59  ;;  %v2541_v13 = vrot.slane %v11309_v14, 1  ;;  %v2542_v29 = vrot.slane %v11312_v46, 1 }
 0x44a   : > { %v2320_v30 = vrot.slane %v2240_v54, 5  ;;  %v2178_v27 = vadd.f32 %v11072_v43, %v2102_v3  ;;  %v11320_v31 = vpop.f32.mrb[34].mxu0  ;;  %8532 = vmatpush1.bf16.msra.mxu1 %v8531_v21 }
 0x44b   : > { %14223 = vst [vmem:[#allocation56_spill] sm:$0xff] %v11320_v31  ;;  %v1970_v6 = vpop.f32.mrb[35].mxu0  ;;  %v2543_v48 = vsel %vm2498_vm1, %v2541_v13, %v2542_v29  ;;  %8533 = vmatprep.subr.bf16.mxu1 %v14221_v20  ;;  %v8537_v31 = vpack.c.bf16 %v3334_v5, %v3333_v11 }
 0x44c   : > { %v11325_v59 = vsel %vm2369_vm0, 0.0, %v2320_v30  ;;  %v11328_v39 = vsel %vm2369_vm0, %v2320_v30, 0.0  ;;  %v2242_v54 = vmax.f32 %v2178_v27, 0.0  ;;  %v2104_v3 = vmul.f32 %v11067_v41, %v1970_v6  ;;  %3517 = vmatprep.mubr.f32.mxu1 %v2543_v48 }
 0x44d   : > { %7919 = vmatmul.mubr.msk.f32.gmra.mrb[28].mxu1 %vm11095_vm2, %v2319_v45  ;;  %v2544_v21 = vrot.slane %v11325_v59, 1  ;;  %v2545_v19 = vrot.slane %v11328_v39, 1 }
 0x44e   : > { %v2321_v18 = vrot.slane %v2242_v54, 5  ;;  %v2180_v13 = vadd.f32 %v11072_v43, %v2104_v3  ;;  %v11336_v29 = vpop.f32.mrb[36].mxu0  ;;  %8535 = vmatpush1.bf16.msra.mxu1 %v8534_v56 }
 0x44f   : > { %14224 = vst [vmem:[#allocation57_spill] sm:$0xff] %v11336_v29  ;;  %v1976_v12 = vpop.f32.mrb[37].mxu0  ;;  %v2546_v27 = vsel %vm2498_vm1, %v2544_v21, %v2545_v19  ;;  %8536 = vmatprep.subr.bf16.mxu1 %v14221_v20 }
 0x450   : > { %v11341_v6 = vsel %vm2369_vm0, 0.0, %v2321_v18  ;;  %v11344_v45 = vsel %vm2369_vm0, %v2321_v18, 0.0  ;;  %v2244_v48 = vmax.f32 %v2180_v13, 0.0  ;;  %v2106_v54 = vmul.f32 %v11067_v41, %v1976_v12  ;;  %3522 = vmatprep.mubr.f32.mxu1 %v2546_v27 }
 0x451   : > { %7921 = vmatmul.mubr.msk.f32.gmra.mrb[30].mxu1 %vm11095_vm2, %v2320_v30  ;;  %v2547_v56 = vrot.slane %v11341_v6, 1  ;;  %v2548_v11 = vrot.slane %v11344_v45, 1 }
 0x452   : > { %v2322_v5 = vrot.slane %v2244_v48, 5  ;;  %v2182_v3 = vadd.f32 %v11072_v43, %v2106_v54  ;;  %v11352_v21 = vpop.f32.mrb[38].mxu0  ;;  %8538 = vmatpush1.bf16.msra.mxu1 %v8537_v31 }
 0x453   : > { %14225 = vst [vmem:[#allocation58_spill] sm:$0xff] %v11352_v21  ;;  %v1982_v19 = vpop.f32.mrb[39].mxu0  ;;  %v2549_v29 = vsel %vm2498_vm1, %v2547_v56, %v2548_v11  ;;  %8539 = vmatprep.subr.bf16.mxu1 %v14221_v20 }
 0x454   : > { %v11357_v12 = vsel %vm2369_vm0, 0.0, %v2322_v5  ;;  %v11360_v30 = vsel %vm2369_vm0, %v2322_v5, 0.0  ;;  %v2246_v13 = vmax.f32 %v2182_v3, 0.0  ;;  %v2108_v27 = vmul.f32 %v11067_v41, %v1982_v19  ;;  %3527 = vmatprep.mubr.f32.mxu1 %v2549_v29 }
 0x455   : > { %7923 = vmatmul.mubr.msk.f32.gmra.mrb[32].mxu1 %vm11095_vm2, %v2321_v18  ;;  %v2550_v31 = vrot.slane %v11357_v12, 1  ;;  %v2551_v48 = vrot.slane %v11360_v30, 1 }
 0x456   : > { %v2323_v54 = vrot.slane %v2246_v13, 5  ;;  %v2184_v56 = vadd.f32 %v11072_v43, %v2108_v27  ;;  %v11368_v11 = vpop.f32.mrb[40].mxu0 }
 0x457   : > { %14226 = vst [vmem:[#allocation59_spill] sm:$0xff] %v11368_v11  ;;  %v1988_v21 = vpop.f32.mrb[41].mxu0  ;;  %v2552_v51 = vsel %vm2498_vm1, %v2550_v31, %v2551_v48 }
 0x458   : > { %v11372_v3 = vsel %vm2369_vm0, 0.0, %v2323_v54  ;;  %v11375_v29 = vsel %vm2369_vm0, %v2323_v54, 0.0  ;;  %v2248_v19 = vmax.f32 %v2184_v56, 0.0  ;;  %v2110_v18 = vmul.f32 %v11067_v41, %v1988_v21  ;;  %3532 = vmatprep.mubr.f32.mxu1 %v2552_v51 }
 0x459   : > { %7925 = vmatmul.mubr.msk.f32.gmra.mrb[34].mxu1 %vm11095_vm2, %v2322_v5  ;;  %v2553_v13 = vrot.slane %v11372_v3, 1  ;;  %v2554_v27 = vrot.slane %v11375_v29, 1 }
 0x45a   : > { %v2324_v11 = vrot.slane %v2248_v19, 5  ;;  %v2186_v31 = vadd.f32 %v11072_v43, %v2110_v18  ;;  %v11383_v48 = vpop.f32.mrb[42].mxu0 }
 0x45b   : > { %14227 = vst [vmem:[#allocation60_spill] sm:$0xff] %v11383_v48  ;;  %v1994_v28 = vpop.f32.mrb[43].mxu0  ;;  %v2555_v7 = vsel %vm2498_vm1, %v2553_v13, %v2554_v27 }
 0x45c   : > { %v11387_v56 = vsel %vm2369_vm0, 0.0, %v2324_v11  ;;  %v11390_v51 = vsel %vm2369_vm0, %v2324_v11, 0.0  ;;  %v2250_v21 = vmax.f32 %v2186_v31, 0.0  ;;  %v2112_v5 = vmul.f32 %v11067_v41, %v1994_v28  ;;  %3537 = vmatprep.mubr.f32.mxu1 %v2555_v7 }
 0x45d   : > { %7927 = vmatmul.mubr.msk.f32.gmra.mrb[36].mxu1 %vm11095_vm2, %v2323_v54  ;;  %v2556_v19 = vrot.slane %v11387_v56, 1  ;;  %v2557_v18 = vrot.slane %v11390_v51, 1 }
 0x45e   : > { %v2325_v48 = vrot.slane %v2250_v21, 5  ;;  %v2188_v13 = vadd.f32 %v11072_v43, %v2112_v5  ;;  %v11398_v27 = vpop.f32.mrb[44].mxu0 }
 0x45f   : > { %14228 = vst [vmem:[#allocation61_spill] sm:$0xff] %v11398_v27  ;;  %v2000_v52 = vpop.f32.mrb[45].mxu0  ;;  %v2558_v32 = vsel %vm2498_vm1, %v2556_v19, %v2557_v18 }
 0x460   : > { %v11402_v31 = vsel %vm2369_vm0, 0.0, %v2325_v48  ;;  %v11405_v7 = vsel %vm2369_vm0, %v2325_v48, 0.0  ;;  %v2252_v28 = vmax.f32 %v2188_v13, 0.0  ;;  %v2114_v54 = vmul.f32 %v11067_v41, %v2000_v52  ;;  %3542 = vmatprep.mubr.f32.mxu1 %v2558_v32 }
 0x461   : > { %7929 = vmatmul.mubr.msk.f32.gmra.mrb[38].mxu1 %vm11095_vm2, %v2324_v11  ;;  %v2559_v21 = vrot.slane %v11402_v31, 1  ;;  %v2560_v5 = vrot.slane %v11405_v7, 1 }
 0x462   : > { %v2326_v27 = vrot.slane %v2252_v28, 5  ;;  %v2190_v19 = vadd.f32 %v11072_v43, %v2114_v54  ;;  %v11413_v18 = vpop.f32.mrb[46].mxu0 }
 0x463   : > { %14229 = vst [vmem:[#allocation62_spill] sm:$0xff] %v11413_v18  ;;  %v2006_v16 = vpop.f32.mrb[47].mxu0  ;;  %v2561_v1 = vsel %vm2498_vm1, %v2559_v21, %v2560_v5 }
 0x464   : > { %v11417_v13 = vsel %vm2369_vm0, 0.0, %v2326_v27  ;;  %v11420_v32 = vsel %vm2369_vm0, %v2326_v27, 0.0  ;;  %v2254_v52 = vmax.f32 %v2190_v19, 0.0  ;;  %v2116_v11 = vmul.f32 %v11067_v41, %v2006_v16  ;;  %3547 = vmatprep.mubr.f32.mxu1 %v2561_v1 }
 0x465   : > { %7931 = vmatmul.mubr.msk.f32.gmra.mrb[40].mxu1 %vm11095_vm2, %v2325_v48  ;;  %v2562_v28 = vrot.slane %v11417_v13, 1  ;;  %v2563_v54 = vrot.slane %v11420_v32, 1 }
 0x466   : > { %v2327_v18 = vrot.slane %v2254_v52, 5  ;;  %v2192_v21 = vadd.f32 %v11072_v43, %v2116_v11  ;;  %v11428_v5 = vpop.f32.mrb[48].mxu0 }
 0x467   : > { %14230 = vst [vmem:[#allocation63_spill] sm:$0xff] %v11428_v5  ;;  %v2012_v53 = vpop.f32.mrb[49].mxu0  ;;  %v2564_v47 = vsel %vm2498_vm1, %v2562_v28, %v2563_v54 }
 0x468   : > { %v11432_v19 = vsel %vm2369_vm0, 0.0, %v2327_v18  ;;  %v11435_v1 = vsel %vm2369_vm0, %v2327_v18, 0.0  ;;  %v2256_v16 = vmax.f32 %v2192_v21, 0.0  ;;  %v2118_v48 = vmul.f32 %v11067_v41, %v2012_v53  ;;  %3552 = vmatprep.mubr.f32.mxu1 %v2564_v47 }
 0x469   : > { %14231 = vst [vmem:[#allocation64_spill] sm:$0xff] %v11432_v19  ;;  %14232 = vst [vmem:[#allocation65_spill] sm:$0xff] %v11435_v1  ;;  %7933 = vmatmul.mubr.msk.f32.gmra.mrb[42].mxu1 %vm11095_vm2, %v2326_v27  ;;  %v2565_v52 = vrot.slane %v11432_v19, 1  ;;  %v2566_v11 = vrot.slane %v11435_v1, 1 }
 0x46a   : > { %v2328_v5 = vrot.slane %v2256_v16, 5  ;;  %v2194_v28 = vadd.f32 %v11072_v43, %v2118_v48  ;;  %v11443_v54 = vpop.f32.mrb[50].mxu0 }
 0x46b   : > { %14233 = vst [vmem:[#allocation66_spill] sm:$0xff] %v11443_v54  ;;  %v2018_v42 = vpop.f32.mrb[51].mxu0  ;;  %v2567_v37 = vsel %vm2498_vm1, %v2565_v52, %v2566_v11 }
 0x46c   : > { %v11447_v21 = vsel %vm2369_vm0, 0.0, %v2328_v5  ;;  %v11450_v47 = vsel %vm2369_vm0, %v2328_v5, 0.0  ;;  %v2258_v53 = vmax.f32 %v2194_v28, 0.0  ;;  %v2120_v27 = vmul.f32 %v11067_v41, %v2018_v42  ;;  %3557 = vmatprep.mubr.f32.mxu1 %v2567_v37 }
 0x46d   : > { %14234 = vst [vmem:[#allocation67_spill] sm:$0xff] %v11447_v21  ;;  %14235 = vst [vmem:[#allocation68_spill] sm:$0xff] %v11450_v47  ;;  %7935 = vmatmul.mubr.msk.f32.gmra.mrb[44].mxu1 %vm11095_vm2, %v2327_v18  ;;  %v2568_v16 = vrot.slane %v11447_v21, 1  ;;  %v2569_v48 = vrot.slane %v11450_v47, 1 }
 0x46e   : > { %v2329_v54 = vrot.slane %v2258_v53, 5  ;;  %v2196_v52 = vadd.f32 %v11072_v43, %v2120_v27  ;;  %v11458_v11 = vpop.f32.mrb[52].mxu0 }
 0x46f   : > { %14236 = vst [vmem:[#allocation69_spill] sm:$0xff] %v11458_v11  ;;  %v2024_v1 = vpop.f32.mrb[53].mxu0  ;;  %v2570_v19 = vsel %vm2498_vm1, %v2568_v16, %v2569_v48 }
 0x470   : > { %v11462_v28 = vsel %vm2369_vm0, 0.0, %v2329_v54  ;;  %v11465_v37 = vsel %vm2369_vm0, %v2329_v54, 0.0  ;;  %v2260_v42 = vmax.f32 %v2196_v52, 0.0  ;;  %v2122_v18 = vmul.f32 %v11067_v41, %v2024_v1  ;;  %3562 = vmatprep.mubr.f32.mxu1 %v2570_v19 }
 0x471   : > { %14237 = vst [vmem:[#allocation70_spill] sm:$0xff] %v11462_v28  ;;  %14238 = vst [vmem:[#allocation71_spill] sm:$0xff] %v11465_v37  ;;  %7937 = vmatmul.mubr.msk.f32.gmra.mrb[46].mxu1 %vm11095_vm2, %v2328_v5  ;;  %v2571_v53 = vrot.slane %v11462_v28, 1  ;;  %v2572_v27 = vrot.slane %v11465_v37, 1 }
 0x472   : > { %v2330_v11 = vrot.slane %v2260_v42, 5  ;;  %v2198_v16 = vadd.f32 %v11072_v43, %v2122_v18  ;;  %v11473_v48 = vpop.f32.mrb[54].mxu0 }
 0x473   : > { %14239 = vst [vmem:[#allocation72_spill] sm:$0xff] %v11473_v48  ;;  %v2030_v47 = vpop.f32.mrb[55].mxu0  ;;  %v2573_v21 = vsel %vm2498_vm1, %v2571_v53, %v2572_v27 }
 0x474   : > { %v11477_v52 = vsel %vm2369_vm0, 0.0, %v2330_v11  ;;  %v11480_v19 = vsel %vm2369_vm0, %v2330_v11, 0.0  ;;  %v2262_v1 = vmax.f32 %v2198_v16, 0.0  ;;  %v2124_v5 = vmul.f32 %v11067_v41, %v2030_v47  ;;  %3567 = vmatprep.mubr.f32.mxu1 %v2573_v21 }
 0x475   : > { %14240 = vst [vmem:[#allocation73_spill] sm:$0xff] %v11477_v52  ;;  %14241 = vst [vmem:[#allocation74_spill] sm:$0xff] %v11480_v19  ;;  %7939 = vmatmul.mubr.msk.f32.gmra.mrb[48].mxu1 %vm11095_vm2, %v2329_v54  ;;  %v2574_v42 = vrot.slane %v11477_v52, 1  ;;  %v2575_v18 = vrot.slane %v11480_v19, 1 }
 0x476   : > { %v2331_v48 = vrot.slane %v2262_v1, 5  ;;  %v2200_v53 = vadd.f32 %v11072_v43, %v2124_v5  ;;  %v11488_v27 = vpop.f32.mrb[56].mxu0 }
 0x477   : > { %14242 = vst [vmem:[#allocation75_spill] sm:$0xff] %v11488_v27  ;;  %v2036_v37 = vpop.f32.mrb[57].mxu0  ;;  %v2576_v28 = vsel %vm2498_vm1, %v2574_v42, %v2575_v18 }
 0x478   : > { %v11492_v16 = vsel %vm2369_vm0, 0.0, %v2331_v48  ;;  %v11495_v21 = vsel %vm2369_vm0, %v2331_v48, 0.0  ;;  %v2264_v47 = vmax.f32 %v2200_v53, 0.0  ;;  %v2126_v54 = vmul.f32 %v11067_v41, %v2036_v37  ;;  %3572 = vmatprep.mubr.f32.mxu1 %v2576_v28 }
 0x479   : > { %14243 = vst [vmem:[#allocation76_spill] sm:$0xff] %v11492_v16  ;;  %14244 = vst [vmem:[#allocation77_spill] sm:$0xff] %v11495_v21  ;;  %7941 = vmatmul.mubr.msk.f32.gmra.mrb[50].mxu1 %vm11095_vm2, %v2330_v11  ;;  %v2577_v1 = vrot.slane %v11492_v16, 1  ;;  %v2578_v5 = vrot.slane %v11495_v21, 1 }
 0x47a   : > { %v2332_v27 = vrot.slane %v2264_v47, 5  ;;  %v2202_v42 = vadd.f32 %v11072_v43, %v2126_v54  ;;  %v11503_v18 = vpop.f32.mrb[58].mxu0 }
 0x47b   : > { %14245 = vst [vmem:[#allocation78_spill] sm:$0xff] %v11503_v18  ;;  %v2042_v19 = vpop.f32.mrb[59].mxu0  ;;  %v2579_v52 = vsel %vm2498_vm1, %v2577_v1, %v2578_v5 }
 0x47c   : > { %v11507_v53 = vsel %vm2369_vm0, 0.0, %v2332_v27  ;;  %v11510_v28 = vsel %vm2369_vm0, %v2332_v27, 0.0  ;;  %v2266_v37 = vmax.f32 %v2202_v42, 0.0  ;;  %v2128_v11 = vmul.f32 %v11067_v41, %v2042_v19  ;;  %3577 = vmatprep.mubr.f32.mxu1 %v2579_v52 }
 0x47d   : > { %14246 = vst [vmem:[#allocation79_spill] sm:$0xff] %v11507_v53  ;;  %14247 = vst [vmem:[#allocation80_spill] sm:$0xff] %v11510_v28  ;;  %7943 = vmatmul.mubr.msk.f32.gmra.mrb[52].mxu1 %vm11095_vm2, %v2331_v48  ;;  %v2580_v47 = vrot.slane %v11507_v53, 1  ;;  %v2581_v54 = vrot.slane %v11510_v28, 1 }
 0x47e   : > { %v2333_v18 = vrot.slane %v2266_v37, 5  ;;  %v2204_v1 = vadd.f32 %v11072_v43, %v2128_v11  ;;  %v11518_v5 = vpop.f32.mrb[60].mxu0 }
 0x47f   : > { %14248 = vst [vmem:[#allocation81_spill] sm:$0xff] %v11518_v5  ;;  %v2048_v21 = vpop.f32.mrb[61].mxu0  ;;  %v2582_v16 = vsel %vm2498_vm1, %v2580_v47, %v2581_v54 }
 0x480   : > { %v11522_v42 = vsel %vm2369_vm0, 0.0, %v2333_v18  ;;  %v11525_v52 = vsel %vm2369_vm0, %v2333_v18, 0.0  ;;  %v2268_v19 = vmax.f32 %v2204_v1, 0.0  ;;  %v2130_v48 = vmul.f32 %v11067_v41, %v2048_v21  ;;  %3582 = vmatprep.mubr.f32.mxu1 %v2582_v16 }
 0x481   : > { %14249 = vst [vmem:[#allocation82_spill] sm:$0xff] %v11522_v42  ;;  %14250 = vst [vmem:[#allocation83_spill] sm:$0xff] %v11525_v52  ;;  %7945 = vmatmul.mubr.msk.f32.gmra.mrb[54].mxu1 %vm11095_vm2, %v2332_v27  ;;  %v2583_v37 = vrot.slane %v11522_v42, 1  ;;  %v2584_v11 = vrot.slane %v11525_v52, 1 }
 0x482   : > { %v2334_v5 = vrot.slane %v2268_v19, 5  ;;  %v2206_v47 = vadd.f32 %v11072_v43, %v2130_v48  ;;  %v11533_v54 = vpop.f32.mrb[62].mxu0 }
 0x483   : > { %14251 = vst [vmem:[#allocation84_spill] sm:$0xff] %v11533_v54  ;;  %v2054_v28 = vpop.f32.mrb[63].mxu0  ;;  %v2585_v53 = vsel %vm2498_vm1, %v2583_v37, %v2584_v11 }
 0x484   : > { %v11537_v1 = vsel %vm2369_vm0, 0.0, %v2334_v5  ;;  %v11540_v16 = vsel %vm2369_vm0, %v2334_v5, 0.0  ;;  %v2270_v21 = vmax.f32 %v2206_v47, 0.0  ;;  %v2132_v27 = vmul.f32 %v11067_v41, %v2054_v28  ;;  %3587 = vmatprep.mubr.f32.mxu1 %v2585_v53 }
 0x485   : > { %14252 = vst [vmem:[#allocation85_spill] sm:$0xff] %v11537_v1  ;;  %14253 = vst [vmem:[#allocation86_spill] sm:$0xff] %v11540_v16  ;;  %7947 = vmatmul.mubr.msk.f32.gmra.mrb[56].mxu1 %vm11095_vm2, %v2333_v18  ;;  %v2586_v19 = vrot.slane %v11537_v1, 1  ;;  %v2587_v48 = vrot.slane %v11540_v16, 1 }
 0x486   : > { %v2335_v54 = vrot.slane %v2270_v21, 5  ;;  %v2208_v37 = vadd.f32 %v11072_v43, %v2132_v27 }
 0x487   : > { %v2588_v11 = vsel %vm2498_vm1, %v2586_v19, %v2587_v48  ;;  %v2757_v48 = vrot.slane %v11083_v57, 3 }
 0x488   : > { %v11550_v52 = vsel %vm2369_vm0, 0.0, %v2335_v54  ;;  %v11553_v47 = vsel %vm2369_vm0, %v2335_v54, 0.0  ;;  %v2272_v41 = vmax.f32 %v2208_v37, 0.0  ;;  %3592 = vmatprep.mubr.f32.mxu1 %v2588_v11  ;;  %v2758_v37 = vrot.slane %v11086_v58, 3 }
 0x489   : > { %14254 = vst [vmem:[#allocation87_spill] sm:$0xff] %v11550_v52  ;;  %14255 = vst [vmem:[#allocation88_spill] sm:$0xff] %v11553_v47  ;;  %7949 = vmatmul.mubr.msk.f32.gmra.mrb[58].mxu1 %vm11095_vm2, %v2334_v5  ;;  %v2589_v18 = vrot.slane %v11550_v52, 1  ;;  %v2590_v53 = vrot.slane %v11553_v47, 1 }
 0x48a   : > { %v2336_v28 = vrot.slane %v2272_v41, 5  ;;  %v3335_v41 = vld [vmem:[#allocation10 + $0x200] sm:$0xff] }
 0x48b   : > { %v2591_v43 = vsel %vm2498_vm1, %v2589_v18, %v2590_v53  ;;  %v3336_v18 = vld [vmem:[#allocation10 + $0x208] sm:$0xff]  ;;  %v2628_v53 = vrot.slane %v11083_v57, 2  ;;  %v2631_v57 = vrot.slane %v11101_v8, 2 }
 0x48c   : > { %v11561_v21 = vsel %vm2369_vm0, 0.0, %v2336_v28  ;;  %v11564_v27 = vsel %vm2369_vm0, %v2336_v28, 0.0  ;;  %3597 = vmatprep.mubr.f32.mxu1 %v2591_v43  ;;  %v2629_v43 = vrot.slane %v11086_v58, 2  ;;  %v8540_v47 = vpack.c.bf16 %v3336_v18, %v3335_v41  ;;  %v3339_v41 = vld [vmem:[#allocation10 + $0x220] sm:$0xff]  ;;  %v3340_v18 = vld [vmem:[#allocation10 + $0x228] sm:$0xff] }
 0x48d   : > { %14256 = vst [vmem:[#allocation89_spill] sm:$0xff] %v11561_v21  ;;  %14257 = vst [vmem:[#allocation90_spill] sm:$0xff] %v11564_v27  ;;  %7951 = vmatmul.mubr.msk.f32.gmra.mrb[60].mxu1 %vm11095_vm2, %v2335_v54  ;;  %v2592_v19 = vrot.slane %v11561_v21, 1  ;;  %v2593_v5 = vrot.slane %v11564_v27, 1  ;;  %v2759_v54 = vsel %vm2756_vm3, %v2757_v48, %v2758_v37  ;;  %v2760_v27 = vrot.slane %v11101_v8, 3 }
 0x48e   : > { %v2761_v21 = vrot.slane %v11104_v9, 3  ;;  %v2632_v58 = vrot.slane %v11104_v9, 2  ;;  %v2764_v48 = vrot.slane %v11120_v25, 3 }
 0x48f   : > { %v2594_v11 = vsel %vm2498_vm1, %v2592_v19, %v2593_v5  ;;  %v3337_v19 = vld [vmem:[#allocation10 + $0x210] sm:$0xff]  ;;  %v3338_v5 = vld [vmem:[#allocation10 + $0x218] sm:$0xff] }
 0x490   : > { %3602 = vmatprep.mubr.f32.mxu1 %v2594_v11  ;;  %v2630_v11 = vsel %vm2627_vm4, %v2628_v53, %v2629_v43  ;;  %v2762_v2 = vsel %vm2756_vm3, %v2760_v27, %v2761_v21  ;;  %v8543_v37 = vpack.c.bf16 %v3338_v5, %v3337_v19  ;;  %v2633_v53 = vsel %vm2627_vm4, %v2631_v57, %v2632_v58  ;;  %v3341_v19 = vld [vmem:[#allocation10 + $0x230] sm:$0xff]  ;;  %v3342_v5 = vld [vmem:[#allocation10 + $0x238] sm:$0xff] }
 0x491   : > { %7953 = vmatmul.mubr.msk.f32.gmra.mrb[62].mxu1 %vm11095_vm2, %v2336_v28  ;;  %v2763_v28 = vrot.slane %v11117_v24, 3  ;;  %v2634_v43 = vrot.slane %v11117_v24, 2  ;;  %v2766_v27 = vrot.slane %v11133_v40, 3  ;;  %v2637_v58 = vrot.slane %v11133_v40, 2 }
 0x492   : > { %3672 = vmatprep.mubr.f32.mxu1 %v2759_v54  ;;  %v2635_v54 = vrot.slane %v11120_v25, 2 }
 0x493   : > { %v2765_v21 = vsel %vm2756_vm3, %v2763_v28, %v2764_v48  ;;  %v2769_v48 = vrot.slane %v11149_v61, 3 }
 0x494   : > { %v2636_v57 = vsel %vm2627_vm4, %v2634_v43, %v2635_v54  ;;  %v2640_v54 = vrot.slane %v11149_v61, 2 }
 0x495   : > { %3673 = vmatmul.mubr.f32.vlgmr.msra.gmra.mrb[0].mxu1 %v2630_v11  ;;  %v2767_v11 = vrot.slane %v11136_v44, 3 }
 0x496   : > { %3677 = vmatprep.mubr.f32.mxu1 %v2762_v2  ;;  %8541 = vmatpush1.bf16.msra.mxu1 %v8540_v47  ;;  %v8546_v47 = vpack.c.bf16 %v3340_v18, %v3339_v41  ;;  %v2638_v2 = vrot.slane %v11136_v44, 2  ;;  %v3343_v41 = vld [vmem:[#allocation10 + $0x240] sm:$0xff]  ;;  %v3344_v18 = vld [vmem:[#allocation10 + $0x248] sm:$0xff] }
 0x497   : > { %8542 = vmatprep.subr.bf16.mxu1 %v14221_v20  ;;  %v2768_v28 = vsel %vm2756_vm3, %v2766_v27, %v2767_v11  ;;  %v2772_v11 = vrot.slane %v11165_v15, 3 }
 0x498   : > { %v2639_v43 = vsel %vm2627_vm4, %v2637_v58, %v2638_v2  ;;  %v2643_v2 = vrot.slane %v11165_v15, 2 }
 0x499   : > { %3678 = vmatmul.mubr.f32.gmra.mrb[2].mxu1 %v2633_v53  ;;  %v2770_v53 = vrot.slane %v11152_v62, 3 }
 0x49a   : > { %3682 = vmatprep.mubr.f32.mxu1 %v2765_v21  ;;  %8544 = vmatpush1.bf16.msra.mxu1 %v8543_v37  ;;  %v8549_v37 = vpack.c.bf16 %v3342_v5, %v3341_v19  ;;  %v2641_v21 = vrot.slane %v11152_v62, 2  ;;  %v3345_v19 = vld [vmem:[#allocation10 + $0x250] sm:$0xff]  ;;  %v3346_v5 = vld [vmem:[#allocation10 + $0x258] sm:$0xff] }
 0x49b   : > { %8545 = vmatprep.subr.bf16.mxu1 %v14221_v20  ;;  %v2771_v27 = vsel %vm2756_vm3, %v2769_v48, %v2770_v53  ;;  %v2775_v53 = vrot.slane %v11181_v35, 3 }
 0x49c   : > { %v2642_v58 = vsel %vm2627_vm4, %v2640_v54, %v2641_v21  ;;  %v2646_v21 = vrot.slane %v11181_v35, 2 }
 0x49d   : > { %3683 = vmatmul.mubr.f32.gmra.mrb[4].mxu1 %v2636_v57  ;;  %v2773_v57 = vrot.slane %v11168_v17, 3 }
 0x49e   : > { %3687 = vmatprep.mubr.f32.mxu1 %v2768_v28  ;;  %8547 = vmatpush1.bf16.msra.mxu1 %v8546_v47  ;;  %v8552_v47 = vpack.c.bf16 %v3344_v18, %v3343_v41  ;;  %v2644_v28 = vrot.slane %v11168_v17, 2  ;;  %v3347_v41 = vld [vmem:[#allocation10 + $0x260] sm:$0xff]  ;;  %v3348_v18 = vld [vmem:[#allocation10 + $0x268] sm:$0xff] }
 0x49f   : > { %8548 = vmatprep.subr.bf16.mxu1 %v14221_v20  ;;  %v2774_v48 = vsel %vm2756_vm3, %v2772_v11, %v2773_v57  ;;  %v2778_v57 = vrot.slane %v11197_v63, 3 }
 0x4a0   : > { %v2645_v54 = vsel %vm2627_vm4, %v2643_v2, %v2644_v28  ;;  %v2649_v28 = vrot.slane %v11197_v63, 2 }
 0x4a1   : > { %3688 = vmatmul.mubr.f32.gmra.mrb[6].mxu1 %v2639_v43  ;;  %v2776_v43 = vrot.slane %v11184_v36, 3 }
 0x4a2   : > { %3692 = vmatprep.mubr.f32.mxu1 %v2771_v27  ;;  %8550 = vmatpush1.bf16.msra.mxu1 %v8549_v37  ;;  %v8555_v37 = vpack.c.bf16 %v3346_v5, %v3345_v19  ;;  %v2647_v27 = vrot.slane %v11184_v36, 2  ;;  %v3349_v19 = vld [vmem:[#allocation10 + $0x270] sm:$0xff]  ;;  %v3350_v5 = vld [vmem:[#allocation10 + $0x278] sm:$0xff] }
 0x4a3   : > { %8551 = vmatprep.subr.bf16.mxu1 %v14221_v20  ;;  %v2777_v11 = vsel %vm2756_vm3, %v2775_v53, %v2776_v43  ;;  %v2781_v43 = vrot.slane %v11213_v23, 3 }
 0x4a4   : > { %v2648_v2 = vsel %vm2627_vm4, %v2646_v21, %v2647_v27  ;;  %v2652_v27 = vrot.slane %v11213_v23, 2 }
 0x4a5   : > { %3693 = vmatmul.mubr.f32.gmra.mrb[8].mxu1 %v2642_v58  ;;  %v2779_v58 = vrot.slane %v11200_v0, 3 }
 0x4a6   : > { %3697 = vmatprep.mubr.f32.mxu1 %v2774_v48  ;;  %8553 = vmatpush1.bf16.msra.mxu1 %v8552_v47  ;;  %v8558_v47 = vpack.c.bf16 %v3348_v18, %v3347_v41  ;;  %v2650_v48 = vrot.slane %v11200_v0, 2  ;;  %v3351_v41 = vld [vmem:[#allocation10 + $0x280] sm:$0xff]  ;;  %v3352_v18 = vld [vmem:[#allocation10 + $0x288] sm:$0xff] }
 0x4a7   : > { %8554 = vmatprep.subr.bf16.mxu1 %v14221_v20  ;;  %v2780_v53 = vsel %vm2756_vm3, %v2778_v57, %v2779_v58  ;;  %v2784_v58 = vrot.slane %v11229_v49, 3 }
 0x4a8   : > { %v2651_v21 = vsel %vm2627_vm4, %v2649_v28, %v2650_v48  ;;  %v2655_v48 = vrot.slane %v11229_v49, 2 }
 0x4a9   : > { %3698 = vmatmul.mubr.f32.gmra.mrb[10].mxu1 %v2645_v54  ;;  %v2782_v54 = vrot.slane %v11216_v26, 3 }
 0x4aa   : > { %3702 = vmatprep.mubr.f32.mxu1 %v2777_v11  ;;  %8556 = vmatpush1.bf16.msra.mxu1 %v8555_v37  ;;  %v8561_v37 = vpack.c.bf16 %v3350_v5, %v3349_v19  ;;  %v2653_v11 = vrot.slane %v11216_v26, 2  ;;  %v3353_v19 = vld [vmem:[#allocation10 + $0x290] sm:$0xff]  ;;  %v3354_v5 = vld [vmem:[#allocation10 + $0x298] sm:$0xff] }
 0x4ab   : > { %8557 = vmatprep.subr.bf16.mxu1 %v14221_v20  ;;  %v2783_v57 = vsel %vm2756_vm3, %v2781_v43, %v2782_v54  ;;  %v2787_v54 = vrot.slane %v11245_v10, 3 }
 0x4ac   : > { %v2654_v28 = vsel %vm2627_vm4, %v2652_v27, %v2653_v11  ;;  %v2658_v11 = vrot.slane %v11245_v10, 2 }
 0x4ad   : > { %3703 = vmatmul.mubr.f32.gmra.mrb[12].mxu1 %v2648_v2  ;;  %v2785_v2 = vrot.slane %v11232_v55, 3 }
 0x4ae   : > { %3707 = vmatprep.mubr.f32.mxu1 %v2780_v53  ;;  %8559 = vmatpush1.bf16.msra.mxu1 %v8558_v47  ;;  %v8564_v47 = vpack.c.bf16 %v3352_v18, %v3351_v41  ;;  %v2656_v53 = vrot.slane %v11232_v55, 2  ;;  %v3355_v41 = vld [vmem:[#allocation10 + $0x2a0] sm:$0xff]  ;;  %v3356_v18 = vld [vmem:[#allocation10 + $0x2a8] sm:$0xff] }
 0x4af   : > { %8560 = vmatprep.subr.bf16.mxu1 %v14221_v20  ;;  %v2786_v43 = vsel %vm2756_vm3, %v2784_v58, %v2785_v2  ;;  %v2790_v2 = vrot.slane %v11261_v33, 3 }
 0x4b0   : > { %v2657_v27 = vsel %vm2627_vm4, %v2655_v48, %v2656_v53  ;;  %v2661_v53 = vrot.slane %v11261_v33, 2 }
 0x4b1   : > { %3708 = vmatmul.mubr.f32.gmra.mrb[14].mxu1 %v2651_v21  ;;  %v2788_v21 = vrot.slane %v11248_v22, 3 }
 0x4b2   : > { %3712 = vmatprep.mubr.f32.mxu1 %v2783_v57  ;;  %8562 = vmatpush1.bf16.msra.mxu1 %v8561_v37  ;;  %v8567_v37 = vpack.c.bf16 %v3354_v5, %v3353_v19  ;;  %v2659_v57 = vrot.slane %v11248_v22, 2  ;;  %v3357_v19 = vld [vmem:[#allocation10 + $0x2b0] sm:$0xff]  ;;  %v3358_v5 = vld [vmem:[#allocation10 + $0x2b8] sm:$0xff] }
 0x4b3   : > { %8563 = vmatprep.subr.bf16.mxu1 %v14221_v20  ;;  %v2789_v58 = vsel %vm2756_vm3, %v2787_v54, %v2788_v21  ;;  %v2793_v21 = vrot.slane %v11277_v4, 3 }
 0x4b4   : > { %v2660_v48 = vsel %vm2627_vm4, %v2658_v11, %v2659_v57  ;;  %v2664_v57 = vrot.slane %v11277_v4, 2 }
 0x4b5   : > { %3713 = vmatmul.mubr.f32.gmra.mrb[16].mxu1 %v2654_v28  ;;  %v2791_v28 = vrot.slane %v11264_v60, 3 }
 0x4b6   : > { %3717 = vmatprep.mubr.f32.mxu1 %v2786_v43  ;;  %8565 = vmatpush1.bf16.msra.mxu1 %v8564_v47  ;;  %v8570_v47 = vpack.c.bf16 %v3356_v18, %v3355_v41  ;;  %v2662_v43 = vrot.slane %v11264_v60, 2  ;;  %v3359_v41 = vld [vmem:[#allocation10 + $0x2c0] sm:$0xff]  ;;  %v3360_v18 = vld [vmem:[#allocation10 + $0x2c8] sm:$0xff] }
 0x4b7   : > { %8566 = vmatprep.subr.bf16.mxu1 %v14221_v20  ;;  %v2792_v54 = vsel %vm2756_vm3, %v2790_v2, %v2791_v28  ;;  %v2796_v28 = vrot.slane %v11293_v34, 3 }
 0x4b8   : > { %v2663_v11 = vsel %vm2627_vm4, %v2661_v53, %v2662_v43  ;;  %v2667_v43 = vrot.slane %v11293_v34, 2 }
 0x4b9   : > { %3718 = vmatmul.mubr.f32.gmra.mrb[18].mxu1 %v2657_v27  ;;  %v2794_v27 = vrot.slane %v11280_v50, 3 }
 0x4ba   : > { %3722 = vmatprep.mubr.f32.mxu1 %v2789_v58  ;;  %8568 = vmatpush1.bf16.msra.mxu1 %v8567_v37  ;;  %v8573_v37 = vpack.c.bf16 %v3358_v5, %v3357_v19  ;;  %v2665_v58 = vrot.slane %v11280_v50, 2  ;;  %v3361_v19 = vld [vmem:[#allocation10 + $0x2d0] sm:$0xff]  ;;  %v3362_v5 = vld [vmem:[#allocation10 + $0x2d8] sm:$0xff] }
 0x4bb   : > { %8569 = vmatprep.subr.bf16.mxu1 %v14221_v20  ;;  %v2795_v2 = vsel %vm2756_vm3, %v2793_v21, %v2794_v27  ;;  %v2799_v27 = vrot.slane %v11309_v14, 3 }
 0x4bc   : > { %v2666_v53 = vsel %vm2627_vm4, %v2664_v57, %v2665_v58  ;;  %v2670_v58 = vrot.slane %v11309_v14, 2 }
 0x4bd   : > { %3723 = vmatmul.mubr.f32.gmra.mrb[20].mxu1 %v2660_v48  ;;  %v2797_v48 = vrot.slane %v11296_v38, 3 }
 0x4be   : > { %3727 = vmatprep.mubr.f32.mxu1 %v2792_v54  ;;  %8571 = vmatpush1.bf16.msra.mxu1 %v8570_v47  ;;  %v8576_v47 = vpack.c.bf16 %v3360_v18, %v3359_v41  ;;  %v2668_v54 = vrot.slane %v11296_v38, 2  ;;  %v3363_v41 = vld [vmem:[#allocation10 + $0x2e0] sm:$0xff]  ;;  %v3364_v18 = vld [vmem:[#allocation10 + $0x2e8] sm:$0xff] }
 0x4bf   : > { %8572 = vmatprep.subr.bf16.mxu1 %v14221_v20  ;;  %v2798_v21 = vsel %vm2756_vm3, %v2796_v28, %v2797_v48  ;;  %v2802_v48 = vrot.slane %v11325_v59, 3 }
 0x4c0   : > { %v2669_v57 = vsel %vm2627_vm4, %v2667_v43, %v2668_v54  ;;  %v2673_v54 = vrot.slane %v11325_v59, 2 }
 0x4c1   : > { %3728 = vmatmul.mubr.f32.gmra.mrb[22].mxu1 %v2663_v11  ;;  %v2800_v11 = vrot.slane %v11312_v46, 3 }
 0x4c2   : > { %3732 = vmatprep.mubr.f32.mxu1 %v2795_v2  ;;  %8574 = vmatpush1.bf16.msra.mxu1 %v8573_v37  ;;  %v8579_v37 = vpack.c.bf16 %v3362_v5, %v3361_v19  ;;  %v2671_v2 = vrot.slane %v11312_v46, 2  ;;  %v3365_v19 = vld [vmem:[#allocation10 + $0x2f0] sm:$0xff]  ;;  %v3366_v5 = vld [vmem:[#allocation10 + $0x2f8] sm:$0xff]  ;;  %v3368_v46 = vld [vmem:[#allocation10 + $0x308] sm:$0xff] }
 0x4c3   : > { %8575 = vmatprep.subr.bf16.mxu1 %v14221_v20  ;;  %v2801_v28 = vsel %vm2756_vm3, %v2799_v27, %v2800_v11  ;;  %v2805_v11 = vrot.slane %v11341_v6, 3 }
 0x4c4   : > { %v2672_v43 = vsel %vm2627_vm4, %v2670_v58, %v2671_v2  ;;  %v2676_v2 = vrot.slane %v11341_v6, 2 }
 0x4c5   : > { %3733 = vmatmul.mubr.f32.gmra.mrb[24].mxu1 %v2666_v53  ;;  %v2803_v53 = vrot.slane %v11328_v39, 3 }
 0x4c6   : > { %3737 = vmatprep.mubr.f32.mxu1 %v2798_v21  ;;  %8577 = vmatpush1.bf16.msra.mxu1 %v8576_v47  ;;  %v8582_v47 = vpack.c.bf16 %v3364_v18, %v3363_v41  ;;  %v2674_v21 = vrot.slane %v11328_v39, 2  ;;  %v8585_v41 = vpack.c.bf16 %v3366_v5, %v3365_v19  ;;  %v2680_v19 = vrot.slane %v11360_v30, 2 }
 0x4c7   : > { %8578 = vmatprep.subr.bf16.mxu1 %v14221_v20  ;;  %v2804_v27 = vsel %vm2756_vm3, %v2802_v48, %v2803_v53  ;;  %v2808_v53 = vrot.slane %v11357_v12, 3 }
 0x4c8   : > { %v2675_v58 = vsel %vm2627_vm4, %v2673_v54, %v2674_v21  ;;  %v2811_v54 = vrot.slane %v11372_v3, 3  ;;  %v2812_v21 = vrot.slane %v11375_v29, 3 }
 0x4c9   : > { %3738 = vmatmul.mubr.f32.gmra.mrb[26].mxu1 %v2669_v57  ;;  %v3367_v57 = vld [vmem:[#allocation10 + $0x300] sm:$0xff] }
 0x4ca   : > { %3742 = vmatprep.mubr.f32.mxu1 %v2801_v28  ;;  %8580 = vmatpush1.bf16.msra.mxu1 %v8579_v37  ;;  %v2806_v37 = vrot.slane %v11344_v45, 3  ;;  %v11685_v18 = vpack.c.bf16 %v3368_v46, %v3367_v57  ;;  %v2677_v28 = vrot.slane %v11344_v45, 2 }
 0x4cb   : > { %8581 = vmatprep.subr.bf16.mxu1 %v14221_v20 }
 0x4cc   : > { %v2807_v48 = vsel %vm2756_vm3, %v2805_v11, %v2806_v37  ;;  %v2678_v46 = vsel %vm2627_vm4, %v2676_v2, %v2677_v28  ;;  %v2683_v11 = vrot.slane %v11375_v29, 2  ;;  %v2813_v37 = vsel %vm2756_vm3, %v2811_v54, %v2812_v21 }
 0x4cd   : > { %3743 = vmatmul.mubr.f32.gmra.mrb[28].mxu1 %v2672_v43  ;;  %v2809_v43 = vrot.slane %v11360_v30, 3  ;;  %v2685_v28 = vrot.slane %v11387_v56, 2  ;;  %v2820_v21 = vrot.slane %v11417_v13, 3 }
 0x4ce   : > { %3747 = vmatprep.mubr.f32.mxu1 %v2804_v27  ;;  %8583 = vmatpush1.bf16.msra.mxu1 %v8582_v47  ;;  %v2679_v47 = vrot.slane %v11357_v12, 2  ;;  %v2682_v27 = vrot.slane %v11372_v3, 2 }
 0x4cf   : > { %8584 = vmatprep.subr.bf16.mxu1 %v14221_v20  ;;  %v2810_v5 = vsel %vm2756_vm3, %v2808_v53, %v2809_v43  ;;  %v2817_v43 = vrot.slane %v11402_v31, 3 }
 0x4d0   : > { %v2681_v57 = vsel %vm2627_vm4, %v2679_v47, %v2680_v19  ;;  %v2684_v2 = vsel %vm2627_vm4, %v2682_v27, %v2683_v11  ;;  %v2688_v19 = vrot.slane %v11402_v31, 2  ;;  %v2691_v11 = vrot.slane %v11417_v13, 2 }
 0x4d1   : > { %3748 = vmatmul.mubr.f32.gmra.mrb[30].mxu1 %v2675_v58  ;;  %v2815_v58 = vrot.slane %v11390_v51, 3 }
 0x4d2   : > { %3752 = vmatprep.mubr.f32.mxu1 %v2807_v48  ;;  %8586 = vmatpush1.bf16.msra.mxu1 %v8585_v41  ;;  %v2814_v41 = vrot.slane %v11387_v56, 3  ;;  %v2686_v48 = vrot.slane %v11390_v51, 2 }
 0x4d3   : > { %8588 = vmatprep.subr.bf16.mxu1 %v11685_v18 }
 0x4d4   : > { %v2816_v53 = vsel %vm2756_vm3, %v2814_v41, %v2815_v58  ;;  %v2687_v47 = vsel %vm2627_vm4, %v2685_v28, %v2686_v48  ;;  %v14258_v58 = vld [vmem:[#allocation64_spill] sm:$0xff]  ;;  %v14259_v28 = vld [vmem:[#allocation65_spill] sm:$0xff] }
 0x4d5   : > { %3753 = vmatmul.mubr.f32.gmra.mrb[32].mxu1 %v2678_v46  ;;  %v2818_v46 = vrot.slane %v11405_v7, 3  ;;  %v2824_v48 = vrot.slane %v14259_v28, 3 }
 0x4d6   : > { %3757 = vmatprep.mubr.f32.mxu1 %v2810_v5  ;;  %v2689_v5 = vrot.slane %v11405_v7, 2 }
 0x4d7   : > { %v2819_v54 = vsel %vm2756_vm3, %v2817_v43, %v2818_v46  ;;  %v2694_v43 = vrot.slane %v14258_v58, 2  ;;  %v2695_v46 = vrot.slane %v14259_v28, 2  ;;  %v14263_v28 = vld [vmem:[#allocation71_spill] sm:$0xff] }
 0x4d8   : > { %v2690_v27 = vsel %vm2627_vm4, %v2688_v19, %v2689_v5  ;;  %v14260_v19 = vld [vmem:[#allocation67_spill] sm:$0xff] }
 0x4d9   : > { %3758 = vmatmul.mubr.f32.gmra.mrb[34].mxu1 %v2681_v57  ;;  %v2821_v57 = vrot.slane %v11420_v32, 3  ;;  %v2826_v5 = vrot.slane %v14260_v19, 3 }
 0x4da   : > { %3762 = vmatprep.mubr.f32.mxu1 %v2813_v37  ;;  %v2692_v37 = vrot.slane %v11420_v32, 2 }
 0x4db   : > { %v2822_v41 = vsel %vm2756_vm3, %v2820_v21, %v2821_v57  ;;  %v2696_v21 = vsel %vm2627_vm4, %v2694_v43, %v2695_v46  ;;  %v2697_v57 = vrot.slane %v14260_v19, 2  ;;  %v14264_v46 = vld [vmem:[#allocation73_spill] sm:$0xff] }
 0x4dc   : > { %v2832_v19 = vrot.slane %v14264_v46, 3 }
 0x4dd   : > { %3763 = vmatmul.mubr.f32.gmra.mrb[36].mxu1 %v2684_v2  ;;  %v2823_v2 = vrot.slane %v14258_v58, 3 }
 0x4de   : > { %3767 = vmatprep.mubr.f32.mxu1 %v2816_v53  ;;  %v2693_v53 = vsel %vm2627_vm4, %v2691_v11, %v2692_v37  ;;  %v14262_v37 = vld [vmem:[#allocation70_spill] sm:$0xff] }
 0x4df   : > { %v2829_v58 = vrot.slane %v14262_v37, 3 }
 0x4e1   : > { %3768 = vmatmul.mubr.f32.gmra.mrb[38].mxu1 %v2687_v47  ;;  %v2825_v47 = vsel %vm2756_vm3, %v2823_v2, %v2824_v48  ;;  %v2700_v48 = vrot.slane %v14262_v37, 2 }
 0x4e2   : > { %3772 = vmatprep.mubr.f32.mxu1 %v2819_v54  ;;  %v14261_v54 = vld [vmem:[#allocation68_spill] sm:$0xff] }
 0x4e5   : > { %3773 = vmatmul.mubr.f32.gmra.mrb[40].mxu1 %v2690_v27  ;;  %v2827_v27 = vrot.slane %v14261_v54, 3 }
 0x4e6   : > { %3777 = vmatprep.mubr.f32.mxu1 %v2822_v41  ;;  %v2698_v41 = vrot.slane %v14261_v54, 2  ;;  %v14265_v54 = vld [vmem:[#allocation74_spill] sm:$0xff] }
 0x4e7   : > { %v2828_v11 = vsel %vm2756_vm3, %v2826_v5, %v2827_v27  ;;  %v2703_v27 = vrot.slane %v14264_v46, 2 }
 0x4e8   : > { %v2699_v2 = vsel %vm2627_vm4, %v2697_v57, %v2698_v41  ;;  %v14266_v41 = vld [vmem:[#allocation76_spill] sm:$0xff] }
 0x4e9   : > { %3778 = vmatmul.mubr.f32.gmra.mrb[42].mxu1 %v2693_v53  ;;  %v2830_v53 = vrot.slane %v14263_v28, 3  ;;  %v2835_v37 = vrot.slane %v14266_v41, 3 }
 0x4ea   : > { %3782 = vmatprep.mubr.f32.mxu1 %v2825_v47  ;;  %v2701_v47 = vrot.slane %v14263_v28, 2  ;;  %v14267_v28 = vld [vmem:[#allocation77_spill] sm:$0xff] }
 0x4eb   : > { %v2831_v43 = vsel %vm2756_vm3, %v2829_v58, %v2830_v53  ;;  %v2706_v53 = vrot.slane %v14266_v41, 2 }
 0x4ec   : > { %v2702_v5 = vsel %vm2627_vm4, %v2700_v48, %v2701_v47  ;;  %v14268_v47 = vld [vmem:[#allocation79_spill] sm:$0xff] }
 0x4ed   : > { %3783 = vmatmul.mubr.f32.gmra.mrb[44].mxu1 %v2696_v21  ;;  %v2833_v21 = vrot.slane %v14265_v54, 3  ;;  %v2838_v46 = vrot.slane %v14268_v47, 3 }
 0x4ee   : > { %3787 = vmatprep.mubr.f32.mxu1 %v2828_v11  ;;  %v2704_v11 = vrot.slane %v14265_v54, 2  ;;  %v14269_v54 = vld [vmem:[#allocation80_spill] sm:$0xff] }
 0x4ef   : > { %v2834_v57 = vsel %vm2756_vm3, %v2832_v19, %v2833_v21  ;;  %v2709_v21 = vrot.slane %v14268_v47, 2 }
 0x4f0   : > { %v2705_v58 = vsel %vm2627_vm4, %v2703_v27, %v2704_v11  ;;  %v2841_v11 = vrot.slane %v11522_v42, 3 }
 0x4f1   : > { %3788 = vmatmul.mubr.f32.gmra.mrb[46].mxu1 %v2699_v2  ;;  %v2836_v2 = vrot.slane %v14267_v28, 3 }
 0x4f2   : > { %3792 = vmatprep.mubr.f32.mxu1 %v2831_v43  ;;  %v2707_v43 = vrot.slane %v14267_v28, 2  ;;  %v14270_v28 = vld [vmem:[#allocation83_spill] sm:$0xff] }
 0x4f3   : > { %v2837_v48 = vsel %vm2756_vm3, %v2835_v37, %v2836_v2  ;;  %v2712_v2 = vrot.slane %v11522_v42, 2  ;;  %v3369_v42 = vld [vmem:[#allocation10 + $0x310] sm:$0xff] }
 0x4f4   : > { %v2708_v19 = vsel %vm2627_vm4, %v2706_v53, %v2707_v43  ;;  %v2844_v43 = vrot.slane %v11537_v1, 3 }
 0x4f5   : > { %3793 = vmatmul.mubr.f32.gmra.mrb[48].mxu1 %v2702_v5  ;;  %v2839_v5 = vrot.slane %v14269_v54, 3 }
 0x4f6   : > { %3797 = vmatprep.mubr.f32.mxu1 %v2834_v57  ;;  %v2710_v57 = vrot.slane %v14269_v54, 2 }
 0x4f7   : > { %v2840_v27 = vsel %vm2756_vm3, %v2838_v46, %v2839_v5  ;;  %v2715_v5 = vrot.slane %v11537_v1, 2 }
 0x4f8   : > { %v2711_v37 = vsel %vm2627_vm4, %v2709_v21, %v2710_v57  ;;  %v2847_v57 = vrot.slane %v11550_v52, 3 }
 0x4f9   : > { %3798 = vmatmul.mubr.f32.gmra.mrb[50].mxu1 %v2705_v58  ;;  %v2842_v58 = vrot.slane %v14270_v28, 3 }
 0x4fa   : > { %3802 = vmatprep.mubr.f32.mxu1 %v2837_v48  ;;  %v2713_v48 = vrot.slane %v14270_v28, 2  ;;  %v14271_v28 = vld [vmem:[#allocation88_spill] sm:$0xff] }
 0x4fb   : > { %v2843_v53 = vsel %vm2756_vm3, %v2841_v11, %v2842_v58  ;;  %v2718_v58 = vrot.slane %v11550_v52, 2 }
 0x4fc   : > { %v2714_v46 = vsel %vm2627_vm4, %v2712_v2, %v2713_v48  ;;  %v14272_v48 = vld [vmem:[#allocation89_spill] sm:$0xff] }
 0x4fd   : > { %3803 = vmatmul.mubr.f32.gmra.mrb[52].mxu1 %v2708_v19  ;;  %v2845_v19 = vrot.slane %v11540_v16, 3  ;;  %v2850_v1 = vrot.slane %v14272_v48, 3 }
 0x4fe   : > { %3807 = vmatprep.mubr.f32.mxu1 %v2840_v27  ;;  %v2716_v27 = vrot.slane %v11540_v16, 2  ;;  %v14273_v16 = vld [vmem:[#allocation90_spill] sm:$0xff] }
 0x4ff   : > { %v2846_v21 = vsel %vm2756_vm3, %v2844_v43, %v2845_v19  ;;  %v2721_v19 = vrot.slane %v14272_v48, 2 }
 0x500   : > { %v2717_v11 = vsel %vm2627_vm4, %v2715_v5, %v2716_v27  ;;  %v14274_v27 = vld [vmem:[#allocation38_spill] sm:$0xff] }
 0x501   : > { %3808 = vmatmul.mubr.f32.gmra.mrb[54].mxu1 %v2711_v37  ;;  %v2848_v37 = vrot.slane %v14271_v28, 3  ;;  %v3014_v52 = vrot.slane %v14274_v27, 5 }
 0x502   : > { %3812 = vmatprep.mubr.f32.mxu1 %v2843_v53  ;;  %v2719_v53 = vrot.slane %v14271_v28, 2  ;;  %v14275_v28 = vld [vmem:[#allocation39_spill] sm:$0xff] }
 0x503   : > { %v2849_v2 = vsel %vm2756_vm3, %v2847_v57, %v2848_v37  ;;  %v2886_v37 = vrot.slane %v14274_v27, 4  ;;  %v3371_v27 = vld [vmem:[#allocation10 + $0x320] sm:$0xff] }
 0x504   : > { %v2720_v43 = vsel %vm2627_vm4, %v2718_v58, %v2719_v53  ;;  %v3370_v58 = vld [vmem:[#allocation10 + $0x318] sm:$0xff] }
 0x505   : > { %3813 = vmatmul.mubr.f32.gmra.mrb[56].mxu1 %v2714_v46  ;;  %v2851_v46 = vrot.slane %v14273_v16, 3 }
 0x506   : > { %3817 = vmatprep.mubr.f32.mxu1 %v2846_v21  ;;  %v2722_v21 = vrot.slane %v14273_v16, 2 }
 0x507   : > { %v2852_v5 = vsel %vm2756_vm3, %v2850_v1, %v2851_v46  ;;  %v3018_v1 = vrot.slane %v11104_v9, 5  ;;  %v8591_v46 = vpack.c.bf16 %v3370_v58, %v3369_v42  ;;  %v2893_v58 = vrot.slane %v11120_v25, 4 }
 0x508   : > { %v2723_v57 = vsel %vm2627_vm4, %v2721_v19, %v2722_v21  ;;  %v2889_v19 = vrot.slane %v11101_v8, 4  ;;  %v2890_v21 = vrot.slane %v11104_v9, 4  ;;  %v3374_v9 = vld [vmem:[#allocation10 + $0x338] sm:$0xff] }
 0x509   : > { %3818 = vmatmul.mubr.f32.gmra.mrb[58].mxu1 %v2717_v11  ;;  %v3015_v11 = vrot.slane %v14275_v28, 5 }
 0x50a   : > { %3822 = vmatprep.mubr.f32.mxu1 %v2849_v2  ;;  %v2887_v2 = vrot.slane %v14275_v28, 4  ;;  %v3372_v28 = vld [vmem:[#allocation10 + $0x328] sm:$0xff] }
 0x50b   : > { %v3016_v53 = vsel %vm2369_vm0, %v3014_v52, %v3015_v11  ;;  %v3020_v52 = vrot.slane %v11117_v24, 5  ;;  %v3021_v11 = vrot.slane %v11120_v25, 5  ;;  %v8595_v42 = vpack.c.bf16 %v3372_v28, %v3371_v27 }
 0x50c   : > { %v2895_v27 = vrot.slane %v11133_v40, 4 }
 0x50d   : > { %3823 = vmatmul.mubr.f32.gmra.mrb[60].mxu1 %v2720_v43  ;;  %v3017_v43 = vrot.slane %v11101_v8, 5 }
 0x50e   : > { %3827 = vmatprep.mubr.f32.mxu1 %v2852_v5  ;;  %v2888_v5 = vsel %vm2885_vm5, %v2886_v37, %v2887_v2  ;;  %v2891_v37 = vsel %vm2885_vm5, %v2889_v19, %v2890_v21  ;;  %v2892_v2 = vrot.slane %v11117_v24, 4  ;;  %v2896_v19 = vrot.slane %v11136_v44, 4  ;;  %v3375_v21 = vld [vmem:[#allocation10 + $0x340] sm:$0xff] }
 0x510   : > { %v2894_v28 = vsel %vm2885_vm5, %v2892_v2, %v2893_v58  ;;  %v2898_v2 = vrot.slane %v11149_v61, 4  ;;  %v2899_v58 = vrot.slane %v11152_v62, 4 }
 0x511   : > { %3828 = vmatmul.mubr.f32.gmra.mrb[62].mxu1 %v2723_v57  ;;  %v3019_v57 = vsel %vm2369_vm0, %v3017_v43, %v3018_v1  ;;  %v3022_v43 = vsel %vm2369_vm0, %v3020_v52, %v3021_v11  ;;  %v3023_v1 = vrot.slane %v11133_v40, 5  ;;  %v3026_v52 = vrot.slane %v11149_v61, 5 }
 0x512   : > { %3897 = vmatprep.mubr.f32.mxu1 %v3016_v53  ;;  %v3373_v53 = vld [vmem:[#allocation10 + $0x330] sm:$0xff]  ;;  %v3027_v11 = vrot.slane %v11152_v62, 5 }
 0x515   : > { %3898 = vmatmul.mubr.f32.vlgmr.msra.gmra.mrb[0].mxu1 %v2888_v5  ;;  %v3024_v5 = vrot.slane %v11136_v44, 5 }
 0x516   : > { %3902 = vmatprep.mubr.f32.mxu1 %v3019_v57  ;;  %8590 = vmatpush3.bf16.msra.mxu1 %v11685_v18  ;;  %v8599_v18 = vpack.c.bf16 %v3374_v9, %v3373_v53  ;;  %v3376_v57 = vld [vmem:[#allocation10 + $0x348] sm:$0xff]  ;;  %v2897_v9 = vsel %vm2885_vm5, %v2895_v27, %v2896_v19  ;;  %v3377_v53 = vld [vmem:[#allocation10 + $0x350] sm:$0xff]  ;;  %v2901_v27 = vrot.slane %v11165_v15, 4  ;;  %v2902_v19 = vrot.slane %v11168_v17, 4 }
 0x517   : > { %8592 = vmatprep.subr.bf16.mxu1 %v8591_v46 }
 0x519   : > { %3903 = vmatmul.mubr.f32.gmra.mrb[2].mxu1 %v2891_v37  ;;  %v3025_v37 = vsel %vm2369_vm0, %v3023_v1, %v3024_v5  ;;  %v3029_v1 = vrot.slane %v11165_v15, 5  ;;  %v3030_v5 = vrot.slane %v11168_v17, 5 }
 0x51a   : > { %3907 = vmatprep.mubr.f32.mxu1 %v3022_v43  ;;  %8594 = vmatpush3.bf16.msra.mxu1 %v8591_v46  ;;  %v8603_v46 = vpack.c.bf16 %v3376_v57, %v3375_v21  ;;  %v3378_v43 = vld [vmem:[#allocation10 + $0x358] sm:$0xff]  ;;  %v2900_v21 = vsel %vm2885_vm5, %v2898_v2, %v2899_v58  ;;  %v3379_v57 = vld [vmem:[#allocation10 + $0x360] sm:$0xff]  ;;  %v2904_v2 = vrot.slane %v11181_v35, 4  ;;  %v2905_v58 = vrot.slane %v11184_v36, 4 }
 0x51b   : > { %8596 = vmatprep.subr.bf16.mxu1 %v8595_v42 }
 0x51d   : > { %3908 = vmatmul.mubr.f32.gmra.mrb[4].mxu1 %v2894_v28  ;;  %v3028_v28 = vsel %vm2369_vm0, %v3026_v52, %v3027_v11  ;;  %v3032_v52 = vrot.slane %v11181_v35, 5  ;;  %v3033_v11 = vrot.slane %v11184_v36, 5 }
 0x51e   : > { %3912 = vmatprep.mubr.f32.mxu1 %v3025_v37  ;;  %8598 = vmatpush3.bf16.msra.mxu1 %v8595_v42  ;;  %v8607_v42 = vpack.c.bf16 %v3378_v43, %v3377_v53  ;;  %v3380_v37 = vld [vmem:[#allocation10 + $0x368] sm:$0xff]  ;;  %v2903_v53 = vsel %vm2885_vm5, %v2901_v27, %v2902_v19  ;;  %v3381_v43 = vld [vmem:[#allocation10 + $0x370] sm:$0xff]  ;;  %v2907_v27 = vrot.slane %v11197_v63, 4  ;;  %v2908_v19 = vrot.slane %v11200_v0, 4 }
 0x51f   : > { %8600 = vmatprep.subr.bf16.mxu1 %v8599_v18 }
 0x521   : > { %3913 = vmatmul.mubr.f32.gmra.mrb[6].mxu1 %v2897_v9  ;;  %v3031_v9 = vsel %vm2369_vm0, %v3029_v1, %v3030_v5  ;;  %v3035_v1 = vrot.slane %v11197_v63, 5  ;;  %v3036_v5 = vrot.slane %v11200_v0, 5 }
 0x522   : > { %3917 = vmatprep.mubr.f32.mxu1 %v3028_v28  ;;  %8602 = vmatpush3.bf16.msra.mxu1 %v8599_v18  ;;  %v8611_v18 = vpack.c.bf16 %v3380_v37, %v3379_v57  ;;  %v3382_v28 = vld [vmem:[#allocation10 + $0x378] sm:$0xff]  ;;  %v2906_v57 = vsel %vm2885_vm5, %v2904_v2, %v2905_v58  ;;  %v3041_v58 = vrot.slane %v11229_v49, 5 }
 0x523   : > { %8604 = vmatprep.subr.bf16.mxu1 %v8603_v46  ;;  %v3037_v37 = vsel %vm2369_vm0, %v3035_v1, %v3036_v5  ;;  %v3044_v5 = vrot.slane %v11245_v10, 5 }
 0x525   : > { %3918 = vmatmul.mubr.f32.gmra.mrb[8].mxu1 %v2900_v21  ;;  %v3034_v21 = vsel %vm2369_vm0, %v3032_v52, %v3033_v11  ;;  %v3039_v52 = vrot.slane %v11216_v26, 5  ;;  %v2910_v11 = vrot.slane %v11213_v23, 4 }
 0x526   : > { %3922 = vmatprep.mubr.f32.mxu1 %v3031_v9  ;;  %8606 = vmatpush3.bf16.msra.mxu1 %v8603_v46  ;;  %v8615_v46 = vpack.c.bf16 %v3382_v28, %v3381_v43  ;;  %v3038_v9 = vrot.slane %v11213_v23, 5  ;;  %v3042_v43 = vrot.slane %v11232_v55, 5  ;;  %v2913_v28 = vrot.slane %v11229_v49, 4 }
 0x527   : > { %8608 = vmatprep.subr.bf16.mxu1 %v8607_v42 }
 0x528   : > { %v3040_v2 = vsel %vm2369_vm0, %v3038_v9, %v3039_v52  ;;  %v3043_v1 = vsel %vm2369_vm0, %v3041_v58, %v3042_v43  ;;  %v3047_v9 = vrot.slane %v11261_v33, 5  ;;  %v3048_v52 = vrot.slane %v11264_v60, 5 }
 0x529   : > { %3923 = vmatmul.mubr.f32.gmra.mrb[10].mxu1 %v2903_v53  ;;  %v2911_v53 = vrot.slane %v11216_v26, 4  ;;  %v3050_v58 = vrot.slane %v11277_v4, 5  ;;  %v3051_v43 = vrot.slane %v11280_v50, 5 }
 0x52a   : > { %3927 = vmatprep.mubr.f32.mxu1 %v3034_v21  ;;  %8610 = vmatpush3.bf16.msra.mxu1 %v8607_v42  ;;  %v2909_v42 = vsel %vm2885_vm5, %v2907_v27, %v2908_v19  ;;  %v2914_v21 = vrot.slane %v11232_v55, 4  ;;  %v2917_v19 = vrot.slane %v11248_v22, 4 }
 0x52b   : > { %8612 = vmatprep.subr.bf16.mxu1 %v8611_v18 }
 0x52c   : > { %v2915_v27 = vsel %vm2885_vm5, %v2913_v28, %v2914_v21  ;;  %v2922_v28 = vrot.slane %v11277_v4, 4  ;;  %v2923_v21 = vrot.slane %v11280_v50, 4 }
 0x52d   : > { %3928 = vmatmul.mubr.f32.gmra.mrb[12].mxu1 %v2906_v57  ;;  %v3045_v57 = vrot.slane %v11248_v22, 5 }
 0x52e   : > { %3932 = vmatprep.mubr.f32.mxu1 %v3037_v37  ;;  %8614 = vmatpush3.bf16.msra.mxu1 %v8611_v18  ;;  %v2912_v18 = vsel %vm2885_vm5, %v2910_v11, %v2911_v53  ;;  %v2919_v11 = vrot.slane %v11261_v33, 4  ;;  %v2920_v53 = vrot.slane %v11264_v60, 4 }
 0x52f   : > { %8616 = vmatprep.subr.bf16.mxu1 %v8615_v46  ;;  %v3046_v37 = vsel %vm2369_vm0, %v3044_v5, %v3045_v57  ;;  %v3053_v5 = vrot.slane %v11293_v34, 5  ;;  %v3054_v57 = vrot.slane %v11296_v38, 5 }
 0x531   : > { %3933 = vmatmul.mubr.f32.gmra.mrb[14].mxu1 %v2909_v42 }
 0x532   : > { %3937 = vmatprep.mubr.f32.mxu1 %v3040_v2  ;;  %8618 = vmatpush3.bf16.msra.mxu1 %v8615_v46  ;;  %v2916_v46 = vrot.slane %v11245_v10, 4  ;;  %v3049_v2 = vsel %vm2369_vm0, %v3047_v9, %v3048_v52  ;;  %v3056_v9 = vrot.slane %v11309_v14, 5  ;;  %v14276_v52 = vld [vmem:[#allocation55_spill] sm:$0xff] }
 0x533   : > { %8619 = vmatprep.subr.bf16.mxu1 %v14221_v20 }
 0x534   : > { %v2918_v42 = vsel %vm2885_vm5, %v2916_v46, %v2917_v19  ;;  %v2925_v46 = vrot.slane %v11293_v34, 4  ;;  %v2926_v19 = vrot.slane %v11296_v38, 4 }
 0x535   : > { %3938 = vmatmul.mubr.f32.gmra.mrb[16].mxu1 %v2912_v18  ;;  %v2921_v18 = vsel %vm2885_vm5, %v2919_v11, %v2920_v53  ;;  %v2928_v53 = vrot.slane %v11309_v14, 4 }
 0x536   : > { %3942 = vmatprep.mubr.f32.mxu1 %v3043_v1  ;;  %v3052_v1 = vsel %vm2369_vm0, %v3050_v58, %v3051_v43  ;;  %v2927_v11 = vsel %vm2885_vm5, %v2925_v46, %v2926_v19  ;;  %v3059_v43 = vrot.slane %v11325_v59, 5  ;;  %v2934_v19 = vrot.slane %v11341_v6, 4 }
 0x539   : > { %3943 = vmatmul.mubr.f32.gmra.mrb[18].mxu1 %v2915_v27  ;;  %v2924_v27 = vsel %vm2885_vm5, %v2922_v28, %v2923_v21  ;;  %v2931_v21 = vrot.slane %v11325_v59, 4 }
 0x53a   : > { %3947 = vmatprep.mubr.f32.mxu1 %v3046_v37  ;;  %v3055_v37 = vsel %vm2369_vm0, %v3053_v5, %v3054_v57  ;;  %v3062_v57 = vrot.slane %v11341_v6, 5 }
 0x53d   : > { %3948 = vmatmul.mubr.f32.gmra.mrb[20].mxu1 %v2918_v42  ;;  %v3057_v42 = vrot.slane %v14276_v52, 5 }
 0x53e   : > { %3952 = vmatprep.mubr.f32.mxu1 %v3049_v2  ;;  %v2929_v2 = vrot.slane %v14276_v52, 4 }
 0x53f   : > { %v3058_v58 = vsel %vm2369_vm0, %v3056_v9, %v3057_v42  ;;  %v3065_v42 = vrot.slane %v11357_v12, 5 }
 0x540   : > { %v2930_v28 = vsel %vm2885_vm5, %v2928_v53, %v2929_v2  ;;  %v2937_v2 = vrot.slane %v11357_v12, 4 }
 0x541   : > { %3953 = vmatmul.mubr.f32.gmra.mrb[22].mxu1 %v2921_v18  ;;  %v3060_v18 = vrot.slane %v11328_v39, 5 }
 0x542   : > { %3957 = vmatprep.mubr.f32.mxu1 %v3052_v1  ;;  %v2932_v1 = vrot.slane %v11328_v39, 4 }
 0x543   : > { %v3061_v5 = vsel %vm2369_vm0, %v3059_v43, %v3060_v18  ;;  %v3068_v18 = vrot.slane %v11372_v3, 5 }
 0x544   : > { %v2933_v46 = vsel %vm2885_vm5, %v2931_v21, %v2932_v1  ;;  %v2940_v1 = vrot.slane %v11372_v3, 4 }
 0x545   : > { %3958 = vmatmul.mubr.f32.gmra.mrb[24].mxu1 %v2924_v27  ;;  %v3063_v27 = vrot.slane %v11344_v45, 5 }
 0x546   : > { %3962 = vmatprep.mubr.f32.mxu1 %v3055_v37  ;;  %v2935_v37 = vrot.slane %v11344_v45, 4 }
 0x547   : > { %v3064_v9 = vsel %vm2369_vm0, %v3062_v57, %v3063_v27  ;;  %v3071_v27 = vrot.slane %v11387_v56, 5 }
 0x548   : > { %v2936_v53 = vsel %vm2885_vm5, %v2934_v19, %v2935_v37  ;;  %v2943_v37 = vrot.slane %v11387_v56, 4 }
 0x549   : > { %3963 = vmatmul.mubr.f32.gmra.mrb[26].mxu1 %v2927_v11  ;;  %v3066_v11 = vrot.slane %v11360_v30, 5 }
 0x54a   : > { %3967 = vmatprep.mubr.f32.mxu1 %v3058_v58  ;;  %v2938_v58 = vrot.slane %v11360_v30, 4 }
 0x54b   : > { %v3067_v43 = vsel %vm2369_vm0, %v3065_v42, %v3066_v11  ;;  %v3074_v11 = vrot.slane %v11402_v31, 5 }
 0x54c   : > { %v2939_v21 = vsel %vm2885_vm5, %v2937_v2, %v2938_v58  ;;  %v2946_v58 = vrot.slane %v11402_v31, 4 }
 0x54d   : > { %3968 = vmatmul.mubr.f32.gmra.mrb[28].mxu1 %v2930_v28  ;;  %v3069_v28 = vrot.slane %v11375_v29, 5 }
 0x54e   : > { %3972 = vmatprep.mubr.f32.mxu1 %v3061_v5  ;;  %v2941_v5 = vrot.slane %v11375_v29, 4 }
 0x54f   : > { %v3070_v57 = vsel %vm2369_vm0, %v3068_v18, %v3069_v28  ;;  %v3077_v28 = vrot.slane %v11417_v13, 5 }
 0x550   : > { %v2942_v19 = vsel %vm2885_vm5, %v2940_v1, %v2941_v5  ;;  %v2949_v5 = vrot.slane %v11417_v13, 4 }
 0x551   : > { %3973 = vmatmul.mubr.f32.gmra.mrb[30].mxu1 %v2933_v46  ;;  %v3072_v46 = vrot.slane %v11390_v51, 5 }
 0x552   : > { %3977 = vmatprep.mubr.f32.mxu1 %v3064_v9  ;;  %v2944_v9 = vrot.slane %v11390_v51, 4 }
 0x553   : > { %v3073_v42 = vsel %vm2369_vm0, %v3071_v27, %v3072_v46  ;;  %v14277_v46 = vld [vmem:[#allocation64_spill] sm:$0xff] }
 0x554   : > { %v2945_v2 = vsel %vm2885_vm5, %v2943_v37, %v2944_v9  ;;  %v14278_v37 = vld [vmem:[#allocation65_spill] sm:$0xff] }
 0x555   : > { %3978 = vmatmul.mubr.f32.gmra.mrb[32].mxu1 %v2936_v53  ;;  %v3075_v53 = vrot.slane %v11405_v7, 5  ;;  %v3081_v9 = vrot.slane %v14278_v37, 5 }
 0x556   : > { %3982 = vmatprep.mubr.f32.mxu1 %v3067_v43  ;;  %v2947_v43 = vrot.slane %v11405_v7, 4 }
 0x557   : > { %v3076_v18 = vsel %vm2369_vm0, %v3074_v11, %v3075_v53  ;;  %v2952_v11 = vrot.slane %v14277_v46, 4  ;;  %v2953_v53 = vrot.slane %v14278_v37, 4  ;;  %v14282_v37 = vld [vmem:[#allocation71_spill] sm:$0xff] }
 0x558   : > { %v2948_v1 = vsel %vm2885_vm5, %v2946_v58, %v2947_v43  ;;  %v14279_v58 = vld [vmem:[#allocation67_spill] sm:$0xff] }
 0x559   : > { %3983 = vmatmul.mubr.f32.gmra.mrb[34].mxu1 %v2939_v21  ;;  %v3078_v21 = vrot.slane %v11420_v32, 5  ;;  %v3083_v43 = vrot.slane %v14279_v58, 5 }
 0x55a   : > { %3987 = vmatprep.mubr.f32.mxu1 %v3070_v57  ;;  %v2950_v57 = vrot.slane %v11420_v32, 4 }
 0x55b   : > { %v3079_v27 = vsel %vm2369_vm0, %v3077_v28, %v3078_v21  ;;  %v2954_v28 = vsel %vm2885_vm5, %v2952_v11, %v2953_v53  ;;  %v2955_v21 = vrot.slane %v14279_v58, 4  ;;  %v14283_v53 = vld [vmem:[#allocation73_spill] sm:$0xff] }
 0x55c   : > { %v3089_v58 = vrot.slane %v14283_v53, 5 }
 0x55d   : > { %3988 = vmatmul.mubr.f32.gmra.mrb[36].mxu1 %v2942_v19  ;;  %v3080_v19 = vrot.slane %v14277_v46, 5 }
 0x55e   : > { %3992 = vmatprep.mubr.f32.mxu1 %v3073_v42  ;;  %v2951_v42 = vsel %vm2885_vm5, %v2949_v5, %v2950_v57  ;;  %v14281_v57 = vld [vmem:[#allocation70_spill] sm:$0xff] }
 0x55f   : > { %v3086_v46 = vrot.slane %v14281_v57, 5 }
 0x561   : > { %3993 = vmatmul.mubr.f32.gmra.mrb[38].mxu1 %v2945_v2  ;;  %v3082_v2 = vsel %vm2369_vm0, %v3080_v19, %v3081_v9  ;;  %v2958_v9 = vrot.slane %v14281_v57, 4 }
 0x562   : > { %3997 = vmatprep.mubr.f32.mxu1 %v3076_v18  ;;  %v14280_v18 = vld [vmem:[#allocation68_spill] sm:$0xff] }
 0x565   : > { %3998 = vmatmul.mubr.f32.gmra.mrb[40].mxu1 %v2948_v1  ;;  %v3084_v1 = vrot.slane %v14280_v18, 5 }
 0x566   : > { %4002 = vmatprep.mubr.f32.mxu1 %v3079_v27  ;;  %v2956_v27 = vrot.slane %v14280_v18, 4  ;;  %v14284_v18 = vld [vmem:[#allocation74_spill] sm:$0xff] }
 0x567   : > { %v3085_v5 = vsel %vm2369_vm0, %v3083_v43, %v3084_v1  ;;  %v2961_v1 = vrot.slane %v14283_v53, 4 }
 0x568   : > { %v2957_v19 = vsel %vm2885_vm5, %v2955_v21, %v2956_v27  ;;  %v3092_v27 = vrot.slane %v14266_v41, 5 }
 0x569   : > { %4003 = vmatmul.mubr.f32.gmra.mrb[42].mxu1 %v2951_v42  ;;  %v3087_v42 = vrot.slane %v14282_v37, 5 }
 0x56a   : > { %4007 = vmatprep.mubr.f32.mxu1 %v3082_v2  ;;  %v2959_v2 = vrot.slane %v14282_v37, 4  ;;  %v14285_v37 = vld [vmem:[#allocation77_spill] sm:$0xff] }
 0x56b   : > { %v3088_v11 = vsel %vm2369_vm0, %v3086_v46, %v3087_v42  ;;  %v2964_v42 = vrot.slane %v14266_v41, 4 }
 0x56c   : > { %v2960_v43 = vsel %vm2885_vm5, %v2958_v9, %v2959_v2  ;;  %v3095_v2 = vrot.slane %v14268_v47, 5 }
 0x56d   : > { %4008 = vmatmul.mubr.f32.gmra.mrb[44].mxu1 %v2954_v28  ;;  %v3090_v28 = vrot.slane %v14284_v18, 5 }
 0x56e   : > { %4012 = vmatprep.mubr.f32.mxu1 %v3085_v5  ;;  %v2962_v5 = vrot.slane %v14284_v18, 4 }
 0x56f   : > { %v3091_v21 = vsel %vm2369_vm0, %v3089_v58, %v3090_v28  ;;  %v2967_v28 = vrot.slane %v14268_v47, 4 }
 0x570   : > { %v2963_v46 = vsel %vm2885_vm5, %v2961_v1, %v2962_v5  ;;  %v14286_v5 = vld [vmem:[#allocation82_spill] sm:$0xff] }
 0x571   : > { %4013 = vmatmul.mubr.f32.gmra.mrb[46].mxu1 %v2957_v19  ;;  %v3093_v19 = vrot.slane %v14285_v37, 5  ;;  %v3098_v41 = vrot.slane %v14286_v5, 5 }
 0x572   : > { %4017 = vmatprep.mubr.f32.mxu1 %v3088_v11  ;;  %v2965_v11 = vrot.slane %v14285_v37, 4  ;;  %v14287_v37 = vld [vmem:[#allocation83_spill] sm:$0xff] }
 0x573   : > { %v3094_v9 = vsel %vm2369_vm0, %v3092_v27, %v3093_v19  ;;  %v2970_v19 = vrot.slane %v14286_v5, 4 }
 0x574   : > { %v2966_v58 = vsel %vm2885_vm5, %v2964_v42, %v2965_v11  ;;  %v14288_v11 = vld [vmem:[#allocation85_spill] sm:$0xff] }
 0x575   : > { %4018 = vmatmul.mubr.f32.gmra.mrb[48].mxu1 %v2960_v43  ;;  %v3096_v43 = vrot.slane %v14269_v54, 5  ;;  %v3101_v47 = vrot.slane %v14288_v11, 5 }
 0x576   : > { %4022 = vmatprep.mubr.f32.mxu1 %v3091_v21  ;;  %v2968_v21 = vrot.slane %v14269_v54, 4  ;;  %v14289_v54 = vld [vmem:[#allocation86_spill] sm:$0xff] }
 0x577   : > { %v3097_v1 = vsel %vm2369_vm0, %v3095_v2, %v3096_v43  ;;  %v2973_v43 = vrot.slane %v14288_v11, 4 }
 0x578   : > { %v2969_v27 = vsel %vm2885_vm5, %v2967_v28, %v2968_v21  ;;  %v14290_v21 = vld [vmem:[#allocation87_spill] sm:$0xff] }
 0x579   : > { %4023 = vmatmul.mubr.f32.gmra.mrb[50].mxu1 %v2963_v46  ;;  %v3099_v46 = vrot.slane %v14287_v37, 5  ;;  %v3104_v5 = vrot.slane %v14290_v21, 5 }
 0x57a   : > { %4027 = vmatprep.mubr.f32.mxu1 %v3094_v9  ;;  %v2971_v9 = vrot.slane %v14287_v37, 4  ;;  %v14291_v37 = vld [vmem:[#allocation88_spill] sm:$0xff] }
 0x57b   : > { %v3100_v42 = vsel %vm2369_vm0, %v3098_v41, %v3099_v46  ;;  %v2976_v46 = vrot.slane %v14290_v21, 4 }
 0x57c   : > { %v2972_v2 = vsel %vm2885_vm5, %v2970_v19, %v2971_v9  ;;  %v3107_v9 = vrot.slane %v14272_v48, 5 }
 0x57d   : > { %4028 = vmatmul.mubr.f32.gmra.mrb[52].mxu1 %v2966_v58  ;;  %v3102_v58 = vrot.slane %v14289_v54, 5 }
 0x57e   : > { %4032 = vmatprep.mubr.f32.mxu1 %v3097_v1  ;;  %v2974_v1 = vrot.slane %v14289_v54, 4 }
 0x57f   : > { %v3103_v28 = vsel %vm2369_vm0, %v3101_v47, %v3102_v58  ;;  %v2979_v58 = vrot.slane %v14272_v48, 4 }
 0x580   : > { %v2975_v41 = vsel %vm2885_vm5, %v2973_v43, %v2974_v1  ;;  %v14292_v1 = vld [vmem:[#allocation38_spill] sm:$0xff] }
 0x581   : > { %4033 = vmatmul.mubr.f32.gmra.mrb[54].mxu1 %v2969_v27  ;;  %v3105_v27 = vrot.slane %v14291_v37, 5  ;;  %v3143_v21 = vrot.slane %v14292_v1, 6 }
 0x582   : > { %4037 = vmatprep.mubr.f32.mxu1 %v3100_v42  ;;  %v2977_v42 = vrot.slane %v14291_v37, 4  ;;  %v14293_v37 = vld [vmem:[#allocation39_spill] sm:$0xff] }
 0x583   : > { %v3106_v19 = vsel %vm2369_vm0, %v3104_v5, %v3105_v27  ;;  %v3146_v27 = vrot.slane %v11101_v8, 6  ;;  %v3155_v8 = vrot.slane %v11149_v61, 6  ;;  %v3164_v61 = vrot.slane %v11197_v63, 6 }
 0x584   : > { %v2978_v47 = vsel %vm2885_vm5, %v2976_v46, %v2977_v42  ;;  %v3149_v42 = vrot.slane %v11117_v24, 6  ;;  %v3158_v24 = vrot.slane %v11165_v15, 6  ;;  %v3167_v15 = vrot.slane %v11213_v23, 6 }
 0x585   : > { %4038 = vmatmul.mubr.f32.gmra.mrb[56].mxu1 %v2972_v2  ;;  %v3108_v2 = vrot.slane %v14273_v16, 5  ;;  %v3173_v63 = vrot.slane %v11245_v10, 6  ;;  %v3176_v23 = vrot.slane %v11261_v33, 6  ;;  %v3182_v10 = vrot.slane %v11293_v34, 6 }
 0x586   : > { %4042 = vmatprep.mubr.f32.mxu1 %v3103_v28  ;;  %v2980_v28 = vrot.slane %v14273_v16, 4  ;;  %v3185_v33 = vrot.slane %v11309_v14, 6 }
 0x587   : > { %v3109_v43 = vsel %vm2369_vm0, %v3107_v9, %v3108_v2  ;;  %v3153_v2 = vrot.slane %v11136_v44, 6  ;;  %v3162_v44 = vrot.slane %v11184_v36, 6  ;;  %v3171_v36 = vrot.slane %v11232_v55, 6 }
 0x588   : > { %v2981_v5 = vsel %vm2885_vm5, %v2979_v58, %v2980_v28  ;;  %v3156_v28 = vrot.slane %v11152_v62, 6  ;;  %v3165_v62 = vrot.slane %v11200_v0, 6  ;;  %v3174_v0 = vrot.slane %v11248_v22, 6 }
 0x589   : > { %4043 = vmatmul.mubr.f32.gmra.mrb[58].mxu1 %v2975_v41  ;;  %v3144_v41 = vrot.slane %v14293_v37, 6  ;;  %v3152_v37 = vrot.slane %v11133_v40, 6  ;;  %v3161_v40 = vrot.slane %v11181_v35, 6  ;;  %v3170_v35 = vrot.slane %v11229_v49, 6 }
 0x58a   : > { %4047 = vmatprep.mubr.f32.mxu1 %v3106_v19  ;;  %v14294_v19 = vld [vmem:[#allocation41_spill] sm:$0xff]  ;;  %v3179_v49 = vrot.slane %v11277_v4, 6  ;;  %v3180_v55 = vrot.slane %v11280_v50, 6  ;;  %v3183_v22 = vrot.slane %v11296_v38, 6  ;;  %v3188_v4 = vrot.slane %v11325_v59, 6 }
 0x58b   : > { %v3147_v54 = vrot.slane %v14294_v19, 6  ;;  %v3145_v46 = vsel %vm3142_vm6, %v3143_v21, %v3144_v41  ;;  %v3154_v21 = vsel %vm3142_vm6, %v3152_v37, %v3153_v2  ;;  %v3163_v1 = vsel %vm3142_vm6, %v3161_v40, %v3162_v44  ;;  %v4394_v37 = vld [vmem:[#allocation14 + $0x8] sm:$0xff] }
 0x58c   : > { %v3166_v41 = vsel %vm3142_vm6, %v3164_v61, %v3165_v62  ;;  %v3175_v19 = vsel %vm3142_vm6, %v3173_v63, %v3174_v0  ;;  %v3189_v50 = vrot.slane %v11328_v39, 6  ;;  %v3191_v38 = vrot.slane %v11341_v6, 6  ;;  %v4395_v39 = vld [vmem:[#allocation14 + $0x10] sm:$0xff]  ;;  %v4400_v62 = vld [vmem:[#allocation14 + $0x38] sm:$0xff]  ;;  %v4401_v63 = vld [vmem:[#allocation14 + $0x40] sm:$0xff] }
 0x58d   : > { %4048 = vmatmul.mubr.f32.gmra.mrb[60].mxu1 %v2978_v47  ;;  %v3150_v47 = vrot.slane %v11120_v25, 6  ;;  %v3148_v9 = vsel %vm3142_vm6, %v3146_v27, %v3147_v54  ;;  %v3159_v25 = vrot.slane %v11168_v17, 6  ;;  %v3157_v54 = vsel %vm3142_vm6, %v3155_v8, %v3156_v28  ;;  %v4396_v8 = vld [vmem:[#allocation14 + $0x18] sm:$0xff]  ;;  %v4399_v61 = vld [vmem:[#allocation14 + $0x30] sm:$0xff]  ;;  %v4402_v0 = vld [vmem:[#allocation14 + $0x48] sm:$0xff] }
 0x58e   : > { %4052 = vmatprep.mubr.f32.mxu1 %v3109_v43  ;;  %v3168_v17 = vrot.slane %v11216_v26, 6  ;;  %v3172_v27 = vsel %vm3142_vm6, %v3170_v35, %v3171_v36  ;;  %v3177_v26 = vrot.slane %v11264_v60, 6  ;;  %v3186_v60 = vrot.slane %v14276_v52, 6  ;;  %v14297_v36 = vld [vmem:[#allocation67_spill] sm:$0xff] }
 0x58f   : > { %v3151_v58 = vsel %vm3142_vm6, %v3149_v42, %v3150_v47  ;;  %v3160_v43 = vsel %vm3142_vm6, %v3158_v24, %v3159_v25  ;;  %v3181_v42 = vsel %vm3142_vm6, %v3179_v49, %v3180_v55  ;;  %v3184_v47 = vsel %vm3142_vm6, %v3182_v10, %v3183_v22  ;;  %v4397_v25 = vld [vmem:[#allocation14 + $0x20] sm:$0xff]  ;;  %v4403_v22 = vld [vmem:[#allocation14 + $0x50] sm:$0xff] }
 0x590   : > { %v3187_v34 = vsel %vm3142_vm6, %v3185_v33, %v3186_v60  ;;  %v3192_v2 = vrot.slane %v11344_v45, 6  ;;  %v3190_v14 = vsel %vm3142_vm6, %v3188_v4, %v3189_v50  ;;  %v3194_v52 = vrot.slane %v11357_v12, 6  ;;  %v14300_v60 = vld [vmem:[#allocation76_spill] sm:$0xff] }
 0x591   : > { %4053 = vmatmul.mubr.f32.gmra.mrb[62].mxu1 %v2981_v5  ;;  %v3169_v5 = vsel %vm3142_vm6, %v3167_v15, %v3168_v17  ;;  %v3195_v59 = vrot.slane %v11360_v30, 6  ;;  %v3197_v6 = vrot.slane %v11372_v3, 6  ;;  %v3198_v45 = vrot.slane %v11375_v29, 6  ;;  %v14295_v15 = vld [vmem:[#allocation64_spill] sm:$0xff]  ;;  %v14296_v17 = vld [vmem:[#allocation65_spill] sm:$0xff] }
 0x592   : > { %8091 = vmatprep.mubr.f32.mxu1 %v3145_v46  ;;  %v3178_v46 = vsel %vm3142_vm6, %v3176_v23, %v3177_v26  ;;  %v3193_v28 = vsel %vm3142_vm6, %v3191_v38, %v3192_v2  ;;  %v3200_v12 = vrot.slane %v11387_v56, 6  ;;  %v3201_v30 = vrot.slane %v11390_v51, 6  ;;  %v14299_v26 = vld [vmem:[#allocation71_spill] sm:$0xff]  ;;  %v4406_v2 = vld [vmem:[#allocation14 + $0x68] sm:$0xff] }
 0x593   : > { %v3196_v24 = vsel %vm3142_vm6, %v3194_v52, %v3195_v59  ;;  %v3199_v40 = vsel %vm3142_vm6, %v3197_v6, %v3198_v45  ;;  %v3203_v3 = vrot.slane %v11402_v31, 6  ;;  %v3204_v29 = vrot.slane %v11405_v7, 6  ;;  %v4405_v38 = vld [vmem:[#allocation14 + $0x60] sm:$0xff]  ;;  %v14306_v45 = vld [vmem:[#allocation86_spill] sm:$0xff] }
 0x594   : > { %v3206_v56 = vrot.slane %v11417_v13, 6  ;;  %v3207_v51 = vrot.slane %v11420_v32, 6  ;;  %v3209_v31 = vrot.slane %v14295_v15, 6  ;;  %v3210_v7 = vrot.slane %v14296_v17, 6  ;;  %v14305_v59 = vld [vmem:[#allocation83_spill] sm:$0xff]  ;;  %v4411_v15 = vld [vmem:[#allocation14 + $0x90] sm:$0xff] }
 0x595   : > { %8092 = vmatmul.mubr.f32.vlgmr.msra.gmra.mrb[64].mxu1 %v3148_v9  ;;  %v4393_v9 = vld [vmem:[#allocation14] sm:$0xff]  ;;  %v3212_v13 = vrot.slane %v14297_v36, 6  ;;  %v3215_v23 = vrot.slane %v14281_v57, 6  ;;  %v8632_v49 = vpack.c.bf16 %v4402_v0, %v4401_v63  ;;  %v3219_v10 = vrot.slane %v14284_v18, 6  ;;  %v4416_v36 = vld [vmem:[#allocation14 + $0xb8] sm:$0xff] }
 0x596   : > { %8094 = vmatprep.mubr.f32.mxu1 %v3151_v58  ;;  %v8620_v58 = vpack.c.bf16 %v4394_v37, %v4393_v9  ;;  %v3208_v35 = vsel %vm3142_vm6, %v3206_v56, %v3207_v51  ;;  %v3221_v57 = vrot.slane %v14300_v60, 6  ;;  %v14302_v37 = vld [vmem:[#allocation79_spill] sm:$0xff]  ;;  %v3230_v6 = vrot.slane %v14288_v11, 6  ;;  %v4410_v51 = vld [vmem:[#allocation14 + $0x88] sm:$0xff] }
 0x597   : > { %v3236_v11 = vrot.slane %v14272_v48, 6  ;;  %v4409_v56 = vld [vmem:[#allocation14 + $0x80] sm:$0xff]  ;;  %v14309_v17 = vmov 0.0  }
 0x598   : > { %8621 = vmatpush1.bf16.msra.mxu1 %v8620_v58  ;;  %v4417_v0 = vld [vmem:[#allocation14 + $0xc0] sm:$0xff] }
 0x599   : > { %8095 = vmatmul.mubr.f32.gmra.mrb[66].mxu1 %v3154_v21  ;;  %8622 = vmatprep.subr.bf16.mxu1 %v14221_v20  ;;  %v8623_v21 = vpack.c.bf16 %v4396_v8, %v4395_v39  ;;  %v3228_v39 = vrot.slane %v14305_v59, 6  ;;  %v8638_v8 = vpack.c.bf16 %v4406_v2, %v4405_v38  ;;  %v4421_v60 = vld [vmem:[#allocation14 + $0xe0] sm:$0xff]  ;;  %v4423_v38 = vld [vmem:[#allocation14 + $0xf0] sm:$0xff]  ;;  %v4424_v2 = vld [vmem:[#allocation14 + $0xf8] sm:$0xff] }
 0x59a   : > { %8097 = vmatprep.mubr.f32.mxu1 %v3157_v54  ;;  %v4398_v54 = vld [vmem:[#allocation14 + $0x28] sm:$0xff] }
 0x59b   : > { %v8626_v44 = vpack.c.bf16 %v4398_v54, %v4397_v25  ;;  %v14307_v25 = vld [vmem:[#allocation87_spill] sm:$0xff]  ;;  %v4498_v59 = vld [vmem:[#allocation14 + $0x348] sm:$0xff] }
 0x59c   : > { %8624 = vmatpush1.bf16.msra.mxu1 %v8623_v21  ;;  %v3231_v21 = vrot.slane %v14306_v45, 6  ;;  %v3233_v54 = vrot.slane %v14307_v25, 6 }
 0x59d   : > { %8098 = vmatmul.mubr.f32.gmra.mrb[68].mxu1 %v3160_v43  ;;  %8625 = vmatprep.subr.bf16.mxu1 %v14221_v20  ;;  %v3202_v43 = vsel %vm3142_vm6, %v3200_v12, %v3201_v30  ;;  %v4408_v12 = vld [vmem:[#allocation14 + $0x78] sm:$0xff] }
 0x59e   : > { %8100 = vmatprep.mubr.f32.mxu1 %v3163_v1  ;;  %v3205_v1 = vsel %vm3142_vm6, %v3203_v3, %v3204_v29 }
 0x5a0   : > { %8627 = vmatpush1.bf16.msra.mxu1 %v8626_v44  ;;  %v3232_v44 = vsel %vm3142_vm6, %v3230_v6, %v3231_v21  ;;  %v4426_v6 = vld [vmem:[#allocation14 + $0x108] sm:$0xff] }
 0x5a1   : > { %8101 = vmatmul.mubr.f32.gmra.mrb[70].mxu1 %v3166_v41  ;;  %8628 = vmatprep.subr.bf16.mxu1 %v14221_v20  ;;  %v8629_v41 = vpack.c.bf16 %v4400_v62, %v4399_v61  ;;  %v8644_v62 = vpack.c.bf16 %v4410_v51, %v4409_v56 }
 0x5a2   : > { %8103 = vmatprep.mubr.f32.mxu1 %v3169_v5  ;;  %v14298_v5 = vld [vmem:[#allocation68_spill] sm:$0xff] }
 0x5a3   : > { %v3213_v32 = vrot.slane %v14298_v5, 6  ;;  %v4489_v5 = vld [vmem:[#allocation14 + $0x300] sm:$0xff] }
 0x5a4   : > { %8630 = vmatpush1.bf16.msra.mxu1 %v8629_v41 }
 0x5a5   : > { %8104 = vmatmul.mubr.f32.gmra.mrb[72].mxu1 %v3172_v27  ;;  %8631 = vmatprep.subr.bf16.mxu1 %v14221_v20  ;;  %v3211_v27 = vsel %vm3142_vm6, %v3209_v31, %v3210_v7  ;;  %v3214_v55 = vsel %vm3142_vm6, %v3212_v13, %v3213_v32  ;;  %v4412_v31 = vld [vmem:[#allocation14 + $0x98] sm:$0xff]  ;;  %v4414_v7 = vld [vmem:[#allocation14 + $0xa8] sm:$0xff] }
 0x5a6   : > { %8106 = vmatprep.mubr.f32.mxu1 %v3175_v19  ;;  %v3216_v19 = vrot.slane %v14299_v26, 6  ;;  %v8647_v48 = vpack.c.bf16 %v4412_v31, %v4411_v15  ;;  %v4490_v32 = vld [vmem:[#allocation14 + $0x308] sm:$0xff]  ;;  %v4491_v26 = vld [vmem:[#allocation14 + $0x310] sm:$0xff] }
 0x5a7   : > { %v8763_v63 = vpack.c.bf16 %v4490_v32, %v4489_v5  ;;  %v4431_v32 = vld [vmem:[#allocation14 + $0x130] sm:$0xff] }
 0x5a8   : > { %8633 = vmatpush1.bf16.msra.mxu1 %v8632_v49  ;;  %v3217_v33 = vsel %vm3142_vm6, %v3215_v23, %v3216_v19  ;;  %v4492_v19 = vld [vmem:[#allocation14 + $0x318] sm:$0xff] }
 0x5a9   : > { %8107 = vmatmul.mubr.f32.gmra.mrb[74].mxu1 %v3178_v46  ;;  %v3218_v46 = vrot.slane %v14283_v53, 6  ;;  %8634 = vmatprep.subr.bf16.mxu1 %v14221_v20  ;;  %v3224_v53 = vrot.slane %v14302_v37, 6  ;;  %v8767_v49 = vpack.c.bf16 %v4492_v19, %v4491_v26 }
 0x5aa   : > { %8109 = vmatprep.mubr.f32.mxu1 %v3181_v42  ;;  %v4404_v42 = vld [vmem:[#allocation14 + $0x58] sm:$0xff]  ;;  %8764 = vmatprep.subr.bf16.mxu0 %v8763_v63 }
 0x5ab   : > { %v8635_v50 = vpack.c.bf16 %v4404_v42, %v4403_v22  ;;  %v3220_v9 = vsel %vm3142_vm6, %v3218_v46, %v3219_v10  ;;  %8766 = vmatpush3.bf16.msra.mxu0 %v8763_v63  ;;  %v4420_v46 = vld [vmem:[#allocation14 + $0xd8] sm:$0xff]  ;;  %v4493_v22 = vld [vmem:[#allocation14 + $0x320] sm:$0xff]  ;;  %v4494_v42 = vld [vmem:[#allocation14 + $0x328] sm:$0xff] }
 0x5ac   : > { %8768 = vmatprep.subr.bf16.mxu0 %v8767_v49  ;;  %v4432_v63 = vld [vmem:[#allocation14 + $0x138] sm:$0xff] }
 0x5ad   : > { %8110 = vmatmul.mubr.f32.gmra.mrb[76].mxu1 %v3184_v47  ;;  %v14301_v47 = vld [vmem:[#allocation77_spill] sm:$0xff] }
 0x5ae   : > { %8112 = vmatprep.mubr.f32.mxu1 %v3187_v34  ;;  %v3222_v4 = vrot.slane %v14301_v47, 6  ;;  %8636 = vmatpush1.bf16.msra.mxu1 %v8635_v50  ;;  %v14303_v34 = vld [vmem:[#allocation80_spill] sm:$0xff]  ;;  %v4496_v50 = vld [vmem:[#allocation14 + $0x338] sm:$0xff] }
 0x5af   : > { %v3225_v18 = vrot.slane %v14303_v34, 6  ;;  %8637 = vmatprep.subr.bf16.mxu1 %v14221_v20  ;;  %8770 = vmatpush3.bf16.msra.mxu0 %v8767_v49  ;;  %v4433_v49 = vld [vmem:[#allocation14 + $0x140] sm:$0xff] }
 0x5b0   : > { %v3223_v58 = vsel %vm3142_vm6, %v3221_v57, %v3222_v4  ;;  %v4422_v57 = vld [vmem:[#allocation14 + $0xe8] sm:$0xff]  ;;  %v4495_v4 = vld [vmem:[#allocation14 + $0x330] sm:$0xff] }
 0x5b1   : > { %8113 = vmatmul.mubr.f32.gmra.mrb[78].mxu1 %v3190_v14  ;;  %v14304_v14 = vld [vmem:[#allocation82_spill] sm:$0xff]  ;;  %v8662_v47 = vpack.c.bf16 %v4422_v57, %v4421_v60 }
 0x5b2   : > { %8115 = vmatprep.mubr.f32.mxu1 %v3193_v28  ;;  %v3227_v52 = vrot.slane %v14304_v14, 6  ;;  %8639 = vmatpush1.bf16.msra.mxu1 %v8638_v8  ;;  %v3226_v28 = vsel %vm3142_vm6, %v3224_v53, %v3225_v18  ;;  %v8665_v14 = vpack.c.bf16 %v4424_v2, %v4423_v38  ;;  %v4435_v60 = vld [vmem:[#allocation14 + $0x150] sm:$0xff]  ;;  %v4436_v57 = vld [vmem:[#allocation14 + $0x158] sm:$0xff]  ;;  %v4438_v38 = vld [vmem:[#allocation14 + $0x168] sm:$0xff] }
 0x5b3   : > { %8640 = vmatprep.subr.bf16.mxu1 %v14221_v20 }
 0x5b4   : > { %v3229_v30 = vsel %vm3142_vm6, %v3227_v52, %v3228_v39  ;;  %v4497_v52 = vld [vmem:[#allocation14 + $0x340] sm:$0xff] }
 0x5b5   : > { %8116 = vmatmul.mubr.f32.gmra.mrb[80].mxu1 %v3196_v24  ;;  %v4407_v24 = vld [vmem:[#allocation14 + $0x70] sm:$0xff]  ;;  %v8779_v8 = vpack.c.bf16 %v4498_v59, %v4497_v52 }
 0x5b6   : > { %8118 = vmatprep.mubr.f32.mxu1 %v3199_v40  ;;  %v14308_v40 = vld [vmem:[#allocation88_spill] sm:$0xff]  ;;  %v8641_v29 = vpack.c.bf16 %v4408_v12, %v4407_v24  ;;  %v4499_v24 = vld [vmem:[#allocation14 + $0x350] sm:$0xff]  ;;  %v4500_v12 = vld [vmem:[#allocation14 + $0x358] sm:$0xff] }
 0x5b7   : > { %v3234_v3 = vrot.slane %v14308_v40, 6  ;;  %v8783_v25 = vpack.c.bf16 %v4500_v12, %v4499_v24  ;;  %v4501_v40 = vld [vmem:[#allocation14 + $0x360] sm:$0xff]  ;;  %v4442_v12 = vld [vmem:[#allocation14 + $0x188] sm:$0xff] }
 0x5b8   : > { %8642 = vmatpush1.bf16.msra.mxu1 %v8641_v29  ;;  %v4441_v24 = vld [vmem:[#allocation14 + $0x180] sm:$0xff] }
 0x5b9   : > { %8119 = vmatmul.mubr.f32.gmra.mrb[82].mxu1 %v3202_v43  ;;  %v3237_v43 = vrot.slane %v14273_v16, 6  ;;  %8643 = vmatprep.subr.bf16.mxu1 %v14221_v20  ;;  %v3235_v61 = vsel %vm3142_vm6, %v3233_v54, %v3234_v3  ;;  %v4413_v16 = vld [vmem:[#allocation14 + $0xa0] sm:$0xff]  ;;  %v4502_v3 = vld [vmem:[#allocation14 + $0x368] sm:$0xff] }
 0x5ba   : > { %8121 = vmatprep.mubr.f32.mxu1 %v3205_v1  ;;  %v8650_v41 = vpack.c.bf16 %v4414_v7, %v4413_v16  ;;  %v4429_v16 = vld [vmem:[#allocation14 + $0x120] sm:$0xff]  ;;  %v4430_v7 = vld [vmem:[#allocation14 + $0x128] sm:$0xff] }
 0x5bb   : > { %v3238_v1 = vsel %vm3142_vm6, %v3236_v11, %v3237_v43  ;;  %v4427_v11 = vld [vmem:[#allocation14 + $0x110] sm:$0xff]  ;;  %v4428_v43 = vld [vmem:[#allocation14 + $0x118] sm:$0xff] }
 0x5bc   : > { %8645 = vmatpush1.bf16.msra.mxu1 %v8644_v62  ;;  %v8671_v51 = vpack.c.bf16 %v4428_v43, %v4427_v11  ;;  %v4504_v62 = vld [vmem:[#allocation14 + $0x378] sm:$0xff] }
 0x5bd   : > { %8122 = vmatmul.mubr.f32.gmra.mrb[84].mxu1 %v3208_v35  ;;  %8646 = vmatprep.subr.bf16.mxu1 %v14221_v20  ;;  %v4415_v35 = vld [vmem:[#allocation14 + $0xb0] sm:$0xff]  ;;  %v4444_v11 = vld [vmem:[#allocation14 + $0x198] sm:$0xff] }
 0x5be   : > { %8124 = vmatprep.mubr.f32.mxu1 %v3211_v27  ;;  %v8653_v13 = vpack.c.bf16 %v4416_v36, %v4415_v35  ;;  %v4418_v27 = vld [vmem:[#allocation14 + $0xc8] sm:$0xff]  ;;  %v8674_v35 = vpack.c.bf16 %v4430_v7, %v4429_v16 }
 0x5bf   : > { %v8656_v23 = vpack.c.bf16 %v4418_v27, %v4417_v0  ;;  %v8677_v27 = vpack.c.bf16 %v4432_v63, %v4431_v32  ;;  %v4447_v32 = vld [vmem:[#allocation14 + $0x1b0] sm:$0xff]  ;;  %v4448_v63 = vld [vmem:[#allocation14 + $0x1b8] sm:$0xff] }
 0x5c0   : > { %8648 = vmatpush1.bf16.msra.mxu1 %v8647_v48 }
 0x5c1   : > { %8125 = vmatmul.mubr.f32.gmra.mrb[86].mxu1 %v3214_v55  ;;  %8649 = vmatprep.subr.bf16.mxu1 %v14221_v20  ;;  %v4419_v55 = vld [vmem:[#allocation14 + $0xd0] sm:$0xff] }
 0x5c2   : > { %8127 = vmatprep.mubr.f32.mxu1 %v3217_v33  ;;  %v8659_v10 = vpack.c.bf16 %v4420_v46, %v4419_v55  ;;  %v8771_v33 = vpack.c.bf16 %v4494_v42, %v4493_v22  ;;  %v4434_v55 = vld [vmem:[#allocation14 + $0x148] sm:$0xff] }
 0x5c4   : > { %8651 = vmatpush1.bf16.msra.mxu1 %v8650_v41  ;;  %8772 = vmatprep.subr.bf16.mxu0 %v8771_v33 }
 0x5c5   : > { %8128 = vmatmul.mubr.f32.gmra.mrb[88].mxu1 %v3220_v9  ;;  %8652 = vmatprep.subr.bf16.mxu1 %v14221_v20  ;;  %v8775_v9 = vpack.c.bf16 %v4496_v50, %v4495_v4  ;;  %v8683_v4 = vpack.c.bf16 %v4436_v57, %v4435_v60 }
 0x5c6   : > { %8130 = vmatprep.mubr.f32.mxu1 %v3223_v58  ;;  %8774 = vmatpush3.bf16.msra.mxu0 %v8771_v33 }
 0x5c7   : > { %8776 = vmatprep.subr.bf16.mxu0 %v8775_v9 }
 0x5c8   : > { %8654 = vmatpush1.bf16.msra.mxu1 %v8653_v13 }
 0x5c9   : > { %8131 = vmatmul.mubr.f32.gmra.mrb[90].mxu1 %v3226_v28  ;;  %8655 = vmatprep.subr.bf16.mxu1 %v14221_v20  ;;  %v4425_v28 = vld [vmem:[#allocation14 + $0x100] sm:$0xff] }
 0x5ca   : > { %8133 = vmatprep.mubr.f32.mxu1 %v3229_v30  ;;  %8778 = vmatpush3.bf16.msra.mxu0 %v8775_v9  ;;  %v8668_v21 = vpack.c.bf16 %v4426_v6, %v4425_v28  ;;  %v4440_v28 = vld [vmem:[#allocation14 + $0x178] sm:$0xff] }
 0x5cb   : > { %8780 = vmatprep.subr.bf16.mxu0 %v8779_v8 }
 0x5cc   : > { %8657 = vmatpush1.bf16.msra.mxu1 %v8656_v23 }
 0x5cd   : > { %8134 = vmatmul.mubr.f32.gmra.mrb[92].mxu1 %v3232_v44  ;;  %8658 = vmatprep.subr.bf16.mxu1 %v14221_v20  ;;  %v8787_v44 = vpack.c.bf16 %v4502_v3, %v4501_v40 }
 0x5ce   : > { %8136 = vmatprep.mubr.f32.mxu1 %v3235_v61  ;;  %8782 = vmatpush3.bf16.msra.mxu0 %v8779_v8  ;;  %v4503_v61 = vld [vmem:[#allocation14 + $0x370] sm:$0xff] }
 0x5cf   : > { %8784 = vmatprep.subr.bf16.mxu0 %v8783_v25  ;;  %v8791_v15 = vpack.c.bf16 %v4504_v62, %v4503_v61  ;;  %v4439_v8 = vld [vmem:[#allocation14 + $0x170] sm:$0xff] }
 0x5d0   : > { %8660 = vmatpush1.bf16.msra.mxu1 %v8659_v10  ;;  %v8680_v10 = vpack.c.bf16 %v4434_v55, %v4433_v49  ;;  %v4449_v55 = vld [vmem:[#allocation14 + $0x1c0] sm:$0xff] }
 0x5d1   : > { %8137 = vmatmul.mubr.f32.gmra.mrb[94].mxu1 %v3238_v1  ;;  %8661 = vmatprep.subr.bf16.mxu1 %v14221_v20 }
 0x5d2   : > { %4569 = vmatprep.mubr.f32.mxu1 %v14309_v17  ;;  %8786 = vmatpush3.bf16.msra.mxu0 %v8783_v25  ;;  %v8692_v25 = vpack.c.bf16 %v4442_v12, %v4441_v24 }
 0x5d3   : > { %8788 = vmatprep.subr.bf16.mxu0 %v8787_v44 }
 0x5d4   : > { %8663 = vmatpush1.bf16.msra.mxu1 %v8662_v47 }
 0x5d5   : > { %8664 = vmatprep.subr.bf16.mxu1 %v14221_v20 }
 0x5d6   : > { %8790 = vmatpush3.bf16.msra.mxu0 %v8787_v44  ;;  %v4443_v44 = vld [vmem:[#allocation14 + $0x190] sm:$0xff] }
 0x5d7   : > { %8792 = vmatprep.subr.bf16.mxu0 %v8791_v15 }
 0x5d8   : > { %8666 = vmatpush1.bf16.msra.mxu1 %v8665_v14 }
 0x5d9   : > { %8667 = vmatprep.subr.bf16.mxu1 %v14221_v20 }
 0x5da   : > { %8794 = vmatpush3.bf16.msra.mxu0 %v8791_v15  ;;  %v4445_v15 = vld [vmem:[#allocation14 + $0x1a0] sm:$0xff] }
 0x5db   : > { %4570 = vmatmul.mubr.f32.vlgmr.msra.gmra.mrb[96].mxu1 %v14309_v17 }
 0x5dc   : > { %8669 = vmatpush1.bf16.msra.mxu1 %v8668_v21  ;;  %4574 = vmatprep.mubr.f32.mxu1 %v14309_v17  ;;  %v8689_v21 = vpack.c.bf16 %v4440_v28, %v4439_v8  ;;  %v4453_v28 = vld [vmem:[#allocation14 + $0x1e0] sm:$0xff] }
 0x5dd   : > { %8670 = vmatprep.subr.bf16.mxu1 %v14221_v20 }
 0x5df   : > { %4575 = vmatmul.mubr.f32.gmra.mrb[98].mxu1 %v14309_v17 }
 0x5e0   : > { %8672 = vmatpush1.bf16.msra.mxu1 %v8671_v51  ;;  %v8695_v51 = vpack.c.bf16 %v4444_v11, %v4443_v44  ;;  %v4455_v44 = vld [vmem:[#allocation14 + $0x1f0] sm:$0xff]  ;;  %v4456_v11 = vld [vmem:[#allocation14 + $0x1f8] sm:$0xff] }
 0x5e1   : > { %8673 = vmatprep.subr.bf16.mxu1 %v14221_v20 }
 0x5e4   : > { %8675 = vmatpush1.bf16.msra.mxu1 %v8674_v35 }
 0x5e5   : > { %8676 = vmatprep.subr.bf16.mxu1 %v14221_v20 }
 0x5e8   : > { %v12088_v37 = vpop.f32.mrb[0].mxu1  ;;  %8678 = vmatpush1.bf16.msra.mxu1 %v8677_v27 }
 0x5e9   : > { %v3901_v53 = vpop.f32.mrb[1].mxu1  ;;  %8679 = vmatprep.subr.bf16.mxu1 %v14221_v20 }
 0x5ec   : > { %v12091_v34 = vpop.f32.mrb[2].mxu1  ;;  %8681 = vmatpush1.bf16.msra.mxu1 %v8680_v10  ;;  %v4450_v10 = vld [vmem:[#allocation14 + $0x1c8] sm:$0xff] }
 0x5ed   : > { %v3906_v18 = vpop.f32.mrb[3].mxu1  ;;  %8682 = vmatprep.subr.bf16.mxu1 %v14221_v20 }
 0x5ee   : > { %v4437_v18 = vld [vmem:[#allocation14 + $0x160] sm:$0xff] }
 0x5ef   : > { %v8686_v14 = vpack.c.bf16 %v4438_v38, %v4437_v18  ;;  %v4452_v18 = vld [vmem:[#allocation14 + $0x1d8] sm:$0xff] }
 0x5f0   : > { %v12093_v58 = vpop.f32.mrb[4].mxu1  ;;  %8684 = vmatpush1.bf16.msra.mxu1 %v8683_v4 }
 0x5f1   : > { %v3911_v39 = vpop.f32.mrb[5].mxu1  ;;  %8685 = vmatprep.subr.bf16.mxu1 %v14221_v20 }
 0x5f4   : > { %v12096_v45 = vpop.f32.mrb[6].mxu1  ;;  %8687 = vmatpush1.bf16.msra.mxu1 %v8686_v14 }
 0x5f5   : > { %v3916_v30 = vpop.f32.mrb[7].mxu1  ;;  %8688 = vmatprep.subr.bf16.mxu1 %v14221_v20 }
 0x5f8   : > { %v12101_v54 = vpop.f32.mrb[8].mxu1  ;;  %8690 = vmatpush1.bf16.msra.mxu1 %v8689_v21  ;;  %v4454_v21 = vld [vmem:[#allocation14 + $0x1e8] sm:$0xff] }
 0x5f9   : > { %v3921_v29 = vpop.f32.mrb[9].mxu1  ;;  %8691 = vmatprep.subr.bf16.mxu1 %v14221_v20  ;;  %v8710_v12 = vpack.c.bf16 %v4454_v21, %v4453_v28 }
 0x5fc   : > { %v12104_v56 = vpop.f32.mrb[10].mxu1  ;;  %8693 = vmatpush1.bf16.msra.mxu1 %v8692_v25 }
 0x5fd   : > { %v3926_v1 = vpop.f32.mrb[11].mxu1  ;;  %8694 = vmatprep.subr.bf16.mxu1 %v14221_v20 }
 0x600   : > { %v12107_v31 = vpop.f32.mrb[12].mxu1  ;;  %8696 = vmatpush1.bf16.msra.mxu1 %v8695_v51  ;;  %v8713_v51 = vpack.c.bf16 %v4456_v11, %v4455_v44 }
 0x601   : > { %v3931_v48 = vpop.f32.mrb[13].mxu1  ;;  %8697 = vmatprep.subr.bf16.mxu1 %v14221_v20 }
 0x602   : > { %v4446_v48 = vld [vmem:[#allocation14 + $0x1a8] sm:$0xff] }
 0x603   : > { %v8698_v7 = vpack.c.bf16 %v4446_v48, %v4445_v15  ;;  %v12172_v15 = vld [vmem:[#allocation11] ss:$0 sm:$0xff] }
 0x604   : > { %v12109_v41 = vpop.f32.mrb[14].mxu1 }
 0x605   : > { %v3936_v36 = vpop.f32.mrb[15].mxu1  ;;  %8699 = vmatpush1.bf16.msra.mxu1 %v8698_v7 }
 0x606   : > { %8700 = vmatprep.subr.bf16.mxu1 %v14221_v20 }
 0x608   : > { %v12112_v13 = vpop.f32.mrb[16].mxu1 }
 0x609   : > { %v3941_v5 = vpop.f32.mrb[17].mxu1 }
 0x60c   : > { %v12114_v0 = vpop.f32.mrb[18].mxu1 }
 0x60d   : > { %v3946_v23 = vpop.f32.mrb[19].mxu1 }
 0x60e   : > { %v8701_v23 = vpack.c.bf16 %v4448_v63, %v4447_v32  ;;  %v12178_v32 = vld [vmem:[#allocation13] ss:$0 sm:$0xff] }
 0x610   : > { %v12117_v26 = vpop.f32.mrb[20].mxu1  ;;  %8702 = vmatpush1.bf16.msra.mxu1 %v8701_v23 }
 0x611   : > { %v3951_v19 = vpop.f32.mrb[21].mxu1  ;;  %8703 = vmatprep.subr.bf16.mxu1 %v14221_v20 }
 0x614   : > { %v12119_v46 = vpop.f32.mrb[22].mxu1 }
 0x615   : > { %v3956_v22 = vpop.f32.mrb[23].mxu1 }
 0x618   : > { %v12122_v42 = vpop.f32.mrb[24].mxu1 }
 0x619   : > { %v3961_v33 = vpop.f32.mrb[25].mxu1 }
 0x61a   : > { %v8704_v33 = vpack.c.bf16 %v4450_v10, %v4449_v55 }
 0x61c   : > { %v12124_v47 = vpop.f32.mrb[26].mxu1  ;;  %8705 = vmatpush1.bf16.msra.mxu1 %v8704_v33 }
 0x61d   : > { %v3966_v50 = vpop.f32.mrb[27].mxu1  ;;  %8706 = vmatprep.subr.bf16.mxu1 %v14221_v20 }
 0x620   : > { %v12127_v9 = vpop.f32.mrb[28].mxu1 }
 0x621   : > { %v3971_v53 = vpop.f32.mrb[29].mxu1 }
 0x622   : > { %v4451_v53 = vld [vmem:[#allocation14 + $0x1d0] sm:$0xff] }
 0x623   : > { %v8707_v14 = vpack.c.bf16 %v4452_v18, %v4451_v53 }
 0x624   : > { %v12129_v2 = vpop.f32.mrb[30].mxu1 }
 0x625   : > { %v3976_v52 = vpop.f32.mrb[31].mxu1  ;;  %8708 = vmatpush1.bf16.msra.mxu1 %v8707_v14 }
 0x626   : > { %8709 = vmatprep.subr.bf16.mxu1 %v14221_v20 }
 0x628   : > { %v12132_v59 = vpop.f32.mrb[32].mxu1 }
 0x629   : > { %v3981_v39 = vpop.f32.mrb[33].mxu1  ;;  %8711 = vmatpush1.bf16.msra.mxu1 %v8710_v12 }
 0x62a   : > { %8712 = vmatprep.subr.bf16.mxu1 %v14221_v20 }
 0x62c   : > { %v12134_v6 = vpop.f32.mrb[34].mxu1 }
 0x62d   : > { %v3986_v30 = vpop.f32.mrb[35].mxu1  ;;  %8714 = vmatpush1.bf16.msra.mxu1 %v8713_v51 }
 0x62e   : > { %8715 = vmatprep.subr.bf16.mxu1 %v14221_v20 }
 0x630   : > { %v12137_v40 = vpop.f32.mrb[36].mxu1 }
 0x631   : > { %v3991_v3 = vpop.f32.mrb[37].mxu1 }
 0x634   : > { %v12140_v29 = vpop.f32.mrb[38].mxu1 }
 0x635   : > { %v3996_v43 = vpop.f32.mrb[39].mxu1 }
 0x638   : > { %v12142_v61 = vpop.f32.mrb[40].mxu1 }
 0x639   : > { %v4001_v62 = vpop.f32.mrb[41].mxu1 }
 0x63c   : > { %v12145_v1 = vpop.f32.mrb[42].mxu1 }
 0x63d   : > { %v4006_v16 = vpop.f32.mrb[43].mxu1 }
 0x640   : > { %v12147_v35 = vpop.f32.mrb[44].mxu1 }
 0x641   : > { %v4011_v36 = vpop.f32.mrb[45].mxu1 }
 0x644   : > { %v12150_v5 = vpop.f32.mrb[46].mxu1 }
 0x645   : > { %v4016_v27 = vpop.f32.mrb[47].mxu1 }
 0x648   : > { %v12152_v19 = vpop.f32.mrb[48].mxu1 }
 0x649   : > { %v4021_v49 = vpop.f32.mrb[49].mxu1 }
 0x64c   : > { %v12155_v22 = vpop.f32.mrb[50].mxu1 }
 0x64d   : > { %v4026_v60 = vpop.f32.mrb[51].mxu1 }
 0x650   : > { %v12158_v57 = vpop.f32.mrb[52].mxu1 }
 0x651   : > { %v4031_v4 = vpop.f32.mrb[53].mxu1 }
 0x654   : > { %v12160_v50 = vpop.f32.mrb[54].mxu1 }
 0x655   : > { %v4036_v38 = vpop.f32.mrb[55].mxu1 }
 0x658   : > { %v12162_v52 = vpop.f32.mrb[56].mxu1 }
 0x659   : > { %v4041_v39 = vpop.f32.mrb[57].mxu1 }
 0x65c   : > { %v12165_v8 = vpop.f32.mrb[58].mxu1 }
 0x65d   : > { %v4046_v24 = vpop.f32.mrb[59].mxu1 }
 0x660   : > { %v12167_v30 = vpop.f32.mrb[60].mxu1 }
 0x661   : > { %v4051_v25 = vpop.f32.mrb[61].mxu1 }
 0x664   : > { %v12170_v3 = vpop.f32.mrb[62].mxu1 }
 0x665   : > { %v4056_v43 = vpop.f32.mrb[63].mxu1 }
 0x668   : > { %v8093_v62 = vpop.f32.mrb[64].mxu1 }
 0x669   : > { %v4130_v48 = vadd.f32 %v8093_v62, %v12091_v34  ;;  %v4124_v16 = vpop.f32.mrb[65].mxu1 }
 0x66a   : > { %v4125_v7 = vadd.f32 %v4124_v16, %v12088_v37 }
 0x66b   : > { %v4291_v36 = vmul.f32 %v12172_v15, %v4130_v48 }
 0x66c   : > { %v4290_v63 = vmul.f32 %v12172_v15, %v4125_v7  ;;  %v8096_v27 = vpop.f32.mrb[66].mxu1 }
 0x66d   : > { %v4140_v23 = vadd.f32 %v8096_v27, %v12096_v45  ;;  %v4134_v49 = vpop.f32.mrb[67].mxu1  ;;  %v4330_v55 = vadd.f32 %v12178_v32, %v4291_v36 }
 0x66e   : > { %v4329_v10 = vadd.f32 %v12178_v32, %v4290_v63  ;;  %v4135_v33 = vadd.f32 %v4134_v49, %v12093_v58 }
 0x66f   : > { %v4293_v34 = vmul.f32 %v12172_v15, %v4140_v23  ;;  %v12191_v45 = vmax.f32 %v4330_v55, 0.0 }
 0x670   : > { %v12186_v60 = vmax.f32 %v4329_v10, 0.0  ;;  %v4292_v37 = vmul.f32 %v12172_v15, %v4135_v33  ;;  %v8099_v4 = vpop.f32.mrb[68].mxu1 }
 0x671   : > { %v4332_v53 = vadd.f32 %v12178_v32, %v4293_v34  ;;  %v4150_v18 = vadd.f32 %v8099_v4, %v12104_v56  ;;  %v4144_v38 = vpop.f32.mrb[69].mxu1 }
 0x672   : > { %v4331_v14 = vadd.f32 %v12178_v32, %v4292_v37  ;;  %v4145_v39 = vadd.f32 %v4144_v38, %v12101_v54  ;;  %4579 = vmatprep.mubr.f32.mxu1 %v12186_v60 }
 0x673   : > { %v12196_v58 = vmax.f32 %v4332_v53, 0.0  ;;  %v4295_v28 = vmul.f32 %v12172_v15, %v4150_v18  ;;  %4580 = vmatmul.mubr.f32.gmra.mrb[100].mxu1 %v14309_v17 }
 0x674   : > { %v4294_v21 = vmul.f32 %v12172_v15, %v4145_v39  ;;  %v8102_v24 = vpop.f32.mrb[70].mxu1  ;;  %4584 = vmatprep.mubr.f32.mxu1 %v12191_v45  ;;  %v12205_v54 = vmax.f32 %v4331_v14, 0.0 }
 0x675   : > { %v4334_v56 = vadd.f32 %v12178_v32, %v4295_v28  ;;  %v4160_v12 = vadd.f32 %v8102_v24, %v12109_v41  ;;  %v4154_v25 = vpop.f32.mrb[71].mxu1  ;;  %8171 = vmatprep.mubr.f32.mxu0 %v12196_v58 }
 0x676   : > { %v4333_v44 = vadd.f32 %v12178_v32, %v4294_v21  ;;  %v4155_v11 = vadd.f32 %v4154_v25, %v12107_v31 }
 0x677   : > { %v4297_v43 = vmul.f32 %v12172_v15, %v4160_v12  ;;  %4585 = vmatmul.mubr.f32.gmra.mrb[102].mxu1 %v12186_v60  ;;  %v12215_v41 = vmax.f32 %v4334_v56, 0.0 }
 0x678   : > { %v12211_v51 = vmax.f32 %v4333_v44, 0.0  ;;  %v4296_v62 = vmul.f32 %v12172_v15, %v4155_v11  ;;  %v8105_v48 = vpop.f32.mrb[72].mxu1  ;;  %4589 = vmatprep.mubr.f32.mxu1 %v12205_v54 }
 0x679   : > { %v4336_v16 = vadd.f32 %v12178_v32, %v4297_v43  ;;  %v4170_v7 = vadd.f32 %v8105_v48, %v12114_v0  ;;  %v4164_v36 = vpop.f32.mrb[73].mxu1 }
 0x67a   : > { %v4335_v31 = vadd.f32 %v12178_v32, %v4296_v62  ;;  %v4165_v63 = vadd.f32 %v4164_v36, %v12112_v13  ;;  %8172 = vmatmul.mubr.f32.vlgmr.msra.gmra.mrb[64].mxu0 %v12211_v51 }
 0x67b   : > { %4590 = vmatmul.mubr.f32.gmra.mrb[104].mxu1 %v12191_v45  ;;  %8174 = vmatprep.mubr.f32.mxu0 %v12215_v41  ;;  %v12227_v49 = vmax.f32 %v4336_v16, 0.0  ;;  %v4299_v43 = vmul.f32 %v12172_v15, %v4170_v7 }
 0x67c   : > { %v12224_v27 = vmax.f32 %v4335_v31, 0.0  ;;  %v8108_v23 = vpop.f32.mrb[74].mxu1  ;;  %4594 = vmatprep.mubr.f32.mxu1 %v12196_v58  ;;  %v4298_v39 = vmul.f32 %v12172_v15, %v4165_v63 }
 0x67d   : > { %v4180_v0 = vadd.f32 %v8108_v23, %v12119_v46  ;;  %v4174_v55 = vpop.f32.mrb[75].mxu1 }
 0x67e   : > { %v4175_v10 = vadd.f32 %v4174_v55, %v12117_v26  ;;  %8175 = vmatmul.mubr.f32.gmra.mrb[66].mxu0 %v12224_v27  ;;  %v4337_v62 = vadd.f32 %v12178_v32, %v4298_v39 }
 0x67f   : > { %v4301_v13 = vmul.f32 %v12172_v15, %v4180_v0  ;;  %4595 = vmatmul.mubr.f32.gmra.mrb[106].mxu1 %v12205_v54  ;;  %8177 = vmatprep.mubr.f32.mxu0 %v12227_v49  ;;  %v4338_v0 = vadd.f32 %v12178_v32, %v4299_v43 }
 0x680   : > { %v8111_v33 = vpop.f32.mrb[76].mxu1  ;;  %4599 = vmatprep.mubr.f32.mxu1 %v12211_v51  ;;  %v12284_v55 = vmax.f32 %v4337_v62, 0.0 }
 0x681   : > { %v4340_v34 = vadd.f32 %v12178_v32, %v4301_v13  ;;  %v4190_v37 = vadd.f32 %v8111_v33, %v12124_v47  ;;  %v4184_v4 = vpop.f32.mrb[77].mxu1  ;;  %v4300_v13 = vmul.f32 %v12172_v15, %v4175_v10 }
 0x682   : > { %v4185_v46 = vadd.f32 %v4184_v4, %v12122_v42  ;;  %8178 = vmatmul.mubr.f32.gmra.mrb[68].mxu0 %v14309_v17 }
 0x683   : > { %v4303_v26 = vmul.f32 %v12172_v15, %v4190_v37  ;;  %4600 = vmatmul.mubr.f32.gmra.mrb[108].mxu1 %v12196_v58  ;;  %8180 = vmatprep.mubr.f32.mxu0 %v14309_v17  ;;  %v12245_v38 = vmax.f32 %v4340_v34, 0.0 }
 0x684   : > { %v4302_v53 = vmul.f32 %v12172_v15, %v4185_v46  ;;  %v8114_v18 = vpop.f32.mrb[78].mxu1  ;;  %4604 = vmatprep.mubr.f32.mxu1 %v12215_v41 }
 0x685   : > { %v4342_v47 = vadd.f32 %v12178_v32, %v4303_v26  ;;  %v4200_v14 = vadd.f32 %v8114_v18, %v12129_v2  ;;  %v4194_v42 = vpop.f32.mrb[79].mxu1  ;;  %v12296_v26 = vmax.f32 %v4338_v0, 0.0 }
 0x686   : > { %v4341_v28 = vadd.f32 %v12178_v32, %v4302_v53  ;;  %v4195_v21 = vadd.f32 %v4194_v42, %v12127_v9  ;;  %8181 = vmatmul.mubr.f32.gmra.mrb[70].mxu0 %v14309_v17 }
 0x687   : > { %v4305_v24 = vmul.f32 %v12172_v15, %v4200_v14  ;;  %4605 = vmatmul.mubr.f32.gmra.mrb[110].mxu1 %v12211_v51  ;;  %8183 = vmatprep.mubr.f32.mxu0 %v12245_v38  ;;  %v12260_v25 = vmax.f32 %v4342_v47, 0.0 }
 0x688   : > { %v12256_v56 = vmax.f32 %v4341_v28, 0.0  ;;  %v4304_v12 = vmul.f32 %v12172_v15, %v4195_v21  ;;  %v8117_v2 = vpop.f32.mrb[80].mxu1  ;;  %4609 = vmatprep.mubr.f32.mxu1 %v14309_v17 }
 0x689   : > { %v4344_v44 = vadd.f32 %v12178_v32, %v4305_v24  ;;  %v4210_v9 = vadd.f32 %v8117_v2, %v12134_v6  ;;  %v4204_v11 = vpop.f32.mrb[81].mxu1 }
 0x68a   : > { %v4343_v48 = vadd.f32 %v12178_v32, %v4304_v12  ;;  %v12268_v16 = vadd.f32 %v4204_v11, %v12132_v59  ;;  %8184 = vmatmul.mubr.f32.gmra.mrb[72].mxu0 %v12256_v56 }
 0x68b   : > { %v4307_v36 = vmul.f32 %v12172_v15, %v4210_v9  ;;  %4610 = vmatmul.mubr.f32.gmra.mrb[112].mxu1 %v14309_v17  ;;  %8186 = vmatprep.mubr.f32.mxu0 %v12260_v25  ;;  %v12277_v7 = vmax.f32 %v4344_v44, 0.0 }
 0x68c   : > { %v12274_v31 = vmax.f32 %v4343_v48, 0.0  ;;  %v8120_v6 = vpop.f32.mrb[82].mxu1  ;;  %4614 = vmatprep.mubr.f32.mxu1 %v14309_v17 }
 0x68d   : > { %v12280_v63 = vadd.f32 %v12178_v32, %v4307_v36  ;;  %v4220_v59 = vadd.f32 %v8120_v6, %v12140_v29  ;;  %v4214_v23 = vpop.f32.mrb[83].mxu1 }
 0x68e   : > { %v4215_v33 = vadd.f32 %v4214_v23, %v12137_v40  ;;  %8187 = vmatmul.mubr.f32.gmra.mrb[74].mxu0 %v12274_v31  ;;  %v4339_v40 = vadd.f32 %v12178_v32, %v4300_v13 }
 0x68f   : > { %v4309_v34 = vmul.f32 %v12172_v15, %v4220_v59  ;;  %4615 = vmatmul.mubr.f32.gmra.mrb[114].mxu1 %v14309_v17  ;;  %8189 = vmatprep.mubr.f32.mxu0 %v12277_v7 }
 0x690   : > { %v4308_v37 = vmul.f32 %v12172_v15, %v4215_v33  ;;  %v8123_v29 = vpop.f32.mrb[84].mxu1  ;;  %4619 = vmatprep.mubr.f32.mxu1 %v12284_v55  ;;  %v12313_v21 = vmax.f32 %v4339_v40, 0.0 }
 0x691   : > { %v4348_v4 = vadd.f32 %v12178_v32, %v4309_v34  ;;  %v4230_v46 = vadd.f32 %v8123_v29, %v12145_v1  ;;  %v4224_v10 = vpop.f32.mrb[85].mxu1 }
 0x692   : > { %v12300_v53 = vadd.f32 %v12178_v32, %v4308_v37  ;;  %v4225_v18 = vadd.f32 %v4224_v10, %v12142_v61  ;;  %8190 = vmatmul.mubr.f32.gmra.mrb[76].mxu0 %v14309_v17 }
 0x693   : > { %v4311_v47 = vmul.f32 %v12172_v15, %v4230_v46  ;;  %4620 = vmatmul.mubr.f32.gmra.mrb[116].mxu1 %v14309_v17  ;;  %8192 = vmatprep.mubr.f32.mxu0 %v14309_v17  ;;  %v12309_v42 = vmax.f32 %v4348_v4, 0.0 }
 0x694   : > { %v4310_v1 = vmul.f32 %v12172_v15, %v4225_v18  ;;  %v8126_v14 = vpop.f32.mrb[86].mxu1  ;;  %4624 = vmatprep.mubr.f32.mxu1 %v12296_v26 }
 0x695   : > { %v4350_v39 = vadd.f32 %v12178_v32, %v4311_v47  ;;  %v4240_v28 = vadd.f32 %v8126_v14, %v12150_v5  ;;  %v4234_v61 = vpop.f32.mrb[87].mxu1 }
 0x696   : > { %v4349_v24 = vadd.f32 %v12178_v32, %v4310_v1  ;;  %v4235_v12 = vadd.f32 %v4234_v61, %v12147_v35  ;;  %8193 = vmatmul.mubr.f32.gmra.mrb[78].mxu0 %v14309_v17  ;;  %v4306_v61 = vmul.f32 %v12172_v15, %v12268_v16 }
 0x697   : > { %v4313_v2 = vmul.f32 %v12172_v15, %v4240_v28  ;;  %4625 = vmatmul.mubr.f32.gmra.mrb[118].mxu1 %v12284_v55  ;;  %8195 = vmatprep.mubr.f32.mxu0 %v12309_v42  ;;  %v12325_v11 = vmax.f32 %v4350_v39, 0.0 }
 0x698   : > { %v12321_v44 = vmax.f32 %v4349_v24, 0.0  ;;  %v4312_v9 = vmul.f32 %v12172_v15, %v4235_v12  ;;  %v8129_v5 = vpop.f32.mrb[88].mxu1  ;;  %4629 = vmatprep.mubr.f32.mxu1 %v12313_v21 }
 0x699   : > { %v4352_v43 = vadd.f32 %v12178_v32, %v4313_v2  ;;  %v4250_v35 = vadd.f32 %v8129_v5, %v12155_v22  ;;  %v4244_v62 = vpop.f32.mrb[89].mxu1 }
 0x69a   : > { %v4351_v48 = vadd.f32 %v12178_v32, %v4312_v9  ;;  %v4245_v36 = vadd.f32 %v4244_v62, %v12152_v19  ;;  %8196 = vmatmul.mubr.f32.gmra.mrb[80].mxu0 %v12321_v44 }
 0x69b   : > { %v4315_v6 = vmul.f32 %v12172_v15, %v4250_v35  ;;  %4630 = vmatmul.mubr.f32.gmra.mrb[120].mxu1 %v12296_v26  ;;  %8198 = vmatprep.mubr.f32.mxu0 %v12325_v11  ;;  %v12339_v22 = vmax.f32 %v4352_v43, 0.0 }
 0x69c   : > { %v12335_v59 = vmax.f32 %v4351_v48, 0.0  ;;  %v4314_v23 = vmul.f32 %v12172_v15, %v4245_v36  ;;  %v8132_v0 = vpop.f32.mrb[90].mxu1  ;;  %4634 = vmatprep.mubr.f32.mxu1 %v12245_v38  ;;  %v12408_v48 = vmax.f32 %v12300_v53, 0.0 }
 0x69d   : > { %v12342_v13 = vadd.f32 %v12178_v32, %v4315_v6  ;;  %v4260_v19 = vadd.f32 %v8132_v0, %v12160_v50  ;;  %v4254_v33 = vpop.f32.mrb[91].mxu1  ;;  %v4457_v6 = vld [vmem:[#allocation14 + $0x200] sm:$0xff] }
 0x69e   : > { %v12346_v34 = vadd.f32 %v12178_v32, %v4314_v23  ;;  %v4255_v37 = vadd.f32 %v4254_v33, %v12158_v57  ;;  %8199 = vmatmul.mubr.f32.gmra.mrb[82].mxu0 %v12335_v59  ;;  %v4458_v23 = vld [vmem:[#allocation14 + $0x208] sm:$0xff] }
 0x69f   : > { %v4317_v29 = vmul.f32 %v12172_v15, %v4260_v19  ;;  %4635 = vmatmul.mubr.f32.gmra.mrb[122].mxu1 %v12313_v21  ;;  %8201 = vmatprep.mubr.f32.mxu0 %v12339_v22  ;;  %v12429_v53 = vmax.f32 %v12342_v13, 0.0  ;;  %v8716_v0 = vpack.c.bf16 %v4458_v23, %v4457_v6  ;;  %v4459_v13 = vld [vmem:[#allocation14 + $0x210] sm:$0xff]  ;;  %v4460_v19 = vld [vmem:[#allocation14 + $0x218] sm:$0xff]  ;;  %v4478_v6 = vld [vmem:[#allocation14 + $0x2a8] sm:$0xff] }
 0x6a0   : > { %v4316_v4 = vmul.f32 %v12172_v15, %v4255_v37  ;;  %v8135_v46 = vpop.f32.mrb[92].mxu1  ;;  %4639 = vmatprep.mubr.f32.mxu1 %v12256_v56  ;;  %v8719_v33 = vpack.c.bf16 %v4460_v19, %v4459_v13  ;;  %v4462_v37 = vld [vmem:[#allocation14 + $0x228] sm:$0xff]  ;;  %v4480_v13 = vld [vmem:[#allocation14 + $0x2b8] sm:$0xff] }
 0x6a1   : > { %v4356_v50 = vadd.f32 %v12178_v32, %v4317_v29  ;;  %v4270_v10 = vadd.f32 %v8135_v46, %v12165_v8  ;;  %v4264_v40 = vpop.f32.mrb[93].mxu1  ;;  %v4464_v46 = vld [vmem:[#allocation14 + $0x238] sm:$0xff] }
 0x6a2   : > { %v4355_v57 = vadd.f32 %v12178_v32, %v4316_v4  ;;  %v4265_v18 = vadd.f32 %v4264_v40, %v12162_v52  ;;  %8202 = vmatmul.mubr.f32.gmra.mrb[84].mxu0 %v14309_v17  ;;  %v4463_v4 = vld [vmem:[#allocation14 + $0x230] sm:$0xff]  ;;  %v4466_v40 = vld [vmem:[#allocation14 + $0x248] sm:$0xff] }
 0x6a3   : > { %v4319_v47 = vmul.f32 %v12172_v15, %v4270_v10  ;;  %4640 = vmatmul.mubr.f32.gmra.mrb[124].mxu1 %v12245_v38  ;;  %8204 = vmatprep.mubr.f32.mxu0 %v14309_v17  ;;  %v12365_v39 = vmax.f32 %v4356_v50, 0.0  ;;  %v8725_v50 = vpack.c.bf16 %v4464_v46, %v4463_v4  ;;  %v4465_v10 = vld [vmem:[#allocation14 + $0x240] sm:$0xff] }
 0x6a4   : > { %v4318_v1 = vmul.f32 %v12172_v15, %v4265_v18  ;;  %v8138_v14 = vpop.f32.mrb[94].mxu1  ;;  %4644 = vmatprep.mubr.f32.mxu1 %v12260_v25  ;;  %v12433_v36 = vmax.f32 %v4355_v57, 0.0  ;;  %v4467_v57 = vld [vmem:[#allocation14 + $0x250] sm:$0xff]  ;;  %v4468_v18 = vld [vmem:[#allocation14 + $0x258] sm:$0xff]  ;;  %v4485_v46 = vld [vmem:[#allocation14 + $0x2e0] sm:$0xff] }
 0x6a5   : > { %v4358_v8 = vadd.f32 %v12178_v32, %v4319_v47  ;;  %v4280_v28 = vadd.f32 %v8138_v14, %v12170_v3  ;;  %v4274_v52 = vpop.f32.mrb[95].mxu1  ;;  %v8731_v47 = vpack.c.bf16 %v4468_v18, %v4467_v57  ;;  %v4470_v14 = vld [vmem:[#allocation14 + $0x268] sm:$0xff] }
 0x6a6   : > { %v4357_v24 = vadd.f32 %v12178_v32, %v4318_v1  ;;  %v4275_v12 = vadd.f32 %v4274_v52, %v12167_v30  ;;  %8205 = vmatmul.mubr.f32.gmra.mrb[86].mxu0 %v14309_v17  ;;  %v4345_v30 = vadd.f32 %v12178_v32, %v4306_v61  ;;  %v4469_v1 = vld [vmem:[#allocation14 + $0x260] sm:$0xff]  ;;  %v4472_v52 = vld [vmem:[#allocation14 + $0x278] sm:$0xff] }
 0x6a7   : > { %v4321_v2 = vmul.f32 %v12172_v15, %v4280_v28  ;;  %4645 = vmatmul.mubr.f32.gmra.mrb[126].mxu1 %v12256_v56  ;;  %8207 = vmatprep.mubr.f32.mxu0 %v12365_v39  ;;  %v12381_v5 = vmax.f32 %v4358_v8, 0.0  ;;  %v8734_v8 = vpack.c.bf16 %v4470_v14, %v4469_v1  ;;  %v4471_v28 = vld [vmem:[#allocation14 + $0x270] sm:$0xff] }
 0x6a8   : > { %v12377_v9 = vmax.f32 %v4357_v24, 0.0  ;;  %v4320_v3 = vmul.f32 %v12172_v15, %v4275_v12  ;;  %4649 = vmatprep.mubr.f32.mxu1 %v14309_v17  ;;  %v12394_v62 = vmax.f32 %v4345_v30, 0.0  ;;  %v8737_v61 = vpack.c.bf16 %v4472_v52, %v4471_v28  ;;  %v4473_v24 = vld [vmem:[#allocation14 + $0x280] sm:$0xff]  ;;  %v4474_v12 = vld [vmem:[#allocation14 + $0x288] sm:$0xff] }
 0x6a9   : > { %v4360_v16 = vadd.f32 %v12178_v32, %v4321_v2  ;;  %v8740_v2 = vpack.c.bf16 %v4474_v12, %v4473_v24 }
 0x6aa   : > { %v4359_v43 = vadd.f32 %v12178_v32, %v4320_v3  ;;  %8208 = vmatmul.mubr.f32.gmra.mrb[88].mxu0 %v12377_v9  ;;  %v12401_v32 = vmax.f32 %v12280_v63, 0.0  ;;  %v12424_v63 = vmax.f32 %v12346_v34, 0.0  ;;  %v4461_v34 = vld [vmem:[#allocation14 + $0x220] sm:$0xff]  ;;  %v4475_v3 = vld [vmem:[#allocation14 + $0x290] sm:$0xff] }
 0x6ab   : > { %4650 = vmatmul.mubr.f32.gmra.mrb[128].mxu1 %v14309_v17  ;;  %8210 = vmatprep.mubr.f32.mxu0 %v12381_v5  ;;  %v12392_v15 = vmax.f32 %v4360_v16, 0.0  ;;  %v8722_v29 = vpack.c.bf16 %v4462_v37, %v4461_v34  ;;  %v4476_v16 = vld [vmem:[#allocation14 + $0x298] sm:$0xff]  ;;  %v4482_v34 = vld [vmem:[#allocation14 + $0x2c8] sm:$0xff]  ;;  %v4483_v37 = vld [vmem:[#allocation14 + $0x2d0] sm:$0xff] }
 0x6ac   : > { %v12389_v35 = vmax.f32 %v4359_v43, 0.0  ;;  %4654 = vmatprep.mubr.f32.mxu1 %v14309_v17  ;;  %v8743_v30 = vpack.c.bf16 %v4476_v16, %v4475_v3  ;;  %v4477_v43 = vld [vmem:[#allocation14 + $0x2a0] sm:$0xff]  ;;  %v5516_v16 = vld [vmem:[#allocation19 + $0x8] sm:$0xff] }
 0x6ad   : > { %v8746_v23 = vpack.c.bf16 %v4478_v6, %v4477_v43  ;;  %v5515_v43 = vld [vmem:[#allocation19] sm:$0xff] }
 0x6ae   : > { %8211 = vmatmul.mubr.f32.gmra.mrb[90].mxu0 %v12389_v35 }
 0x6af   : > { %4655 = vmatmul.mubr.f32.gmra.mrb[130].mxu1 %v14309_v17  ;;  %8213 = vmatprep.mubr.f32.mxu0 %v12392_v15 }
 0x6b0   : > { %4659 = vmatprep.mubr.f32.mxu1 %v12394_v62 }
 0x6b2   : > { %8214 = vmatmul.mubr.f32.gmra.mrb[92].mxu0 %v14309_v17 }
 0x6b3   : > { %4660 = vmatmul.mubr.f32.gmra.mrb[132].mxu1 %v14309_v17  ;;  %8216 = vmatprep.mubr.f32.mxu0 %v14309_v17 }
 0x6b4   : > { %4664 = vmatprep.mubr.f32.mxu1 %v12401_v32 }
 0x6b6   : > { %8217 = vmatmul.mubr.f32.gmra.mrb[94].mxu0 %v14309_v17 }
 0x6b7   : > { %4665 = vmatmul.mubr.f32.gmra.mrb[134].mxu1 %v12394_v62 }
 0x6b8   : > { %4669 = vmatprep.mubr.f32.mxu1 %v12408_v48 }
 0x6bb   : > { %4670 = vmatmul.mubr.f32.gmra.mrb[136].mxu1 %v12401_v32 }
 0x6bc   : > { %4674 = vmatprep.mubr.f32.mxu1 %v12309_v42 }
 0x6bf   : > { %4675 = vmatmul.mubr.f32.gmra.mrb[138].mxu1 %v12408_v48 }
 0x6c0   : > { %4679 = vmatprep.mubr.f32.mxu1 %v12321_v44 }
 0x6c3   : > { %4680 = vmatmul.mubr.f32.gmra.mrb[140].mxu1 %v12309_v42 }
 0x6c4   : > { %4684 = vmatprep.mubr.f32.mxu1 %v12325_v11 }
 0x6c7   : > { %4685 = vmatmul.mubr.f32.gmra.mrb[142].mxu1 %v12321_v44 }
 0x6c8   : > { %4689 = vmatprep.mubr.f32.mxu1 %v14309_v17 }
 0x6cb   : > { %4690 = vmatmul.mubr.f32.gmra.mrb[144].mxu1 %v14309_v17 }
 0x6cc   : > { %4694 = vmatprep.mubr.f32.mxu1 %v14309_v17 }
 0x6cf   : > { %4695 = vmatmul.mubr.f32.gmra.mrb[146].mxu1 %v14309_v17 }
 0x6d0   : > { %4699 = vmatprep.mubr.f32.mxu1 %v12424_v63 }
 0x6d3   : > { %4700 = vmatmul.mubr.f32.gmra.mrb[148].mxu1 %v14309_v17 }
 0x6d4   : > { %4704 = vmatprep.mubr.f32.mxu1 %v12429_v53 }
 0x6d7   : > { %4705 = vmatmul.mubr.f32.gmra.mrb[150].mxu1 %v12424_v63 }
 0x6d8   : > { %4709 = vmatprep.mubr.f32.mxu1 %v12433_v36 }
 0x6db   : > { %4710 = vmatmul.mubr.f32.gmra.mrb[152].mxu1 %v12429_v53 }
 0x6dc   : > { %4714 = vmatprep.mubr.f32.mxu1 %v12365_v39 }
 0x6df   : > { %4715 = vmatmul.mubr.f32.gmra.mrb[154].mxu1 %v12433_v36 }
 0x6e0   : > { %4719 = vmatprep.mubr.f32.mxu1 %v12377_v9 }
 0x6e3   : > { %4720 = vmatmul.mubr.f32.gmra.mrb[156].mxu1 %v12365_v39 }
 0x6e4   : > { %4724 = vmatprep.mubr.f32.mxu1 %v12381_v5 }
 0x6e7   : > { %4725 = vmatmul.mubr.f32.gmra.mrb[158].mxu1 %v12377_v9 }
 0x6e8   : > { %4794 = vmatprep.mubr.f32.mxu1 %v12186_v60 }
 0x6eb   : > { %4795 = vmatmul.mubr.f32.vlgmr.msra.gmra.mrb[96].mxu1 %v14309_v17 }
 0x6ec   : > { %4799 = vmatprep.mubr.f32.mxu1 %v12191_v45  ;;  %8717 = vmatpush1.bf16.msra.mxu1 %v8716_v0  ;;  %v4479_v0 = vld [vmem:[#allocation14 + $0x2b0] sm:$0xff] }
 0x6ed   : > { %8718 = vmatprep.subr.bf16.mxu1 %v14221_v20  ;;  %v8749_v19 = vpack.c.bf16 %v4480_v13, %v4479_v0  ;;  %v5521_v0 = vld [vmem:[#allocation19 + $0x30] sm:$0xff]  ;;  %v5528_v13 = vld [vmem:[#allocation19 + $0x68] sm:$0xff] }
 0x6ef   : > { %4800 = vmatmul.mubr.f32.gmra.mrb[98].mxu1 %v12186_v60  ;;  %v8728_v60 = vpack.c.bf16 %v4466_v40, %v4465_v10  ;;  %v4487_v40 = vld [vmem:[#allocation14 + $0x2f0] sm:$0xff] }
 0x6f0   : > { %4804 = vmatprep.mubr.f32.mxu1 %v12205_v54  ;;  %8720 = vmatpush1.bf16.msra.mxu1 %v8719_v33  ;;  %v4481_v33 = vld [vmem:[#allocation14 + $0x2c0] sm:$0xff] }
 0x6f1   : > { %8721 = vmatprep.subr.bf16.mxu1 %v14221_v20 }
 0x6f3   : > { %4805 = vmatmul.mubr.f32.gmra.mrb[100].mxu1 %v12191_v45 }
 0x6f4   : > { %4809 = vmatprep.mubr.f32.mxu1 %v12196_v58  ;;  %8723 = vmatpush1.bf16.msra.mxu1 %v8722_v29  ;;  %v4484_v29 = vld [vmem:[#allocation14 + $0x2d8] sm:$0xff] }
 0x6f5   : > { %8724 = vmatprep.subr.bf16.mxu1 %v14221_v20  ;;  %v8755_v4 = vpack.c.bf16 %v4484_v29, %v4483_v37  ;;  %v5537_v37 = vld [vmem:[#allocation19 + $0xb0] sm:$0xff] }
 0x6f6   : > { %v5529_v29 = vld [vmem:[#allocation19 + $0x70] sm:$0xff] }
 0x6f7   : > { %4810 = vmatmul.mubr.f32.gmra.mrb[102].mxu1 %v12205_v54 }
 0x6f8   : > { %4814 = vmatprep.mubr.f32.mxu1 %v12211_v51  ;;  %8726 = vmatpush1.bf16.msra.mxu1 %v8725_v50  ;;  %v4486_v50 = vld [vmem:[#allocation14 + $0x2e8] sm:$0xff] }
 0x6f9   : > { %8727 = vmatprep.subr.bf16.mxu1 %v14221_v20  ;;  %v8758_v10 = vpack.c.bf16 %v4486_v50, %v4485_v46  ;;  %v5536_v50 = vld [vmem:[#allocation19 + $0xa8] sm:$0xff] }
 0x6fb   : > { %4815 = vmatmul.mubr.f32.gmra.mrb[104].mxu1 %v12196_v58 }
 0x6fc   : > { %4819 = vmatprep.mubr.f32.mxu1 %v12215_v41  ;;  %8729 = vmatpush1.bf16.msra.mxu1 %v8728_v60  ;;  %v4488_v60 = vld [vmem:[#allocation14 + $0x2f8] sm:$0xff] }
 0x6fd   : > { %8730 = vmatprep.subr.bf16.mxu1 %v14221_v20  ;;  %v8761_v57 = vpack.c.bf16 %v4488_v60, %v4487_v40  ;;  %v5542_v40 = vld [vmem:[#allocation19 + $0xd8] sm:$0xff]  ;;  %v8801_v60 = vpack.c.bf16 %v5536_v50, %v5529_v29  ;;  %v5557_v50 = vld [vmem:[#allocation19 + $0x150] sm:$0xff] }
 0x6ff   : > { %4820 = vmatmul.mubr.f32.gmra.mrb[106].mxu1 %v12211_v51 }
 0x700   : > { %4824 = vmatprep.mubr.f32.mxu1 %v12224_v27  ;;  %8732 = vmatpush1.bf16.msra.mxu1 %v8731_v47 }
 0x701   : > { %8733 = vmatprep.subr.bf16.mxu1 %v14221_v20 }
 0x703   : > { %4825 = vmatmul.mubr.f32.gmra.mrb[108].mxu1 %v12215_v41 }
 0x704   : > { %4829 = vmatprep.mubr.f32.mxu1 %v12227_v49  ;;  %8735 = vmatpush1.bf16.msra.mxu1 %v8734_v8 }
 0x705   : > { %8736 = vmatprep.subr.bf16.mxu1 %v14221_v20 }
 0x707   : > { %4830 = vmatmul.mubr.f32.gmra.mrb[110].mxu1 %v12224_v27 }
 0x708   : > { %4834 = vmatprep.mubr.f32.mxu1 %v12284_v55  ;;  %8738 = vmatpush1.bf16.msra.mxu1 %v8737_v61 }
 0x709   : > { %8739 = vmatprep.subr.bf16.mxu1 %v14221_v20 }
 0x70b   : > { %4835 = vmatmul.mubr.f32.gmra.mrb[112].mxu1 %v14309_v17 }
 0x70c   : > { %4839 = vmatprep.mubr.f32.mxu1 %v12296_v26  ;;  %8741 = vmatpush1.bf16.msra.mxu1 %v8740_v2 }
 0x70d   : > { %8742 = vmatprep.subr.bf16.mxu1 %v14221_v20 }
 0x70f   : > { %4840 = vmatmul.mubr.f32.gmra.mrb[114].mxu1 %v12284_v55  ;;  %v8752_v55 = vpack.c.bf16 %v4482_v34, %v4481_v33  ;;  %v8988_v34 = vpack.c.bf16 %v5528_v13, %v5521_v0  ;;  %v5549_v13 = vld [vmem:[#allocation19 + $0x110] sm:$0xff] }
 0x710   : > { %4844 = vmatprep.mubr.f32.mxu1 %v12313_v21  ;;  %8744 = vmatpush1.bf16.msra.mxu1 %v8743_v30  ;;  %v5523_v30 = vld [vmem:[#allocation19 + $0x40] sm:$0xff] }
 0x711   : > { %8745 = vmatprep.subr.bf16.mxu1 %v14221_v20  ;;  %v8795_v6 = vpack.c.bf16 %v5523_v30, %v5516_v16  ;;  %v5551_v16 = vld [vmem:[#allocation19 + $0x120] sm:$0xff] }
 0x713   : > { %4845 = vmatmul.mubr.f32.gmra.mrb[116].mxu1 %v12296_v26  ;;  %8796 = vmatprep.subr.bf16.mxu0 %v8795_v6 }
 0x714   : > { %4849 = vmatprep.mubr.f32.mxu1 %v12245_v38  ;;  %8747 = vmatpush1.bf16.msra.mxu1 %v8746_v23  ;;  %v5522_v23 = vld [vmem:[#allocation19 + $0x38] sm:$0xff] }
 0x715   : > { %8748 = vmatprep.subr.bf16.mxu1 %v14221_v20  ;;  %v8797_v33 = vpack.c.bf16 %v5522_v23, %v5515_v43  ;;  %v5543_v43 = vld [vmem:[#allocation19 + $0xe0] sm:$0xff]  ;;  %v5550_v23 = vld [vmem:[#allocation19 + $0x118] sm:$0xff] }
 0x716   : > { %v8805_v29 = vpack.c.bf16 %v5550_v23, %v5543_v43  ;;  %v5571_v43 = vld [vmem:[#allocation19 + $0x1c0] sm:$0xff]  ;;  %v5578_v23 = vld [vmem:[#allocation19 + $0x1f8] sm:$0xff] }
 0x717   : > { %4850 = vmatmul.mubr.f32.gmra.mrb[118].mxu1 %v12313_v21  ;;  %8798 = vmatpush1.bf16.msra.mxu0 %v8797_v33  ;;  %v5565_v33 = vld [vmem:[#allocation19 + $0x190] sm:$0xff] }
 0x718   : > { %4854 = vmatprep.mubr.f32.mxu1 %v12256_v56  ;;  %8750 = vmatpush1.bf16.msra.mxu1 %v8749_v19 }
 0x719   : > { %8751 = vmatprep.subr.bf16.mxu1 %v14221_v20 }
 0x71b   : > { %4855 = vmatmul.mubr.f32.gmra.mrb[120].mxu1 %v12245_v38 }
 0x71c   : > { %4859 = vmatprep.mubr.f32.mxu1 %v12260_v25  ;;  %8753 = vmatpush1.bf16.msra.mxu1 %v8752_v55  ;;  %v5530_v55 = vld [vmem:[#allocation19 + $0x78] sm:$0xff] }
 0x71d   : > { %8754 = vmatprep.subr.bf16.mxu1 %v14221_v20  ;;  %v8799_v46 = vpack.c.bf16 %v5537_v37, %v5530_v55  ;;  %v5556_v55 = vld [vmem:[#allocation19 + $0x148] sm:$0xff] }
 0x71f   : > { %4860 = vmatmul.mubr.f32.gmra.mrb[122].mxu1 %v12256_v56  ;;  %8800 = vmatprep.subr.bf16.mxu0 %v8799_v46 }
 0x720   : > { %4864 = vmatprep.mubr.f32.mxu1 %v12274_v31  ;;  %8756 = vmatpush1.bf16.msra.mxu1 %v8755_v4 }
 0x721   : > { %8757 = vmatprep.subr.bf16.mxu1 %v14221_v20  ;;  %8802 = vmatpush1.bf16.msra.mxu0 %v8801_v60 }
 0x723   : > { %4865 = vmatmul.mubr.f32.gmra.mrb[124].mxu1 %v12260_v25 }
 0x724   : > { %4869 = vmatprep.mubr.f32.mxu1 %v12277_v7  ;;  %8759 = vmatpush1.bf16.msra.mxu1 %v8758_v10  ;;  %v5535_v10 = vld [vmem:[#allocation19 + $0xa0] sm:$0xff] }
 0x725   : > { %8760 = vmatprep.subr.bf16.mxu1 %v14221_v20  ;;  %v8991_v30 = vpack.c.bf16 %v5542_v40, %v5535_v10  ;;  %v5564_v10 = vld [vmem:[#allocation19 + $0x188] sm:$0xff] }
 0x726   : > { %v8809_v60 = vpack.c.bf16 %v5564_v10, %v5557_v50  ;;  %v5585_v50 = vld [vmem:[#allocation19 + $0x230] sm:$0xff]  ;;  %v5592_v10 = vld [vmem:[#allocation19 + $0x268] sm:$0xff] }
 0x727   : > { %4870 = vmatmul.mubr.f32.gmra.mrb[126].mxu1 %v12274_v31 }
 0x728   : > { %4874 = vmatprep.mubr.f32.mxu1 %v12394_v62  ;;  %8762 = vmatpush1.bf16.msra.mxu1 %v8761_v57  ;;  %v5544_v57 = vld [vmem:[#allocation19 + $0xe8] sm:$0xff] }
 0x729   : > { %8987 = vmatprep.subr.bf16.mxu1 %v14221_v20  ;;  %v8803_v6 = vpack.c.bf16 %v5551_v16, %v5544_v57  ;;  %v5563_v57 = vld [vmem:[#allocation19 + $0x180] sm:$0xff]  ;;  %v5570_v16 = vld [vmem:[#allocation19 + $0x1b8] sm:$0xff] }
 0x72b   : > { %4875 = vmatmul.mubr.f32.gmra.mrb[128].mxu1 %v14309_v17  ;;  %8804 = vmatprep.subr.bf16.mxu0 %v8803_v6 }
 0x72c   : > { %4879 = vmatprep.mubr.f32.mxu1 %v12401_v32  ;;  %8806 = vmatpush1.bf16.msra.mxu0 %v8805_v29  ;;  %v8813_v29 = vpack.c.bf16 %v5578_v23, %v5571_v43  ;;  %v5599_v43 = vld [vmem:[#allocation19 + $0x2a0] sm:$0xff]  ;;  %v5606_v23 = vld [vmem:[#allocation19 + $0x2d8] sm:$0xff] }
 0x72f   : > { %4880 = vmatmul.mubr.f32.gmra.mrb[130].mxu1 %v12394_v62 }
 0x730   : > { %4884 = vmatprep.mubr.f32.mxu1 %v12408_v48 }
 0x733   : > { %4885 = vmatmul.mubr.f32.gmra.mrb[132].mxu1 %v12401_v32 }
 0x734   : > { %4889 = vmatprep.mubr.f32.mxu1 %v12309_v42 }
 0x737   : > { %4890 = vmatmul.mubr.f32.gmra.mrb[134].mxu1 %v12408_v48 }
 0x738   : > { %4894 = vmatprep.mubr.f32.mxu1 %v12321_v44 }
 0x73b   : > { %4895 = vmatmul.mubr.f32.gmra.mrb[136].mxu1 %v12309_v42 }
 0x73c   : > { %4899 = vmatprep.mubr.f32.mxu1 %v12325_v11 }
 0x73f   : > { %4900 = vmatmul.mubr.f32.gmra.mrb[138].mxu1 %v12321_v44 }
 0x740   : > { %4904 = vmatprep.mubr.f32.mxu1 %v12335_v59 }
 0x743   : > { %4905 = vmatmul.mubr.f32.gmra.mrb[140].mxu1 %v12325_v11 }
 0x744   : > { %4909 = vmatprep.mubr.f32.mxu1 %v12339_v22 }
 0x747   : > { %4910 = vmatmul.mubr.f32.gmra.mrb[142].mxu1 %v12335_v59 }
 0x748   : > { %4914 = vmatprep.mubr.f32.mxu1 %v12424_v63 }
 0x74b   : > { %4915 = vmatmul.mubr.f32.gmra.mrb[144].mxu1 %v14309_v17 }
 0x74c   : > { %4919 = vmatprep.mubr.f32.mxu1 %v12429_v53 }
 0x74d   : > { %v12511_v62 = vpop.f32.mrb[64].mxu0 }
 0x74e   : > { %v12513_v18 = vpop.f32.mrb[65].mxu0 }
 0x74f   : > { %4920 = vmatmul.mubr.f32.gmra.mrb[146].mxu1 %v12424_v63 }
 0x750   : > { %4924 = vmatprep.mubr.f32.mxu1 %v12433_v36 }
 0x751   : > { %v12517_v47 = vpop.f32.mrb[66].mxu0 }
 0x752   : > { %v12519_v1 = vpop.f32.mrb[67].mxu0 }
 0x753   : > { %4925 = vmatmul.mubr.f32.gmra.mrb[148].mxu1 %v12429_v53 }
 0x754   : > { %4929 = vmatprep.mubr.f32.mxu1 %v12365_v39 }
 0x755   : > { %v12523_v14 = vpop.f32.mrb[68].mxu0 }
 0x756   : > { %v12525_v8 = vpop.f32.mrb[69].mxu0 }
 0x757   : > { %4930 = vmatmul.mubr.f32.gmra.mrb[150].mxu1 %v12433_v36 }
 0x758   : > { %4934 = vmatprep.mubr.f32.mxu1 %v12377_v9 }
 0x759   : > { %v12529_v28 = vpop.f32.mrb[70].mxu0 }
 0x75a   : > { %v12531_v63 = vpop.f32.mrb[71].mxu0 }
 0x75b   : > { %4935 = vmatmul.mubr.f32.gmra.mrb[152].mxu1 %v12365_v39 }
 0x75c   : > { %4939 = vmatprep.mubr.f32.mxu1 %v12381_v5 }
 0x75d   : > { %v12535_v52 = vpop.f32.mrb[72].mxu0 }
 0x75e   : > { %v12537_v61 = vpop.f32.mrb[73].mxu0 }
 0x75f   : > { %4940 = vmatmul.mubr.f32.gmra.mrb[154].mxu1 %v12377_v9 }
 0x760   : > { %4944 = vmatprep.mubr.f32.mxu1 %v12389_v35 }
 0x761   : > { %v12541_v24 = vpop.f32.mrb[74].mxu0 }
 0x762   : > { %v12543_v12 = vpop.f32.mrb[75].mxu0 }
 0x763   : > { %4945 = vmatmul.mubr.f32.gmra.mrb[156].mxu1 %v12381_v5 }
 0x764   : > { %4949 = vmatprep.mubr.f32.mxu1 %v12392_v15 }
 0x765   : > { %v12547_v2 = vpop.f32.mrb[76].mxu0 }
 0x766   : > { %v12549_v3 = vpop.f32.mrb[77].mxu0 }
 0x767   : > { %4950 = vmatmul.mubr.f32.gmra.mrb[158].mxu1 %v12389_v35 }
 0x768   : > { %5019 = vmatprep.mubr.f32.mxu1 %v12205_v54 }
 0x769   : > { %v12553_v19 = vpop.f32.mrb[78].mxu0 }
 0x76a   : > { %v12555_v4 = vpop.f32.mrb[79].mxu0 }
 0x76b   : > { %5020 = vmatmul.mubr.f32.vlgmr.msra.gmra.mrb[96].mxu1 %v12191_v45  ;;  %v5558_v45 = vld [vmem:[#allocation19 + $0x158] sm:$0xff] }
 0x76c   : > { %5024 = vmatprep.mubr.f32.mxu1 %v12196_v58  ;;  %8989 = vmatpush1.bf16.msra.mxu1 %v8988_v34  ;;  %v8994_v34 = vpack.c.bf16 %v5556_v55, %v5549_v13  ;;  %v8807_v40 = vpack.c.bf16 %v5565_v33, %v5558_v45  ;;  %v5577_v55 = vld [vmem:[#allocation19 + $0x1f0] sm:$0xff]  ;;  %v5584_v45 = vld [vmem:[#allocation19 + $0x228] sm:$0xff] }
 0x76d   : > { %v12559_v0 = vpop.f32.mrb[80].mxu0  ;;  %8990 = vmatprep.subr.bf16.mxu1 %v14221_v20 }
 0x76e   : > { %14310 = vst [vmem:[#allocation89_spill] sm:$0xff] %v12559_v0  ;;  %v12562_v37 = vpop.f32.mrb[81].mxu0  ;;  %8808 = vmatprep.subr.bf16.mxu0 %v8807_v40 }
 0x76f   : > { %14311 = vst [vmem:[#allocation90_spill] sm:$0xff] %v12562_v37  ;;  %5025 = vmatmul.mubr.f32.gmra.mrb[98].mxu1 %v12205_v54  ;;  %v5572_v37 = vld [vmem:[#allocation19 + $0x1c8] sm:$0xff]  ;;  %v5579_v54 = vld [vmem:[#allocation19 + $0x200] sm:$0xff]  ;;  %8810 = vmatpush1.bf16.msra.mxu0 %v8809_v60  ;;  %v8817_v60 = vpack.c.bf16 %v5592_v10, %v5585_v50  ;;  %v5613_v50 = vld [vmem:[#allocation19 + $0x310] sm:$0xff] }
 0x770   : > { %5029 = vmatprep.mubr.f32.mxu1 %v12211_v51  ;;  %8992 = vmatpush1.bf16.msra.mxu1 %v8991_v30  ;;  %v8997_v30 = vpack.c.bf16 %v5570_v16, %v5563_v57  ;;  %v8811_v13 = vpack.c.bf16 %v5579_v54, %v5572_v37  ;;  %v5591_v57 = vld [vmem:[#allocation19 + $0x260] sm:$0xff]  ;;  %v5598_v16 = vld [vmem:[#allocation19 + $0x298] sm:$0xff]  ;;  %v5620_v10 = vld [vmem:[#allocation19 + $0x348] sm:$0xff] }
 0x771   : > { %v12566_v46 = vpop.f32.mrb[82].mxu0  ;;  %8993 = vmatprep.subr.bf16.mxu1 %v14221_v20 }
 0x772   : > { %14312 = vst [vmem:[#allocation55_spill] sm:$0xff] %v12566_v46  ;;  %v12569_v0 = vpop.f32.mrb[83].mxu0  ;;  %v5586_v46 = vld [vmem:[#allocation19 + $0x238] sm:$0xff]  ;;  %8812 = vmatprep.subr.bf16.mxu0 %v8811_v13 }
 0x773   : > { %5030 = vmatmul.mubr.f32.gmra.mrb[100].mxu1 %v12196_v58  ;;  %v5593_v58 = vld [vmem:[#allocation19 + $0x270] sm:$0xff]  ;;  %8814 = vmatpush1.bf16.msra.mxu0 %v8813_v29  ;;  %v8821_v29 = vpack.c.bf16 %v5606_v23, %v5599_v43  ;;  %v5627_v43 = vld [vmem:[#allocation19 + $0x380] sm:$0xff]  ;;  %v5634_v23 = vld [vmem:[#allocation19 + $0x3b8] sm:$0xff] }
 0x774   : > { %5034 = vmatprep.mubr.f32.mxu1 %v12215_v41  ;;  %8995 = vmatpush1.bf16.msra.mxu1 %v8994_v34  ;;  %v9000_v34 = vpack.c.bf16 %v5584_v45, %v5577_v55  ;;  %v8815_v37 = vpack.c.bf16 %v5593_v58, %v5586_v46  ;;  %v5605_v55 = vld [vmem:[#allocation19 + $0x2d0] sm:$0xff]  ;;  %v5612_v45 = vld [vmem:[#allocation19 + $0x308] sm:$0xff] }
 0x775   : > { %v12573_v6 = vpop.f32.mrb[84].mxu0  ;;  %8996 = vmatprep.subr.bf16.mxu1 %v14221_v20 }
 0x776   : > { %14313 = vst [vmem:[#allocation70_spill] sm:$0xff] %v12573_v6  ;;  %v12576_v33 = vpop.f32.mrb[85].mxu0  ;;  %v5600_v6 = vld [vmem:[#allocation19 + $0x2a8] sm:$0xff]  ;;  %8816 = vmatprep.subr.bf16.mxu0 %v8815_v37 }
 0x777   : > { %5035 = vmatmul.mubr.f32.gmra.mrb[102].mxu1 %v12211_v51  ;;  %v5607_v51 = vld [vmem:[#allocation19 + $0x2e0] sm:$0xff]  ;;  %8818 = vmatpush1.bf16.msra.mxu0 %v8817_v60  ;;  %v8825_v60 = vpack.c.bf16 %v5620_v10, %v5613_v50  ;;  %v5648_v50 = vld [vmem:[#allocation19 + $0x428] sm:$0xff] }
 0x778   : > { %5039 = vmatprep.mubr.f32.mxu1 %v12224_v27  ;;  %8998 = vmatpush1.bf16.msra.mxu1 %v8997_v30  ;;  %v9003_v30 = vpack.c.bf16 %v5598_v16, %v5591_v57  ;;  %v8819_v46 = vpack.c.bf16 %v5607_v51, %v5600_v6  ;;  %v5619_v57 = vld [vmem:[#allocation19 + $0x340] sm:$0xff]  ;;  %v5626_v16 = vld [vmem:[#allocation19 + $0x378] sm:$0xff] }
 0x779   : > { %v12580_v40 = vpop.f32.mrb[86].mxu0  ;;  %8999 = vmatprep.subr.bf16.mxu1 %v14221_v20 }
 0x77a   : > { %14314 = vst [vmem:[#allocation73_spill] sm:$0xff] %v12580_v40  ;;  %v12583_v54 = vpop.f32.mrb[87].mxu0  ;;  %v5614_v40 = vld [vmem:[#allocation19 + $0x318] sm:$0xff]  ;;  %8820 = vmatprep.subr.bf16.mxu0 %v8819_v46  ;;  %v5633_v46 = vld [vmem:[#allocation19 + $0x3b0] sm:$0xff] }
 0x77b   : > { %5040 = vmatmul.mubr.f32.gmra.mrb[104].mxu1 %v12215_v41  ;;  %v5621_v41 = vld [vmem:[#allocation19 + $0x350] sm:$0xff]  ;;  %8822 = vmatpush1.bf16.msra.mxu0 %v8821_v29 }
 0x77c   : > { %5044 = vmatprep.mubr.f32.mxu1 %v12227_v49  ;;  %9001 = vmatpush1.bf16.msra.mxu1 %v9000_v34  ;;  %v9006_v34 = vpack.c.bf16 %v5612_v45, %v5605_v55  ;;  %v8823_v6 = vpack.c.bf16 %v5621_v41, %v5614_v40  ;;  %v5640_v55 = vld [vmem:[#allocation19 + $0x3e8] sm:$0xff]  ;;  %v5642_v45 = vld [vmem:[#allocation19 + $0x3f8] sm:$0xff]  ;;  %v5649_v41 = vld [vmem:[#allocation19 + $0x430] sm:$0xff] }
 0x77d   : > { %v12587_v13 = vpop.f32.mrb[88].mxu0  ;;  %9002 = vmatprep.subr.bf16.mxu1 %v14221_v20  ;;  %v9012_v29 = vpack.c.bf16 %v5640_v55, %v5633_v46  ;;  %v8831_v10 = vpack.c.bf16 %v5649_v41, %v5642_v45  ;;  %v5668_v46 = vld [vmem:[#allocation19 + $0x4c8] sm:$0xff]  ;;  %v5670_v55 = vld [vmem:[#allocation19 + $0x4d8] sm:$0xff]  ;;  %v5677_v45 = vld [vmem:[#allocation19 + $0x510] sm:$0xff] }
 0x77e   : > { %14315 = vst [vmem:[#allocation74_spill] sm:$0xff] %v12587_v13  ;;  %v12590_v58 = vpop.f32.mrb[89].mxu0  ;;  %v5628_v13 = vld [vmem:[#allocation19 + $0x388] sm:$0xff]  ;;  %8824 = vmatprep.subr.bf16.mxu0 %v8823_v6  ;;  %v5647_v6 = vld [vmem:[#allocation19 + $0x420] sm:$0xff] }
 0x77f   : > { %5045 = vmatmul.mubr.f32.gmra.mrb[106].mxu1 %v12224_v27  ;;  %v5635_v27 = vld [vmem:[#allocation19 + $0x3c0] sm:$0xff]  ;;  %8826 = vmatpush1.bf16.msra.mxu0 %v8825_v60 }
 0x780   : > { %5049 = vmatprep.mubr.f32.mxu1 %v14309_v17  ;;  %9004 = vmatpush1.bf16.msra.mxu1 %v9003_v30  ;;  %v9009_v30 = vpack.c.bf16 %v5626_v16, %v5619_v57  ;;  %v8827_v40 = vpack.c.bf16 %v5635_v27, %v5628_v13  ;;  %v5654_v13 = vld [vmem:[#allocation19 + $0x458] sm:$0xff]  ;;  %v5656_v57 = vld [vmem:[#allocation19 + $0x468] sm:$0xff]  ;;  %v5663_v16 = vld [vmem:[#allocation19 + $0x4a0] sm:$0xff] }
 0x781   : > { %v12594_v37 = vpop.f32.mrb[90].mxu0  ;;  %9005 = vmatprep.subr.bf16.mxu1 %v14221_v20  ;;  %v9015_v60 = vpack.c.bf16 %v5654_v13, %v5647_v6  ;;  %v5684_v6 = vld [vmem:[#allocation19 + $0x548] sm:$0xff]  ;;  %v5691_v13 = vld [vmem:[#allocation19 + $0x580] sm:$0xff] }
 0x782   : > { %v12597_v51 = vpop.f32.mrb[91].mxu0  ;;  %8828 = vmatprep.subr.bf16.mxu0 %v8827_v40  ;;  %v5661_v40 = vld [vmem:[#allocation19 + $0x490] sm:$0xff] }
 0x783   : > { %5050 = vmatmul.mubr.f32.gmra.mrb[108].mxu1 %v12227_v49  ;;  %v8829_v49 = vpack.c.bf16 %v5634_v23, %v5627_v43  ;;  %v5662_v43 = vld [vmem:[#allocation19 + $0x498] sm:$0xff]  ;;  %v8835_v23 = vpack.c.bf16 %v5663_v16, %v5656_v57  ;;  %v9018_v41 = vpack.c.bf16 %v5668_v46, %v5661_v40  ;;  %v5683_v16 = vld [vmem:[#allocation19 + $0x540] sm:$0xff]  ;;  %v5705_v40 = vld [vmem:[#allocation19 + $0x5f0] sm:$0xff] }
 0x784   : > { %5054 = vmatprep.mubr.f32.mxu1 %v14309_v17  ;;  %9007 = vmatpush1.bf16.msra.mxu1 %v9006_v34  ;;  %v5641_v34 = vld [vmem:[#allocation19 + $0x3f0] sm:$0xff] }
 0x785   : > { %9008 = vmatprep.subr.bf16.mxu1 %v14221_v20  ;;  %8830 = vmatpush1.bf16.msra.mxu0 %v8829_v49  ;;  %v8833_v27 = vpack.c.bf16 %v5648_v50, %v5641_v34  ;;  %v5669_v49 = vld [vmem:[#allocation19 + $0x4d0] sm:$0xff]  ;;  %v8839_v34 = vpack.c.bf16 %v5677_v45, %v5670_v55  ;;  %v5675_v50 = vld [vmem:[#allocation19 + $0x500] sm:$0xff]  ;;  %v5704_v45 = vld [vmem:[#allocation19 + $0x5e8] sm:$0xff] }
 0x786   : > { %8832 = vmatprep.subr.bf16.mxu0 %v8831_v10  ;;  %v5682_v10 = vld [vmem:[#allocation19 + $0x538] sm:$0xff]  ;;  %v5697_v55 = vld [vmem:[#allocation19 + $0x5b0] sm:$0xff] }
 0x787   : > { %5055 = vmatmul.mubr.f32.gmra.mrb[110].mxu1 %v14309_v17  ;;  %v9021_v57 = vpack.c.bf16 %v5682_v10, %v5675_v50  ;;  %v5725_v50 = vld [vmem:[#allocation19 + $0x690] sm:$0xff] }
 0x788   : > { %5059 = vmatprep.mubr.f32.mxu1 %v12313_v21  ;;  %9010 = vmatpush1.bf16.msra.mxu1 %v9009_v30  ;;  %v5655_v30 = vld [vmem:[#allocation19 + $0x460] sm:$0xff] }
 0x789   : > { %9011 = vmatprep.subr.bf16.mxu1 %v14221_v20  ;;  %8834 = vmatpush1.bf16.msra.mxu0 %v8833_v27  ;;  %v5690_v27 = vld [vmem:[#allocation19 + $0x578] sm:$0xff] }
 0x78a   : > { %8836 = vmatprep.subr.bf16.mxu0 %v8835_v23  ;;  %v5698_v23 = vld [vmem:[#allocation19 + $0x5b8] sm:$0xff] }
 0x78b   : > { %5060 = vmatmul.mubr.f32.gmra.mrb[112].mxu1 %v12296_v26  ;;  %v8837_v26 = vpack.c.bf16 %v5662_v43, %v5655_v30  ;;  %v5689_v30 = vld [vmem:[#allocation19 + $0x570] sm:$0xff]  ;;  %v5696_v43 = vld [vmem:[#allocation19 + $0x5a8] sm:$0xff] }
 0x78c   : > { %5064 = vmatprep.mubr.f32.mxu1 %v12245_v38  ;;  %9013 = vmatpush1.bf16.msra.mxu1 %v9012_v29  ;;  %v5676_v29 = vld [vmem:[#allocation19 + $0x508] sm:$0xff]  ;;  %v9024_v46 = vpack.c.bf16 %v5696_v43, %v5689_v30 }
 0x78d   : > { %9014 = vmatprep.subr.bf16.mxu1 %v14221_v20  ;;  %8838 = vmatpush1.bf16.msra.mxu0 %v8837_v26  ;;  %v8847_v26 = vpack.c.bf16 %v5705_v40, %v5698_v23  ;;  %v9655_v40 = vld [vmem:[#allocation8] sm:$0x3] }
 0x78e   : > { %8840 = vmatprep.subr.bf16.mxu0 %v8839_v34 }
 0x78f   : > { %5065 = vmatmul.mubr.f32.gmra.mrb[114].mxu1 %v12313_v21  ;;  %v8841_v21 = vpack.c.bf16 %v5676_v29, %v5669_v49  ;;  %v5710_v49 = vld [vmem:[#allocation19 + $0x618] sm:$0xff]  ;;  %v8849_v29 = vpack.c.bf16 %v5704_v45, %v5697_v55 }
 0x790   : > { %5069 = vmatprep.mubr.f32.mxu1 %v12256_v56  ;;  %9016 = vmatpush1.bf16.msra.mxu1 %v9015_v60  ;;  %v8843_v60 = vpack.c.bf16 %v5691_v13, %v5684_v6  ;;  %v5732_v6 = vld [vmem:[#allocation19 + $0x6c8] sm:$0xff]  ;;  %v5731_v13 = vld [vmem:[#allocation19 + $0x6c0] sm:$0xff] }
 0x791   : > { %9017 = vmatprep.subr.bf16.mxu1 %v14221_v20  ;;  %8842 = vmatpush1.bf16.msra.mxu0 %v8841_v21  ;;  %v5738_v21 = vld [vmem:[#allocation19 + $0x6f8] sm:$0xff] }
 0x792   : > { %8844 = vmatprep.subr.bf16.mxu0 %v8843_v60  ;;  %v5525_v60 = vld [vmem:[#allocation19 + $0x50] sm:$0xff] }
 0x793   : > { %5070 = vmatmul.mubr.f32.gmra.mrb[116].mxu1 %v12245_v38  ;;  %v8845_v38 = vpack.c.bf16 %v5690_v27, %v5683_v16  ;;  %v9033_v16 = vpack.c.bf16 %v5738_v21, %v5731_v13  ;;  %v5518_v27 = vld [vmem:[#allocation19 + $0x18] sm:$0xff] }
 0x794   : > { %5074 = vmatprep.mubr.f32.mxu1 %v12260_v25  ;;  %9019 = vmatpush1.bf16.msra.mxu1 %v9018_v41  ;;  %v5703_v41 = vld [vmem:[#allocation19 + $0x5e0] sm:$0xff]  ;;  %v8859_v30 = vpack.c.bf16 %v5525_v60, %v5518_v27 }
 0x795   : > { %9020 = vmatprep.subr.bf16.mxu1 %v14221_v20  ;;  %8846 = vmatpush1.bf16.msra.mxu0 %v8845_v38 }
 0x796   : > { %8848 = vmatprep.subr.bf16.mxu0 %v8847_v26  ;;  %v12681_v26 = vld [vmem:[#allocation17] ss:$0 sm:$0xff] }
 0x797   : > { %5075 = vmatmul.mubr.f32.gmra.mrb[118].mxu1 %v12256_v56  ;;  %v9027_v56 = vpack.c.bf16 %v5710_v49, %v5703_v41 }
 0x798   : > { %5079 = vmatprep.mubr.f32.mxu1 %v12274_v31  ;;  %9022 = vmatpush1.bf16.msra.mxu1 %v9021_v57  ;;  %v8857_v57 = vpack.c.bf16 %v5732_v6, %v5725_v50 }
 0x799   : > { %9023 = vmatprep.subr.bf16.mxu1 %v14221_v20  ;;  %8850 = vmatpush1.bf16.msra.mxu0 %v8849_v29  ;;  %v14319_v29 = vld [vmem:[#allocation36_spill] sm:$0xff] }
 0x79b   : > { %5080 = vmatmul.mubr.f32.gmra.mrb[120].mxu1 %v12260_v25  ;;  %v5712_v25 = vld [vmem:[#allocation19 + $0x628] sm:$0xff] }
 0x79c   : > { %5084 = vmatprep.mubr.f32.mxu1 %v12277_v7  ;;  %9025 = vmatpush1.bf16.msra.mxu1 %v9024_v46  ;;  %v12678_v46 = vld [vmem:[#allocation16] ss:$0 sm:$0xff] }
 0x79d   : > { %9026 = vmatprep.subr.bf16.mxu1 %v14221_v20 }
 0x79f   : > { %5085 = vmatmul.mubr.f32.gmra.mrb[122].mxu1 %v12274_v31  ;;  %v5719_v31 = vld [vmem:[#allocation19 + $0x660] sm:$0xff] }
 0x7a0   : > { %5089 = vmatprep.mubr.f32.mxu1 %v14309_v17  ;;  %9028 = vmatpush1.bf16.msra.mxu1 %v9027_v56 }
 0x7a1   : > { %9029 = vmatprep.subr.bf16.mxu1 %v14221_v20 }
 0x7a3   : > { %5090 = vmatmul.mubr.f32.gmra.mrb[124].mxu1 %v12277_v7  ;;  %v5711_v7 = vld [vmem:[#allocation19 + $0x620] sm:$0xff] }
 0x7a4   : > { %5094 = vmatprep.mubr.f32.mxu1 %v14309_v17 }
 0x7a7   : > { %5095 = vmatmul.mubr.f32.gmra.mrb[126].mxu1 %v14309_v17 }
 0x7a8   : > { %5099 = vmatprep.mubr.f32.mxu1 %v12408_v48 }
 0x7ab   : > { %5100 = vmatmul.mubr.f32.gmra.mrb[128].mxu1 %v12401_v32  ;;  %v5718_v32 = vld [vmem:[#allocation19 + $0x658] sm:$0xff] }
 0x7ac   : > { %5104 = vmatprep.mubr.f32.mxu1 %v12309_v42 }
 0x7af   : > { %5105 = vmatmul.mubr.f32.gmra.mrb[130].mxu1 %v12408_v48  ;;  %v5724_v48 = vld [vmem:[#allocation19 + $0x688] sm:$0xff] }
 0x7b0   : > { %5109 = vmatprep.mubr.f32.mxu1 %v12321_v44 }
 0x7b3   : > { %5110 = vmatmul.mubr.f32.gmra.mrb[132].mxu1 %v12309_v42  ;;  %v8851_v42 = vpack.c.bf16 %v5719_v31, %v5712_v25  ;;  %v5517_v31 = vld [vmem:[#allocation19 + $0x10] sm:$0xff] }
 0x7b4   : > { %5114 = vmatprep.mubr.f32.mxu1 %v12325_v11 }
 0x7b5   : > { %8852 = vmatprep.subr.bf16.mxu0 %v8851_v42 }
 0x7b7   : > { %5115 = vmatmul.mubr.f32.gmra.mrb[134].mxu1 %v12321_v44  ;;  %v5717_v44 = vld [vmem:[#allocation19 + $0x650] sm:$0xff] }
 0x7b8   : > { %5119 = vmatprep.mubr.f32.mxu1 %v12335_v59  ;;  %v9030_v34 = vpack.c.bf16 %v5724_v48, %v5717_v44  ;;  %v5532_v48 = vld [vmem:[#allocation19 + $0x88] sm:$0xff] }
 0x7ba   : > { %9031 = vmatpush1.bf16.msra.mxu1 %v9030_v34 }
 0x7bb   : > { %5120 = vmatmul.mubr.f32.gmra.mrb[136].mxu1 %v12325_v11  ;;  %v8853_v11 = vpack.c.bf16 %v5718_v32, %v5711_v7  ;;  %9032 = vmatprep.subr.bf16.mxu1 %v14221_v20  ;;  %v12659_v20 = vpop.f32.mrb[92].mxu0  ;;  %v5524_v7 = vld [vmem:[#allocation19 + $0x48] sm:$0xff] }
 0x7bc   : > { %5124 = vmatprep.mubr.f32.mxu1 %v12339_v22 }
 0x7bd   : > { %8854 = vmatpush1.bf16.msra.mxu0 %v8853_v11 }
 0x7be   : > { %9034 = vmatpush1.bf16.msra.mxu1 %v9033_v16  ;;  %v5538_v16 = vld [vmem:[#allocation19 + $0xb8] sm:$0xff] }
 0x7bf   : > { %5125 = vmatmul.mubr.f32.gmra.mrb[138].mxu1 %v12335_v59  ;;  %v5726_v59 = vld [vmem:[#allocation19 + $0x698] sm:$0xff] }
 0x7c0   : > { %5129 = vmatprep.mubr.f32.mxu1 %v14309_v17 }
 0x7c3   : > { %5130 = vmatmul.mubr.f32.gmra.mrb[140].mxu1 %v12339_v22  ;;  %v5733_v22 = vld [vmem:[#allocation19 + $0x6d0] sm:$0xff] }
 0x7c4   : > { %5134 = vmatprep.mubr.f32.mxu1 %v14309_v17  ;;  %v8855_v10 = vpack.c.bf16 %v5733_v22, %v5726_v59  ;;  %v8861_v59 = vpack.c.bf16 %v5524_v7, %v5517_v31 }
 0x7c6   : > { %8856 = vmatprep.subr.bf16.mxu0 %v8855_v10  ;;  %v14321_v10 = vld [vmem:[#allocation37_spill] sm:$0xff] }
 0x7c7   : > { %5135 = vmatmul.mubr.f32.gmra.mrb[142].mxu1 %v14309_v17  ;;  %8858 = vmatpush1.bf16.msra.mxu0 %v8857_v57  ;;  %v5531_v57 = vld [vmem:[#allocation19 + $0x80] sm:$0xff] }
 0x7c8   : > { %5139 = vmatprep.mubr.f32.mxu1 %v12433_v36  ;;  %8860 = vmatprep.subr.bf16.mxu0 %v8859_v30  ;;  %v5546_v30 = vld [vmem:[#allocation19 + $0xf8] sm:$0xff] }
 0x7cb   : > { %5140 = vmatmul.mubr.f32.gmra.mrb[144].mxu1 %v12429_v53 }
 0x7cc   : > { %5144 = vmatprep.mubr.f32.mxu1 %v12365_v39 }
 0x7cf   : > { %5145 = vmatmul.mubr.f32.gmra.mrb[146].mxu1 %v12433_v36  ;;  %v9654_v36 = vld [vmem:[#allocation7] sm:$0x3] }
 0x7d0   : > { %5149 = vmatprep.mubr.f32.mxu1 %v12377_v9 }
 0x7d3   : > { %5150 = vmatmul.mubr.f32.gmra.mrb[148].mxu1 %v12365_v39  ;;  %v12661_v39 = vpop.f32.mrb[93].mxu0 }
 0x7d4   : > { %5154 = vmatprep.mubr.f32.mxu1 %v12381_v5 }
 0x7d7   : > { %5155 = vmatmul.mubr.f32.gmra.mrb[150].mxu1 %v12377_v9  ;;  %v14316_v9 = vld [vmem:[#allocation33_spill] sm:$0xff] }
 0x7d8   : > { %5159 = vmatprep.mubr.f32.mxu1 %v12389_v35  ;;  %v12664_v53 = vsub.s32 0, %v14316_v9 }
 0x7da   : > { %14317 = vst [vmem:[#allocation85_spill] sm:$0xff] %v12664_v53 }
 0x7db   : > { %5160 = vmatmul.mubr.f32.gmra.mrb[152].mxu1 %v12381_v5  ;;  %v12666_v5 = vpop.f32.mrb[94].mxu0 }
 0x7dc   : > { %5164 = vmatprep.mubr.f32.mxu1 %v12392_v15  ;;  %v12671_v43 = vpop.f32.mrb[95].mxu0 }
 0x7df   : > { %5165 = vmatmul.mubr.f32.gmra.mrb[154].mxu1 %v12389_v35  ;;  %v12669_v35 = vrot.slane %v9654_v36, %v12664_v53  ;;  %v5553_v36 = vld [vmem:[#allocation19 + $0x130] sm:$0xff] }
 0x7e0   : > { %5169 = vmatprep.mubr.f32.mxu1 %v14309_v17 }
 0x7e1   : > { %v2071_v56 = vmul.f32 %v12669_v35, %v14319_v29  ;;  %v2073_v6 = vmul.f32 %v12669_v35, %v14321_v10  ;;  %v5545_v29 = vld [vmem:[#allocation19 + $0xf0] sm:$0xff] }
 0x7e3   : > { %5170 = vmatmul.mubr.f32.gmra.mrb[156].mxu1 %v12392_v15  ;;  %v14318_v15 = vld [vmem:[#allocation35_spill] sm:$0xff] }
 0x7e4   : > { %5174 = vmatprep.mubr.f32.mxu1 %v14309_v17  ;;  %v2069_v23 = vmul.f32 %v12669_v35, %v14318_v15 }
 0x7e7   : > { %5175 = vmatmul.mubr.f32.gmra.mrb[158].mxu1 %v14309_v17  ;;  %v12676_v17 = vrot.slane %v9655_v40, %v12664_v53  ;;  %v8865_v40 = vpack.c.bf16 %v5538_v16, %v5531_v57 }
 0x7e9   : > { %v2145_v49 = vadd.f32 %v12676_v17, %v2069_v23  ;;  %v2147_v50 = vadd.f32 %v12676_v17, %v2071_v56  ;;  %v5552_v56 = vld [vmem:[#allocation19 + $0x128] sm:$0xff] }
 0x7eb   : > { %v12692_v22 = vmax.f32 %v2145_v49, 0.0  ;;  %v8867_v49 = vpack.c.bf16 %v5553_v36, %v5546_v30 }
 0x7ed   : > { %14320 = vst [vmem:[#allocation38_spill] sm:$0xff] %v12692_v22 }
 0x83e   : > { %v5021_v38 = vpop.f32.mrb[96].mxu1 }
 0x83f   : > { %v5247_v55 = vadd.f32 %v12513_v18, %v5021_v38  ;;  %v5023_v45 = vpop.f32.mrb[97].mxu1  ;;  %v5539_v18 = vld [vmem:[#allocation19 + $0xc0] sm:$0xff]  ;;  %v12706_v38 = vmax.f32 %v2147_v50, 0.0 }
 0x840   : > { %v8863_v21 = vpack.c.bf16 %v5539_v18, %v5532_v48  ;;  %v8869_v18 = vpack.c.bf16 %v5552_v56, %v5545_v29  ;;  %v5580_v29 = vld [vmem:[#allocation19 + $0x208] sm:$0xff] }
 0x841   : > { %v5412_v41 = vmul.f32 %v12678_v46, %v5247_v55  ;;  %v14323_v55 = vld [vmem:[#allocation40_spill] sm:$0xff] }
 0x842   : > { %v5026_v25 = vpop.f32.mrb[98].mxu1  ;;  %v2075_v45 = vmul.f32 %v12669_v35, %v14323_v55 }
 0x843   : > { %v5451_v42 = vadd.f32 %v12681_v26, %v5412_v41  ;;  %v5252_v32 = vadd.f32 %v12511_v62, %v5026_v25  ;;  %v5028_v44 = vpop.f32.mrb[99].mxu1 }
 0x845   : > { %v12689_v11 = vmax.f32 %v5451_v42, 0.0  ;;  %v5413_v34 = vmul.f32 %v12678_v46, %v5252_v32  ;;  %v5560_v42 = vld [vmem:[#allocation19 + $0x168] sm:$0xff]  ;;  %v5567_v32 = vld [vmem:[#allocation19 + $0x1a0] sm:$0xff] }
 0x846   : > { %v5031_v13 = vpop.f32.mrb[100].mxu1 }
 0x847   : > { %v5452_v62 = vadd.f32 %v12681_v26, %v5413_v34  ;;  %v5257_v27 = vadd.f32 %v12519_v1, %v5031_v13  ;;  %v5033_v60 = vpop.f32.mrb[101].mxu1  ;;  %5840 = vmatprep.mubr.f32.mxu0 %v12689_v11  ;;  %6611 = vmatprep.mubr.f32.mxu1 %v12689_v11  ;;  %v2149_v1 = vadd.f32 %v12676_v17, %v2073_v6  ;;  %v5559_v13 = vld [vmem:[#allocation19 + $0x160] sm:$0xff] }
 0x848   : > { %5841 = vmatmul.mubr.f32.vlgmr.msra.gmra.mrb[96].mxu0 %v12692_v22  ;;  %6612 = vmatmul.mubr.f32.vlgmr.msra.gmra.mrb[160].mxu1 %v12692_v22  ;;  %v8871_v6 = vpack.c.bf16 %v5567_v32, %v5560_v42  ;;  %v5581_v60 = vld [vmem:[#allocation19 + $0x210] sm:$0xff]  ;;  %v5595_v42 = vld [vmem:[#allocation19 + $0x280] sm:$0xff] }
 0x849   : > { %v12703_v15 = vmax.f32 %v5452_v62, 0.0  ;;  %v5414_v23 = vmul.f32 %v12678_v46, %v5257_v27  ;;  %8862 = vmatpush1.bf16.msra.mxu0 %v8861_v59  ;;  %v12720_v34 = vmax.f32 %v2149_v1, 0.0  ;;  %v14324_v59 = vld [vmem:[#allocation42_spill] sm:$0xff]  ;;  %v5574_v27 = vld [vmem:[#allocation19 + $0x1d8] sm:$0xff] }
 0x84a   : > { %v5036_v41 = vpop.f32.mrb[102].mxu1  ;;  %8864 = vmatprep.subr.bf16.mxu0 %v8863_v21  ;;  %v2077_v50 = vmul.f32 %v12669_v35, %v14324_v59  ;;  %v5566_v21 = vld [vmem:[#allocation19 + $0x198] sm:$0xff]  ;;  %v14326_v59 = vld [vmem:[#allocation44_spill] sm:$0xff] }
 0x84b   : > { %14322 = vst [vmem:[#allocation39_spill] sm:$0xff] %v12703_v15  ;;  %v5453_v25 = vadd.f32 %v12681_v26, %v5414_v23  ;;  %v5262_v31 = vadd.f32 %v12517_v47, %v5036_v41  ;;  %v5038_v7 = vpop.f32.mrb[103].mxu1  ;;  %5846 = vmatprep.mubr.f32.mxu0 %v12703_v15  ;;  %6616 = vmatprep.mubr.f32.mxu1 %v12703_v15  ;;  %v14325_v1 = vld [vmem:[#allocation43_spill] sm:$0xff] }
 0x84c   : > { %5847 = vmatmul.mubr.f32.gmra.mrb[98].mxu0 %v12706_v38  ;;  %6617 = vmatmul.mubr.f32.gmra.mrb[162].mxu1 %v12706_v38  ;;  %v2151_v47 = vadd.f32 %v12676_v17, %v2075_v45  ;;  %v8873_v23 = vpack.c.bf16 %v5566_v21, %v5559_v13  ;;  %v2079_v55 = vmul.f32 %v12669_v35, %v14325_v1  ;;  %v5588_v7 = vld [vmem:[#allocation19 + $0x248] sm:$0xff]  ;;  %v5587_v13 = vld [vmem:[#allocation19 + $0x240] sm:$0xff]  ;;  %v5594_v21 = vld [vmem:[#allocation19 + $0x278] sm:$0xff] }
 0x84d   : > { %v12717_v44 = vmax.f32 %v5453_v25, 0.0  ;;  %v5415_v48 = vmul.f32 %v12678_v46, %v5262_v31  ;;  %8866 = vmatpush1.bf16.msra.mxu0 %v8865_v40  ;;  %v8875_v41 = vpack.c.bf16 %v5581_v60, %v5574_v27  ;;  %v5602_v27 = vld [vmem:[#allocation19 + $0x2b8] sm:$0xff]  ;;  %v5609_v60 = vld [vmem:[#allocation19 + $0x2f0] sm:$0xff] }
 0x84e   : > { %v5041_v10 = vpop.f32.mrb[104].mxu1  ;;  %8868 = vmatprep.subr.bf16.mxu0 %v8867_v49  ;;  %v12734_v40 = vmax.f32 %v2151_v47, 0.0  ;;  %v5573_v49 = vld [vmem:[#allocation19 + $0x1d0] sm:$0xff] }
 0x84f   : > { %v5454_v57 = vadd.f32 %v12681_v26, %v5415_v48  ;;  %v5267_v16 = vadd.f32 %v12525_v8, %v5041_v10  ;;  %v5043_v62 = vpop.f32.mrb[105].mxu1  ;;  %5852 = vmatprep.mubr.f32.mxu0 %v12717_v44  ;;  %6621 = vmatprep.mubr.f32.mxu1 %v12717_v44  ;;  %v2153_v8 = vadd.f32 %v12676_v17, %v2077_v50 }
 0x850   : > { %5853 = vmatmul.mubr.f32.gmra.mrb[100].mxu0 %v12720_v34  ;;  %6622 = vmatmul.mubr.f32.gmra.mrb[164].mxu1 %v12720_v34  ;;  %v2081_v50 = vmul.f32 %v12669_v35, %v14326_v59 }
 0x851   : > { %v12731_v30 = vmax.f32 %v5454_v57, 0.0  ;;  %v5416_v36 = vmul.f32 %v12678_v46, %v5267_v16  ;;  %8870 = vmatpush1.bf16.msra.mxu0 %v8869_v18  ;;  %v8877_v18 = vpack.c.bf16 %v5580_v29, %v5573_v49  ;;  %v12748_v47 = vmax.f32 %v2153_v8, 0.0  ;;  %v5601_v29 = vld [vmem:[#allocation19 + $0x2b0] sm:$0xff] }
 0x852   : > { %v5046_v45 = vpop.f32.mrb[106].mxu1  ;;  %8872 = vmatprep.subr.bf16.mxu0 %v8871_v6  ;;  %v8879_v6 = vpack.c.bf16 %v5595_v42, %v5588_v7  ;;  %v8881_v8 = vpack.c.bf16 %v5594_v21, %v5587_v13  ;;  %v8883_v49 = vpack.c.bf16 %v5609_v60, %v5602_v27  ;;  %v5616_v42 = vld [vmem:[#allocation19 + $0x328] sm:$0xff] }
 0x853   : > { %v5455_v56 = vadd.f32 %v12681_v26, %v5416_v36  ;;  %v5272_v25 = vadd.f32 %v12523_v14, %v5046_v45  ;;  %v5048_v31 = vpop.f32.mrb[107].mxu1  ;;  %5858 = vmatprep.mubr.f32.mxu0 %v12731_v30  ;;  %6626 = vmatprep.mubr.f32.mxu1 %v12731_v30  ;;  %v2155_v14 = vadd.f32 %v12676_v17, %v2079_v55  ;;  %v14327_v55 = vld [vmem:[#allocation45_spill] sm:$0xff] }
 0x854   : > { %5859 = vmatmul.mubr.f32.gmra.mrb[102].mxu0 %v12734_v40  ;;  %6627 = vmatmul.mubr.f32.gmra.mrb[166].mxu1 %v12734_v40  ;;  %v2083_v45 = vmul.f32 %v12669_v35, %v14327_v55 }
 0x855   : > { %v12745_v32 = vmax.f32 %v5455_v56, 0.0  ;;  %v5417_v48 = vmul.f32 %v12678_v46, %v5272_v25  ;;  %8874 = vmatpush1.bf16.msra.mxu0 %v8873_v23  ;;  %v12762_v1 = vmax.f32 %v2155_v14, 0.0  ;;  %v5608_v56 = vld [vmem:[#allocation19 + $0x2e8] sm:$0xff] }
 0x856   : > { %v5051_v10 = vpop.f32.mrb[108].mxu1  ;;  %8876 = vmatprep.subr.bf16.mxu0 %v8875_v41  ;;  %v8885_v59 = vpack.c.bf16 %v5608_v56, %v5601_v29 }
 0x857   : > { %v5456_v57 = vadd.f32 %v12681_v26, %v5417_v48  ;;  %v5277_v16 = vadd.f32 %v12531_v63, %v5051_v10  ;;  %v5053_v62 = vpop.f32.mrb[109].mxu1  ;;  %5864 = vmatprep.mubr.f32.mxu0 %v12745_v32  ;;  %6631 = vmatprep.mubr.f32.mxu1 %v12745_v32  ;;  %v2157_v63 = vadd.f32 %v12676_v17, %v2081_v50  ;;  %v5623_v48 = vld [vmem:[#allocation19 + $0x360] sm:$0xff]  ;;  %v14328_v10 = vld [vmem:[#allocation46_spill] sm:$0xff] }
 0x858   : > { %5865 = vmatmul.mubr.f32.gmra.mrb[104].mxu0 %v12748_v47  ;;  %6632 = vmatmul.mubr.f32.gmra.mrb[168].mxu1 %v12748_v47  ;;  %v8887_v21 = vpack.c.bf16 %v5623_v48, %v5616_v42 }
 0x859   : > { %v12759_v36 = vmax.f32 %v5456_v57, 0.0  ;;  %v5418_v23 = vmul.f32 %v12678_v46, %v5277_v16  ;;  %8878 = vmatpush1.bf16.msra.mxu0 %v8877_v18  ;;  %v12776_v50 = vmax.f32 %v2157_v63, 0.0  ;;  %v5615_v57 = vld [vmem:[#allocation19 + $0x320] sm:$0xff]  ;;  %v5622_v16 = vld [vmem:[#allocation19 + $0x358] sm:$0xff] }
 0x85a   : > { %v5056_v41 = vpop.f32.mrb[110].mxu1  ;;  %8880 = vmatprep.subr.bf16.mxu0 %v8879_v6  ;;  %v2085_v6 = vmul.f32 %v12669_v35, %v14328_v10 }
 0x85b   : > { %v5457_v25 = vadd.f32 %v12681_v26, %v5418_v23  ;;  %v5282_v31 = vadd.f32 %v12529_v28, %v5056_v41  ;;  %v5058_v7 = vpop.f32.mrb[111].mxu1  ;;  %5870 = vmatprep.mubr.f32.mxu0 %v12759_v36  ;;  %6636 = vmatprep.mubr.f32.mxu1 %v12759_v36  ;;  %v2159_v28 = vadd.f32 %v12676_v17, %v2083_v45  ;;  %v5630_v23 = vld [vmem:[#allocation19 + $0x398] sm:$0xff] }
 0x85c   : > { %5871 = vmatmul.mubr.f32.gmra.mrb[106].mxu0 %v12762_v1  ;;  %6637 = vmatmul.mubr.f32.gmra.mrb[170].mxu1 %v12762_v1  ;;  %v8889_v45 = vpack.c.bf16 %v5622_v16, %v5615_v57  ;;  %v5636_v7 = vld [vmem:[#allocation19 + $0x3c8] sm:$0xff]  ;;  %v14330_v57 = vld [vmem:[#allocation48_spill] sm:$0xff] }
 0x85d   : > { %v12773_v18 = vmax.f32 %v5457_v25, 0.0  ;;  %v5419_v14 = vmul.f32 %v12678_v46, %v5282_v31  ;;  %8882 = vmatpush1.bf16.msra.mxu0 %v8881_v8  ;;  %v5637_v8 = vld [vmem:[#allocation19 + $0x3d0] sm:$0xff]  ;;  %v12790_v41 = vmax.f32 %v2159_v28, 0.0  ;;  %v5651_v28 = vld [vmem:[#allocation19 + $0x440] sm:$0xff]  ;;  %v2089_v16 = vmul.f32 %v12669_v35, %v14330_v57 }
 0x85e   : > { %v5061_v13 = vpop.f32.mrb[112].mxu1  ;;  %8884 = vmatprep.subr.bf16.mxu0 %v8883_v49  ;;  %v14329_v49 = vld [vmem:[#allocation47_spill] sm:$0xff]  ;;  %v8891_v25 = vpack.c.bf16 %v5637_v8, %v5630_v23  ;;  %v5629_v31 = vld [vmem:[#allocation19 + $0x390] sm:$0xff] }
 0x85f   : > { %v5458_v62 = vadd.f32 %v12681_v26, %v5419_v14  ;;  %v5287_v27 = vadd.f32 %v12537_v61, %v5061_v13  ;;  %v5063_v60 = vpop.f32.mrb[113].mxu1  ;;  %5876 = vmatprep.mubr.f32.mxu0 %v12773_v18  ;;  %6641 = vmatprep.mubr.f32.mxu1 %v12773_v18  ;;  %v2161_v61 = vadd.f32 %v12676_v17, %v2085_v6  ;;  %v5650_v23 = vld [vmem:[#allocation19 + $0x438] sm:$0xff] }
 0x860   : > { %5877 = vmatmul.mubr.f32.gmra.mrb[108].mxu0 %v12776_v50  ;;  %6642 = vmatmul.mubr.f32.gmra.mrb[172].mxu1 %v12776_v50  ;;  %v2087_v29 = vmul.f32 %v12669_v35, %v14329_v49  ;;  %v8893_v13 = vpack.c.bf16 %v5636_v7, %v5629_v31  ;;  %v5643_v60 = vld [vmem:[#allocation19 + $0x400] sm:$0xff]  ;;  %v14331_v7 = vld [vmem:[#allocation49_spill] sm:$0xff] }
 0x861   : > { %v12787_v63 = vmax.f32 %v5458_v62, 0.0  ;;  %v5420_v55 = vmul.f32 %v12678_v46, %v5287_v27  ;;  %8886 = vmatpush1.bf16.msra.mxu0 %v8885_v59  ;;  %v5644_v59 = vld [vmem:[#allocation19 + $0x408] sm:$0xff] }
 0x862   : > { %v5066_v56 = vpop.f32.mrb[114].mxu1  ;;  %8888 = vmatprep.subr.bf16.mxu0 %v8887_v21  ;;  %v12804_v21 = vmax.f32 %v2161_v61, 0.0  ;;  %v8895_v27 = vpack.c.bf16 %v5651_v28, %v5644_v59  ;;  %v5665_v61 = vld [vmem:[#allocation19 + $0x4b0] sm:$0xff]  ;;  %v5664_v28 = vld [vmem:[#allocation19 + $0x4a8] sm:$0xff] }
 0x863   : > { %v5459_v42 = vadd.f32 %v12681_v26, %v5420_v55  ;;  %v5292_v48 = vadd.f32 %v12535_v52, %v5066_v56  ;;  %v5068_v14 = vpop.f32.mrb[115].mxu1  ;;  %5882 = vmatprep.mubr.f32.mxu0 %v12787_v63  ;;  %6646 = vmatprep.mubr.f32.mxu1 %v12787_v63  ;;  %v2163_v52 = vadd.f32 %v12676_v17, %v2087_v29  ;;  %v5657_v59 = vld [vmem:[#allocation19 + $0x470] sm:$0xff] }
 0x864   : > { %5883 = vmatmul.mubr.f32.gmra.mrb[110].mxu0 %v12790_v41  ;;  %6647 = vmatmul.mubr.f32.gmra.mrb[174].mxu1 %v12790_v41 }
 0x865   : > { %v12801_v10 = vmax.f32 %v5459_v42, 0.0  ;;  %v5421_v6 = vmul.f32 %v12678_v46, %v5292_v48  ;;  %8890 = vmatpush1.bf16.msra.mxu0 %v8889_v45  ;;  %v5658_v45 = vld [vmem:[#allocation19 + $0x478] sm:$0xff]  ;;  %v12818_v31 = vmax.f32 %v2163_v52, 0.0  ;;  %v2091_v42 = vmul.f32 %v12669_v35, %v14331_v7  ;;  %v5679_v52 = vld [vmem:[#allocation19 + $0x520] sm:$0xff] }
 0x866   : > { %v5071_v62 = vpop.f32.mrb[116].mxu1  ;;  %8892 = vmatprep.subr.bf16.mxu0 %v8891_v25  ;;  %v8897_v25 = vpack.c.bf16 %v5650_v23, %v5643_v60  ;;  %v8899_v14 = vpack.c.bf16 %v5665_v61, %v5658_v45  ;;  %v8901_v60 = vpack.c.bf16 %v5664_v28, %v5657_v59  ;;  %v5671_v61 = vld [vmem:[#allocation19 + $0x4e0] sm:$0xff] }
 0x867   : > { %v5460_v8 = vadd.f32 %v12681_v26, %v5421_v6  ;;  %v5297_v55 = vadd.f32 %v12543_v12, %v5071_v62  ;;  %v5073_v49 = vpop.f32.mrb[117].mxu1  ;;  %5888 = vmatprep.mubr.f32.mxu0 %v12801_v10  ;;  %6651 = vmatprep.mubr.f32.mxu1 %v12801_v10  ;;  %v2165_v12 = vadd.f32 %v12676_v17, %v2089_v16 }
 0x868   : > { %5889 = vmatmul.mubr.f32.gmra.mrb[112].mxu0 %v12804_v21  ;;  %6652 = vmatmul.mubr.f32.gmra.mrb[176].mxu1 %v12804_v21 }
 0x869   : > { %v12815_v29 = vmax.f32 %v5460_v8, 0.0  ;;  %v5422_v56 = vmul.f32 %v12678_v46, %v5297_v55  ;;  %8894 = vmatpush1.bf16.msra.mxu0 %v8893_v13  ;;  %v5672_v13 = vld [vmem:[#allocation19 + $0x4e8] sm:$0xff]  ;;  %v12832_v23 = vmax.f32 %v2165_v12, 0.0  ;;  %v14332_v8 = vld [vmem:[#allocation50_spill] sm:$0xff] }
 0x86a   : > { %v5076_v48 = vpop.f32.mrb[118].mxu1  ;;  %8896 = vmatprep.subr.bf16.mxu0 %v8895_v27  ;;  %v2093_v55 = vmul.f32 %v12669_v35, %v14332_v8  ;;  %v8903_v45 = vpack.c.bf16 %v5679_v52, %v5672_v13  ;;  %v5693_v12 = vld [vmem:[#allocation19 + $0x590] sm:$0xff]  ;;  %v5692_v8 = vld [vmem:[#allocation19 + $0x588] sm:$0xff] }
 0x86b   : > { %v5461_v6 = vadd.f32 %v12681_v26, %v5422_v56  ;;  %v5302_v57 = vadd.f32 %v12541_v24, %v5076_v48  ;;  %v5078_v62 = vpop.f32.mrb[119].mxu1  ;;  %5894 = vmatprep.mubr.f32.mxu0 %v12815_v29  ;;  %6656 = vmatprep.mubr.f32.mxu1 %v12815_v29  ;;  %v2167_v24 = vadd.f32 %v12676_v17, %v2091_v42  ;;  %v5678_v56 = vld [vmem:[#allocation19 + $0x518] sm:$0xff] }
 0x86c   : > { %5895 = vmatmul.mubr.f32.gmra.mrb[114].mxu0 %v12818_v31  ;;  %6657 = vmatmul.mubr.f32.gmra.mrb[178].mxu1 %v12818_v31  ;;  %v8905_v59 = vpack.c.bf16 %v5678_v56, %v5671_v61 }
 0x86d   : > { %v12829_v16 = vmax.f32 %v5461_v6, 0.0  ;;  %v5423_v27 = vmul.f32 %v12678_v46, %v5302_v57  ;;  %8898 = vmatpush1.bf16.msra.mxu0 %v8897_v25  ;;  %v5686_v25 = vld [vmem:[#allocation19 + $0x558] sm:$0xff]  ;;  %v12846_v28 = vmax.f32 %v2167_v24, 0.0  ;;  %v5707_v24 = vld [vmem:[#allocation19 + $0x600] sm:$0xff] }
 0x86e   : > { %v5081_v49 = vpop.f32.mrb[120].mxu1  ;;  %8900 = vmatprep.subr.bf16.mxu0 %v8899_v14  ;;  %v14333_v57 = vld [vmem:[#allocation51_spill] sm:$0xff]  ;;  %v8907_v52 = vpack.c.bf16 %v5693_v12, %v5686_v25 }
 0x86f   : > { %v5462_v7 = vadd.f32 %v12681_v26, %v5423_v27  ;;  %v5307_v48 = vadd.f32 %v12549_v3, %v5081_v49  ;;  %v5083_v6 = vpop.f32.mrb[121].mxu1  ;;  %5900 = vmatprep.mubr.f32.mxu0 %v12829_v16  ;;  %6661 = vmatprep.mubr.f32.mxu1 %v12829_v16  ;;  %v2169_v3 = vadd.f32 %v12676_v17, %v2093_v55  ;;  %v5685_v27 = vld [vmem:[#allocation19 + $0x550] sm:$0xff] }
 0x870   : > { %5901 = vmatmul.mubr.f32.gmra.mrb[116].mxu0 %v12832_v23  ;;  %6662 = vmatmul.mubr.f32.gmra.mrb[180].mxu1 %v12832_v23  ;;  %v2095_v62 = vmul.f32 %v12669_v35, %v14333_v57  ;;  %v8909_v61 = vpack.c.bf16 %v5692_v8, %v5685_v27  ;;  %v5699_v57 = vld [vmem:[#allocation19 + $0x5c0] sm:$0xff] }
 0x871   : > { %v12843_v42 = vmax.f32 %v5462_v7, 0.0  ;;  %v5424_v14 = vmul.f32 %v12678_v46, %v5307_v48  ;;  %8902 = vmatpush1.bf16.msra.mxu0 %v8901_v60  ;;  %v5700_v60 = vld [vmem:[#allocation19 + $0x5c8] sm:$0xff]  ;;  %v12860_v56 = vmax.f32 %v2169_v3, 0.0  ;;  %v14335_v48 = vld [vmem:[#allocation52_spill] sm:$0xff]  ;;  %v5721_v3 = vld [vmem:[#allocation19 + $0x670] sm:$0xff] }
 0x872   : > { %v5086_v13 = vpop.f32.mrb[122].mxu1  ;;  %8904 = vmatprep.subr.bf16.mxu0 %v8903_v45  ;;  %v2097_v25 = vmul.f32 %v12669_v35, %v14335_v48  ;;  %v5720_v48 = vld [vmem:[#allocation19 + $0x668] sm:$0xff] }
 0x873   : > { %v5463_v49 = vadd.f32 %v12681_v26, %v5424_v14  ;;  %v5312_v7 = vadd.f32 %v12547_v2, %v5086_v13  ;;  %v5088_v6 = vpop.f32.mrb[123].mxu1  ;;  %5906 = vmatprep.mubr.f32.mxu0 %v12843_v42  ;;  %6666 = vmatprep.mubr.f32.mxu1 %v12843_v42  ;;  %v2171_v2 = vadd.f32 %v12676_v17, %v2095_v62  ;;  %v5706_v13 = vld [vmem:[#allocation19 + $0x5f8] sm:$0xff] }
 0x874   : > { %5907 = vmatmul.mubr.f32.gmra.mrb[118].mxu0 %v12846_v28  ;;  %6667 = vmatmul.mubr.f32.gmra.mrb[182].mxu1 %v12846_v28  ;;  %v8911_v14 = vpack.c.bf16 %v5707_v24, %v5700_v60  ;;  %v8913_v27 = vpack.c.bf16 %v5706_v13, %v5699_v57 }
 0x875   : > { %v12857_v55 = vmax.f32 %v5463_v49, 0.0  ;;  %v5425_v45 = vmul.f32 %v12678_v46, %v5312_v7  ;;  %8906 = vmatpush1.bf16.msra.mxu0 %v8905_v59  ;;  %v5714_v59 = vld [vmem:[#allocation19 + $0x638] sm:$0xff]  ;;  %v12874_v8 = vmax.f32 %v2171_v2, 0.0  ;;  %v5735_v2 = vld [vmem:[#allocation19 + $0x6e0] sm:$0xff] }
 0x876   : > { %v5091_v12 = vpop.f32.mrb[124].mxu1  ;;  %8908 = vmatprep.subr.bf16.mxu0 %v8907_v52  ;;  %v8915_v24 = vpack.c.bf16 %v5721_v3, %v5714_v59 }
 0x877   : > { %14334 = vst [vmem:[#allocation41_spill] sm:$0xff] %v12857_v55  ;;  %v5464_v6 = vadd.f32 %v12681_v26, %v5425_v45  ;;  %v5317_v49 = vadd.f32 %v12555_v4, %v5091_v12  ;;  %v5093_v53 = vpop.f32.mrb[125].mxu1  ;;  %5912 = vmatprep.mubr.f32.mxu0 %v12857_v55  ;;  %6671 = vmatprep.mubr.f32.mxu1 %v12857_v55  ;;  %14337 = vst [vmem:[#allocation65_spill] sm:$0xff] %v12874_v8  ;;  %v5713_v45 = vld [vmem:[#allocation19 + $0x630] sm:$0xff] }
 0x878   : > { %5913 = vmatmul.mubr.f32.gmra.mrb[120].mxu0 %v12860_v56  ;;  %6672 = vmatmul.mubr.f32.gmra.mrb[184].mxu1 %v12860_v56  ;;  %v2173_v4 = vadd.f32 %v12676_v17, %v2097_v25  ;;  %v14338_v53 = vld [vmem:[#allocation53_spill] sm:$0xff]  ;;  %v8917_v57 = vpack.c.bf16 %v5720_v48, %v5713_v45 }
 0x879   : > { %v12871_v62 = vmax.f32 %v5464_v6, 0.0  ;;  %v5426_v52 = vmul.f32 %v12678_v46, %v5317_v49  ;;  %8910 = vmatpush1.bf16.msra.mxu0 %v8909_v61  ;;  %v2099_v7 = vmul.f32 %v12669_v35, %v14338_v53  ;;  %v5728_v61 = vld [vmem:[#allocation19 + $0x6a8] sm:$0xff]  ;;  %v5734_v53 = vld [vmem:[#allocation19 + $0x6d8] sm:$0xff] }
 0x87a   : > { %v5096_v60 = vpop.f32.mrb[126].mxu1  ;;  %8912 = vmatprep.subr.bf16.mxu0 %v8911_v14  ;;  %v12888_v13 = vmax.f32 %v2173_v4, 0.0  ;;  %v8919_v3 = vpack.c.bf16 %v5735_v2, %v5728_v61  ;;  %v5527_v4 = vld [vmem:[#allocation19 + $0x60] sm:$0xff] }
 0x87b   : > { %14336 = vst [vmem:[#allocation64_spill] sm:$0xff] %v12871_v62  ;;  %v5465_v12 = vadd.f32 %v12681_v26, %v5426_v52  ;;  %v5322_v6 = vadd.f32 %v12553_v19, %v5096_v60  ;;  %v5098_v9 = vpop.f32.mrb[127].mxu1  ;;  %5918 = vmatprep.mubr.f32.mxu0 %v12871_v62  ;;  %6676 = vmatprep.mubr.f32.mxu1 %v12871_v62  ;;  %v5727_v52 = vld [vmem:[#allocation19 + $0x6a0] sm:$0xff] }
 0x87c   : > { %5919 = vmatmul.mubr.f32.gmra.mrb[122].mxu0 %v12874_v8  ;;  %6677 = vmatmul.mubr.f32.gmra.mrb[186].mxu1 %v12874_v8  ;;  %v2175_v19 = vadd.f32 %v12676_v17, %v2099_v7  ;;  %v14339_v9 = vld [vmem:[#allocation54_spill] sm:$0xff]  ;;  %v8921_v45 = vpack.c.bf16 %v5734_v53, %v5727_v52 }
 0x87d   : > { %v12885_v25 = vmax.f32 %v5465_v12, 0.0  ;;  %v5427_v14 = vmul.f32 %v12678_v46, %v5322_v6  ;;  %8914 = vmatpush1.bf16.msra.mxu0 %v8913_v27  ;;  %v2101_v49 = vmul.f32 %v12669_v35, %v14339_v9  ;;  %v14340_v12 = vld [vmem:[#allocation90_spill] sm:$0xff]  ;;  %v5520_v27 = vld [vmem:[#allocation19 + $0x28] sm:$0xff]  ;;  %v14341_v6 = vld [vmem:[#allocation56_spill] sm:$0xff] }
 0x87e   : > { %v5101_v59 = vpop.f32.mrb[128].mxu1  ;;  %8916 = vmatprep.subr.bf16.mxu0 %v8915_v24  ;;  %v12902_v48 = vmax.f32 %v2175_v19, 0.0  ;;  %v2103_v61 = vmul.f32 %v12669_v35, %v14341_v6 }
 0x87f   : > { %v5466_v60 = vadd.f32 %v12681_v26, %v5427_v14  ;;  %v5327_v8 = vadd.f32 %v14340_v12, %v5101_v59  ;;  %v5103_v62 = vpop.f32.mrb[129].mxu1  ;;  %5924 = vmatprep.mubr.f32.mxu0 %v12885_v25  ;;  %6681 = vmatprep.mubr.f32.mxu1 %v12885_v25  ;;  %v8923_v14 = vpack.c.bf16 %v5527_v4, %v5520_v27  ;;  %v14342_v59 = vld [vmem:[#allocation89_spill] sm:$0xff] }
 0x880   : > { %5925 = vmatmul.mubr.f32.gmra.mrb[124].mxu0 %v12888_v13  ;;  %6682 = vmatmul.mubr.f32.gmra.mrb[188].mxu1 %v12888_v13  ;;  %v2177_v62 = vadd.f32 %v12676_v17, %v2101_v49  ;;  %v2179_v49 = vadd.f32 %v12676_v17, %v2103_v61 }
 0x881   : > { %v12899_v7 = vmax.f32 %v5466_v60, 0.0  ;;  %v5428_v24 = vmul.f32 %v12678_v46, %v5327_v8  ;;  %8918 = vmatpush1.bf16.msra.mxu0 %v8917_v57 }
 0x882   : > { %v5106_v2 = vpop.f32.mrb[130].mxu1  ;;  %8920 = vmatprep.subr.bf16.mxu0 %v8919_v3  ;;  %v12916_v19 = vmax.f32 %v2177_v62, 0.0  ;;  %v14343_v3 = vld [vmem:[#allocation57_spill] sm:$0xff]  ;;  %v12930_v6 = vmax.f32 %v2179_v49, 0.0 }
 0x883   : > { %v5467_v9 = vadd.f32 %v12681_v26, %v5428_v24  ;;  %v5332_v12 = vadd.f32 %v14342_v59, %v5106_v2  ;;  %v5108_v60 = vpop.f32.mrb[131].mxu1  ;;  %5930 = vmatprep.mubr.f32.mxu0 %v12899_v7  ;;  %6686 = vmatprep.mubr.f32.mxu1 %v12899_v7  ;;  %v2105_v52 = vmul.f32 %v12669_v35, %v14343_v3  ;;  %v14345_v2 = vld [vmem:[#allocation58_spill] sm:$0xff]  ;;  %v14346_v59 = vld [vmem:[#allocation55_spill] sm:$0xff] }
 0x884   : > { %5931 = vmatmul.mubr.f32.gmra.mrb[126].mxu0 %v12902_v48  ;;  %6687 = vmatmul.mubr.f32.gmra.mrb[190].mxu1 %v12902_v48  ;;  %14344 = vst [vmem:[#allocation67_spill] sm:$0xff] %v12930_v6 }
 0x885   : > { %v12913_v8 = vmax.f32 %v5467_v9, 0.0  ;;  %v5429_v57 = vmul.f32 %v12678_v46, %v5332_v12  ;;  %8922 = vmatpush1.bf16.msra.mxu0 %v8921_v45  ;;  %v2181_v61 = vadd.f32 %v12676_v17, %v2105_v52 }
 0x886   : > { %v5111_v53 = vpop.f32.mrb[132].mxu1  ;;  %8924 = vmatprep.subr.bf16.mxu0 %v8923_v14 }
 0x887   : > { %v5468_v27 = vadd.f32 %v12681_v26, %v5429_v57  ;;  %v5337_v4 = vadd.f32 %v12569_v0, %v5111_v53  ;;  %v5113_v24 = vpop.f32.mrb[133].mxu1  ;;  %5936 = vmatprep.mubr.f32.mxu0 %v12913_v8  ;;  %6691 = vmatprep.mubr.f32.mxu1 %v12913_v8  ;;  %v2107_v0 = vmul.f32 %v12669_v35, %v14345_v2  ;;  %v12944_v3 = vmax.f32 %v2181_v61, 0.0  ;;  %v14349_v53 = vld [vmem:[#allocation59_spill] sm:$0xff] }
 0x888   : > { %5937 = vmatmul.mubr.f32.gmra.mrb[128].mxu0 %v12916_v19  ;;  %6692 = vmatmul.mubr.f32.gmra.mrb[192].mxu1 %v12916_v19 }
 0x889   : > { %v12927_v45 = vmax.f32 %v5468_v27, 0.0  ;;  %v5430_v62 = vmul.f32 %v12678_v46, %v5337_v4  ;;  %14348 = vst [vmem:[#allocation71_spill] sm:$0xff] %v12944_v3  ;;  %v2183_v52 = vadd.f32 %v12676_v17, %v2107_v0  ;;  %v2109_v27 = vmul.f32 %v12669_v35, %v14349_v53 }
 0x88a   : > { %v5116_v14 = vpop.f32.mrb[134].mxu1 }
 0x88b   : > { %v5469_v9 = vadd.f32 %v12681_v26, %v5430_v62  ;;  %v5342_v12 = vadd.f32 %v14346_v59, %v5116_v14  ;;  %v5118_v60 = vpop.f32.mrb[135].mxu1  ;;  %5942 = vmatprep.mubr.f32.mxu0 %v12927_v45  ;;  %6696 = vmatprep.mubr.f32.mxu1 %v12927_v45  ;;  %v12958_v14 = vmax.f32 %v2183_v52, 0.0  ;;  %v14352_v59 = vld [vmem:[#allocation60_spill] sm:$0xff] }
 0x88c   : > { %5943 = vmatmul.mubr.f32.gmra.mrb[130].mxu0 %v12930_v6  ;;  %6697 = vmatmul.mubr.f32.gmra.mrb[194].mxu1 %v12930_v6 }
 0x88d   : > { %v12941_v57 = vmax.f32 %v5469_v9, 0.0  ;;  %v5431_v49 = vmul.f32 %v12678_v46, %v5342_v12  ;;  %14351 = vst [vmem:[#allocation77_spill] sm:$0xff] %v12958_v14  ;;  %v2185_v9 = vadd.f32 %v12676_v17, %v2109_v27 }
 0x88e   : > { %v5121_v4 = vpop.f32.mrb[136].mxu1 }
 0x88f   : > { %14347 = vst [vmem:[#allocation68_spill] sm:$0xff] %v12941_v57  ;;  %v5470_v24 = vadd.f32 %v12681_v26, %v5431_v49  ;;  %v5347_v62 = vadd.f32 %v12576_v33, %v5121_v4  ;;  %v5123_v2 = vpop.f32.mrb[137].mxu1  ;;  %5948 = vmatprep.mubr.f32.mxu0 %v12941_v57  ;;  %6701 = vmatprep.mubr.f32.mxu1 %v12941_v57  ;;  %v14353_v49 = vld [vmem:[#allocation70_spill] sm:$0xff] }
 0x890   : > { %5949 = vmatmul.mubr.f32.gmra.mrb[132].mxu0 %v12944_v3  ;;  %6702 = vmatmul.mubr.f32.gmra.mrb[196].mxu1 %v12944_v3  ;;  %v2111_v33 = vmul.f32 %v12669_v35, %v14352_v59  ;;  %v14356_v2 = vld [vmem:[#allocation61_spill] sm:$0xff] }
 0x891   : > { %v12955_v61 = vmax.f32 %v5470_v24, 0.0  ;;  %v5432_v0 = vmul.f32 %v12678_v46, %v5347_v62  ;;  %v12972_v24 = vmax.f32 %v2185_v9, 0.0 }
 0x892   : > { %v5126_v12 = vpop.f32.mrb[138].mxu1  ;;  %v2187_v62 = vadd.f32 %v12676_v17, %v2111_v33 }
 0x893   : > { %14350 = vst [vmem:[#allocation76_spill] sm:$0xff] %v12955_v61  ;;  %v5471_v60 = vadd.f32 %v12681_v26, %v5432_v0  ;;  %v5352_v53 = vadd.f32 %v14353_v49, %v5126_v12  ;;  %v5128_v4 = vpop.f32.mrb[139].mxu1  ;;  %5954 = vmatprep.mubr.f32.mxu0 %v12955_v61  ;;  %6706 = vmatprep.mubr.f32.mxu1 %v12955_v61  ;;  %14355 = vst [vmem:[#allocation80_spill] sm:$0xff] %v12972_v24 }
 0x894   : > { %5955 = vmatmul.mubr.f32.gmra.mrb[134].mxu0 %v12958_v14  ;;  %6707 = vmatmul.mubr.f32.gmra.mrb[198].mxu1 %v12958_v14  ;;  %v2113_v0 = vmul.f32 %v12669_v35, %v14356_v2 }
 0x895   : > { %v12969_v52 = vmax.f32 %v5471_v60, 0.0  ;;  %v5433_v27 = vmul.f32 %v12678_v46, %v5352_v53  ;;  %v12986_v60 = vmax.f32 %v2187_v62, 0.0 }
 0x896   : > { %v5131_v59 = vpop.f32.mrb[140].mxu1  ;;  %v2189_v53 = vadd.f32 %v12676_v17, %v2113_v0 }
 0x897   : > { %14354 = vst [vmem:[#allocation79_spill] sm:$0xff] %v12969_v52  ;;  %v5472_v12 = vadd.f32 %v12681_v26, %v5433_v27  ;;  %v5357_v49 = vadd.f32 %v12583_v54, %v5131_v59  ;;  %v5133_v4 = vpop.f32.mrb[141].mxu1  ;;  %5960 = vmatprep.mubr.f32.mxu0 %v12969_v52  ;;  %6711 = vmatprep.mubr.f32.mxu1 %v12969_v52  ;;  %14358 = vst [vmem:[#allocation83_spill] sm:$0xff] %v12986_v60  ;;  %v14359_v27 = vld [vmem:[#allocation62_spill] sm:$0xff] }
 0x898   : > { %5961 = vmatmul.mubr.f32.gmra.mrb[136].mxu0 %v12972_v24  ;;  %6712 = vmatmul.mubr.f32.gmra.mrb[200].mxu1 %v12972_v24  ;;  %v2115_v54 = vmul.f32 %v12669_v35, %v14359_v27  ;;  %v14360_v4 = vld [vmem:[#allocation73_spill] sm:$0xff] }
 0x899   : > { %v12983_v9 = vmax.f32 %v5472_v12, 0.0  ;;  %v5434_v33 = vmul.f32 %v12678_v46, %v5357_v49  ;;  %v13000_v12 = vmax.f32 %v2189_v53, 0.0 }
 0x89a   : > { %v5136_v2 = vpop.f32.mrb[142].mxu1  ;;  %v2191_v49 = vadd.f32 %v12676_v17, %v2115_v54 }
 0x89b   : > { %14357 = vst [vmem:[#allocation82_spill] sm:$0xff] %v12983_v9  ;;  %v5473_v59 = vadd.f32 %v12681_v26, %v5434_v33  ;;  %v5362_v52 = vadd.f32 %v14360_v4, %v5136_v2  ;;  %v5138_v14 = vpop.f32.mrb[143].mxu1  ;;  %5966 = vmatprep.mubr.f32.mxu0 %v12983_v9  ;;  %6716 = vmatprep.mubr.f32.mxu1 %v12983_v9  ;;  %14362 = vst [vmem:[#allocation87_spill] sm:$0xff] %v13000_v12  ;;  %v14363_v33 = vld [vmem:[#allocation63_spill] sm:$0xff] }
 0x89c   : > { %5967 = vmatmul.mubr.f32.gmra.mrb[138].mxu0 %v12986_v60  ;;  %6717 = vmatmul.mubr.f32.gmra.mrb[202].mxu1 %v12986_v60  ;;  %v2117_v27 = vmul.f32 %v12669_v35, %v14363_v33  ;;  %v13014_v54 = vmax.f32 %v2191_v49, 0.0 }
 0x89d   : > { %v12997_v62 = vmax.f32 %v5473_v59, 0.0  ;;  %v5435_v0 = vmul.f32 %v12678_v46, %v5362_v52 }
 0x89e   : > { %v5141_v14 = vpop.f32.mrb[144].mxu1  ;;  %14365 = vst [vmem:[#allocation35_spill] sm:$0xff] %v13014_v54  ;;  %v2193_v59 = vadd.f32 %v12676_v17, %v2117_v27 }
 0x89f   : > { %14361 = vst [vmem:[#allocation86_spill] sm:$0xff] %v12997_v62  ;;  %v5474_v2 = vadd.f32 %v12681_v26, %v5435_v0  ;;  %v5367_v4 = vadd.f32 %v12590_v58, %v5141_v14  ;;  %v5143_v9 = vpop.f32.mrb[145].mxu1  ;;  %5972 = vmatprep.mubr.f32.mxu0 %v12997_v62  ;;  %6721 = vmatprep.mubr.f32.mxu1 %v12997_v62  ;;  %v14366_v0 = vld [vmem:[#allocation66_spill] sm:$0xff] }
 0x8a0   : > { %5973 = vmatmul.mubr.f32.gmra.mrb[140].mxu0 %v13000_v12  ;;  %6722 = vmatmul.mubr.f32.gmra.mrb[204].mxu1 %v13000_v12  ;;  %v2119_v58 = vmul.f32 %v12669_v35, %v14366_v0  ;;  %v14367_v14 = vld [vmem:[#allocation74_spill] sm:$0xff] }
 0x8a1   : > { %v13011_v52 = vmax.f32 %v5474_v2, 0.0  ;;  %v5436_v53 = vmul.f32 %v12678_v46, %v5367_v4  ;;  %v13028_v2 = vmax.f32 %v2193_v59, 0.0 }
 0x8a2   : > { %v5146_v9 = vpop.f32.mrb[146].mxu1  ;;  %v2195_v4 = vadd.f32 %v12676_v17, %v2119_v58 }
 0x8a3   : > { %14364 = vst [vmem:[#allocation88_spill] sm:$0xff] %v13011_v52  ;;  %v5475_v33 = vadd.f32 %v12681_v26, %v5436_v53  ;;  %v5372_v62 = vadd.f32 %v14367_v14, %v5146_v9  ;;  %v5148_v60 = vpop.f32.mrb[147].mxu1  ;;  %5978 = vmatprep.mubr.f32.mxu0 %v13011_v52  ;;  %6726 = vmatprep.mubr.f32.mxu1 %v13011_v52  ;;  %14369 = vst [vmem:[#allocation37_spill] sm:$0xff] %v13028_v2  ;;  %v14370_v53 = vld [vmem:[#allocation69_spill] sm:$0xff] }
 0x8a4   : > { %5979 = vmatmul.mubr.f32.gmra.mrb[142].mxu0 %v13014_v54  ;;  %6727 = vmatmul.mubr.f32.gmra.mrb[206].mxu1 %v13014_v54  ;;  %v2121_v0 = vmul.f32 %v12669_v35, %v14370_v53  ;;  %v13042_v58 = vmax.f32 %v2195_v4, 0.0 }
 0x8a5   : > { %v13025_v49 = vmax.f32 %v5475_v33, 0.0  ;;  %v5437_v27 = vmul.f32 %v12678_v46, %v5372_v62 }
 0x8a6   : > { %v5151_v60 = vpop.f32.mrb[148].mxu1  ;;  %14372 = vst [vmem:[#allocation42_spill] sm:$0xff] %v13042_v58  ;;  %v2197_v33 = vadd.f32 %v12676_v17, %v2121_v0 }
 0x8a7   : > { %14368 = vst [vmem:[#allocation36_spill] sm:$0xff] %v13025_v49  ;;  %v5476_v9 = vadd.f32 %v12681_v26, %v5437_v27  ;;  %v5377_v14 = vadd.f32 %v12597_v51, %v5151_v60  ;;  %v5153_v52 = vpop.f32.mrb[149].mxu1  ;;  %5984 = vmatprep.mubr.f32.mxu0 %v13025_v49  ;;  %6731 = vmatprep.mubr.f32.mxu1 %v13025_v49  ;;  %v14373_v27 = vld [vmem:[#allocation72_spill] sm:$0xff] }
 0x8a8   : > { %5985 = vmatmul.mubr.f32.gmra.mrb[144].mxu0 %v13028_v2  ;;  %6732 = vmatmul.mubr.f32.gmra.mrb[208].mxu1 %v13028_v2  ;;  %v2123_v51 = vmul.f32 %v12669_v35, %v14373_v27 }
 0x8a9   : > { %v13039_v62 = vmax.f32 %v5476_v9, 0.0  ;;  %v5438_v59 = vmul.f32 %v12678_v46, %v5377_v14  ;;  %v13056_v9 = vmax.f32 %v2197_v33, 0.0 }
 0x8aa   : > { %v5156_v52 = vpop.f32.mrb[150].mxu1  ;;  %v2199_v14 = vadd.f32 %v12676_v17, %v2123_v51 }
 0x8ab   : > { %14371 = vst [vmem:[#allocation40_spill] sm:$0xff] %v13039_v62  ;;  %v5477_v53 = vadd.f32 %v12681_v26, %v5438_v59  ;;  %v5382_v60 = vadd.f32 %v12594_v37, %v5156_v52  ;;  %v5158_v49 = vpop.f32.mrb[151].mxu1  ;;  %5990 = vmatprep.mubr.f32.mxu0 %v13039_v62  ;;  %6736 = vmatprep.mubr.f32.mxu1 %v13039_v62  ;;  %14375 = vst [vmem:[#allocation44_spill] sm:$0xff] %v13056_v9  ;;  %v14376_v59 = vld [vmem:[#allocation75_spill] sm:$0xff] }
 0x8ac   : > { %5991 = vmatmul.mubr.f32.gmra.mrb[146].mxu0 %v13042_v58  ;;  %6737 = vmatmul.mubr.f32.gmra.mrb[210].mxu1 %v13042_v58  ;;  %v2125_v37 = vmul.f32 %v12669_v35, %v14376_v59 }
 0x8ad   : > { %v13053_v4 = vmax.f32 %v5477_v53, 0.0  ;;  %v5439_v0 = vmul.f32 %v12678_v46, %v5382_v60  ;;  %v13070_v53 = vmax.f32 %v2199_v14, 0.0 }
 0x8ae   : > { %v5161_v49 = vpop.f32.mrb[152].mxu1  ;;  %v2201_v60 = vadd.f32 %v12676_v17, %v2125_v37 }
 0x8af   : > { %14374 = vst [vmem:[#allocation43_spill] sm:$0xff] %v13053_v4  ;;  %v5478_v27 = vadd.f32 %v12681_v26, %v5439_v0  ;;  %v5387_v52 = vadd.f32 %v12661_v39, %v5161_v49  ;;  %v5163_v62 = vpop.f32.mrb[153].mxu1  ;;  %5996 = vmatprep.mubr.f32.mxu0 %v13053_v4  ;;  %6741 = vmatprep.mubr.f32.mxu1 %v13053_v4  ;;  %14378 = vst [vmem:[#allocation46_spill] sm:$0xff] %v13070_v53  ;;  %v14379_v0 = vld [vmem:[#allocation78_spill] sm:$0xff] }
 0x8b0   : > { %5997 = vmatmul.mubr.f32.gmra.mrb[148].mxu0 %v13056_v9  ;;  %6742 = vmatmul.mubr.f32.gmra.mrb[212].mxu1 %v13056_v9  ;;  %v2127_v39 = vmul.f32 %v12669_v35, %v14379_v0 }
 0x8b1   : > { %v13067_v33 = vmax.f32 %v5478_v27, 0.0  ;;  %v5440_v51 = vmul.f32 %v12678_v46, %v5387_v52  ;;  %v13084_v27 = vmax.f32 %v2201_v60, 0.0  ;;  %v9656_v60 = vld [vmem:[#allocation16] ss:$0 sm:$0xff] }
 0x8b2   : > { %v5166_v62 = vpop.f32.mrb[154].mxu1  ;;  %v2203_v52 = vadd.f32 %v12676_v17, %v2127_v39 }
 0x8b3   : > { %14377 = vst [vmem:[#allocation45_spill] sm:$0xff] %v13067_v33  ;;  %v5479_v59 = vadd.f32 %v12681_v26, %v5440_v51  ;;  %v5392_v49 = vadd.f32 %v12659_v20, %v5166_v62  ;;  %v5168_v4 = vpop.f32.mrb[155].mxu1  ;;  %6002 = vmatprep.mubr.f32.mxu0 %v13067_v33  ;;  %6746 = vmatprep.mubr.f32.mxu1 %v13067_v33  ;;  %v14381_v51 = vld [vmem:[#allocation81_spill] sm:$0xff] }
 0x8b4   : > { %6003 = vmatmul.mubr.f32.gmra.mrb[150].mxu0 %v13070_v53  ;;  %6747 = vmatmul.mubr.f32.gmra.mrb[214].mxu1 %v13070_v53  ;;  %v2129_v20 = vmul.f32 %v12669_v35, %v14381_v51 }
 0x8b5   : > { %v13081_v14 = vmax.f32 %v5479_v59, 0.0  ;;  %v5441_v37 = vmul.f32 %v12678_v46, %v5392_v49  ;;  %v13097_v59 = vmax.f32 %v2203_v52, 0.0 }
 0x8b6   : > { %v5171_v4 = vpop.f32.mrb[156].mxu1  ;;  %v2205_v49 = vadd.f32 %v12676_v17, %v2129_v20 }
 0x8b7   : > { %14380 = vst [vmem:[#allocation47_spill] sm:$0xff] %v13081_v14  ;;  %v5480_v0 = vadd.f32 %v12681_v26, %v5441_v37  ;;  %v5397_v62 = vadd.f32 %v12671_v43, %v5171_v4  ;;  %v5173_v33 = vpop.f32.mrb[157].mxu1  ;;  %6008 = vmatprep.mubr.f32.mxu0 %v13081_v14  ;;  %6751 = vmatprep.mubr.f32.mxu1 %v13081_v14  ;;  %v14382_v26 = vld [vmem:[#allocation84_spill] sm:$0xff]  ;;  %v9657_v37 = vld [vmem:[#allocation17] ss:$0 sm:$0xff] }
 0x8b8   : > { %6009 = vmatmul.mubr.f32.gmra.mrb[152].mxu0 %v13084_v27  ;;  %6752 = vmatmul.mubr.f32.gmra.mrb[216].mxu1 %v13084_v27  ;;  %v2131_v43 = vmul.f32 %v12669_v35, %v14382_v26  ;;  %v5526_v26 = vld [vmem:[#allocation19 + $0x58] sm:$0xff] }
 0x8b9   : > { %v13095_v46 = vmax.f32 %v5480_v0, 0.0  ;;  %v5442_v39 = vmul.f32 %v9656_v60, %v5397_v62  ;;  %v13109_v0 = vmax.f32 %v2205_v49, 0.0 }
 0x8ba   : > { %v5176_v33 = vpop.f32.mrb[158].mxu1  ;;  %v2207_v35 = vadd.f32 %v12676_v17, %v2131_v43  ;;  %v5534_v17 = vld [vmem:[#allocation19 + $0x98] sm:$0xff] }
 0x8bb   : > { %v5481_v51 = vadd.f32 %v9657_v37, %v5442_v39  ;;  %v5402_v4 = vadd.f32 %v12666_v5, %v5176_v33  ;;  %v5178_v14 = vpop.f32.mrb[159].mxu1  ;;  %6014 = vmatprep.mubr.f32.mxu0 %v13095_v46  ;;  %6756 = vmatprep.mubr.f32.mxu1 %v13095_v46  ;;  %14384 = vst [vmem:[#allocation49_spill] sm:$0xff] %v13109_v0  ;;  %v5519_v39 = vld [vmem:[#allocation19 + $0x20] sm:$0xff]  ;;  %v5533_v33 = vld [vmem:[#allocation19 + $0x90] sm:$0xff] }
 0x8bc   : > { %6015 = vmatmul.mubr.f32.gmra.mrb[154].mxu0 %v13097_v59  ;;  %6757 = vmatmul.mubr.f32.gmra.mrb[218].mxu1 %v13097_v59  ;;  %v13118_v14 = vmax.f32 %v2207_v35, 0.0  ;;  %v8925_v49 = vpack.c.bf16 %v5526_v26, %v5519_v39 }
 0x8bd   : > { %v13107_v52 = vmax.f32 %v5481_v51, 0.0  ;;  %v5443_v20 = vmul.f32 %v9656_v60, %v5402_v4  ;;  %v5541_v60 = vld [vmem:[#allocation19 + $0xd0] sm:$0xff]  ;;  %v5548_v51 = vld [vmem:[#allocation19 + $0x108] sm:$0xff]  ;;  %v5555_v4 = vld [vmem:[#allocation19 + $0x140] sm:$0xff] }
 0x8be   : > { %14386 = vst [vmem:[#allocation51_spill] sm:$0xff] %v13118_v14  ;;  %v8927_v43 = vpack.c.bf16 %v5541_v60, %v5534_v17  ;;  %v8931_v35 = vpack.c.bf16 %v5555_v4, %v5548_v51  ;;  %v5561_v17 = vld [vmem:[#allocation19 + $0x170] sm:$0xff]  ;;  %v5568_v60 = vld [vmem:[#allocation19 + $0x1a8] sm:$0xff]  ;;  %v5590_v51 = vld [vmem:[#allocation19 + $0x258] sm:$0xff] }
 0x8bf   : > { %14383 = vst [vmem:[#allocation48_spill] sm:$0xff] %v13107_v52  ;;  %v5482_v62 = vadd.f32 %v9657_v37, %v5443_v20  ;;  %6020 = vmatprep.mubr.f32.mxu0 %v13107_v52  ;;  %6761 = vmatprep.mubr.f32.mxu1 %v13107_v52  ;;  %v5540_v37 = vld [vmem:[#allocation19 + $0xc8] sm:$0xff]  ;;  %v5597_v4 = vld [vmem:[#allocation19 + $0x290] sm:$0xff] }
 0x8c0   : > { %6021 = vmatmul.mubr.f32.gmra.mrb[156].mxu0 %v13109_v0  ;;  %6762 = vmatmul.mubr.f32.gmra.mrb[220].mxu1 %v13109_v0  ;;  %v8929_v20 = vpack.c.bf16 %v5540_v37, %v5533_v33  ;;  %v5562_v0 = vld [vmem:[#allocation19 + $0x178] sm:$0xff]  ;;  %v5575_v33 = vld [vmem:[#allocation19 + $0x1e0] sm:$0xff] }
 0x8c1   : > { %v13116_v5 = vmax.f32 %v5482_v62, 0.0  ;;  %v5547_v62 = vld [vmem:[#allocation19 + $0x100] sm:$0xff]  ;;  %v5582_v37 = vld [vmem:[#allocation19 + $0x218] sm:$0xff] }
 0x8c3   : > { %14385 = vst [vmem:[#allocation50_spill] sm:$0xff] %v13116_v5  ;;  %6026 = vmatprep.mubr.f32.mxu0 %v13116_v5  ;;  %6766 = vmatprep.mubr.f32.mxu1 %v13116_v5  ;;  %v5554_v5 = vld [vmem:[#allocation19 + $0x138] sm:$0xff] }
 0x8c4   : > { %6027 = vmatmul.mubr.f32.gmra.mrb[158].mxu0 %v13118_v14  ;;  %6767 = vmatmul.mubr.f32.gmra.mrb[222].mxu1 %v13118_v14  ;;  %v5569_v14 = vld [vmem:[#allocation19 + $0x1b0] sm:$0xff]  ;;  %v8933_v39 = vpack.c.bf16 %v5554_v5, %v5547_v62  ;;  %v8943_v5 = vpack.c.bf16 %v5597_v4, %v5590_v51  ;;  %v5611_v62 = vld [vmem:[#allocation19 + $0x300] sm:$0xff]  ;;  %v5632_v51 = vld [vmem:[#allocation19 + $0x3a8] sm:$0xff] }
 0x8c5   : > { %6097 = vmatprep.mubr.f32.mxu0 %v12689_v11  ;;  %v8935_v26 = vpack.c.bf16 %v5569_v14, %v5562_v0  ;;  %v8941_v0 = vpack.c.bf16 %v5582_v37, %v5575_v33  ;;  %v5589_v14 = vld [vmem:[#allocation19 + $0x250] sm:$0xff]  ;;  %v5624_v37 = vld [vmem:[#allocation19 + $0x368] sm:$0xff]  ;;  %v5639_v4 = vld [vmem:[#allocation19 + $0x3e0] sm:$0xff] }
 0x8c6   : > { %v5617_v33 = vld [vmem:[#allocation19 + $0x330] sm:$0xff] }
 0x8c8   : > { %6098 = vmatmul.mubr.f32.vlgmr.msra.gmra.mrb[160].mxu0 %v12692_v22  ;;  %v5576_v22 = vld [vmem:[#allocation19 + $0x1e8] sm:$0xff] }
 0x8c9   : > { %6103 = vmatprep.mubr.f32.mxu0 %v12703_v15  ;;  %8926 = vmatpush1.bf16.msra.mxu0 %v8925_v49  ;;  %v5583_v15 = vld [vmem:[#allocation19 + $0x220] sm:$0xff]  ;;  %v8937_v49 = vpack.c.bf16 %v5568_v60, %v5561_v17  ;;  %v5618_v17 = vld [vmem:[#allocation19 + $0x338] sm:$0xff]  ;;  %v5625_v60 = vld [vmem:[#allocation19 + $0x370] sm:$0xff] }
 0x8ca   : > { %8928 = vmatprep.subr.bf16.mxu0 %v8927_v43  ;;  %v8939_v43 = vpack.c.bf16 %v5583_v15, %v5576_v22 }
 0x8cc   : > { %6104 = vmatmul.mubr.f32.gmra.mrb[162].mxu0 %v12706_v38 }
 0x8cd   : > { %6109 = vmatprep.mubr.f32.mxu0 %v12717_v44  ;;  %8930 = vmatpush1.bf16.msra.mxu0 %v8929_v20  ;;  %v5596_v20 = vld [vmem:[#allocation19 + $0x288] sm:$0xff] }
 0x8ce   : > { %8932 = vmatprep.subr.bf16.mxu0 %v8931_v35  ;;  %v5604_v35 = vld [vmem:[#allocation19 + $0x2c8] sm:$0xff]  ;;  %v8945_v22 = vpack.c.bf16 %v5596_v20, %v5589_v14  ;;  %v5631_v14 = vld [vmem:[#allocation19 + $0x3a0] sm:$0xff]  ;;  %v5638_v20 = vld [vmem:[#allocation19 + $0x3d8] sm:$0xff] }
 0x8cf   : > { %v8947_v15 = vpack.c.bf16 %v5611_v62, %v5604_v35  ;;  %v5646_v35 = vld [vmem:[#allocation19 + $0x418] sm:$0xff]  ;;  %v5653_v62 = vld [vmem:[#allocation19 + $0x450] sm:$0xff] }
 0x8d0   : > { %6110 = vmatmul.mubr.f32.gmra.mrb[164].mxu0 %v12720_v34 }
 0x8d1   : > { %6115 = vmatprep.mubr.f32.mxu0 %v12731_v30  ;;  %8934 = vmatpush1.bf16.msra.mxu0 %v8933_v39  ;;  %v5603_v39 = vld [vmem:[#allocation19 + $0x2c0] sm:$0xff] }
 0x8d2   : > { %8936 = vmatprep.subr.bf16.mxu0 %v8935_v26  ;;  %v5610_v26 = vld [vmem:[#allocation19 + $0x2f8] sm:$0xff] }
 0x8d4   : > { %6116 = vmatmul.mubr.f32.gmra.mrb[166].mxu0 %v12734_v40 }
 0x8d5   : > { %6121 = vmatprep.mubr.f32.mxu0 %v12745_v32  ;;  %8938 = vmatpush1.bf16.msra.mxu0 %v8937_v49  ;;  %v8949_v49 = vpack.c.bf16 %v5610_v26, %v5603_v39  ;;  %v5645_v39 = vld [vmem:[#allocation19 + $0x410] sm:$0xff]  ;;  %v5652_v26 = vld [vmem:[#allocation19 + $0x448] sm:$0xff] }
 0x8d6   : > { %8940 = vmatprep.subr.bf16.mxu0 %v8939_v43  ;;  %v8951_v43 = vpack.c.bf16 %v5625_v60, %v5618_v17  ;;  %v5660_v17 = vld [vmem:[#allocation19 + $0x488] sm:$0xff]  ;;  %v5667_v60 = vld [vmem:[#allocation19 + $0x4c0] sm:$0xff] }
 0x8d8   : > { %6122 = vmatmul.mubr.f32.gmra.mrb[168].mxu0 %v12748_v47 }
 0x8d9   : > { %6127 = vmatprep.mubr.f32.mxu0 %v12759_v36  ;;  %8942 = vmatpush1.bf16.msra.mxu0 %v8941_v0  ;;  %v8953_v0 = vpack.c.bf16 %v5624_v37, %v5617_v33  ;;  %v5659_v33 = vld [vmem:[#allocation19 + $0x480] sm:$0xff]  ;;  %v5666_v37 = vld [vmem:[#allocation19 + $0x4b8] sm:$0xff] }
 0x8da   : > { %8944 = vmatprep.subr.bf16.mxu0 %v8943_v5  ;;  %v8955_v5 = vpack.c.bf16 %v5639_v4, %v5632_v51  ;;  %v5674_v51 = vld [vmem:[#allocation19 + $0x4f8] sm:$0xff]  ;;  %v5681_v4 = vld [vmem:[#allocation19 + $0x530] sm:$0xff] }
 0x8dc   : > { %6128 = vmatmul.mubr.f32.gmra.mrb[170].mxu0 %v12762_v1 }
 0x8dd   : > { %6133 = vmatprep.mubr.f32.mxu0 %v12773_v18  ;;  %8946 = vmatpush1.bf16.msra.mxu0 %v8945_v22  ;;  %v8957_v22 = vpack.c.bf16 %v5638_v20, %v5631_v14  ;;  %v5673_v14 = vld [vmem:[#allocation19 + $0x4f0] sm:$0xff]  ;;  %v5680_v20 = vld [vmem:[#allocation19 + $0x528] sm:$0xff] }
 0x8de   : > { %8948 = vmatprep.subr.bf16.mxu0 %v8947_v15  ;;  %v8959_v15 = vpack.c.bf16 %v5653_v62, %v5646_v35  ;;  %v5688_v35 = vld [vmem:[#allocation19 + $0x568] sm:$0xff]  ;;  %v5695_v62 = vld [vmem:[#allocation19 + $0x5a0] sm:$0xff] }
 0x8e0   : > { %6134 = vmatmul.mubr.f32.gmra.mrb[172].mxu0 %v12776_v50 }
 0x8e1   : > { %6139 = vmatprep.mubr.f32.mxu0 %v12787_v63  ;;  %8950 = vmatpush1.bf16.msra.mxu0 %v8949_v49  ;;  %v8961_v49 = vpack.c.bf16 %v5652_v26, %v5645_v39  ;;  %v5687_v39 = vld [vmem:[#allocation19 + $0x560] sm:$0xff]  ;;  %v5694_v26 = vld [vmem:[#allocation19 + $0x598] sm:$0xff] }
 0x8e2   : > { %8952 = vmatprep.subr.bf16.mxu0 %v8951_v43  ;;  %v8963_v43 = vpack.c.bf16 %v5667_v60, %v5660_v17  ;;  %v5702_v17 = vld [vmem:[#allocation19 + $0x5d8] sm:$0xff]  ;;  %v5709_v60 = vld [vmem:[#allocation19 + $0x610] sm:$0xff] }
 0x8e4   : > { %6140 = vmatmul.mubr.f32.gmra.mrb[174].mxu0 %v12790_v41 }
 0x8e5   : > { %6145 = vmatprep.mubr.f32.mxu0 %v12801_v10  ;;  %8954 = vmatpush1.bf16.msra.mxu0 %v8953_v0  ;;  %v8965_v0 = vpack.c.bf16 %v5666_v37, %v5659_v33  ;;  %v5701_v33 = vld [vmem:[#allocation19 + $0x5d0] sm:$0xff]  ;;  %v5708_v37 = vld [vmem:[#allocation19 + $0x608] sm:$0xff] }
 0x8e6   : > { %8956 = vmatprep.subr.bf16.mxu0 %v8955_v5  ;;  %v8967_v5 = vpack.c.bf16 %v5681_v4, %v5674_v51  ;;  %v5716_v51 = vld [vmem:[#allocation19 + $0x648] sm:$0xff]  ;;  %v5723_v4 = vld [vmem:[#allocation19 + $0x680] sm:$0xff] }
 0x8e8   : > { %6146 = vmatmul.mubr.f32.gmra.mrb[176].mxu0 %v12804_v21 }
 0x8e9   : > { %6151 = vmatprep.mubr.f32.mxu0 %v12815_v29  ;;  %8958 = vmatpush1.bf16.msra.mxu0 %v8957_v22  ;;  %v8969_v22 = vpack.c.bf16 %v5680_v20, %v5673_v14  ;;  %v8979_v14 = vpack.c.bf16 %v5723_v4, %v5716_v51  ;;  %v5715_v20 = vld [vmem:[#allocation19 + $0x640] sm:$0xff]  ;;  %v14392_v51 = vld [vmem:[#allocation85_spill] sm:$0xff] }
 0x8ea   : > { %8960 = vmatprep.subr.bf16.mxu0 %v8959_v15  ;;  %v8971_v15 = vpack.c.bf16 %v5695_v62, %v5688_v35  ;;  %v5722_v35 = vld [vmem:[#allocation19 + $0x678] sm:$0xff] }
 0x8eb   : > { %v5730_v62 = vld [vmem:[#allocation19 + $0x6b8] sm:$0xff] }
 0x8ec   : > { %6152 = vmatmul.mubr.f32.gmra.mrb[178].mxu0 %v12818_v31 }
 0x8ed   : > { %6157 = vmatprep.mubr.f32.mxu0 %v12829_v16  ;;  %8962 = vmatpush1.bf16.msra.mxu0 %v8961_v49  ;;  %v8973_v49 = vpack.c.bf16 %v5694_v26, %v5687_v39  ;;  %v5729_v26 = vld [vmem:[#allocation19 + $0x6b0] sm:$0xff] }
 0x8ee   : > { %8964 = vmatprep.subr.bf16.mxu0 %v8963_v43  ;;  %v8975_v43 = vpack.c.bf16 %v5709_v60, %v5702_v17  ;;  %v5736_v17 = vld [vmem:[#allocation19 + $0x6e8] sm:$0xff] }
 0x8ef   : > { %v8985_v60 = vpack.c.bf16 %v5736_v17, %v5729_v26 }
 0x8f0   : > { %6158 = vmatmul.mubr.f32.gmra.mrb[180].mxu0 %v12832_v23 }
 0x8f1   : > { %6163 = vmatprep.mubr.f32.mxu0 %v12843_v42  ;;  %8966 = vmatpush1.bf16.msra.mxu0 %v8965_v0  ;;  %v14387_v0 = vld [vmem:[#allocation64_spill] sm:$0xff] }
 0x8f2   : > { %8968 = vmatprep.subr.bf16.mxu0 %v8967_v5  ;;  %v8977_v5 = vpack.c.bf16 %v5708_v37, %v5701_v33  ;;  %v14391_v33 = vld [vmem:[#allocation79_spill] sm:$0xff]  ;;  %v5739_v37 = vld [vmem:[#allocation20] sm:$0xff] }
 0x8f3   : > { %v13168_v4 = vrot.slane %v5739_v37, %v14392_v51 }
 0x8f4   : > { %6164 = vmatmul.mubr.f32.gmra.mrb[182].mxu0 %v12846_v28 }
 0x8f5   : > { %6169 = vmatprep.mubr.f32.mxu0 %v12857_v55  ;;  %8970 = vmatpush1.bf16.msra.mxu0 %v8969_v22  ;;  %v5737_v55 = vld [vmem:[#allocation19 + $0x6f0] sm:$0xff]  ;;  %v14388_v22 = vld [vmem:[#allocation65_spill] sm:$0xff] }
 0x8f6   : > { %8972 = vmatprep.subr.bf16.mxu0 %v8971_v15  ;;  %v8981_v15 = vpack.c.bf16 %v5722_v35, %v5715_v20  ;;  %v8983_v39 = vpack.c.bf16 %v5737_v55, %v5730_v62  ;;  %v14389_v55 = vld [vmem:[#allocation33_spill] sm:$0xff]  ;;  %v14394_v20 = vld [vmem:[#allocation34_spill] sm:$0xff] }
 0x8f7   : > { %v13174_v35 = vrot.slane %v5739_v37, %v14394_v20 }
 0x8f8   : > { %6170 = vmatmul.mubr.f32.gmra.mrb[184].mxu0 %v12860_v56 }
 0x8f9   : > { %6175 = vmatprep.mubr.f32.mxu0 %v14387_v0  ;;  %8974 = vmatpush1.bf16.msra.mxu0 %v8973_v49  ;;  %v5767_v49 = vsub.s32 6, %v14389_v55  ;;  %v9658_v55 = vld [vmem:[%s10758_s18] sm:$0xff] }
 0x8fa   : > { %8976 = vmatprep.subr.bf16.mxu0 %v8975_v43  ;;  %v14390_v43 = vld [vmem:[#allocation77_spill] sm:$0xff] }
 0x8fc   : > { %6176 = vmatmul.mubr.f32.gmra.mrb[186].mxu0 %v14388_v22 }
 0x8fd   : > { %6181 = vmatprep.mubr.f32.mxu0 %v12885_v25  ;;  %8978 = vmatpush1.bf16.msra.mxu0 %v8977_v5  ;;  %v13170_v5 = vrot.slane %v5739_v37, %v5767_v49 }
 0x8fe   : > { %8980 = vmatprep.subr.bf16.mxu0 %v8979_v14  ;;  %v14393_v14 = vld [vmem:[#allocation82_spill] sm:$0xff] }
 0x900   : > { %6182 = vmatmul.mubr.f32.gmra.mrb[188].mxu0 %v12888_v13 }
 0x901   : > { %6187 = vmatprep.mubr.f32.mxu0 %v12899_v7  ;;  %8982 = vmatpush1.bf16.msra.mxu0 %v8981_v15 }
 0x902   : > { %8984 = vmatprep.subr.bf16.mxu0 %v8983_v39 }
 0x904   : > { %6188 = vmatmul.mubr.f32.gmra.mrb[190].mxu0 %v12902_v48 }
 0x905   : > { %6193 = vmatprep.mubr.f32.mxu0 %v12913_v8  ;;  %8986 = vmatpush1.bf16.msra.mxu0 %v8985_v60  ;;  %v14395_v60 = vld [vmem:[#allocation83_spill] sm:$0xff] }
 0x908   : > { %6194 = vmatmul.mubr.f32.gmra.mrb[192].mxu0 %v12916_v19 }
 0x909   : > { %6199 = vmatprep.mubr.f32.mxu0 %v12927_v45 }
 0x90c   : > { %6200 = vmatmul.mubr.f32.gmra.mrb[194].mxu0 %v12930_v6 }
 0x90d   : > { %6205 = vmatprep.mubr.f32.mxu0 %v12941_v57 }
 0x910   : > { %6206 = vmatmul.mubr.f32.gmra.mrb[196].mxu0 %v12944_v3  ;;  %v9659_v3 = vld [vmem:[%s10758_s18 + $0x30] sm:$0xff] }
 0x911   : > { %6211 = vmatprep.mubr.f32.mxu0 %v12955_v61 }
 0x914   : > { %6212 = vmatmul.mubr.f32.gmra.mrb[198].mxu0 %v14390_v43 }
 0x915   : > { %6217 = vmatprep.mubr.f32.mxu0 %v14391_v33 }
 0x918   : > { %6218 = vmatmul.mubr.f32.gmra.mrb[200].mxu0 %v12972_v24  ;;  %v14396_v24 = vld [vmem:[#allocation86_spill] sm:$0xff] }
 0x919   : > { %6223 = vmatprep.mubr.f32.mxu0 %v14393_v14 }
 0x91b   : > { %v5842_v62 = vpop.f32.mrb[96].mxu0  ;;  %v6613_v15 = vpop.f32.mrb[160].mxu1 }
 0x91c   : > { %v5843_v39 = vadd.f32 %v5842_v62, %v13168_v4  ;;  %v6614_v26 = vadd.f32 %v6613_v15, %v13170_v5  ;;  %v5844_v17 = vpop.f32.mrb[97].mxu0  ;;  %6224 = vmatmul.mubr.f32.gmra.mrb[202].mxu0 %v14395_v60  ;;  %v6615_v51 = vpop.f32.mrb[161].mxu1 }
 0x91d   : > { %v5845_v49 = vadd.f32 %v5844_v17, %v13174_v35  ;;  %6229 = vmatprep.mubr.f32.mxu0 %v14396_v24  ;;  %v9660_v24 = vld [vmem:[%s10758_s18 + $0x8] sm:$0xff] }
 0x91e   : > { %v6772_v14 = vmul.f32 0.17, %v5843_v39  ;;  %v6778_v33 = vmul.f32 0.17, %v6614_v26 }
 0x91f   : > { %v6773_v37 = vmul.f32 0.17, %v5845_v49  ;;  %v5848_v20 = vpop.f32.mrb[98].mxu0  ;;  %v6618_v43 = vpop.f32.mrb[162].mxu1  ;;  %v14397_v49 = vld [vmem:[#allocation88_spill] sm:$0xff] }
 0x920   : > { %v6996_v61 = vadd.f32 %v9658_v55, %v6772_v14  ;;  %v7002_v62 = vadd.f32 %v9659_v3, %v6778_v33  ;;  %v5849_v15 = vadd.f32 %v5848_v20, %v13168_v4  ;;  %v6619_v57 = vadd.f32 %v6618_v43, %v13170_v5  ;;  %v5850_v51 = vpop.f32.mrb[99].mxu0  ;;  %6230 = vmatmul.mubr.f32.gmra.mrb[204].mxu0 %v13000_v12  ;;  %v6620_v17 = vpop.f32.mrb[163].mxu1  ;;  %v9665_v12 = vld [vmem:[%s10758_s18 + $0xa0] sm:$0xff] }
 0x921   : > { %v6997_v39 = vadd.f32 %v9660_v24, %v6773_v37  ;;  %v5851_v26 = vadd.f32 %v5850_v51, %v13174_v35  ;;  %6235 = vmatprep.mubr.f32.mxu0 %v14397_v49  ;;  %v9661_v24 = vld [vmem:[%s10758_s18 + $0x38] sm:$0xff]  ;;  %v9662_v51 = vld [vmem:[%s10758_s18 + $0x68] sm:$0xff] }
 0x922   : > { %v7220_v55 = vmax.f32 %v6996_v61, 0.0  ;;  %v7226_v14 = vmax.f32 %v7002_v62, 0.0  ;;  %v6779_v3 = vmul.f32 0.17, %v5849_v15  ;;  %v6785_v33 = vmul.f32 0.17, %v6619_v57 }
 0x923   : > { %v7221_v20 = vmax.f32 %v6997_v39, 0.0  ;;  %v6780_v60 = vmul.f32 0.17, %v5851_v26  ;;  %v5854_v43 = vpop.f32.mrb[100].mxu0  ;;  %v6623_v6 = vpop.f32.mrb[164].mxu1  ;;  %v9663_v39 = vld [vmem:[%s10758_s18 + $0x40] sm:$0xff] }
 0x924   : > { %7444 = vst [vmem:[%s13191_s19] sm:$0xff] %v7220_v55  ;;  %7450 = vst [vmem:[%s13191_s19 + $0x30] sm:$0xff] %v7226_v14  ;;  %v7003_v37 = vadd.f32 %v9661_v24, %v6779_v3  ;;  %v7009_v61 = vadd.f32 %v9662_v51, %v6785_v33  ;;  %v5855_v62 = vadd.f32 %v5854_v43, %v13168_v4  ;;  %v5856_v15 = vpop.f32.mrb[101].mxu0  ;;  %6236 = vmatmul.mubr.f32.gmra.mrb[206].mxu0 %v13014_v54  ;;  %v6625_v17 = vpop.f32.mrb[165].mxu1  ;;  %v14398_v14 = vld [vmem:[#allocation36_spill] sm:$0xff] }
 0x925   : > { %v6624_v57 = vadd.f32 %v6623_v6, %v13170_v5  ;;  %7445 = vst [vmem:[%s13191_s19 + $0x8] sm:$0xff] %v7221_v20  ;;  %v7004_v26 = vadd.f32 %v9663_v39, %v6780_v60  ;;  %v5857_v55 = vadd.f32 %v5856_v15, %v13174_v35  ;;  %6241 = vmatprep.mubr.f32.mxu0 %v14398_v14  ;;  %v9664_v20 = vld [vmem:[%s10758_s18 + $0x70] sm:$0xff] }
 0x926   : > { %v7227_v3 = vmax.f32 %v7003_v37, 0.0  ;;  %v7233_v33 = vmax.f32 %v7009_v61, 0.0  ;;  %v6786_v43 = vmul.f32 0.17, %v5855_v62  ;;  %v9666_v62 = vld [vmem:[%s10758_s18 + $0x78] sm:$0xff] }
 0x927   : > { %v6792_v24 = vmul.f32 0.17, %v6624_v57  ;;  %v7228_v6 = vmax.f32 %v7004_v26, 0.0  ;;  %v6787_v51 = vmul.f32 0.17, %v5857_v55  ;;  %v5860_v54 = vpop.f32.mrb[102].mxu0 }
 0x928   : > { %v6628_v49 = vpop.f32.mrb[166].mxu1  ;;  %7451 = vst [vmem:[%s13191_s19 + $0x38] sm:$0xff] %v7227_v3  ;;  %7457 = vst [vmem:[%s13191_s19 + $0x68] sm:$0xff] %v7233_v33  ;;  %v7010_v17 = vadd.f32 %v9664_v20, %v6786_v43  ;;  %v5861_v15 = vadd.f32 %v5860_v54, %v13168_v4  ;;  %v5862_v37 = vpop.f32.mrb[103].mxu0  ;;  %6242 = vmatmul.mubr.f32.gmra.mrb[208].mxu0 %v13028_v2  ;;  %v14399_v55 = vld [vmem:[#allocation40_spill] sm:$0xff]  ;;  %v9668_v2 = vld [vmem:[%s10758_s18 + $0xd8] sm:$0xff] }
 0x929   : > { %v7016_v60 = vadd.f32 %v9665_v12, %v6792_v24  ;;  %v6629_v39 = vadd.f32 %v6628_v49, %v13170_v5  ;;  %v6630_v61 = vpop.f32.mrb[167].mxu1  ;;  %7452 = vst [vmem:[%s13191_s19 + $0x40] sm:$0xff] %v7228_v6  ;;  %v7011_v57 = vadd.f32 %v9666_v62, %v6787_v51  ;;  %v5863_v26 = vadd.f32 %v5862_v37, %v13174_v35  ;;  %v9667_v6 = vld [vmem:[%s10758_s18 + $0xa8] sm:$0xff] }
 0x92a   : > { %6247 = vmatprep.mubr.f32.mxu0 %v14399_v55  ;;  %v7234_v12 = vmax.f32 %v7010_v17, 0.0  ;;  %v6793_v54 = vmul.f32 0.17, %v5861_v15  ;;  %v9669_v15 = vld [vmem:[%s10758_s18 + $0xb0] sm:$0xff] }
 0x92b   : > { %v7240_v3 = vmax.f32 %v7016_v60, 0.0  ;;  %v6799_v33 = vmul.f32 0.17, %v6629_v39  ;;  %v7235_v49 = vmax.f32 %v7011_v57, 0.0  ;;  %v6794_v43 = vmul.f32 0.17, %v5863_v26 }
 0x92c   : > { %v5866_v24 = vpop.f32.mrb[104].mxu0  ;;  %v6633_v20 = vpop.f32.mrb[168].mxu1  ;;  %7458 = vst [vmem:[%s13191_s19 + $0x70] sm:$0xff] %v7234_v12  ;;  %v7017_v61 = vadd.f32 %v9667_v6, %v6793_v54  ;;  %6248 = vmatmul.mubr.f32.gmra.mrb[210].mxu0 %v13042_v58  ;;  %v14400_v26 = vld [vmem:[#allocation43_spill] sm:$0xff]  ;;  %v9671_v58 = vld [vmem:[%s10758_s18 + $0x110] sm:$0xff] }
 0x92d   : > { %7464 = vst [vmem:[%s13191_s19 + $0xa0] sm:$0xff] %v7240_v3  ;;  %v7023_v51 = vadd.f32 %v9668_v2, %v6799_v33  ;;  %v5867_v37 = vadd.f32 %v5866_v24, %v13168_v4  ;;  %v6634_v62 = vadd.f32 %v6633_v20, %v13170_v5  ;;  %v5868_v17 = vpop.f32.mrb[105].mxu0  ;;  %v6635_v60 = vpop.f32.mrb[169].mxu1  ;;  %7459 = vst [vmem:[%s13191_s19 + $0x78] sm:$0xff] %v7235_v49  ;;  %6253 = vmatprep.mubr.f32.mxu0 %v14400_v26  ;;  %v9670_v49 = vld [vmem:[%s10758_s18 + $0xe0] sm:$0xff] }
 0x92e   : > { %v7018_v39 = vadd.f32 %v9669_v15, %v6794_v43  ;;  %v5869_v57 = vadd.f32 %v5868_v17, %v13174_v35  ;;  %v7241_v2 = vmax.f32 %v7017_v61, 0.0 }
 0x92f   : > { %v7247_v12 = vmax.f32 %v7023_v51, 0.0  ;;  %v6800_v3 = vmul.f32 0.17, %v5867_v37  ;;  %v6806_v54 = vmul.f32 0.17, %v6634_v62  ;;  %v5872_v20 = vpop.f32.mrb[106].mxu0 }
 0x930   : > { %v7242_v33 = vmax.f32 %v7018_v39, 0.0  ;;  %v6801_v24 = vmul.f32 0.17, %v5869_v57  ;;  %v6638_v6 = vpop.f32.mrb[170].mxu1  ;;  %7465 = vst [vmem:[%s13191_s19 + $0xa8] sm:$0xff] %v7241_v2  ;;  %v5873_v17 = vadd.f32 %v5872_v20, %v13168_v4  ;;  %v5874_v61 = vpop.f32.mrb[107].mxu0  ;;  %6254 = vmatmul.mubr.f32.gmra.mrb[212].mxu0 %v13056_v9 }
 0x931   : > { %7471 = vst [vmem:[%s13191_s19 + $0xd8] sm:$0xff] %v7247_v12  ;;  %v7024_v60 = vadd.f32 %v9670_v49, %v6800_v3  ;;  %v7030_v43 = vadd.f32 %v9671_v58, %v6806_v54  ;;  %v6639_v15 = vadd.f32 %v6638_v6, %v13170_v5  ;;  %v6640_v51 = vpop.f32.mrb[171].mxu1  ;;  %v9672_v37 = vld [vmem:[%s10758_s18 + $0xe8] sm:$0xff]  ;;  %v5875_v39 = vadd.f32 %v5874_v61, %v13174_v35  ;;  %v14401_v57 = vld [vmem:[#allocation45_spill] sm:$0xff] }
 0x932   : > { %7466 = vst [vmem:[%s13191_s19 + $0xb0] sm:$0xff] %v7242_v33  ;;  %v7025_v62 = vadd.f32 %v9672_v37, %v6801_v24  ;;  %6259 = vmatprep.mubr.f32.mxu0 %v14401_v57  ;;  %v6807_v12 = vmul.f32 0.17, %v5873_v17  ;;  %v9673_v33 = vld [vmem:[%s10758_s18 + $0x118] sm:$0xff]  ;;  %v9674_v9 = vld [vmem:[%s10758_s18 + $0x148] sm:$0xff]  ;;  %v9675_v17 = vld [vmem:[%s10758_s18 + $0x120] sm:$0xff] }
 0x933   : > { %v7248_v58 = vmax.f32 %v7024_v60, 0.0  ;;  %v7254_v2 = vmax.f32 %v7030_v43, 0.0  ;;  %v6813_v3 = vmul.f32 0.17, %v6639_v15  ;;  %v6808_v20 = vmul.f32 0.17, %v5875_v39 }
 0x934   : > { %v7249_v54 = vmax.f32 %v7025_v62, 0.0  ;;  %v5878_v6 = vpop.f32.mrb[108].mxu0  ;;  %v6643_v49 = vpop.f32.mrb[172].mxu1  ;;  %v7031_v51 = vadd.f32 %v9673_v33, %v6807_v12  ;;  %6260 = vmatmul.mubr.f32.gmra.mrb[214].mxu0 %v13070_v53  ;;  %v14402_v39 = vld [vmem:[#allocation47_spill] sm:$0xff] }
 0x935   : > { %7472 = vst [vmem:[%s13191_s19 + $0xe0] sm:$0xff] %v7248_v58  ;;  %7478 = vst [vmem:[%s13191_s19 + $0x110] sm:$0xff] %v7254_v2  ;;  %v7037_v24 = vadd.f32 %v9674_v9, %v6813_v3  ;;  %v5879_v61 = vadd.f32 %v5878_v6, %v13168_v4  ;;  %v6644_v37 = vadd.f32 %v6643_v49, %v13170_v5  ;;  %v5880_v60 = vpop.f32.mrb[109].mxu0  ;;  %v6645_v43 = vpop.f32.mrb[173].mxu1  ;;  %6265 = vmatprep.mubr.f32.mxu0 %v14402_v39  ;;  %v9677_v53 = vld [vmem:[%s10758_s18 + $0x180] sm:$0xff] }
 0x936   : > { %7473 = vst [vmem:[%s13191_s19 + $0xe8] sm:$0xff] %v7249_v54  ;;  %v7032_v15 = vadd.f32 %v9675_v17, %v6808_v20  ;;  %v5881_v62 = vadd.f32 %v5880_v60, %v13174_v35  ;;  %v7255_v9 = vmax.f32 %v7031_v51, 0.0  ;;  %v9676_v54 = vld [vmem:[%s10758_s18 + $0x150] sm:$0xff] }
 0x937   : > { %v7261_v58 = vmax.f32 %v7037_v24, 0.0  ;;  %v6814_v2 = vmul.f32 0.17, %v5879_v61  ;;  %v6820_v12 = vmul.f32 0.17, %v6644_v37  ;;  %v5884_v49 = vpop.f32.mrb[110].mxu0 }
 0x938   : > { %v7256_v3 = vmax.f32 %v7032_v15, 0.0  ;;  %v6815_v6 = vmul.f32 0.17, %v5881_v62  ;;  %v6648_v33 = vpop.f32.mrb[174].mxu1  ;;  %7479 = vst [vmem:[%s13191_s19 + $0x118] sm:$0xff] %v7255_v9  ;;  %v5885_v60 = vadd.f32 %v5884_v49, %v13168_v4  ;;  %v5886_v51 = vpop.f32.mrb[111].mxu0  ;;  %6266 = vmatmul.mubr.f32.gmra.mrb[216].mxu0 %v13084_v27 }
 0x939   : > { %7485 = vst [vmem:[%s13191_s19 + $0x148] sm:$0xff] %v7261_v58  ;;  %v7038_v43 = vadd.f32 %v9676_v54, %v6814_v2  ;;  %v7044_v20 = vadd.f32 %v9677_v53, %v6820_v12  ;;  %v6649_v17 = vadd.f32 %v6648_v33, %v13170_v5  ;;  %v6650_v24 = vpop.f32.mrb[175].mxu1  ;;  %v9678_v61 = vld [vmem:[%s10758_s18 + $0x158] sm:$0xff]  ;;  %v5887_v15 = vadd.f32 %v5886_v51, %v13174_v35 }
 0x93a   : > { %7480 = vst [vmem:[%s13191_s19 + $0x120] sm:$0xff] %v7256_v3  ;;  %v7039_v37 = vadd.f32 %v9678_v61, %v6815_v6  ;;  %6271 = vmatprep.mubr.f32.mxu0 %v13095_v46  ;;  %v6821_v9 = vmul.f32 0.17, %v5885_v60  ;;  %v9679_v3 = vld [vmem:[%s10758_s18 + $0x188] sm:$0xff]  ;;  %v9680_v24 = vld [vmem:[%s10758_s18 + $0x1b8] sm:$0xff]  ;;  %v9681_v60 = vld [vmem:[%s10758_s18 + $0x190] sm:$0xff] }
 0x93b   : > { %v7262_v53 = vmax.f32 %v7038_v43, 0.0  ;;  %v7268_v62 = vmax.f32 %v7044_v20, 0.0  ;;  %v6827_v58 = vmul.f32 0.17, %v6649_v17  ;;  %v6822_v12 = vmul.f32 0.17, %v5887_v15 }
 0x93c   : > { %v7263_v2 = vmax.f32 %v7039_v37, 0.0  ;;  %v5890_v49 = vpop.f32.mrb[112].mxu0  ;;  %v6653_v33 = vpop.f32.mrb[176].mxu1  ;;  %v7045_v54 = vadd.f32 %v9679_v3, %v6821_v9  ;;  %6272 = vmatmul.mubr.f32.gmra.mrb[218].mxu0 %v13097_v59 }
 0x93d   : > { %7486 = vst [vmem:[%s13191_s19 + $0x150] sm:$0xff] %v7262_v53  ;;  %7492 = vst [vmem:[%s13191_s19 + $0x180] sm:$0xff] %v7268_v62  ;;  %v7051_v6 = vadd.f32 %v9680_v24, %v6827_v58  ;;  %v5891_v51 = vadd.f32 %v5890_v49, %v13168_v4  ;;  %v6654_v61 = vadd.f32 %v6653_v33, %v13170_v5  ;;  %v5892_v43 = vpop.f32.mrb[113].mxu0  ;;  %v6655_v20 = vpop.f32.mrb[177].mxu1  ;;  %6277 = vmatprep.mubr.f32.mxu0 %v13107_v52  ;;  %v9686_v52 = vld [vmem:[%s10758_s18 + $0x228] sm:$0xff] }
 0x93e   : > { %7487 = vst [vmem:[%s13191_s19 + $0x158] sm:$0xff] %v7263_v2  ;;  %v7046_v17 = vadd.f32 %v9681_v60, %v6822_v12  ;;  %v5893_v37 = vadd.f32 %v5892_v43, %v13174_v35  ;;  %v7269_v15 = vmax.f32 %v7045_v54, 0.0  ;;  %v9682_v2 = vld [vmem:[%s10758_s18 + $0x1c0] sm:$0xff]  ;;  %v9683_v20 = vld [vmem:[%s10758_s18 + $0x1f0] sm:$0xff] }
 0x93f   : > { %v7275_v53 = vmax.f32 %v7051_v6, 0.0  ;;  %v6828_v62 = vmul.f32 0.17, %v5891_v51  ;;  %v6834_v9 = vmul.f32 0.17, %v6654_v61  ;;  %v5896_v33 = vpop.f32.mrb[114].mxu0 }
 0x940   : > { %v7270_v58 = vmax.f32 %v7046_v17, 0.0  ;;  %v6829_v49 = vmul.f32 0.17, %v5893_v37  ;;  %v6658_v3 = vpop.f32.mrb[178].mxu1  ;;  %7493 = vst [vmem:[%s13191_s19 + $0x188] sm:$0xff] %v7269_v15  ;;  %v5897_v43 = vadd.f32 %v5896_v33, %v13168_v4  ;;  %v5898_v54 = vpop.f32.mrb[115].mxu0 }
 0x941   : > { %7499 = vst [vmem:[%s13191_s19 + $0x1b8] sm:$0xff] %v7275_v53  ;;  %v7052_v24 = vadd.f32 %v9682_v2, %v6828_v62  ;;  %v7058_v12 = vadd.f32 %v9683_v20, %v6834_v9  ;;  %v6659_v60 = vadd.f32 %v6658_v3, %v13170_v5  ;;  %v14403_v6 = vld [vmem:[#allocation49_spill] sm:$0xff]  ;;  %v6660_v51 = vpop.f32.mrb[179].mxu1  ;;  %v9684_v61 = vld [vmem:[%s10758_s18 + $0x1c8] sm:$0xff]  ;;  %v5899_v37 = vadd.f32 %v5898_v54, %v13174_v35  ;;  %v14404_v15 = vld [vmem:[#allocation50_spill] sm:$0xff] }
 0x942   : > { %6278 = vmatmul.mubr.f32.gmra.mrb[220].mxu0 %v14403_v6  ;;  %7494 = vst [vmem:[%s13191_s19 + $0x190] sm:$0xff] %v7270_v58  ;;  %v7053_v17 = vadd.f32 %v9684_v61, %v6829_v49  ;;  %v6835_v9 = vmul.f32 0.17, %v5897_v43  ;;  %v9685_v58 = vld [vmem:[%s10758_s18 + $0x1f8] sm:$0xff] }
 0x943   : > { %6283 = vmatprep.mubr.f32.mxu0 %v14404_v15  ;;  %v7276_v53 = vmax.f32 %v7052_v24, 0.0  ;;  %v7282_v62 = vmax.f32 %v7058_v12, 0.0  ;;  %v6841_v33 = vmul.f32 0.17, %v6659_v60  ;;  %v6836_v2 = vmul.f32 0.17, %v5899_v37 }
 0x944   : > { %v7277_v3 = vmax.f32 %v7053_v17, 0.0  ;;  %v5902_v20 = vpop.f32.mrb[116].mxu0  ;;  %v6663_v6 = vpop.f32.mrb[180].mxu1  ;;  %v7059_v51 = vadd.f32 %v9685_v58, %v6835_v9  ;;  %v14405_v12 = vld [vmem:[#allocation51_spill] sm:$0xff] }
 0x945   : > { %7500 = vst [vmem:[%s13191_s19 + $0x1c0] sm:$0xff] %v7276_v53  ;;  %7506 = vst [vmem:[%s13191_s19 + $0x1f0] sm:$0xff] %v7282_v62  ;;  %v7065_v49 = vadd.f32 %v9686_v52, %v6841_v33  ;;  %v5903_v54 = vadd.f32 %v5902_v20, %v13168_v4  ;;  %v6664_v61 = vadd.f32 %v6663_v6, %v13170_v5  ;;  %v5904_v24 = vpop.f32.mrb[117].mxu0  ;;  %v6665_v43 = vpop.f32.mrb[181].mxu1  ;;  %v9687_v60 = vld [vmem:[%s10758_s18 + $0x200] sm:$0xff] }
 0x946   : > { %6284 = vmatmul.mubr.f32.gmra.mrb[222].mxu0 %v14405_v12  ;;  %7501 = vst [vmem:[%s13191_s19 + $0x1c8] sm:$0xff] %v7277_v3  ;;  %v7060_v17 = vadd.f32 %v9687_v60, %v6836_v2  ;;  %v5905_v37 = vadd.f32 %v5904_v24, %v13174_v35  ;;  %v7283_v52 = vmax.f32 %v7059_v51, 0.0  ;;  %v9688_v3 = vld [vmem:[%s10758_s18 + $0x230] sm:$0xff]  ;;  %v9689_v12 = vld [vmem:[%s10758_s18 + $0x260] sm:$0xff] }
 0x947   : > { %6354 = vmatprep.mubr.f32.mxu0 %v12689_v11  ;;  %v7289_v53 = vmax.f32 %v7065_v49, 0.0  ;;  %v6842_v62 = vmul.f32 0.17, %v5903_v54  ;;  %v6848_v9 = vmul.f32 0.17, %v6664_v61  ;;  %v5908_v20 = vpop.f32.mrb[118].mxu0 }
 0x948   : > { %v7284_v6 = vmax.f32 %v7060_v17, 0.0  ;;  %v6843_v33 = vmul.f32 0.17, %v5905_v37  ;;  %v6668_v58 = vpop.f32.mrb[182].mxu1  ;;  %7507 = vst [vmem:[%s13191_s19 + $0x1f8] sm:$0xff] %v7283_v52  ;;  %v5909_v24 = vadd.f32 %v5908_v20, %v13168_v4  ;;  %v5910_v51 = vpop.f32.mrb[119].mxu0 }
 0x949   : > { %7513 = vst [vmem:[%s13191_s19 + $0x228] sm:$0xff] %v7289_v53  ;;  %v7066_v43 = vadd.f32 %v9688_v3, %v6842_v62  ;;  %v7072_v2 = vadd.f32 %v9689_v12, %v6848_v9  ;;  %v6669_v11 = vadd.f32 %v6668_v58, %v13170_v5  ;;  %v14406_v49 = vld [vmem:[#allocation38_spill] sm:$0xff]  ;;  %v6670_v54 = vpop.f32.mrb[183].mxu1  ;;  %v5911_v17 = vadd.f32 %v5910_v51, %v13174_v35  ;;  %v14407_v37 = vld [vmem:[#allocation39_spill] sm:$0xff] }
 0x94a   : > { %6355 = vmatmul.mubr.f32.vlgmr.msra.gmra.mrb[224].mxu0 %v14406_v49  ;;  %7508 = vst [vmem:[%s13191_s19 + $0x200] sm:$0xff] %v7284_v6  ;;  %v9690_v61 = vld [vmem:[%s10758_s18 + $0x238] sm:$0xff]  ;;  %v6849_v53 = vmul.f32 0.17, %v5909_v24  ;;  %v9691_v6 = vld [vmem:[%s10758_s18 + $0x268] sm:$0xff]  ;;  %v9693_v24 = vld [vmem:[%s10758_s18 + $0x270] sm:$0xff] }
 0x94b   : > { %v7067_v60 = vadd.f32 %v9690_v61, %v6843_v33  ;;  %6360 = vmatprep.mubr.f32.mxu0 %v14407_v37  ;;  %v7290_v12 = vmax.f32 %v7066_v43, 0.0  ;;  %v7296_v52 = vmax.f32 %v7072_v2, 0.0  ;;  %v6855_v62 = vmul.f32 0.17, %v6669_v11  ;;  %v5914_v58 = vpop.f32.mrb[120].mxu0  ;;  %v6673_v3 = vpop.f32.mrb[184].mxu1 }
 0x94c   : > { %v6850_v20 = vmul.f32 0.17, %v5911_v17  ;;  %v7073_v49 = vadd.f32 %v9691_v6, %v6849_v53  ;;  %v9692_v54 = vld [vmem:[%s10758_s18 + $0x298] sm:$0xff]  ;;  %v5915_v51 = vadd.f32 %v5914_v58, %v13168_v4  ;;  %v6674_v61 = vadd.f32 %v6673_v3, %v13170_v5  ;;  %v5916_v43 = vpop.f32.mrb[121].mxu0  ;;  %v6675_v2 = vpop.f32.mrb[185].mxu1  ;;  %v9695_v6 = vld [vmem:[%s10758_s18 + $0x2d0] sm:$0xff] }
 0x94d   : > { %v7291_v9 = vmax.f32 %v7067_v60, 0.0  ;;  %7514 = vst [vmem:[%s13191_s19 + $0x230] sm:$0xff] %v7290_v12  ;;  %7520 = vst [vmem:[%s13191_s19 + $0x260] sm:$0xff] %v7296_v52  ;;  %v7079_v33 = vadd.f32 %v9692_v54, %v6855_v62  ;;  %v5917_v60 = vadd.f32 %v5916_v43, %v13174_v35 }
 0x94e   : > { %6361 = vmatmul.mubr.f32.gmra.mrb[226].mxu0 %v12706_v38  ;;  %v7074_v11 = vadd.f32 %v9693_v24, %v6850_v20  ;;  %v7297_v17 = vmax.f32 %v7073_v49, 0.0  ;;  %v6856_v12 = vmul.f32 0.17, %v5915_v51  ;;  %v6862_v52 = vmul.f32 0.17, %v6674_v61  ;;  %v9696_v51 = vld [vmem:[%s10758_s18 + $0x2a8] sm:$0xff] }
 0x94f   : > { %7515 = vst [vmem:[%s13191_s19 + $0x238] sm:$0xff] %v7291_v9  ;;  %6366 = vmatprep.mubr.f32.mxu0 %v12717_v44  ;;  %v7303_v37 = vmax.f32 %v7079_v33, 0.0  ;;  %v6857_v62 = vmul.f32 0.17, %v5917_v60  ;;  %v5920_v38 = vpop.f32.mrb[122].mxu0  ;;  %v6678_v58 = vpop.f32.mrb[186].mxu1 }
 0x950   : > { %v7298_v53 = vmax.f32 %v7074_v11, 0.0  ;;  %7521 = vst [vmem:[%s13191_s19 + $0x268] sm:$0xff] %v7297_v17  ;;  %v9694_v9 = vld [vmem:[%s10758_s18 + $0x2a0] sm:$0xff]  ;;  %v7086_v20 = vadd.f32 %v9695_v6, %v6862_v52  ;;  %v5921_v54 = vadd.f32 %v5920_v38, %v13168_v4  ;;  %v6679_v44 = vadd.f32 %v6678_v58, %v13170_v5  ;;  %v5922_v49 = vpop.f32.mrb[123].mxu0  ;;  %v6680_v33 = vpop.f32.mrb[187].mxu1  ;;  %v9697_v52 = vld [vmem:[%s10758_s18 + $0x2d8] sm:$0xff] }
 0x951   : > { %7527 = vst [vmem:[%s13191_s19 + $0x298] sm:$0xff] %v7303_v37  ;;  %v7080_v3 = vadd.f32 %v9694_v9, %v6856_v12  ;;  %v7081_v61 = vadd.f32 %v9696_v51, %v6857_v62  ;;  %v5923_v43 = vadd.f32 %v5922_v49, %v13174_v35  ;;  %v9698_v38 = vld [vmem:[%s10758_s18 + $0x308] sm:$0xff]  ;;  %v9699_v6 = vld [vmem:[%s10758_s18 + $0x2e0] sm:$0xff] }
 0x952   : > { %6367 = vmatmul.mubr.f32.gmra.mrb[228].mxu0 %v12720_v34  ;;  %7522 = vst [vmem:[%s13191_s19 + $0x270] sm:$0xff] %v7298_v53  ;;  %v7310_v24 = vmax.f32 %v7086_v20, 0.0  ;;  %v6863_v11 = vmul.f32 0.17, %v5921_v54  ;;  %v6869_v60 = vmul.f32 0.17, %v6679_v44 }
 0x953   : > { %6372 = vmatprep.mubr.f32.mxu0 %v12731_v30  ;;  %v7304_v2 = vmax.f32 %v7080_v3, 0.0  ;;  %v7305_v17 = vmax.f32 %v7081_v61, 0.0  ;;  %v6864_v37 = vmul.f32 0.17, %v5923_v43  ;;  %v5926_v34 = vpop.f32.mrb[124].mxu0  ;;  %v6683_v12 = vpop.f32.mrb[188].mxu1 }
 0x954   : > { %7534 = vst [vmem:[%s13191_s19 + $0x2d0] sm:$0xff] %v7310_v24  ;;  %v7087_v53 = vadd.f32 %v9697_v52, %v6863_v11  ;;  %v7093_v62 = vadd.f32 %v9698_v38, %v6869_v60  ;;  %v5927_v58 = vadd.f32 %v5926_v34, %v13168_v4  ;;  %v6684_v30 = vadd.f32 %v6683_v12, %v13170_v5  ;;  %v5928_v9 = vpop.f32.mrb[125].mxu0  ;;  %v6685_v3 = vpop.f32.mrb[189].mxu1  ;;  %v9700_v24 = vld [vmem:[%s10758_s18 + $0x310] sm:$0xff]  ;;  %v9701_v60 = vld [vmem:[%s10758_s18 + $0x340] sm:$0xff]  ;;  %v9702_v52 = vld [vmem:[%s10758_s18 + $0x318] sm:$0xff] }
 0x955   : > { %7528 = vst [vmem:[%s13191_s19 + $0x2a0] sm:$0xff] %v7304_v2  ;;  %7529 = vst [vmem:[%s13191_s19 + $0x2a8] sm:$0xff] %v7305_v17  ;;  %v7088_v20 = vadd.f32 %v9699_v6, %v6864_v37  ;;  %v5929_v54 = vadd.f32 %v5928_v9, %v13174_v35 }
 0x956   : > { %6373 = vmatmul.mubr.f32.gmra.mrb[230].mxu0 %v12734_v40  ;;  %v7311_v44 = vmax.f32 %v7087_v53, 0.0  ;;  %v7317_v49 = vmax.f32 %v7093_v62, 0.0  ;;  %v6870_v33 = vmul.f32 0.17, %v5927_v58  ;;  %v6876_v51 = vmul.f32 0.17, %v6684_v30 }
 0x957   : > { %6378 = vmatprep.mubr.f32.mxu0 %v12745_v32  ;;  %v7312_v61 = vmax.f32 %v7088_v20, 0.0  ;;  %v6871_v43 = vmul.f32 0.17, %v5929_v54  ;;  %v5932_v40 = vpop.f32.mrb[126].mxu0  ;;  %v6688_v2 = vpop.f32.mrb[190].mxu1  ;;  %v9703_v54 = vld [vmem:[%s10758_s18 + $0x348] sm:$0xff] }
 0x958   : > { %7535 = vst [vmem:[%s13191_s19 + $0x2d8] sm:$0xff] %v7311_v44  ;;  %7541 = vst [vmem:[%s13191_s19 + $0x308] sm:$0xff] %v7317_v49  ;;  %v7094_v11 = vadd.f32 %v9700_v24, %v6870_v33  ;;  %v7100_v17 = vadd.f32 %v9701_v60, %v6876_v51  ;;  %v5933_v37 = vadd.f32 %v5932_v40, %v13168_v4  ;;  %v5934_v34 = vpop.f32.mrb[127].mxu0  ;;  %v6690_v12 = vpop.f32.mrb[191].mxu1  ;;  %v9704_v49 = vld [vmem:[%s10758_s18 + $0x378] sm:$0xff]  ;;  %v9705_v40 = vld [vmem:[%s10758_s18 + $0x350] sm:$0xff] }
 0x959   : > { %v6689_v32 = vadd.f32 %v6688_v2, %v13170_v5  ;;  %7536 = vst [vmem:[%s13191_s19 + $0x2e0] sm:$0xff] %v7312_v61  ;;  %v7095_v53 = vadd.f32 %v9702_v52, %v6871_v43  ;;  %v5935_v38 = vadd.f32 %v5934_v34, %v13174_v35  ;;  %v9706_v52 = vld [vmem:[%s10758_s18 + $0x380] sm:$0xff] }
 0x95a   : > { %6379 = vmatmul.mubr.f32.gmra.mrb[232].mxu0 %v12748_v47  ;;  %v7318_v62 = vmax.f32 %v7094_v11, 0.0  ;;  %v7324_v58 = vmax.f32 %v7100_v17, 0.0  ;;  %v6877_v30 = vmul.f32 0.17, %v5933_v37 }
 0x95b   : > { %6384 = vmatprep.mubr.f32.mxu0 %v12759_v36  ;;  %v6883_v9 = vmul.f32 0.17, %v6689_v32  ;;  %v7319_v3 = vmax.f32 %v7095_v53, 0.0  ;;  %v6878_v6 = vmul.f32 0.17, %v5935_v38  ;;  %v5938_v47 = vpop.f32.mrb[128].mxu0 }
 0x95c   : > { %v6693_v20 = vpop.f32.mrb[192].mxu1  ;;  %7542 = vst [vmem:[%s13191_s19 + $0x310] sm:$0xff] %v7318_v62  ;;  %7548 = vst [vmem:[%s13191_s19 + $0x340] sm:$0xff] %v7324_v58  ;;  %v7101_v44 = vadd.f32 %v9703_v54, %v6877_v30  ;;  %v5939_v51 = vadd.f32 %v5938_v47, %v13168_v4  ;;  %v5940_v61 = vpop.f32.mrb[129].mxu0  ;;  %v9707_v38 = vld [vmem:[%s10758_s18 + $0x3b0] sm:$0xff] }
 0x95d   : > { %v7107_v33 = vadd.f32 %v9704_v49, %v6883_v9  ;;  %v6694_v36 = vadd.f32 %v6693_v20, %v13170_v5  ;;  %v6695_v43 = vpop.f32.mrb[193].mxu1  ;;  %7543 = vst [vmem:[%s13191_s19 + $0x318] sm:$0xff] %v7319_v3  ;;  %v7102_v2 = vadd.f32 %v9705_v40, %v6878_v6  ;;  %v5941_v24 = vadd.f32 %v5940_v61, %v13174_v35  ;;  %v9708_v3 = vld [vmem:[%s10758_s18 + $0x388] sm:$0xff]  ;;  %v9709_v61 = vld [vmem:[%s10758_s18 + $0x3b8] sm:$0xff] }
 0x95e   : > { %6385 = vmatmul.mubr.f32.gmra.mrb[234].mxu0 %v12762_v1  ;;  %v7325_v11 = vmax.f32 %v7101_v44, 0.0  ;;  %v6884_v17 = vmul.f32 0.17, %v5939_v51  ;;  %v9710_v40 = vld [vmem:[%s10758_s18 + $0x3e8] sm:$0xff] }
 0x95f   : > { %6390 = vmatprep.mubr.f32.mxu0 %v12773_v18  ;;  %v7331_v60 = vmax.f32 %v7107_v33, 0.0  ;;  %v6890_v37 = vmul.f32 0.17, %v6694_v36  ;;  %v7326_v32 = vmax.f32 %v7102_v2, 0.0  ;;  %v6885_v34 = vmul.f32 0.17, %v5941_v24 }
 0x960   : > { %v5944_v1 = vpop.f32.mrb[130].mxu0  ;;  %v6698_v12 = vpop.f32.mrb[194].mxu1  ;;  %7549 = vst [vmem:[%s13191_s19 + $0x348] sm:$0xff] %v7325_v11  ;;  %v7108_v53 = vadd.f32 %v9706_v52, %v6884_v17  ;;  %v9711_v17 = vld [vmem:[%s10758_s18 + $0x3c0] sm:$0xff] }
 0x961   : > { %7555 = vst [vmem:[%s13191_s19 + $0x378] sm:$0xff] %v7331_v60  ;;  %v7114_v62 = vadd.f32 %v9707_v38, %v6890_v37  ;;  %v5945_v58 = vadd.f32 %v5944_v1, %v13168_v4  ;;  %v6699_v18 = vadd.f32 %v6698_v12, %v13170_v5  ;;  %v5946_v30 = vpop.f32.mrb[131].mxu0  ;;  %v6700_v9 = vpop.f32.mrb[195].mxu1  ;;  %7550 = vst [vmem:[%s13191_s19 + $0x350] sm:$0xff] %v7326_v32 }
 0x962   : > { %6391 = vmatmul.mubr.f32.gmra.mrb[236].mxu0 %v12776_v50  ;;  %v7109_v6 = vadd.f32 %v9708_v3, %v6885_v34  ;;  %v5947_v47 = vadd.f32 %v5946_v30, %v13174_v35  ;;  %v7332_v20 = vmax.f32 %v7108_v53, 0.0  ;;  %v9713_v30 = vld [vmem:[%s10758_s18 + $0x420] sm:$0xff] }
 0x963   : > { %6396 = vmatprep.mubr.f32.mxu0 %v12787_v63  ;;  %v7338_v54 = vmax.f32 %v7114_v62, 0.0  ;;  %v6891_v44 = vmul.f32 0.17, %v5945_v58  ;;  %v6897_v49 = vmul.f32 0.17, %v6699_v18  ;;  %v5950_v50 = vpop.f32.mrb[132].mxu0 }
 0x964   : > { %v7333_v33 = vmax.f32 %v7109_v6, 0.0  ;;  %v6892_v51 = vmul.f32 0.17, %v5947_v47  ;;  %v6703_v36 = vpop.f32.mrb[196].mxu1  ;;  %7556 = vst [vmem:[%s13191_s19 + $0x380] sm:$0xff] %v7332_v20  ;;  %v5951_v24 = vadd.f32 %v5950_v50, %v13168_v4  ;;  %v5952_v11 = vpop.f32.mrb[133].mxu0 }
 0x965   : > { %7562 = vst [vmem:[%s13191_s19 + $0x3b0] sm:$0xff] %v7338_v54  ;;  %v7115_v43 = vadd.f32 %v9709_v61, %v6891_v44  ;;  %v7121_v2 = vadd.f32 %v9710_v40, %v6897_v49  ;;  %v6704_v63 = vadd.f32 %v6703_v36, %v13170_v5  ;;  %v6705_v60 = vpop.f32.mrb[197].mxu1  ;;  %v5953_v32 = vadd.f32 %v5952_v11, %v13174_v35  ;;  %v9712_v58 = vld [vmem:[%s10758_s18 + $0x3f0] sm:$0xff]  ;;  %v9714_v20 = vld [vmem:[%s10758_s18 + $0x3f8] sm:$0xff]  ;;  %v9715_v40 = vld [vmem:[%s10758_s18 + $0x428] sm:$0xff] }
 0x966   : > { %6397 = vmatmul.mubr.f32.gmra.mrb[238].mxu0 %v12790_v41  ;;  %7557 = vst [vmem:[%s13191_s19 + $0x388] sm:$0xff] %v7333_v33  ;;  %v7116_v37 = vadd.f32 %v9711_v17, %v6892_v51  ;;  %v6898_v12 = vmul.f32 0.17, %v5951_v24  ;;  %v9716_v24 = vld [vmem:[%s10758_s18 + $0x458] sm:$0xff] }
 0x967   : > { %6402 = vmatprep.mubr.f32.mxu0 %v12801_v10  ;;  %v7339_v34 = vmax.f32 %v7115_v43, 0.0  ;;  %v7345_v1 = vmax.f32 %v7121_v2, 0.0  ;;  %v6904_v52 = vmul.f32 0.17, %v6704_v63  ;;  %v6899_v38 = vmul.f32 0.17, %v5953_v32 }
 0x968   : > { %v7340_v53 = vmax.f32 %v7116_v37, 0.0  ;;  %v5956_v41 = vpop.f32.mrb[134].mxu0  ;;  %v6708_v62 = vpop.f32.mrb[198].mxu1  ;;  %v7122_v18 = vadd.f32 %v9712_v58, %v6898_v12  ;;  %v9717_v37 = vld [vmem:[%s10758_s18 + $0x430] sm:$0xff]  ;;  %v9718_v58 = vld [vmem:[%s10758_s18 + $0x460] sm:$0xff] }
 0x969   : > { %7563 = vst [vmem:[%s13191_s19 + $0x3b8] sm:$0xff] %v7339_v34  ;;  %7569 = vst [vmem:[%s13191_s19 + $0x3e8] sm:$0xff] %v7345_v1  ;;  %v7128_v9 = vadd.f32 %v9713_v30, %v6904_v52  ;;  %v5957_v3 = vadd.f32 %v5956_v41, %v13168_v4  ;;  %v6709_v10 = vadd.f32 %v6708_v62, %v13170_v5  ;;  %v5958_v6 = vpop.f32.mrb[135].mxu0  ;;  %v6710_v47 = vpop.f32.mrb[199].mxu1  ;;  %v9719_v30 = vld [vmem:[%s10758_s18 + $0x490] sm:$0xff] }
 0x96a   : > { %6403 = vmatmul.mubr.f32.gmra.mrb[240].mxu0 %v12804_v21  ;;  %7564 = vst [vmem:[%s13191_s19 + $0x3c0] sm:$0xff] %v7340_v53  ;;  %v7123_v54 = vadd.f32 %v9714_v20, %v6899_v38  ;;  %v5959_v44 = vadd.f32 %v5958_v6, %v13174_v35  ;;  %v7346_v49 = vmax.f32 %v7122_v18, 0.0  ;;  %v9720_v47 = vld [vmem:[%s10758_s18 + $0x468] sm:$0xff] }
 0x96b   : > { %6408 = vmatprep.mubr.f32.mxu0 %v12815_v29  ;;  %v7352_v33 = vmax.f32 %v7128_v9, 0.0  ;;  %v6905_v51 = vmul.f32 0.17, %v5957_v3  ;;  %v6911_v50 = vmul.f32 0.17, %v6709_v10  ;;  %v5962_v21 = vpop.f32.mrb[136].mxu0 }
 0x96c   : > { %v7347_v36 = vmax.f32 %v7123_v54, 0.0  ;;  %v6906_v61 = vmul.f32 0.17, %v5959_v44  ;;  %v6713_v43 = vpop.f32.mrb[200].mxu1  ;;  %7570 = vst [vmem:[%s13191_s19 + $0x3f0] sm:$0xff] %v7346_v49  ;;  %v5963_v11 = vadd.f32 %v5962_v21, %v13168_v4  ;;  %v5964_v60 = vpop.f32.mrb[137].mxu0 }
 0x96d   : > { %7576 = vst [vmem:[%s13191_s19 + $0x420] sm:$0xff] %v7352_v33  ;;  %v7129_v2 = vadd.f32 %v9715_v40, %v6905_v51  ;;  %v7135_v63 = vadd.f32 %v9716_v24, %v6911_v50  ;;  %v6714_v29 = vadd.f32 %v6713_v43, %v13170_v5  ;;  %v6715_v17 = vpop.f32.mrb[201].mxu1  ;;  %v5965_v34 = vadd.f32 %v5964_v60, %v13174_v35  ;;  %v9721_v21 = vld [vmem:[%s10758_s18 + $0x498] sm:$0xff]  ;;  %v9722_v40 = vld [vmem:[%s10758_s18 + $0x4c8] sm:$0xff] }
 0x96e   : > { %6409 = vmatmul.mubr.f32.gmra.mrb[242].mxu0 %v12818_v31  ;;  %7571 = vst [vmem:[%s13191_s19 + $0x3f8] sm:$0xff] %v7347_v36  ;;  %v7130_v32 = vadd.f32 %v9717_v37, %v6906_v61  ;;  %v6912_v52 = vmul.f32 0.17, %v5963_v11  ;;  %v14408_v37 = vld [vmem:[#allocation41_spill] sm:$0xff] }
 0x96f   : > { %6414 = vmatprep.mubr.f32.mxu0 %v12829_v16  ;;  %v7353_v1 = vmax.f32 %v7129_v2, 0.0  ;;  %v7359_v12 = vmax.f32 %v7135_v63, 0.0  ;;  %v6918_v53 = vmul.f32 0.17, %v6714_v29  ;;  %v6913_v41 = vmul.f32 0.17, %v5965_v34 }
 0x970   : > { %v7354_v38 = vmax.f32 %v7130_v32, 0.0  ;;  %v5968_v31 = vpop.f32.mrb[138].mxu0  ;;  %v6718_v62 = vpop.f32.mrb[202].mxu1  ;;  %v7136_v18 = vadd.f32 %v9718_v58, %v6912_v52  ;;  %v9723_v29 = vld [vmem:[%s10758_s18 + $0x4a0] sm:$0xff] }
 0x971   : > { %7577 = vst [vmem:[%s13191_s19 + $0x428] sm:$0xff] %v7353_v1  ;;  %7583 = vst [vmem:[%s13191_s19 + $0x458] sm:$0xff] %v7359_v12  ;;  %v7142_v9 = vadd.f32 %v9719_v30, %v6918_v53  ;;  %v5969_v3 = vadd.f32 %v5968_v31, %v13168_v4  ;;  %v6719_v16 = vadd.f32 %v6718_v62, %v13170_v5  ;;  %v5970_v10 = vpop.f32.mrb[139].mxu0  ;;  %v6720_v6 = vpop.f32.mrb[203].mxu1  ;;  %v9725_v62 = vld [vmem:[%s10758_s18 + $0x500] sm:$0xff] }
 0x972   : > { %6415 = vmatmul.mubr.f32.gmra.mrb[244].mxu0 %v12832_v23  ;;  %7578 = vst [vmem:[%s13191_s19 + $0x430] sm:$0xff] %v7354_v38  ;;  %v7137_v20 = vadd.f32 %v9720_v47, %v6913_v41  ;;  %v5971_v54 = vadd.f32 %v5970_v10, %v13174_v35  ;;  %v7360_v44 = vmax.f32 %v7136_v18, 0.0  ;;  %v9724_v41 = vld [vmem:[%s10758_s18 + $0x4d0] sm:$0xff] }
 0x973   : > { %6420 = vmatprep.mubr.f32.mxu0 %v12843_v42  ;;  %v7366_v49 = vmax.f32 %v7142_v9, 0.0  ;;  %v6919_v33 = vmul.f32 0.17, %v5969_v3  ;;  %v6925_v51 = vmul.f32 0.17, %v6719_v16  ;;  %v5974_v23 = vpop.f32.mrb[140].mxu0 }
 0x974   : > { %v7361_v50 = vmax.f32 %v7137_v20, 0.0  ;;  %v6920_v36 = vmul.f32 0.17, %v5971_v54  ;;  %v6723_v61 = vpop.f32.mrb[204].mxu1  ;;  %7584 = vst [vmem:[%s13191_s19 + $0x460] sm:$0xff] %v7360_v44  ;;  %v5975_v24 = vadd.f32 %v5974_v23, %v13168_v4  ;;  %v5976_v63 = vpop.f32.mrb[141].mxu0 }
 0x975   : > { %7590 = vst [vmem:[%s13191_s19 + $0x490] sm:$0xff] %v7366_v49  ;;  %v7143_v43 = vadd.f32 %v9721_v21, %v6919_v33  ;;  %v7149_v2 = vadd.f32 %v9722_v40, %v6925_v51  ;;  %v6724_v42 = vadd.f32 %v6723_v61, %v13170_v5  ;;  %v6725_v11 = vpop.f32.mrb[205].mxu1  ;;  %v5977_v17 = vadd.f32 %v5976_v63, %v13174_v35  ;;  %v9726_v16 = vld [vmem:[%s10758_s18 + $0x4d8] sm:$0xff] }
 0x976   : > { %6421 = vmatmul.mubr.f32.gmra.mrb[246].mxu0 %v12846_v28  ;;  %7585 = vst [vmem:[%s13191_s19 + $0x468] sm:$0xff] %v7361_v50  ;;  %v7144_v60 = vadd.f32 %v9723_v29, %v6920_v36  ;;  %v6926_v1 = vmul.f32 0.17, %v5975_v24  ;;  %v9727_v50 = vld [vmem:[%s10758_s18 + $0x508] sm:$0xff]  ;;  %v9728_v23 = vld [vmem:[%s10758_s18 + $0x538] sm:$0xff] }
 0x977   : > { %6426 = vmatprep.mubr.f32.mxu0 %v14408_v37  ;;  %v7367_v32 = vmax.f32 %v7143_v43, 0.0  ;;  %v7373_v34 = vmax.f32 %v7149_v2, 0.0  ;;  %v6932_v12 = vmul.f32 0.17, %v6724_v42  ;;  %v6927_v53 = vmul.f32 0.17, %v5977_v17 }
 0x978   : > { %v7368_v52 = vmax.f32 %v7144_v60, 0.0  ;;  %v5980_v28 = vpop.f32.mrb[142].mxu0  ;;  %v6728_v38 = vpop.f32.mrb[206].mxu1  ;;  %v7150_v31 = vadd.f32 %v9724_v41, %v6926_v1  ;;  %v9729_v2 = vld [vmem:[%s10758_s18 + $0x510] sm:$0xff]  ;;  %v9732_v41 = vld [vmem:[%s10758_s18 + $0x548] sm:$0xff] }
 0x979   : > { %7591 = vst [vmem:[%s13191_s19 + $0x498] sm:$0xff] %v7367_v32  ;;  %7597 = vst [vmem:[%s13191_s19 + $0x4c8] sm:$0xff] %v7373_v34  ;;  %v7156_v58 = vadd.f32 %v9725_v62, %v6932_v12  ;;  %v5981_v18 = vadd.f32 %v5980_v28, %v13168_v4  ;;  %v6729_v30 = vadd.f32 %v6728_v38, %v13170_v5  ;;  %v5982_v9 = vpop.f32.mrb[143].mxu0  ;;  %v6730_v3 = vpop.f32.mrb[207].mxu1  ;;  %v9730_v34 = vld [vmem:[%s10758_s18 + $0x540] sm:$0xff]  ;;  %v9731_v12 = vld [vmem:[%s10758_s18 + $0x570] sm:$0xff] }
 0x97a   : > { %6427 = vmatmul.mubr.f32.gmra.mrb[248].mxu0 %v12860_v56  ;;  %7592 = vst [vmem:[%s13191_s19 + $0x4a0] sm:$0xff] %v7368_v52  ;;  %v7151_v10 = vadd.f32 %v9726_v16, %v6927_v53  ;;  %v5983_v6 = vadd.f32 %v5982_v9, %v13174_v35  ;;  %v7374_v47 = vmax.f32 %v7150_v31, 0.0 }
 0x97b   : > { %6432 = vmatprep.mubr.f32.mxu0 %v14387_v0  ;;  %v7380_v20 = vmax.f32 %v7156_v58, 0.0  ;;  %v6933_v54 = vmul.f32 0.17, %v5981_v18  ;;  %v6939_v44 = vmul.f32 0.17, %v6729_v30  ;;  %v5986_v56 = vpop.f32.mrb[144].mxu0 }
 0x97c   : > { %v7375_v49 = vmax.f32 %v7151_v10, 0.0  ;;  %v6934_v33 = vmul.f32 0.17, %v5983_v6  ;;  %v6733_v51 = vpop.f32.mrb[208].mxu1  ;;  %7598 = vst [vmem:[%s13191_s19 + $0x4d0] sm:$0xff] %v7374_v47  ;;  %v5987_v21 = vadd.f32 %v5986_v56, %v13168_v4  ;;  %v5988_v43 = vpop.f32.mrb[145].mxu0 }
 0x97d   : > { %7604 = vst [vmem:[%s13191_s19 + $0x500] sm:$0xff] %v7380_v20  ;;  %v7157_v36 = vadd.f32 %v9727_v50, %v6933_v54  ;;  %v7163_v61 = vadd.f32 %v9728_v23, %v6939_v44  ;;  %v6734_v0 = vadd.f32 %v6733_v51, %v13170_v5  ;;  %v6735_v40 = vpop.f32.mrb[209].mxu1  ;;  %v5989_v42 = vadd.f32 %v5988_v43, %v13174_v35  ;;  %v9733_v6 = vld [vmem:[%s10758_s18 + $0x578] sm:$0xff]  ;;  %v9734_v20 = vld [vmem:[%s10758_s18 + $0x5a8] sm:$0xff]  ;;  %v9735_v56 = vld [vmem:[%s10758_s18 + $0x580] sm:$0xff] }
 0x97e   : > { %6433 = vmatmul.mubr.f32.gmra.mrb[250].mxu0 %v14388_v22  ;;  %7599 = vst [vmem:[%s13191_s19 + $0x4d8] sm:$0xff] %v7375_v49  ;;  %v7158_v24 = vadd.f32 %v9729_v2, %v6934_v33  ;;  %v6940_v29 = vmul.f32 0.17, %v5987_v21  ;;  %v9736_v2 = vld [vmem:[%s10758_s18 + $0x5b0] sm:$0xff] }
 0x97f   : > { %6438 = vmatprep.mubr.f32.mxu0 %v12885_v25  ;;  %v7381_v63 = vmax.f32 %v7157_v36, 0.0  ;;  %v7387_v11 = vmax.f32 %v7163_v61, 0.0  ;;  %v6946_v60 = vmul.f32 0.17, %v6734_v0  ;;  %v6941_v37 = vmul.f32 0.17, %v5989_v42 }
 0x980   : > { %v7382_v17 = vmax.f32 %v7158_v24, 0.0  ;;  %v5992_v22 = vpop.f32.mrb[146].mxu0  ;;  %v6738_v32 = vpop.f32.mrb[210].mxu1  ;;  %v7164_v1 = vadd.f32 %v9730_v34, %v6940_v29  ;;  %v9737_v42 = vld [vmem:[%s10758_s18 + $0x5e0] sm:$0xff] }
 0x981   : > { %7605 = vst [vmem:[%s13191_s19 + $0x508] sm:$0xff] %v7381_v63  ;;  %7611 = vst [vmem:[%s13191_s19 + $0x538] sm:$0xff] %v7387_v11  ;;  %v7170_v52 = vadd.f32 %v9731_v12, %v6946_v60  ;;  %v5993_v53 = vadd.f32 %v5992_v22, %v13168_v4  ;;  %v6739_v25 = vadd.f32 %v6738_v32, %v13170_v5  ;;  %v5994_v28 = vpop.f32.mrb[147].mxu0  ;;  %v6740_v38 = vpop.f32.mrb[211].mxu1 }
 0x982   : > { %6439 = vmatmul.mubr.f32.gmra.mrb[252].mxu0 %v12888_v13  ;;  %7606 = vst [vmem:[%s13191_s19 + $0x510] sm:$0xff] %v7382_v17  ;;  %v7165_v31 = vadd.f32 %v9732_v41, %v6941_v37  ;;  %v5995_v62 = vadd.f32 %v5994_v28, %v13174_v35  ;;  %v7388_v58 = vmax.f32 %v7164_v1, 0.0  ;;  %v9738_v17 = vld [vmem:[%s10758_s18 + $0x5b8] sm:$0xff]  ;;  %v9739_v28 = vld [vmem:[%s10758_s18 + $0x5e8] sm:$0xff] }
 0x983   : > { %6444 = vmatprep.mubr.f32.mxu0 %v12899_v7  ;;  %v7394_v18 = vmax.f32 %v7170_v52, 0.0  ;;  %v6947_v30 = vmul.f32 0.17, %v5993_v53  ;;  %v6953_v9 = vmul.f32 0.17, %v6739_v25  ;;  %v5998_v13 = vpop.f32.mrb[148].mxu0 }
 0x984   : > { %v7389_v3 = vmax.f32 %v7165_v31, 0.0  ;;  %v6948_v16 = vmul.f32 0.17, %v5995_v62  ;;  %v6743_v10 = vpop.f32.mrb[212].mxu1  ;;  %7612 = vst [vmem:[%s13191_s19 + $0x540] sm:$0xff] %v7388_v58  ;;  %v5999_v44 = vadd.f32 %v5998_v13, %v13168_v4  ;;  %v6000_v49 = vpop.f32.mrb[149].mxu0 }
 0x985   : > { %7618 = vst [vmem:[%s13191_s19 + $0x570] sm:$0xff] %v7394_v18  ;;  %v7171_v47 = vadd.f32 %v9733_v6, %v6947_v30  ;;  %v7177_v54 = vadd.f32 %v9734_v20, %v6953_v9  ;;  %v6744_v7 = vadd.f32 %v6743_v10, %v13170_v5  ;;  %v6745_v33 = vpop.f32.mrb[213].mxu1  ;;  %v6001_v50 = vadd.f32 %v6000_v49, %v13174_v35  ;;  %v9740_v41 = vld [vmem:[%s10758_s18 + $0x618] sm:$0xff]  ;;  %v14409_v18 = vld [vmem:[#allocation67_spill] sm:$0xff]  ;;  %v9741_v9 = vld [vmem:[%s10758_s18 + $0x5f0] sm:$0xff] }
 0x986   : > { %6445 = vmatmul.mubr.f32.gmra.mrb[254].mxu0 %v12902_v48  ;;  %7613 = vst [vmem:[%s13191_s19 + $0x548] sm:$0xff] %v7389_v3  ;;  %v7172_v51 = vadd.f32 %v9735_v56, %v6948_v16  ;;  %v6954_v61 = vmul.f32 0.17, %v5999_v44  ;;  %v14410_v13 = vld [vmem:[#allocation68_spill] sm:$0xff]  ;;  %v9742_v33 = vld [vmem:[%s10758_s18 + $0x620] sm:$0xff] }
 0x987   : > { %6450 = vmatprep.mubr.f32.mxu0 %v12913_v8  ;;  %v7395_v36 = vmax.f32 %v7171_v47, 0.0  ;;  %v7401_v23 = vmax.f32 %v7177_v54, 0.0  ;;  %v6960_v21 = vmul.f32 0.17, %v6744_v7  ;;  %v6955_v43 = vmul.f32 0.17, %v6001_v50 }
 0x988   : > { %v7396_v0 = vmax.f32 %v7172_v51, 0.0  ;;  %v6004_v48 = vpop.f32.mrb[150].mxu0  ;;  %v6748_v40 = vpop.f32.mrb[214].mxu1  ;;  %v7178_v24 = vadd.f32 %v9736_v2, %v6954_v61  ;;  %v9743_v51 = vld [vmem:[%s10758_s18 + $0x650] sm:$0xff] }
 0x989   : > { %7619 = vst [vmem:[%s13191_s19 + $0x578] sm:$0xff] %v7395_v36  ;;  %7625 = vst [vmem:[%s13191_s19 + $0x5a8] sm:$0xff] %v7401_v23  ;;  %v7184_v63 = vadd.f32 %v9737_v42, %v6960_v21  ;;  %v6005_v11 = vadd.f32 %v6004_v48, %v13168_v4  ;;  %v6749_v8 = vadd.f32 %v6748_v40, %v13170_v5  ;;  %v6006_v29 = vpop.f32.mrb[151].mxu0  ;;  %v6750_v60 = vpop.f32.mrb[215].mxu1  ;;  %v14411_v21 = vld [vmem:[#allocation71_spill] sm:$0xff]  ;;  %v14412_v2 = vld [vmem:[#allocation76_spill] sm:$0xff] }
 0x98a   : > { %6451 = vmatmul.mubr.f32.gmra.mrb[0].mxu0 %v12916_v19  ;;  %7620 = vst [vmem:[%s13191_s19 + $0x580] sm:$0xff] %v7396_v0  ;;  %v7179_v37 = vadd.f32 %v9738_v17, %v6955_v43  ;;  %v6007_v22 = vadd.f32 %v6006_v29, %v13174_v35  ;;  %v7402_v32 = vmax.f32 %v7178_v24, 0.0  ;;  %v9744_v43 = vld [vmem:[%s10758_s18 + $0x628] sm:$0xff] }
 0x98b   : > { %6456 = vmatprep.mubr.f32.mxu0 %v12927_v45  ;;  %v7408_v34 = vmax.f32 %v7184_v63, 0.0  ;;  %v6961_v1 = vmul.f32 0.17, %v6005_v11  ;;  %v6967_v12 = vmul.f32 0.17, %v6749_v8  ;;  %v6010_v19 = vpop.f32.mrb[152].mxu0 }
 0x98c   : > { %v7403_v52 = vmax.f32 %v7179_v37, 0.0  ;;  %v6962_v53 = vmul.f32 0.17, %v6007_v22  ;;  %v6753_v25 = vpop.f32.mrb[216].mxu1  ;;  %7626 = vst [vmem:[%s13191_s19 + $0x5b0] sm:$0xff] %v7402_v32  ;;  %v6011_v62 = vadd.f32 %v6010_v19, %v13168_v4  ;;  %v6012_v58 = vpop.f32.mrb[153].mxu0 }
 0x98d   : > { %7632 = vst [vmem:[%s13191_s19 + $0x5e0] sm:$0xff] %v7408_v34  ;;  %v7185_v38 = vadd.f32 %v9739_v28, %v6961_v1  ;;  %v7191_v31 = vadd.f32 %v9740_v41, %v6967_v12  ;;  %v6754_v45 = vadd.f32 %v6753_v25, %v13170_v5  ;;  %v6755_v30 = vpop.f32.mrb[217].mxu1  ;;  %v6013_v16 = vadd.f32 %v6012_v58, %v13174_v35  ;;  %v14413_v8 = vld [vmem:[#allocation33_spill] sm:$0xff]  ;;  %v9746_v1 = vld [vmem:[%s10758_s18 + $0x688] sm:$0xff]  ;;  %v9747_v41 = vld [vmem:[%s10758_s18 + $0x660] sm:$0xff] }
 0x98e   : > { %6457 = vmatmul.mubr.f32.gmra.mrb[2].mxu0 %v14409_v18  ;;  %7627 = vst [vmem:[%s13191_s19 + $0x5b8] sm:$0xff] %v7403_v52  ;;  %v7186_v3 = vadd.f32 %v9741_v9, %v6962_v53  ;;  %v6968_v47 = vmul.f32 0.17, %v6011_v62  ;;  %v5751_v29 = vsub.s32 2, %v14413_v8  ;;  %v9745_v32 = vld [vmem:[%s10758_s18 + $0x658] sm:$0xff] }
 0x98f   : > { %6462 = vmatprep.mubr.f32.mxu0 %v14410_v13  ;;  %v7409_v10 = vmax.f32 %v7185_v38, 0.0  ;;  %v7415_v6 = vmax.f32 %v7191_v31, 0.0  ;;  %v6974_v20 = vmul.f32 0.17, %v6754_v45  ;;  %v6969_v44 = vmul.f32 0.17, %v6013_v16 }
 0x990   : > { %v7410_v54 = vmax.f32 %v7186_v3, 0.0  ;;  %v6016_v7 = vpop.f32.mrb[154].mxu0  ;;  %v6758_v49 = vpop.f32.mrb[218].mxu1  ;;  %v7192_v56 = vadd.f32 %v9742_v33, %v6968_v47  ;;  %v14414_v25 = vld [vmem:[#allocation77_spill] sm:$0xff]  ;;  %v5755_v38 = vsub.s32 3, %v14413_v8  ;;  %v14415_v45 = vld [vmem:[#allocation79_spill] sm:$0xff] }
 0x991   : > { %7633 = vst [vmem:[%s13191_s19 + $0x5e8] sm:$0xff] %v7409_v10  ;;  %7639 = vst [vmem:[%s13191_s19 + $0x618] sm:$0xff] %v7415_v6  ;;  %v7198_v50 = vadd.f32 %v9743_v51, %v6974_v20  ;;  %v6017_v36 = vadd.f32 %v6016_v7, %v13168_v4  ;;  %v6759_v23 = vadd.f32 %v6758_v49, %v13170_v5  ;;  %v6018_v61 = vpop.f32.mrb[155].mxu0  ;;  %v6760_v0 = vpop.f32.mrb[219].mxu1  ;;  %v13514_v6 = vld [vmem:[#allocation20] sm:$0xff] }
 0x992   : > { %6463 = vmatmul.mubr.f32.gmra.mrb[4].mxu0 %v14411_v21  ;;  %7634 = vst [vmem:[%s13191_s19 + $0x5f0] sm:$0xff] %v7410_v54  ;;  %v7193_v48 = vadd.f32 %v9744_v43, %v6969_v44  ;;  %v6019_v40 = vadd.f32 %v6018_v61, %v13174_v35  ;;  %v7416_v24 = vmax.f32 %v7192_v56, 0.0  ;;  %v13517_v47 = vrot.slane %v13514_v6, %v5751_v29  ;;  %v9749_v20 = vld [vmem:[%s10758_s18 + $0x690] sm:$0xff]  ;;  %v9750_v44 = vld [vmem:[%s10758_s18 + $0x6c0] sm:$0xff] }
 0x993   : > { %6468 = vmatprep.mubr.f32.mxu0 %v14412_v2  ;;  %v7422_v42 = vmax.f32 %v7198_v50, 0.0  ;;  %v6975_v63 = vmul.f32 0.17, %v6017_v36  ;;  %v6981_v11 = vmul.f32 0.17, %v6759_v23  ;;  %v6022_v37 = vpop.f32.mrb[156].mxu0  ;;  %v13531_v0 = vrot.slane %v13514_v6, %v5755_v38 }
 0x994   : > { %v7417_v60 = vmax.f32 %v7193_v48, 0.0  ;;  %v6976_v17 = vmul.f32 0.17, %v6019_v40  ;;  %v6763_v22 = vpop.f32.mrb[220].mxu1  ;;  %7640 = vst [vmem:[%s13191_s19 + $0x620] sm:$0xff] %v7416_v24  ;;  %v6023_v52 = vadd.f32 %v6022_v37, %v13168_v4  ;;  %v6024_v19 = vpop.f32.mrb[157].mxu0 }
 0x995   : > { %7646 = vst [vmem:[%s13191_s19 + $0x650] sm:$0xff] %v7422_v42  ;;  %v7199_v34 = vadd.f32 %v9745_v32, %v6975_v63  ;;  %v7205_v12 = vadd.f32 %v9746_v1, %v6981_v11  ;;  %v6764_v53 = vadd.f32 %v6763_v22, %v13170_v5  ;;  %v6765_v28 = vpop.f32.mrb[221].mxu1  ;;  %v6025_v62 = vadd.f32 %v6024_v19, %v13174_v35  ;;  %v14416_v51 = vld [vmem:[#allocation80_spill] sm:$0xff]  ;;  %v9751_v36 = vld [vmem:[%s10758_s18 + $0x698] sm:$0xff] }
 0x996   : > { %6469 = vmatmul.mubr.f32.gmra.mrb[6].mxu0 %v14414_v25  ;;  %7641 = vst [vmem:[%s13191_s19 + $0x628] sm:$0xff] %v7417_v60  ;;  %v7200_v31 = vadd.f32 %v9747_v41, %v6976_v17  ;;  %v6982_v30 = vmul.f32 0.17, %v6023_v52  ;;  %v14417_v21 = vld [vmem:[#allocation82_spill] sm:$0xff]  ;;  %v9752_v42 = vld [vmem:[%s10758_s18 + $0x6c8] sm:$0xff]  ;;  %v9754_v37 = vld [vmem:[%s10758_s18 + $0x6d0] sm:$0xff] }
 0x997   : > { %6474 = vmatprep.mubr.f32.mxu0 %v14415_v45  ;;  %v7423_v58 = vmax.f32 %v7199_v34, 0.0  ;;  %v7429_v18 = vmax.f32 %v7205_v12, 0.0  ;;  %v6988_v9 = vmul.f32 0.17, %v6764_v53  ;;  %v6983_v16 = vmul.f32 0.17, %v6025_v62 }
 0x998   : > { %v7424_v3 = vmax.f32 %v7200_v31, 0.0  ;;  %v6028_v13 = vpop.f32.mrb[158].mxu0  ;;  %v6768_v10 = vpop.f32.mrb[222].mxu1  ;;  %v7206_v54 = vadd.f32 %v9749_v20, %v6982_v30  ;;  %v9753_v11 = vld [vmem:[%s10758_s18 + $0x6f8] sm:$0xff]  ;;  %v14418_v17 = vld [vmem:[#allocation83_spill] sm:$0xff]  ;;  %v9755_v28 = vld [vmem:[%s10758_s18 + $0x10] sm:$0xff] }
 0x999   : > { %7647 = vst [vmem:[%s13191_s19 + $0x658] sm:$0xff] %v7423_v58  ;;  %7653 = vst [vmem:[%s13191_s19 + $0x688] sm:$0xff] %v7429_v18  ;;  %v7212_v7 = vadd.f32 %v9750_v44, %v6988_v9  ;;  %v6029_v49 = vadd.f32 %v6028_v13, %v13168_v4  ;;  %v6769_v33 = vadd.f32 %v6768_v10, %v13170_v5  ;;  %v6030_v56 = vpop.f32.mrb[159].mxu0  ;;  %v6770_v50 = vpop.f32.mrb[223].mxu1  ;;  %v14419_v34 = vld [vmem:[#allocation86_spill] sm:$0xff]  ;;  %v14420_v62 = vld [vmem:[#allocation87_spill] sm:$0xff] }
 0x99a   : > { %6475 = vmatmul.mubr.f32.gmra.mrb[8].mxu0 %v14416_v51  ;;  %7648 = vst [vmem:[%s13191_s19 + $0x660] sm:$0xff] %v7424_v3  ;;  %v7207_v23 = vadd.f32 %v9751_v36, %v6983_v16  ;;  %v6031_v61 = vadd.f32 %v6030_v56, %v13174_v35  ;;  %v7430_v4 = vmax.f32 %v7206_v54, 0.0  ;;  %v9756_v45 = vld [vmem:[%s10758_s18 + $0x18] sm:$0xff]  ;;  %v14421_v30 = vld [vmem:[#allocation88_spill] sm:$0xff] }
 0x99b   : > { %6480 = vmatprep.mubr.f32.mxu0 %v14417_v21  ;;  %v7436_v5 = vmax.f32 %v7212_v7, 0.0  ;;  %v6989_v43 = vmul.f32 0.17, %v6029_v49  ;;  %v6995_v48 = vmul.f32 0.17, %v6769_v33  ;;  %v6099_v24 = vpop.f32.mrb[160].mxu0 }
 0x99c   : > { %v7431_v40 = vmax.f32 %v7207_v23, 0.0  ;;  %v6990_v2 = vmul.f32 0.17, %v6031_v61  ;;  %7654 = vst [vmem:[%s13191_s19 + $0x690] sm:$0xff] %v7430_v4  ;;  %v6100_v29 = vadd.f32 %v6099_v24, %v13517_v47  ;;  %v6101_v60 = vpop.f32.mrb[161].mxu0  ;;  %v9757_v20 = vld [vmem:[%s10758_s18 + $0x48] sm:$0xff] }
 0x99d   : > { %7660 = vst [vmem:[%s13191_s19 + $0x6c0] sm:$0xff] %v7436_v5  ;;  %v7213_v63 = vadd.f32 %v9752_v42, %v6989_v43  ;;  %v7219_v35 = vadd.f32 %v9753_v11, %v6995_v48  ;;  %v6102_v32 = vadd.f32 %v6101_v60, %v13531_v0  ;;  %v14422_v49 = vld [vmem:[#allocation35_spill] sm:$0xff]  ;;  %v9758_v33 = vld [vmem:[%s10758_s18 + $0x50] sm:$0xff]  ;;  %v9761_v60 = vld [vmem:[%s10758_s18 + $0xb8] sm:$0xff] }
 0x99e   : > { %6481 = vmatmul.mubr.f32.gmra.mrb[10].mxu0 %v14418_v17  ;;  %7655 = vst [vmem:[%s13191_s19 + $0x698] sm:$0xff] %v7431_v40  ;;  %v7214_v22 = vadd.f32 %v9754_v37, %v6990_v2  ;;  %v6774_v52 = vmul.f32 0.17, %v6100_v29  ;;  %v9759_v4 = vld [vmem:[%s10758_s18 + $0x80] sm:$0xff]  ;;  %v14423_v40 = vld [vmem:[#allocation37_spill] sm:$0xff]  ;;  %v9760_v2 = vld [vmem:[%s10758_s18 + $0x88] sm:$0xff] }
 0x99f   : > { %6486 = vmatprep.mubr.f32.mxu0 %v14419_v34  ;;  %v7437_v1 = vmax.f32 %v7213_v63, 0.0  ;;  %v7443_v12 = vmax.f32 %v7219_v35, 0.0  ;;  %v6775_v19 = vmul.f32 0.17, %v6102_v32  ;;  %v6105_v25 = vpop.f32.mrb[162].mxu0  ;;  %v14424_v32 = vld [vmem:[#allocation42_spill] sm:$0xff] }
 0x9a0   : > { %v7438_v53 = vmax.f32 %v7214_v22, 0.0  ;;  %v6998_v38 = vadd.f32 %v9755_v28, %v6774_v52  ;;  %v6106_v41 = vadd.f32 %v6105_v25, %v13517_v47  ;;  %v6107_v31 = vpop.f32.mrb[163].mxu0  ;;  %v9762_v34 = vld [vmem:[%s10758_s18 + $0xc0] sm:$0xff]  ;;  %v9763_v28 = vld [vmem:[%s10758_s18 + $0xf0] sm:$0xff] }
 0x9a1   : > { %7661 = vst [vmem:[%s13191_s19 + $0x6c8] sm:$0xff] %v7437_v1  ;;  %7667 = vst [vmem:[%s13191_s19 + $0x6f8] sm:$0xff] %v7443_v12  ;;  %v6999_v58 = vadd.f32 %v9756_v45, %v6775_v19  ;;  %v6108_v18 = vadd.f32 %v6107_v31, %v13531_v0  ;;  %v9764_v45 = vld [vmem:[%s10758_s18 + $0xf8] sm:$0xff] }
 0x9a2   : > { %6487 = vmatmul.mubr.f32.gmra.mrb[12].mxu0 %v14420_v62  ;;  %7662 = vst [vmem:[%s13191_s19 + $0x6d0] sm:$0xff] %v7438_v53  ;;  %v7222_v9 = vmax.f32 %v6998_v38, 0.0  ;;  %v6781_v3 = vmul.f32 0.17, %v6106_v41  ;;  %v14425_v62 = vld [vmem:[#allocation44_spill] sm:$0xff] }
 0x9a3   : > { %6492 = vmatprep.mubr.f32.mxu0 %v14421_v30  ;;  %v7223_v16 = vmax.f32 %v6999_v58, 0.0  ;;  %v6782_v13 = vmul.f32 0.17, %v6108_v18  ;;  %v6111_v10 = vpop.f32.mrb[164].mxu0 }
 0x9a4   : > { %7446 = vst [vmem:[%s13191_s19 + $0x10] sm:$0xff] %v7222_v9  ;;  %v7005_v54 = vadd.f32 %v9757_v20, %v6781_v3  ;;  %v6112_v44 = vadd.f32 %v6111_v10, %v13517_v47  ;;  %v6113_v7 = vpop.f32.mrb[165].mxu0 }
 0x9a5   : > { %7447 = vst [vmem:[%s13191_s19 + $0x18] sm:$0xff] %v7223_v16  ;;  %v7006_v56 = vadd.f32 %v9758_v33, %v6782_v13  ;;  %v6114_v51 = vadd.f32 %v6113_v7, %v13531_v0  ;;  %v9765_v13 = vld [vmem:[%s10758_s18 + $0x128] sm:$0xff]  ;;  %v9766_v7 = vld [vmem:[%s10758_s18 + $0x130] sm:$0xff] }
 0x9a6   : > { %6493 = vmatmul.mubr.f32.gmra.mrb[14].mxu0 %v14422_v49  ;;  %v7229_v50 = vmax.f32 %v7005_v54, 0.0  ;;  %v6788_v36 = vmul.f32 0.17, %v6112_v44  ;;  %v14426_v44 = vld [vmem:[#allocation46_spill] sm:$0xff] }
 0x9a7   : > { %6498 = vmatprep.mubr.f32.mxu0 %v14398_v14  ;;  %v7230_v23 = vmax.f32 %v7006_v56, 0.0  ;;  %v6789_v61 = vmul.f32 0.17, %v6114_v51  ;;  %v6117_v21 = vpop.f32.mrb[166].mxu0 }
 0x9a8   : > { %7453 = vst [vmem:[%s13191_s19 + $0x48] sm:$0xff] %v7229_v50  ;;  %v7012_v5 = vadd.f32 %v9759_v4, %v6788_v36  ;;  %v6118_v43 = vadd.f32 %v6117_v21, %v13517_v47  ;;  %v6119_v48 = vpop.f32.mrb[167].mxu0 }
 0x9a9   : > { %7454 = vst [vmem:[%s13191_s19 + $0x50] sm:$0xff] %v7230_v23  ;;  %v7013_v14 = vadd.f32 %v9760_v2, %v6789_v61  ;;  %v6120_v24 = vadd.f32 %v6119_v48, %v13531_v0  ;;  %v9767_v23 = vld [vmem:[%s10758_s18 + $0x160] sm:$0xff] }
 0x9aa   : > { %6499 = vmatmul.mubr.f32.gmra.mrb[16].mxu0 %v14423_v40  ;;  %v7236_v42 = vmax.f32 %v7012_v5, 0.0  ;;  %v6795_v63 = vmul.f32 0.17, %v6118_v43  ;;  %v9768_v5 = vld [vmem:[%s10758_s18 + $0x168] sm:$0xff] }
 0x9ab   : > { %6504 = vmatprep.mubr.f32.mxu0 %v14399_v55  ;;  %v7237_v11 = vmax.f32 %v7013_v14, 0.0  ;;  %v6796_v35 = vmul.f32 0.17, %v6120_v24  ;;  %v6123_v29 = vpop.f32.mrb[168].mxu0 }
 0x9ac   : > { %7460 = vst [vmem:[%s13191_s19 + $0x80] sm:$0xff] %v7236_v42  ;;  %v7019_v17 = vadd.f32 %v9761_v60, %v6795_v63  ;;  %v6124_v37 = vadd.f32 %v6123_v29, %v13517_v47  ;;  %v6125_v22 = vpop.f32.mrb[169].mxu0  ;;  %v9769_v42 = vld [vmem:[%s10758_s18 + $0x198] sm:$0xff]  ;;  %v14427_v60 = vld [vmem:[#allocation48_spill] sm:$0xff] }
 0x9ad   : > { %7461 = vst [vmem:[%s13191_s19 + $0x88] sm:$0xff] %v7237_v11  ;;  %v7020_v55 = vadd.f32 %v9762_v34, %v6796_v35  ;;  %v6126_v1 = vadd.f32 %v6125_v22, %v13531_v0  ;;  %v9770_v35 = vld [vmem:[%s10758_s18 + $0x1a0] sm:$0xff] }
 0x9ae   : > { %6505 = vmatmul.mubr.f32.gmra.mrb[18].mxu0 %v14424_v32  ;;  %v7243_v12 = vmax.f32 %v7019_v17, 0.0  ;;  %v6802_v52 = vmul.f32 0.17, %v6124_v37 }
 0x9af   : > { %6510 = vmatprep.mubr.f32.mxu0 %v14400_v26  ;;  %v7244_v53 = vmax.f32 %v7020_v55, 0.0  ;;  %v6803_v19 = vmul.f32 0.17, %v6126_v1  ;;  %v6129_v25 = vpop.f32.mrb[170].mxu0  ;;  %v9771_v55 = vld [vmem:[%s10758_s18 + $0x1d0] sm:$0xff] }
 0x9b0   : > { %7467 = vst [vmem:[%s13191_s19 + $0xb8] sm:$0xff] %v7243_v12  ;;  %v7026_v38 = vadd.f32 %v9763_v28, %v6802_v52  ;;  %v6130_v41 = vadd.f32 %v6129_v25, %v13517_v47  ;;  %v6131_v31 = vpop.f32.mrb[171].mxu0  ;;  %v14428_v52 = vld [vmem:[#allocation49_spill] sm:$0xff] }
 0x9b1   : > { %7468 = vst [vmem:[%s13191_s19 + $0xc0] sm:$0xff] %v7244_v53  ;;  %v7027_v26 = vadd.f32 %v9764_v45, %v6803_v19  ;;  %v6132_v58 = vadd.f32 %v6131_v31, %v13531_v0  ;;  %v9772_v53 = vld [vmem:[%s10758_s18 + $0x1d8] sm:$0xff]  ;;  %v9773_v45 = vld [vmem:[%s10758_s18 + $0x208] sm:$0xff] }
 0x9b2   : > { %6511 = vmatmul.mubr.f32.gmra.mrb[20].mxu0 %v14425_v62  ;;  %v7250_v18 = vmax.f32 %v7026_v38, 0.0  ;;  %v6809_v30 = vmul.f32 0.17, %v6130_v41 }
 0x9b3   : > { %6516 = vmatprep.mubr.f32.mxu0 %v14401_v57  ;;  %v7251_v9 = vmax.f32 %v7027_v26, 0.0  ;;  %v6810_v3 = vmul.f32 0.17, %v6132_v58  ;;  %v6135_v16 = vpop.f32.mrb[172].mxu0 }
 0x9b4   : > { %7474 = vst [vmem:[%s13191_s19 + $0xf0] sm:$0xff] %v7250_v18  ;;  %v7033_v10 = vadd.f32 %v9765_v13, %v6809_v30  ;;  %v6136_v20 = vadd.f32 %v6135_v16, %v13517_v47  ;;  %v6137_v54 = vpop.f32.mrb[173].mxu0  ;;  %v14429_v30 = vld [vmem:[#allocation51_spill] sm:$0xff] }
 0x9b5   : > { %7475 = vst [vmem:[%s13191_s19 + $0xf8] sm:$0xff] %v7251_v9  ;;  %v7034_v57 = vadd.f32 %v9766_v7, %v6810_v3  ;;  %v6138_v49 = vadd.f32 %v6137_v54, %v13531_v0  ;;  %v9774_v9 = vld [vmem:[%s10758_s18 + $0x210] sm:$0xff] }
 0x9b6   : > { %6517 = vmatmul.mubr.f32.gmra.mrb[22].mxu0 %v14426_v44  ;;  %v7257_v33 = vmax.f32 %v7033_v10, 0.0  ;;  %v6816_v56 = vmul.f32 0.17, %v6136_v20  ;;  %v9775_v44 = vld [vmem:[%s10758_s18 + $0x240] sm:$0xff] }
 0x9b7   : > { %6522 = vmatprep.mubr.f32.mxu0 %v14402_v39  ;;  %v7258_v51 = vmax.f32 %v7034_v57, 0.0  ;;  %v6817_v50 = vmul.f32 0.17, %v6138_v49  ;;  %v6141_v36 = vpop.f32.mrb[174].mxu0 }
 0x9b8   : > { %7481 = vst [vmem:[%s13191_s19 + $0x128] sm:$0xff] %v7257_v33  ;;  %v7040_v61 = vadd.f32 %v9767_v23, %v6816_v56  ;;  %v6142_v21 = vadd.f32 %v6141_v36, %v13517_v47  ;;  %v6143_v4 = vpop.f32.mrb[175].mxu0  ;;  %v9776_v33 = vld [vmem:[%s10758_s18 + $0x248] sm:$0xff] }
 0x9b9   : > { %7482 = vst [vmem:[%s13191_s19 + $0x130] sm:$0xff] %v7258_v51  ;;  %v7041_v39 = vadd.f32 %v9768_v5, %v6817_v50  ;;  %v6144_v43 = vadd.f32 %v6143_v4, %v13531_v0  ;;  %v9777_v4 = vld [vmem:[%s10758_s18 + $0x278] sm:$0xff] }
 0x9ba   : > { %6523 = vmatmul.mubr.f32.gmra.mrb[24].mxu0 %v13084_v27  ;;  %v7264_v48 = vmax.f32 %v7040_v61, 0.0  ;;  %v6823_v40 = vmul.f32 0.17, %v6142_v21 }
 0x9bb   : > { %6528 = vmatprep.mubr.f32.mxu0 %v13095_v46  ;;  %v7265_v2 = vmax.f32 %v7041_v39, 0.0  ;;  %v6824_v14 = vmul.f32 0.17, %v6144_v43  ;;  %v6147_v24 = vpop.f32.mrb[176].mxu0 }
 0x9bc   : > { %7488 = vst [vmem:[%s13191_s19 + $0x160] sm:$0xff] %v7264_v48  ;;  %v7047_v63 = vadd.f32 %v9769_v42, %v6823_v40  ;;  %v6148_v27 = vadd.f32 %v6147_v24, %v13517_v47  ;;  %v6149_v11 = vpop.f32.mrb[177].mxu0  ;;  %v9778_v48 = vld [vmem:[%s10758_s18 + $0x280] sm:$0xff] }
 0x9bd   : > { %7489 = vst [vmem:[%s13191_s19 + $0x168] sm:$0xff] %v7265_v2  ;;  %v7048_v46 = vadd.f32 %v9770_v35, %v6824_v14  ;;  %v6150_v29 = vadd.f32 %v6149_v11, %v13531_v0  ;;  %v9779_v11 = vld [vmem:[%s10758_s18 + $0x2b0] sm:$0xff] }
 0x9be   : > { %6529 = vmatmul.mubr.f32.gmra.mrb[26].mxu0 %v13097_v59  ;;  %v7271_v17 = vmax.f32 %v7047_v63, 0.0  ;;  %v6830_v37 = vmul.f32 0.17, %v6148_v27 }
 0x9bf   : > { %6534 = vmatprep.mubr.f32.mxu0 %v14427_v60  ;;  %v7272_v22 = vmax.f32 %v7048_v46, 0.0  ;;  %v6831_v32 = vmul.f32 0.17, %v6150_v29  ;;  %v6153_v34 = vpop.f32.mrb[178].mxu0  ;;  %v9780_v60 = vld [vmem:[%s10758_s18 + $0x2b8] sm:$0xff] }
 0x9c0   : > { %7495 = vst [vmem:[%s13191_s19 + $0x198] sm:$0xff] %v7271_v17  ;;  %v7054_v1 = vadd.f32 %v9771_v55, %v6830_v37  ;;  %v6154_v59 = vadd.f32 %v6153_v34, %v13517_v47  ;;  %v6155_v12 = vpop.f32.mrb[179].mxu0 }
 0x9c1   : > { %7496 = vst [vmem:[%s13191_s19 + $0x1a0] sm:$0xff] %v7272_v22  ;;  %v7055_v19 = vadd.f32 %v9772_v53, %v6831_v32  ;;  %v6156_v25 = vadd.f32 %v6155_v12, %v13531_v0 }
 0x9c2   : > { %6535 = vmatmul.mubr.f32.gmra.mrb[28].mxu0 %v14428_v52  ;;  %v7278_v28 = vmax.f32 %v7054_v1, 0.0  ;;  %v6837_v38 = vmul.f32 0.17, %v6154_v59  ;;  %v9781_v59 = vld [vmem:[%s10758_s18 + $0x2e8] sm:$0xff] }
 0x9c3   : > { %6540 = vmatprep.mubr.f32.mxu0 %v14404_v15  ;;  %v7279_v41 = vmax.f32 %v7055_v19, 0.0  ;;  %v6838_v31 = vmul.f32 0.17, %v6156_v25  ;;  %v6159_v62 = vpop.f32.mrb[180].mxu0  ;;  %v9782_v19 = vld [vmem:[%s10758_s18 + $0x2f0] sm:$0xff] }
 0x9c4   : > { %7502 = vst [vmem:[%s13191_s19 + $0x1d0] sm:$0xff] %v7278_v28  ;;  %v7061_v26 = vadd.f32 %v9773_v45, %v6837_v38  ;;  %v6160_v58 = vadd.f32 %v6159_v62, %v13517_v47  ;;  %v6161_v18 = vpop.f32.mrb[181].mxu0 }
 0x9c5   : > { %7503 = vst [vmem:[%s13191_s19 + $0x1d8] sm:$0xff] %v7279_v41  ;;  %v7062_v15 = vadd.f32 %v9774_v9, %v6838_v31  ;;  %v6162_v3 = vadd.f32 %v6161_v18, %v13531_v0  ;;  %v9784_v9 = vld [vmem:[%s10758_s18 + $0x328] sm:$0xff] }
 0x9c6   : > { %6541 = vmatmul.mubr.f32.gmra.mrb[30].mxu0 %v14429_v30  ;;  %v7285_v16 = vmax.f32 %v7061_v26, 0.0  ;;  %v6844_v13 = vmul.f32 0.17, %v6160_v58  ;;  %v9783_v26 = vld [vmem:[%s10758_s18 + $0x320] sm:$0xff] }
 0x9c7   : > { %v7286_v10 = vmax.f32 %v7062_v15, 0.0  ;;  %v6845_v20 = vmul.f32 0.17, %v6162_v3  ;;  %v6165_v54 = vpop.f32.mrb[182].mxu0 }
 0x9c8   : > { %7509 = vst [vmem:[%s13191_s19 + $0x208] sm:$0xff] %v7285_v16  ;;  %v7068_v7 = vadd.f32 %v9775_v44, %v6844_v13  ;;  %v6166_v57 = vadd.f32 %v6165_v54, %v13517_v47  ;;  %v6167_v49 = vpop.f32.mrb[183].mxu0  ;;  %v9785_v44 = vld [vmem:[%s10758_s18 + $0x358] sm:$0xff] }
 0x9c9   : > { %7510 = vst [vmem:[%s13191_s19 + $0x210] sm:$0xff] %v7286_v10  ;;  %v7069_v56 = vadd.f32 %v9776_v33, %v6845_v20  ;;  %v6168_v51 = vadd.f32 %v6167_v49, %v13531_v0  ;;  %v9786_v33 = vld [vmem:[%s10758_s18 + $0x360] sm:$0xff] }
 0x9ca   : > { %v7292_v50 = vmax.f32 %v7068_v7, 0.0  ;;  %v6851_v36 = vmul.f32 0.17, %v6166_v57 }
 0x9cb   : > { %v7293_v23 = vmax.f32 %v7069_v56, 0.0  ;;  %v6852_v61 = vmul.f32 0.17, %v6168_v51  ;;  %v6171_v21 = vpop.f32.mrb[184].mxu0 }
 0x9cc   : > { %7516 = vst [vmem:[%s13191_s19 + $0x240] sm:$0xff] %v7292_v50  ;;  %v7075_v5 = vadd.f32 %v9777_v4, %v6851_v36  ;;  %v6172_v39 = vadd.f32 %v6171_v21, %v13517_v47  ;;  %v6173_v43 = vpop.f32.mrb[185].mxu0  ;;  %v9787_v4 = vld [vmem:[%s10758_s18 + $0x390] sm:$0xff] }
 0x9cd   : > { %7517 = vst [vmem:[%s13191_s19 + $0x248] sm:$0xff] %v7293_v23  ;;  %v7076_v40 = vadd.f32 %v9778_v48, %v6852_v61  ;;  %v6174_v2 = vadd.f32 %v6173_v43, %v13531_v0  ;;  %v9788_v48 = vld [vmem:[%s10758_s18 + $0x398] sm:$0xff] }
 0x9ce   : > { %v7299_v14 = vmax.f32 %v7075_v5, 0.0  ;;  %v6858_v24 = vmul.f32 0.17, %v6172_v39 }
 0x9cf   : > { %v7300_v42 = vmax.f32 %v7076_v40, 0.0  ;;  %v6859_v63 = vmul.f32 0.17, %v6174_v2  ;;  %v6177_v27 = vpop.f32.mrb[186].mxu0 }
 0x9d0   : > { %7523 = vst [vmem:[%s13191_s19 + $0x278] sm:$0xff] %v7299_v14  ;;  %v7082_v35 = vadd.f32 %v9779_v11, %v6858_v24  ;;  %v6178_v46 = vadd.f32 %v6177_v27, %v13517_v47  ;;  %v6179_v29 = vpop.f32.mrb[187].mxu0  ;;  %v9789_v11 = vld [vmem:[%s10758_s18 + $0x3c8] sm:$0xff] }
 0x9d1   : > { %7524 = vst [vmem:[%s13191_s19 + $0x280] sm:$0xff] %v7300_v42  ;;  %v7083_v17 = vadd.f32 %v9780_v60, %v6859_v63  ;;  %v6180_v37 = vadd.f32 %v6179_v29, %v13531_v0  ;;  %v9790_v60 = vld [vmem:[%s10758_s18 + $0x3d0] sm:$0xff] }
 0x9d2   : > { %v7306_v22 = vmax.f32 %v7082_v35, 0.0  ;;  %v6865_v32 = vmul.f32 0.17, %v6178_v46 }
 0x9d3   : > { %v7307_v34 = vmax.f32 %v7083_v17, 0.0  ;;  %v6866_v55 = vmul.f32 0.17, %v6180_v37  ;;  %v6183_v1 = vpop.f32.mrb[188].mxu0 }
 0x9d4   : > { %7530 = vst [vmem:[%s13191_s19 + $0x2b0] sm:$0xff] %v7306_v22  ;;  %v7089_v12 = vadd.f32 %v9781_v59, %v6865_v32  ;;  %v6184_v52 = vadd.f32 %v6183_v1, %v13517_v47  ;;  %v6185_v53 = vpop.f32.mrb[189].mxu0  ;;  %v9791_v59 = vld [vmem:[%s10758_s18 + $0x400] sm:$0xff] }
 0x9d5   : > { %7531 = vst [vmem:[%s13191_s19 + $0x2b8] sm:$0xff] %v7307_v34  ;;  %v7090_v25 = vadd.f32 %v9782_v19, %v6866_v55  ;;  %v6186_v28 = vadd.f32 %v6185_v53, %v13531_v0  ;;  %v9792_v19 = vld [vmem:[%s10758_s18 + $0x408] sm:$0xff] }
 0x9d6   : > { %v7313_v38 = vmax.f32 %v7089_v12, 0.0  ;;  %v6872_v41 = vmul.f32 0.17, %v6184_v52 }
 0x9d7   : > { %v7314_v31 = vmax.f32 %v7090_v25, 0.0  ;;  %v6873_v62 = vmul.f32 0.17, %v6186_v28  ;;  %v6189_v45 = vpop.f32.mrb[190].mxu0 }
 0x9d8   : > { %7537 = vst [vmem:[%s13191_s19 + $0x2e8] sm:$0xff] %v7313_v38  ;;  %v7096_v58 = vadd.f32 %v9783_v26, %v6872_v41  ;;  %v6190_v18 = vadd.f32 %v6189_v45, %v13517_v47  ;;  %v6191_v30 = vpop.f32.mrb[191].mxu0  ;;  %v9793_v26 = vld [vmem:[%s10758_s18 + $0x438] sm:$0xff] }
 0x9d9   : > { %7538 = vst [vmem:[%s13191_s19 + $0x2f0] sm:$0xff] %v7314_v31  ;;  %v7097_v15 = vadd.f32 %v9784_v9, %v6873_v62  ;;  %v6192_v3 = vadd.f32 %v6191_v30, %v13531_v0  ;;  %v9794_v9 = vld [vmem:[%s10758_s18 + $0x440] sm:$0xff] }
 0x9da   : > { %v7320_v16 = vmax.f32 %v7096_v58, 0.0  ;;  %v6879_v13 = vmul.f32 0.17, %v6190_v18 }
 0x9db   : > { %v7321_v10 = vmax.f32 %v7097_v15, 0.0  ;;  %v6880_v20 = vmul.f32 0.17, %v6192_v3  ;;  %v6195_v54 = vpop.f32.mrb[192].mxu0 }
 0x9dc   : > { %7544 = vst [vmem:[%s13191_s19 + $0x320] sm:$0xff] %v7320_v16  ;;  %v7103_v7 = vadd.f32 %v9785_v44, %v6879_v13  ;;  %v6196_v57 = vadd.f32 %v6195_v54, %v13517_v47  ;;  %v6197_v49 = vpop.f32.mrb[193].mxu0  ;;  %v9795_v44 = vld [vmem:[%s10758_s18 + $0x470] sm:$0xff] }
 0x9dd   : > { %7545 = vst [vmem:[%s13191_s19 + $0x328] sm:$0xff] %v7321_v10  ;;  %v7104_v56 = vadd.f32 %v9786_v33, %v6880_v20  ;;  %v6198_v51 = vadd.f32 %v6197_v49, %v13531_v0  ;;  %v9796_v33 = vld [vmem:[%s10758_s18 + $0x478] sm:$0xff] }
 0x9de   : > { %v7327_v50 = vmax.f32 %v7103_v7, 0.0  ;;  %v6886_v36 = vmul.f32 0.17, %v6196_v57 }
 0x9df   : > { %v7328_v23 = vmax.f32 %v7104_v56, 0.0  ;;  %v6887_v61 = vmul.f32 0.17, %v6198_v51  ;;  %v6201_v21 = vpop.f32.mrb[194].mxu0 }
 0x9e0   : > { %7551 = vst [vmem:[%s13191_s19 + $0x358] sm:$0xff] %v7327_v50  ;;  %v7110_v5 = vadd.f32 %v9787_v4, %v6886_v36  ;;  %v6202_v39 = vadd.f32 %v6201_v21, %v13517_v47  ;;  %v6203_v43 = vpop.f32.mrb[195].mxu0  ;;  %v9797_v4 = vld [vmem:[%s10758_s18 + $0x4a8] sm:$0xff] }
 0x9e1   : > { %7552 = vst [vmem:[%s13191_s19 + $0x360] sm:$0xff] %v7328_v23  ;;  %v7111_v40 = vadd.f32 %v9788_v48, %v6887_v61  ;;  %v6204_v2 = vadd.f32 %v6203_v43, %v13531_v0  ;;  %v9798_v48 = vld [vmem:[%s10758_s18 + $0x4b0] sm:$0xff] }
 0x9e2   : > { %v7334_v14 = vmax.f32 %v7110_v5, 0.0  ;;  %v6893_v24 = vmul.f32 0.17, %v6202_v39 }
 0x9e3   : > { %v7335_v42 = vmax.f32 %v7111_v40, 0.0  ;;  %v6894_v63 = vmul.f32 0.17, %v6204_v2  ;;  %v6207_v27 = vpop.f32.mrb[196].mxu0 }
 0x9e4   : > { %7558 = vst [vmem:[%s13191_s19 + $0x390] sm:$0xff] %v7334_v14  ;;  %v7117_v35 = vadd.f32 %v9789_v11, %v6893_v24  ;;  %v6208_v46 = vadd.f32 %v6207_v27, %v13517_v47  ;;  %v6209_v29 = vpop.f32.mrb[197].mxu0  ;;  %v9799_v11 = vld [vmem:[%s10758_s18 + $0x4e0] sm:$0xff] }
 0x9e5   : > { %7559 = vst [vmem:[%s13191_s19 + $0x398] sm:$0xff] %v7335_v42  ;;  %v7118_v17 = vadd.f32 %v9790_v60, %v6894_v63  ;;  %v6210_v37 = vadd.f32 %v6209_v29, %v13531_v0  ;;  %v9800_v60 = vld [vmem:[%s10758_s18 + $0x4e8] sm:$0xff] }
 0x9e6   : > { %v7341_v22 = vmax.f32 %v7117_v35, 0.0  ;;  %v6900_v32 = vmul.f32 0.17, %v6208_v46 }
 0x9e7   : > { %v7342_v34 = vmax.f32 %v7118_v17, 0.0  ;;  %v6901_v55 = vmul.f32 0.17, %v6210_v37  ;;  %v6213_v1 = vpop.f32.mrb[198].mxu0 }
 0x9e8   : > { %7565 = vst [vmem:[%s13191_s19 + $0x3c8] sm:$0xff] %v7341_v22  ;;  %v7124_v12 = vadd.f32 %v9791_v59, %v6900_v32  ;;  %v6214_v52 = vadd.f32 %v6213_v1, %v13517_v47  ;;  %v6215_v53 = vpop.f32.mrb[199].mxu0  ;;  %v9801_v59 = vld [vmem:[%s10758_s18 + $0x518] sm:$0xff] }
 0x9e9   : > { %7566 = vst [vmem:[%s13191_s19 + $0x3d0] sm:$0xff] %v7342_v34  ;;  %v7125_v25 = vadd.f32 %v9792_v19, %v6901_v55  ;;  %v6216_v28 = vadd.f32 %v6215_v53, %v13531_v0  ;;  %v9802_v19 = vld [vmem:[%s10758_s18 + $0x520] sm:$0xff] }
 0x9ea   : > { %v7348_v38 = vmax.f32 %v7124_v12, 0.0  ;;  %v6907_v41 = vmul.f32 0.17, %v6214_v52 }
 0x9eb   : > { %v7349_v31 = vmax.f32 %v7125_v25, 0.0  ;;  %v6908_v62 = vmul.f32 0.17, %v6216_v28  ;;  %v6219_v45 = vpop.f32.mrb[200].mxu0 }
 0x9ec   : > { %7572 = vst [vmem:[%s13191_s19 + $0x400] sm:$0xff] %v7348_v38  ;;  %v7131_v58 = vadd.f32 %v9793_v26, %v6907_v41  ;;  %v6220_v18 = vadd.f32 %v6219_v45, %v13517_v47  ;;  %v6221_v30 = vpop.f32.mrb[201].mxu0  ;;  %v9803_v26 = vld [vmem:[%s10758_s18 + $0x550] sm:$0xff] }
 0x9ed   : > { %7573 = vst [vmem:[%s13191_s19 + $0x408] sm:$0xff] %v7349_v31  ;;  %v7132_v15 = vadd.f32 %v9794_v9, %v6908_v62  ;;  %v6222_v3 = vadd.f32 %v6221_v30, %v13531_v0  ;;  %v9804_v9 = vld [vmem:[%s10758_s18 + $0x558] sm:$0xff] }
 0x9ee   : > { %v7355_v16 = vmax.f32 %v7131_v58, 0.0  ;;  %v6914_v13 = vmul.f32 0.17, %v6220_v18 }
 0x9ef   : > { %v7356_v10 = vmax.f32 %v7132_v15, 0.0  ;;  %v6915_v20 = vmul.f32 0.17, %v6222_v3  ;;  %v6225_v54 = vpop.f32.mrb[202].mxu0 }
 0x9f0   : > { %7579 = vst [vmem:[%s13191_s19 + $0x438] sm:$0xff] %v7355_v16  ;;  %v7138_v7 = vadd.f32 %v9795_v44, %v6914_v13  ;;  %v6226_v57 = vadd.f32 %v6225_v54, %v13517_v47  ;;  %v6227_v49 = vpop.f32.mrb[203].mxu0  ;;  %v9805_v44 = vld [vmem:[%s10758_s18 + $0x588] sm:$0xff] }
 0x9f1   : > { %7580 = vst [vmem:[%s13191_s19 + $0x440] sm:$0xff] %v7356_v10  ;;  %v7139_v56 = vadd.f32 %v9796_v33, %v6915_v20  ;;  %v6228_v51 = vadd.f32 %v6227_v49, %v13531_v0  ;;  %v9806_v33 = vld [vmem:[%s10758_s18 + $0x590] sm:$0xff] }
 0x9f2   : > { %v7362_v50 = vmax.f32 %v7138_v7, 0.0  ;;  %v6921_v36 = vmul.f32 0.17, %v6226_v57 }
 0x9f3   : > { %v7363_v23 = vmax.f32 %v7139_v56, 0.0  ;;  %v6922_v61 = vmul.f32 0.17, %v6228_v51  ;;  %v6231_v21 = vpop.f32.mrb[204].mxu0 }
 0x9f4   : > { %7586 = vst [vmem:[%s13191_s19 + $0x470] sm:$0xff] %v7362_v50  ;;  %v7145_v5 = vadd.f32 %v9797_v4, %v6921_v36  ;;  %v6232_v39 = vadd.f32 %v6231_v21, %v13517_v47  ;;  %v6233_v43 = vpop.f32.mrb[205].mxu0  ;;  %v9807_v4 = vld [vmem:[%s10758_s18 + $0x5c0] sm:$0xff] }
 0x9f5   : > { %7587 = vst [vmem:[%s13191_s19 + $0x478] sm:$0xff] %v7363_v23  ;;  %v7146_v40 = vadd.f32 %v9798_v48, %v6922_v61  ;;  %v6234_v2 = vadd.f32 %v6233_v43, %v13531_v0  ;;  %v9808_v48 = vld [vmem:[%s10758_s18 + $0x5c8] sm:$0xff] }
 0x9f6   : > { %v7369_v14 = vmax.f32 %v7145_v5, 0.0  ;;  %v6928_v24 = vmul.f32 0.17, %v6232_v39 }
 0x9f7   : > { %v7370_v42 = vmax.f32 %v7146_v40, 0.0  ;;  %v6929_v63 = vmul.f32 0.17, %v6234_v2  ;;  %v6237_v27 = vpop.f32.mrb[206].mxu0 }
 0x9f8   : > { %7593 = vst [vmem:[%s13191_s19 + $0x4a8] sm:$0xff] %v7369_v14  ;;  %v7152_v35 = vadd.f32 %v9799_v11, %v6928_v24  ;;  %v6238_v46 = vadd.f32 %v6237_v27, %v13517_v47  ;;  %v6239_v29 = vpop.f32.mrb[207].mxu0  ;;  %v9809_v11 = vld [vmem:[%s10758_s18 + $0x5f8] sm:$0xff] }
 0x9f9   : > { %7594 = vst [vmem:[%s13191_s19 + $0x4b0] sm:$0xff] %v7370_v42  ;;  %v7153_v17 = vadd.f32 %v9800_v60, %v6929_v63  ;;  %v6240_v37 = vadd.f32 %v6239_v29, %v13531_v0  ;;  %v9810_v60 = vld [vmem:[%s10758_s18 + $0x600] sm:$0xff] }
 0x9fa   : > { %v7376_v22 = vmax.f32 %v7152_v35, 0.0  ;;  %v6935_v32 = vmul.f32 0.17, %v6238_v46 }
 0x9fb   : > { %v7377_v34 = vmax.f32 %v7153_v17, 0.0  ;;  %v6936_v55 = vmul.f32 0.17, %v6240_v37  ;;  %v6243_v1 = vpop.f32.mrb[208].mxu0 }
 0x9fc   : > { %7600 = vst [vmem:[%s13191_s19 + $0x4e0] sm:$0xff] %v7376_v22  ;;  %v7159_v12 = vadd.f32 %v9801_v59, %v6935_v32  ;;  %v6244_v52 = vadd.f32 %v6243_v1, %v13517_v47  ;;  %v6245_v53 = vpop.f32.mrb[209].mxu0  ;;  %v9811_v59 = vld [vmem:[%s10758_s18 + $0x630] sm:$0xff] }
 0x9fd   : > { %7601 = vst [vmem:[%s13191_s19 + $0x4e8] sm:$0xff] %v7377_v34  ;;  %v7160_v25 = vadd.f32 %v9802_v19, %v6936_v55  ;;  %v6246_v28 = vadd.f32 %v6245_v53, %v13531_v0  ;;  %v9812_v19 = vld [vmem:[%s10758_s18 + $0x638] sm:$0xff] }
 0x9fe   : > { %v7383_v38 = vmax.f32 %v7159_v12, 0.0  ;;  %v6942_v41 = vmul.f32 0.17, %v6244_v52 }
 0x9ff   : > { %v7384_v31 = vmax.f32 %v7160_v25, 0.0  ;;  %v6943_v62 = vmul.f32 0.17, %v6246_v28  ;;  %v6249_v45 = vpop.f32.mrb[210].mxu0 }
 0xa00   : > { %7607 = vst [vmem:[%s13191_s19 + $0x518] sm:$0xff] %v7383_v38  ;;  %v7166_v58 = vadd.f32 %v9803_v26, %v6942_v41  ;;  %v6250_v18 = vadd.f32 %v6249_v45, %v13517_v47  ;;  %v6251_v30 = vpop.f32.mrb[211].mxu0  ;;  %v5759_v26 = vsub.s32 4, %v14413_v8 }
 0xa01   : > { %7608 = vst [vmem:[%s13191_s19 + $0x520] sm:$0xff] %v7384_v31  ;;  %v7167_v15 = vadd.f32 %v9804_v9, %v6943_v62  ;;  %v6252_v3 = vadd.f32 %v6251_v30, %v13531_v0 }
 0xa02   : > { %v7390_v16 = vmax.f32 %v7166_v58, 0.0  ;;  %v6949_v13 = vmul.f32 0.17, %v6250_v18  ;;  %v9813_v58 = vld [vmem:[%s10758_s18 + $0x668] sm:$0xff] }
 0xa03   : > { %v7391_v10 = vmax.f32 %v7167_v15, 0.0  ;;  %v6950_v20 = vmul.f32 0.17, %v6252_v3  ;;  %v6255_v54 = vpop.f32.mrb[212].mxu0  ;;  %v5763_v15 = vsub.s32 5, %v14413_v8  ;;  %v9814_v3 = vld [vmem:[%s10758_s18 + $0x670] sm:$0xff] }
 0xa04   : > { %7614 = vst [vmem:[%s13191_s19 + $0x550] sm:$0xff] %v7390_v16  ;;  %v7173_v7 = vadd.f32 %v9805_v44, %v6949_v13  ;;  %v6256_v57 = vadd.f32 %v6255_v54, %v13517_v47  ;;  %v6257_v49 = vpop.f32.mrb[213].mxu0 }
 0xa05   : > { %7615 = vst [vmem:[%s13191_s19 + $0x558] sm:$0xff] %v7391_v10  ;;  %v7174_v56 = vadd.f32 %v9806_v33, %v6950_v20  ;;  %v6258_v51 = vadd.f32 %v6257_v49, %v13531_v0 }
 0xa06   : > { %v7397_v50 = vmax.f32 %v7173_v7, 0.0  ;;  %v6956_v36 = vmul.f32 0.17, %v6256_v57  ;;  %v9815_v57 = vld [vmem:[%s10758_s18 + $0x6a0] sm:$0xff] }
 0xa07   : > { %v7398_v23 = vmax.f32 %v7174_v56, 0.0  ;;  %v6957_v61 = vmul.f32 0.17, %v6258_v51  ;;  %v6261_v21 = vpop.f32.mrb[214].mxu0  ;;  %v13749_v56 = vrot.slane %v13514_v6, %v5759_v26  ;;  %v9816_v51 = vld [vmem:[%s10758_s18 + $0x6a8] sm:$0xff]  ;;  %v9823_v26 = vld [vmem:[%s10758_s18 + $0x90] sm:$0xff] }
 0xa08   : > { %7621 = vst [vmem:[%s13191_s19 + $0x588] sm:$0xff] %v7397_v50  ;;  %v7180_v5 = vadd.f32 %v9807_v4, %v6956_v36  ;;  %v6262_v39 = vadd.f32 %v6261_v21, %v13517_v47  ;;  %v6263_v43 = vpop.f32.mrb[215].mxu0 }
 0xa09   : > { %7622 = vst [vmem:[%s13191_s19 + $0x590] sm:$0xff] %v7398_v23  ;;  %v7181_v40 = vadd.f32 %v9808_v48, %v6957_v61  ;;  %v6264_v2 = vadd.f32 %v6263_v43, %v13531_v0  ;;  %v13755_v23 = vrot.slane %v13514_v6, %v5763_v15 }
 0xa0a   : > { %v7404_v14 = vmax.f32 %v7180_v5, 0.0  ;;  %v6963_v24 = vmul.f32 0.17, %v6262_v39  ;;  %v9817_v39 = vld [vmem:[%s10758_s18 + $0x6d8] sm:$0xff] }
 0xa0b   : > { %v7405_v42 = vmax.f32 %v7181_v40, 0.0  ;;  %v6964_v63 = vmul.f32 0.17, %v6264_v2  ;;  %v6267_v27 = vpop.f32.mrb[216].mxu0 }
 0xa0c   : > { %7628 = vst [vmem:[%s13191_s19 + $0x5c0] sm:$0xff] %v7404_v14  ;;  %v7187_v35 = vadd.f32 %v9809_v11, %v6963_v24  ;;  %v6268_v46 = vadd.f32 %v6267_v27, %v13517_v47  ;;  %v6269_v29 = vpop.f32.mrb[217].mxu0  ;;  %v9819_v11 = vld [vmem:[%s10758_s18 + $0x20] sm:$0xff] }
 0xa0d   : > { %7629 = vst [vmem:[%s13191_s19 + $0x5c8] sm:$0xff] %v7405_v42  ;;  %v7188_v17 = vadd.f32 %v9810_v60, %v6964_v63  ;;  %v6270_v37 = vadd.f32 %v6269_v29, %v13531_v0  ;;  %v9820_v60 = vld [vmem:[%s10758_s18 + $0x28] sm:$0xff] }
 0xa0e   : > { %v7411_v22 = vmax.f32 %v7187_v35, 0.0  ;;  %v6970_v32 = vmul.f32 0.17, %v6268_v46 }
 0xa0f   : > { %v7412_v34 = vmax.f32 %v7188_v17, 0.0  ;;  %v6971_v55 = vmul.f32 0.17, %v6270_v37  ;;  %v6273_v1 = vpop.f32.mrb[218].mxu0 }
 0xa10   : > { %7635 = vst [vmem:[%s13191_s19 + $0x5f8] sm:$0xff] %v7411_v22  ;;  %v7194_v12 = vadd.f32 %v9811_v59, %v6970_v32  ;;  %v6274_v52 = vadd.f32 %v6273_v1, %v13517_v47  ;;  %v6275_v53 = vpop.f32.mrb[219].mxu0  ;;  %v9821_v59 = vld [vmem:[%s10758_s18 + $0x58] sm:$0xff] }
 0xa11   : > { %7636 = vst [vmem:[%s13191_s19 + $0x600] sm:$0xff] %v7412_v34  ;;  %v7195_v25 = vadd.f32 %v9812_v19, %v6971_v55  ;;  %v6276_v28 = vadd.f32 %v6275_v53, %v13531_v0  ;;  %v9822_v19 = vld [vmem:[%s10758_s18 + $0x60] sm:$0xff] }
 0xa12   : > { %v7418_v38 = vmax.f32 %v7194_v12, 0.0  ;;  %v6977_v41 = vmul.f32 0.17, %v6274_v52 }
 0xa13   : > { %v7419_v31 = vmax.f32 %v7195_v25, 0.0  ;;  %v6978_v62 = vmul.f32 0.17, %v6276_v28 }
 0xa14   : > { %7642 = vst [vmem:[%s13191_s19 + $0x630] sm:$0xff] %v7418_v38  ;;  %v7201_v18 = vadd.f32 %v9813_v58, %v6977_v41 }
 0xa15   : > { %v6279_v45 = vpop.f32.mrb[220].mxu0  ;;  %7643 = vst [vmem:[%s13191_s19 + $0x638] sm:$0xff] %v7419_v31  ;;  %v7202_v16 = vadd.f32 %v9814_v3, %v6978_v62 }
 0xa16   : > { %v6280_v30 = vadd.f32 %v6279_v45, %v13517_v47  ;;  %v6281_v9 = vpop.f32.mrb[221].mxu0  ;;  %v7425_v10 = vmax.f32 %v7201_v18, 0.0 }
 0xa17   : > { %v6282_v13 = vadd.f32 %v6281_v9, %v13531_v0  ;;  %v7426_v54 = vmax.f32 %v7202_v16, 0.0  ;;  %v9824_v9 = vld [vmem:[%s10758_s18 + $0x98] sm:$0xff] }
 0xa18   : > { %v6984_v20 = vmul.f32 0.17, %v6280_v30  ;;  %7649 = vst [vmem:[%s13191_s19 + $0x668] sm:$0xff] %v7425_v10 }
 0xa19   : > { %v6985_v44 = vmul.f32 0.17, %v6282_v13  ;;  %v6285_v7 = vpop.f32.mrb[222].mxu0  ;;  %7650 = vst [vmem:[%s13191_s19 + $0x670] sm:$0xff] %v7426_v54 }
 0xa1a   : > { %v7208_v49 = vadd.f32 %v9815_v57, %v6984_v20  ;;  %v6286_v33 = vadd.f32 %v6285_v7, %v13517_v47  ;;  %v6287_v8 = vpop.f32.mrb[223].mxu0 }
 0xa1b   : > { %v7209_v50 = vadd.f32 %v9816_v51, %v6985_v44  ;;  %v6288_v36 = vadd.f32 %v6287_v8, %v13531_v0  ;;  %v9818_v0 = vld [vmem:[%s10758_s18 + $0x6e0] sm:$0xff]  ;;  %v9825_v44 = vld [vmem:[%s10758_s18 + $0xc8] sm:$0xff] }
 0xa1c   : > { %v7432_v61 = vmax.f32 %v7208_v49, 0.0  ;;  %v6991_v21 = vmul.f32 0.17, %v6286_v33  ;;  %v9826_v33 = vld [vmem:[%s10758_s18 + $0xd0] sm:$0xff] }
 0xa1d   : > { %v7433_v4 = vmax.f32 %v7209_v50, 0.0  ;;  %v6992_v5 = vmul.f32 0.17, %v6288_v36  ;;  %v6356_v47 = vpop.f32.mrb[224].mxu0 }
 0xa1e   : > { %7656 = vst [vmem:[%s13191_s19 + $0x6a0] sm:$0xff] %v7432_v61  ;;  %v7215_v43 = vadd.f32 %v9817_v39, %v6991_v21  ;;  %v6357_v48 = vadd.f32 %v6356_v47, %v13749_v56  ;;  %v6358_v40 = vpop.f32.mrb[225].mxu0 }
 0xa1f   : > { %7657 = vst [vmem:[%s13191_s19 + $0x6a8] sm:$0xff] %v7433_v4  ;;  %v7216_v2 = vadd.f32 %v9818_v0, %v6992_v5  ;;  %v6359_v6 = vadd.f32 %v6358_v40, %v13755_v23  ;;  %v9827_v5 = vld [vmem:[%s10758_s18 + $0x100] sm:$0xff] }
 0xa20   : > { %v7439_v14 = vmax.f32 %v7215_v43, 0.0  ;;  %v6776_v24 = vmul.f32 0.17, %v6357_v48  ;;  %v9828_v48 = vld [vmem:[%s10758_s18 + $0x108] sm:$0xff] }
 0xa21   : > { %v7440_v42 = vmax.f32 %v7216_v2, 0.0  ;;  %v6777_v63 = vmul.f32 0.17, %v6359_v6  ;;  %v6362_v27 = vpop.f32.mrb[226].mxu0 }
 0xa22   : > { %7663 = vst [vmem:[%s13191_s19 + $0x6d8] sm:$0xff] %v7439_v14  ;;  %v7000_v35 = vadd.f32 %v9819_v11, %v6776_v24  ;;  %v6363_v46 = vadd.f32 %v6362_v27, %v13749_v56  ;;  %v6364_v29 = vpop.f32.mrb[227].mxu0 }
 0xa23   : > { %7664 = vst [vmem:[%s13191_s19 + $0x6e0] sm:$0xff] %v7440_v42  ;;  %v7001_v17 = vadd.f32 %v9820_v60, %v6777_v63  ;;  %v6365_v37 = vadd.f32 %v6364_v29, %v13755_v23  ;;  %v9829_v63 = vld [vmem:[%s10758_s18 + $0x138] sm:$0xff] }
 0xa24   : > { %v7224_v22 = vmax.f32 %v7000_v35, 0.0  ;;  %v6783_v32 = vmul.f32 0.17, %v6363_v46  ;;  %v9830_v46 = vld [vmem:[%s10758_s18 + $0x140] sm:$0xff] }
 0xa25   : > { %v7225_v34 = vmax.f32 %v7001_v17, 0.0  ;;  %v6784_v55 = vmul.f32 0.17, %v6365_v37  ;;  %v6368_v1 = vpop.f32.mrb[228].mxu0 }
 0xa26   : > { %7448 = vst [vmem:[%s13191_s19 + $0x20] sm:$0xff] %v7224_v22  ;;  %v7007_v12 = vadd.f32 %v9821_v59, %v6783_v32  ;;  %v6369_v52 = vadd.f32 %v6368_v1, %v13749_v56  ;;  %v6370_v53 = vpop.f32.mrb[229].mxu0 }
 0xa27   : > { %7449 = vst [vmem:[%s13191_s19 + $0x28] sm:$0xff] %v7225_v34  ;;  %v7008_v25 = vadd.f32 %v9822_v19, %v6784_v55  ;;  %v6371_v28 = vadd.f32 %v6370_v53, %v13755_v23  ;;  %v9831_v55 = vld [vmem:[%s10758_s18 + $0x170] sm:$0xff] }
 0xa28   : > { %v7231_v38 = vmax.f32 %v7007_v12, 0.0  ;;  %v6790_v41 = vmul.f32 0.17, %v6369_v52  ;;  %v9832_v52 = vld [vmem:[%s10758_s18 + $0x178] sm:$0xff] }
 0xa29   : > { %v7232_v31 = vmax.f32 %v7008_v25, 0.0  ;;  %v6791_v62 = vmul.f32 0.17, %v6371_v28  ;;  %v6374_v45 = vpop.f32.mrb[230].mxu0 }
 0xa2a   : > { %7455 = vst [vmem:[%s13191_s19 + $0x58] sm:$0xff] %v7231_v38  ;;  %v7014_v58 = vadd.f32 %v9823_v26, %v6790_v41  ;;  %v6375_v18 = vadd.f32 %v6374_v45, %v13749_v56  ;;  %v6376_v30 = vpop.f32.mrb[231].mxu0 }
 0xa2b   : > { %7456 = vst [vmem:[%s13191_s19 + $0x60] sm:$0xff] %v7232_v31  ;;  %v7015_v15 = vadd.f32 %v9824_v9, %v6791_v62  ;;  %v6377_v3 = vadd.f32 %v6376_v30, %v13755_v23  ;;  %v9833_v62 = vld [vmem:[%s10758_s18 + $0x1a8] sm:$0xff] }
 0xa2c   : > { %v7238_v16 = vmax.f32 %v7014_v58, 0.0  ;;  %v6797_v13 = vmul.f32 0.17, %v6375_v18  ;;  %v9834_v18 = vld [vmem:[%s10758_s18 + $0x1b0] sm:$0xff] }
 0xa2d   : > { %v7239_v10 = vmax.f32 %v7015_v15, 0.0  ;;  %v6798_v20 = vmul.f32 0.17, %v6377_v3  ;;  %v6380_v54 = vpop.f32.mrb[232].mxu0 }
 0xa2e   : > { %7462 = vst [vmem:[%s13191_s19 + $0x90] sm:$0xff] %v7238_v16  ;;  %v7021_v7 = vadd.f32 %v9825_v44, %v6797_v13  ;;  %v6381_v57 = vadd.f32 %v6380_v54, %v13749_v56  ;;  %v6382_v49 = vpop.f32.mrb[233].mxu0 }
 0xa2f   : > { %7463 = vst [vmem:[%s13191_s19 + $0x98] sm:$0xff] %v7239_v10  ;;  %v7022_v8 = vadd.f32 %v9826_v33, %v6798_v20  ;;  %v6383_v51 = vadd.f32 %v6382_v49, %v13755_v23  ;;  %v9835_v20 = vld [vmem:[%s10758_s18 + $0x1e0] sm:$0xff] }
 0xa30   : > { %v7245_v50 = vmax.f32 %v7021_v7, 0.0  ;;  %v6804_v36 = vmul.f32 0.17, %v6381_v57  ;;  %v9836_v57 = vld [vmem:[%s10758_s18 + $0x1e8] sm:$0xff] }
 0xa31   : > { %v7246_v61 = vmax.f32 %v7022_v8, 0.0  ;;  %v6805_v21 = vmul.f32 0.17, %v6383_v51  ;;  %v6386_v4 = vpop.f32.mrb[234].mxu0 }
 0xa32   : > { %7469 = vst [vmem:[%s13191_s19 + $0xc8] sm:$0xff] %v7245_v50  ;;  %v7028_v47 = vadd.f32 %v9827_v5, %v6804_v36  ;;  %v6387_v39 = vadd.f32 %v6386_v4, %v13749_v56  ;;  %v6388_v43 = vpop.f32.mrb[235].mxu0 }
 0xa33   : > { %7470 = vst [vmem:[%s13191_s19 + $0xd0] sm:$0xff] %v7246_v61  ;;  %v7029_v40 = vadd.f32 %v9828_v48, %v6805_v21  ;;  %v6389_v0 = vadd.f32 %v6388_v43, %v13755_v23  ;;  %v9837_v21 = vld [vmem:[%s10758_s18 + $0x218] sm:$0xff] }
 0xa34   : > { %v7252_v2 = vmax.f32 %v7028_v47, 0.0  ;;  %v6811_v6 = vmul.f32 0.17, %v6387_v39  ;;  %v9838_v39 = vld [vmem:[%s10758_s18 + $0x220] sm:$0xff] }
 0xa35   : > { %v7253_v14 = vmax.f32 %v7029_v40, 0.0  ;;  %v6812_v24 = vmul.f32 0.17, %v6389_v0  ;;  %v6392_v42 = vpop.f32.mrb[236].mxu0 }
 0xa36   : > { %7476 = vst [vmem:[%s13191_s19 + $0x100] sm:$0xff] %v7252_v2  ;;  %v7035_v27 = vadd.f32 %v9829_v63, %v6811_v6  ;;  %v6393_v11 = vadd.f32 %v6392_v42, %v13749_v56  ;;  %v6394_v35 = vpop.f32.mrb[237].mxu0 }
 0xa37   : > { %7477 = vst [vmem:[%s13191_s19 + $0x108] sm:$0xff] %v7253_v14  ;;  %v7036_v29 = vadd.f32 %v9830_v46, %v6812_v24  ;;  %v6395_v60 = vadd.f32 %v6394_v35, %v13755_v23  ;;  %v9839_v24 = vld [vmem:[%s10758_s18 + $0x250] sm:$0xff] }
 0xa38   : > { %v7259_v17 = vmax.f32 %v7035_v27, 0.0  ;;  %v6818_v37 = vmul.f32 0.17, %v6393_v11  ;;  %v9840_v11 = vld [vmem:[%s10758_s18 + $0x258] sm:$0xff] }
 0xa39   : > { %v7260_v22 = vmax.f32 %v7036_v29, 0.0  ;;  %v6819_v32 = vmul.f32 0.17, %v6395_v60  ;;  %v6398_v34 = vpop.f32.mrb[238].mxu0 }
 0xa3a   : > { %7483 = vst [vmem:[%s13191_s19 + $0x138] sm:$0xff] %v7259_v17  ;;  %v7042_v1 = vadd.f32 %v9831_v55, %v6818_v37  ;;  %v6399_v59 = vadd.f32 %v6398_v34, %v13749_v56  ;;  %v6400_v12 = vpop.f32.mrb[239].mxu0 }
 0xa3b   : > { %7484 = vst [vmem:[%s13191_s19 + $0x140] sm:$0xff] %v7260_v22  ;;  %v7043_v53 = vadd.f32 %v9832_v52, %v6819_v32  ;;  %v6401_v19 = vadd.f32 %v6400_v12, %v13755_v23  ;;  %v9841_v32 = vld [vmem:[%s10758_s18 + $0x288] sm:$0xff] }
 0xa3c   : > { %v7266_v25 = vmax.f32 %v7042_v1, 0.0  ;;  %v6825_v28 = vmul.f32 0.17, %v6399_v59  ;;  %v9842_v59 = vld [vmem:[%s10758_s18 + $0x290] sm:$0xff] }
 0xa3d   : > { %v7267_v38 = vmax.f32 %v7043_v53, 0.0  ;;  %v6826_v41 = vmul.f32 0.17, %v6401_v19  ;;  %v6404_v31 = vpop.f32.mrb[240].mxu0 }
 0xa3e   : > { %7490 = vst [vmem:[%s13191_s19 + $0x170] sm:$0xff] %v7266_v25  ;;  %v7049_v45 = vadd.f32 %v9833_v62, %v6825_v28  ;;  %v6405_v26 = vadd.f32 %v6404_v31, %v13749_v56  ;;  %v6406_v58 = vpop.f32.mrb[241].mxu0 }
 0xa3f   : > { %7491 = vst [vmem:[%s13191_s19 + $0x178] sm:$0xff] %v7267_v38  ;;  %v7050_v30 = vadd.f32 %v9834_v18, %v6826_v41  ;;  %v6407_v9 = vadd.f32 %v6406_v58, %v13755_v23  ;;  %v9843_v41 = vld [vmem:[%s10758_s18 + $0x2c0] sm:$0xff] }
 0xa40   : > { %v7273_v15 = vmax.f32 %v7049_v45, 0.0  ;;  %v6832_v3 = vmul.f32 0.17, %v6405_v26  ;;  %v9844_v26 = vld [vmem:[%s10758_s18 + $0x2c8] sm:$0xff] }
 0xa41   : > { %v7274_v16 = vmax.f32 %v7050_v30, 0.0  ;;  %v6833_v13 = vmul.f32 0.17, %v6407_v9  ;;  %v6410_v10 = vpop.f32.mrb[242].mxu0 }
 0xa42   : > { %7497 = vst [vmem:[%s13191_s19 + $0x1a8] sm:$0xff] %v7273_v15  ;;  %v7056_v54 = vadd.f32 %v9835_v20, %v6832_v3  ;;  %v6411_v44 = vadd.f32 %v6410_v10, %v13749_v56  ;;  %v6412_v7 = vpop.f32.mrb[243].mxu0 }
 0xa43   : > { %7498 = vst [vmem:[%s13191_s19 + $0x1b0] sm:$0xff] %v7274_v16  ;;  %v7057_v49 = vadd.f32 %v9836_v57, %v6833_v13  ;;  %v6413_v33 = vadd.f32 %v6412_v7, %v13755_v23  ;;  %v9845_v13 = vld [vmem:[%s10758_s18 + $0x2f8] sm:$0xff] }
 0xa44   : > { %v7280_v8 = vmax.f32 %v7056_v54, 0.0  ;;  %v6839_v51 = vmul.f32 0.17, %v6411_v44  ;;  %v9846_v44 = vld [vmem:[%s10758_s18 + $0x300] sm:$0xff] }
 0xa45   : > { %v7281_v50 = vmax.f32 %v7057_v49, 0.0  ;;  %v6840_v36 = vmul.f32 0.17, %v6413_v33  ;;  %v6416_v61 = vpop.f32.mrb[244].mxu0 }
 0xa46   : > { %7504 = vst [vmem:[%s13191_s19 + $0x1e0] sm:$0xff] %v7280_v8  ;;  %v7063_v4 = vadd.f32 %v9837_v21, %v6839_v51  ;;  %v6417_v5 = vadd.f32 %v6416_v61, %v13749_v56  ;;  %v6418_v47 = vpop.f32.mrb[245].mxu0 }
 0xa47   : > { %7505 = vst [vmem:[%s13191_s19 + $0x1e8] sm:$0xff] %v7281_v50  ;;  %v7064_v43 = vadd.f32 %v9838_v39, %v6840_v36  ;;  %v6419_v48 = vadd.f32 %v6418_v47, %v13755_v23  ;;  %v9847_v36 = vld [vmem:[%s10758_s18 + $0x330] sm:$0xff] }
 0xa48   : > { %v7287_v40 = vmax.f32 %v7063_v4, 0.0  ;;  %v6846_v0 = vmul.f32 0.17, %v6417_v5  ;;  %v9848_v5 = vld [vmem:[%s10758_s18 + $0x338] sm:$0xff] }
 0xa49   : > { %v7288_v2 = vmax.f32 %v7064_v43, 0.0  ;;  %v6847_v6 = vmul.f32 0.17, %v6419_v48  ;;  %v6422_v14 = vpop.f32.mrb[246].mxu0 }
 0xa4a   : > { %7511 = vst [vmem:[%s13191_s19 + $0x218] sm:$0xff] %v7287_v40  ;;  %v7070_v42 = vadd.f32 %v9839_v24, %v6846_v0  ;;  %v6423_v63 = vadd.f32 %v6422_v14, %v13749_v56  ;;  %v6424_v27 = vpop.f32.mrb[247].mxu0 }
 0xa4b   : > { %7512 = vst [vmem:[%s13191_s19 + $0x220] sm:$0xff] %v7288_v2  ;;  %v7071_v35 = vadd.f32 %v9840_v11, %v6847_v6  ;;  %v6425_v46 = vadd.f32 %v6424_v27, %v13755_v23  ;;  %v9849_v6 = vld [vmem:[%s10758_s18 + $0x368] sm:$0xff] }
 0xa4c   : > { %v7294_v29 = vmax.f32 %v7070_v42, 0.0  ;;  %v6853_v60 = vmul.f32 0.17, %v6423_v63  ;;  %v9850_v63 = vld [vmem:[%s10758_s18 + $0x370] sm:$0xff] }
 0xa4d   : > { %v7295_v17 = vmax.f32 %v7071_v35, 0.0  ;;  %v6854_v37 = vmul.f32 0.17, %v6425_v46  ;;  %v6428_v22 = vpop.f32.mrb[248].mxu0 }
 0xa4e   : > { %7518 = vst [vmem:[%s13191_s19 + $0x250] sm:$0xff] %v7294_v29  ;;  %v7077_v34 = vadd.f32 %v9841_v32, %v6853_v60  ;;  %v6429_v55 = vadd.f32 %v6428_v22, %v13749_v56  ;;  %v6430_v1 = vpop.f32.mrb[249].mxu0 }
 0xa4f   : > { %7519 = vst [vmem:[%s13191_s19 + $0x258] sm:$0xff] %v7295_v17  ;;  %v7078_v12 = vadd.f32 %v9842_v59, %v6854_v37  ;;  %v6431_v52 = vadd.f32 %v6430_v1, %v13755_v23  ;;  %v9851_v37 = vld [vmem:[%s10758_s18 + $0x3a0] sm:$0xff] }
 0xa50   : > { %v7301_v53 = vmax.f32 %v7077_v34, 0.0  ;;  %v6860_v19 = vmul.f32 0.17, %v6429_v55  ;;  %v9852_v55 = vld [vmem:[%s10758_s18 + $0x3a8] sm:$0xff] }
 0xa51   : > { %v7302_v25 = vmax.f32 %v7078_v12, 0.0  ;;  %v6861_v28 = vmul.f32 0.17, %v6431_v52  ;;  %v6434_v38 = vpop.f32.mrb[250].mxu0 }
 0xa52   : > { %7525 = vst [vmem:[%s13191_s19 + $0x288] sm:$0xff] %v7301_v53  ;;  %v7084_v31 = vadd.f32 %v9843_v41, %v6860_v19  ;;  %v6435_v62 = vadd.f32 %v6434_v38, %v13749_v56  ;;  %v6436_v45 = vpop.f32.mrb[251].mxu0 }
 0xa53   : > { %7526 = vst [vmem:[%s13191_s19 + $0x290] sm:$0xff] %v7302_v25  ;;  %v7085_v58 = vadd.f32 %v9844_v26, %v6861_v28  ;;  %v6437_v18 = vadd.f32 %v6436_v45, %v13755_v23  ;;  %v9853_v28 = vld [vmem:[%s10758_s18 + $0x3d8] sm:$0xff] }
 0xa54   : > { %v7308_v30 = vmax.f32 %v7084_v31, 0.0  ;;  %v6867_v9 = vmul.f32 0.17, %v6435_v62  ;;  %v9854_v62 = vld [vmem:[%s10758_s18 + $0x3e0] sm:$0xff] }
 0xa55   : > { %v7309_v15 = vmax.f32 %v7085_v58, 0.0  ;;  %v6868_v3 = vmul.f32 0.17, %v6437_v18  ;;  %v6440_v16 = vpop.f32.mrb[252].mxu0 }
 0xa56   : > { %7532 = vst [vmem:[%s13191_s19 + $0x2c0] sm:$0xff] %v7308_v30  ;;  %v7091_v10 = vadd.f32 %v9845_v13, %v6867_v9  ;;  %v6441_v20 = vadd.f32 %v6440_v16, %v13749_v56  ;;  %v6442_v54 = vpop.f32.mrb[253].mxu0 }
 0xa57   : > { %7533 = vst [vmem:[%s13191_s19 + $0x2c8] sm:$0xff] %v7309_v15  ;;  %v7092_v7 = vadd.f32 %v9846_v44, %v6868_v3  ;;  %v6443_v57 = vadd.f32 %v6442_v54, %v13755_v23  ;;  %v9855_v3 = vld [vmem:[%s10758_s18 + $0x410] sm:$0xff] }
 0xa58   : > { %v7315_v49 = vmax.f32 %v7091_v10, 0.0  ;;  %v6874_v33 = vmul.f32 0.17, %v6441_v20  ;;  %v9856_v20 = vld [vmem:[%s10758_s18 + $0x418] sm:$0xff] }
 0xa59   : > { %v7316_v8 = vmax.f32 %v7092_v7, 0.0  ;;  %v6875_v51 = vmul.f32 0.17, %v6443_v57  ;;  %v6446_v50 = vpop.f32.mrb[254].mxu0 }
 0xa5a   : > { %7539 = vst [vmem:[%s13191_s19 + $0x2f8] sm:$0xff] %v7315_v49  ;;  %v7098_v61 = vadd.f32 %v9847_v36, %v6874_v33  ;;  %v6447_v21 = vadd.f32 %v6446_v50, %v13749_v56  ;;  %v6448_v4 = vpop.f32.mrb[255].mxu0 }
 0xa5b   : > { %7540 = vst [vmem:[%s13191_s19 + $0x300] sm:$0xff] %v7316_v8  ;;  %v7099_v47 = vadd.f32 %v9848_v5, %v6875_v51  ;;  %v6449_v39 = vadd.f32 %v6448_v4, %v13755_v23  ;;  %v9857_v51 = vld [vmem:[%s10758_s18 + $0x448] sm:$0xff] }
 0xa5c   : > { %v7322_v43 = vmax.f32 %v7098_v61, 0.0  ;;  %v6881_v48 = vmul.f32 0.17, %v6447_v21  ;;  %v9858_v21 = vld [vmem:[%s10758_s18 + $0x450] sm:$0xff] }
 0xa5d   : > { %v7323_v40 = vmax.f32 %v7099_v47, 0.0  ;;  %v6882_v0 = vmul.f32 0.17, %v6449_v39  ;;  %v6452_v2 = vpop.f32.mrb[0].mxu0 }
 0xa5e   : > { %7546 = vst [vmem:[%s13191_s19 + $0x330] sm:$0xff] %v7322_v43  ;;  %v7105_v14 = vadd.f32 %v9849_v6, %v6881_v48  ;;  %v6453_v24 = vadd.f32 %v6452_v2, %v13749_v56  ;;  %v6454_v42 = vpop.f32.mrb[1].mxu0 }
 0xa5f   : > { %7547 = vst [vmem:[%s13191_s19 + $0x338] sm:$0xff] %v7323_v40  ;;  %v7106_v27 = vadd.f32 %v9850_v63, %v6882_v0  ;;  %v6455_v11 = vadd.f32 %v6454_v42, %v13755_v23  ;;  %v9859_v0 = vld [vmem:[%s10758_s18 + $0x480] sm:$0xff] }
 0xa60   : > { %v7329_v35 = vmax.f32 %v7105_v14, 0.0  ;;  %v6888_v46 = vmul.f32 0.17, %v6453_v24  ;;  %v9860_v24 = vld [vmem:[%s10758_s18 + $0x488] sm:$0xff] }
 0xa61   : > { %v7330_v29 = vmax.f32 %v7106_v27, 0.0  ;;  %v6889_v60 = vmul.f32 0.17, %v6455_v11  ;;  %v6458_v17 = vpop.f32.mrb[2].mxu0 }
 0xa62   : > { %7553 = vst [vmem:[%s13191_s19 + $0x368] sm:$0xff] %v7329_v35  ;;  %v7112_v22 = vadd.f32 %v9851_v37, %v6888_v46  ;;  %v6459_v32 = vadd.f32 %v6458_v17, %v13749_v56  ;;  %v6460_v34 = vpop.f32.mrb[3].mxu0 }
 0xa63   : > { %7554 = vst [vmem:[%s13191_s19 + $0x370] sm:$0xff] %v7330_v29  ;;  %v7113_v1 = vadd.f32 %v9852_v55, %v6889_v60  ;;  %v6461_v59 = vadd.f32 %v6460_v34, %v13755_v23  ;;  %v9861_v60 = vld [vmem:[%s10758_s18 + $0x4b8] sm:$0xff] }
 0xa64   : > { %v7336_v12 = vmax.f32 %v7112_v22, 0.0  ;;  %v6895_v52 = vmul.f32 0.17, %v6459_v32  ;;  %v9862_v32 = vld [vmem:[%s10758_s18 + $0x4c0] sm:$0xff] }
 0xa65   : > { %v7337_v53 = vmax.f32 %v7113_v1, 0.0  ;;  %v6896_v19 = vmul.f32 0.17, %v6461_v59  ;;  %v6464_v25 = vpop.f32.mrb[4].mxu0 }
 0xa66   : > { %7560 = vst [vmem:[%s13191_s19 + $0x3a0] sm:$0xff] %v7336_v12  ;;  %v7119_v38 = vadd.f32 %v9853_v28, %v6895_v52  ;;  %v6465_v41 = vadd.f32 %v6464_v25, %v13749_v56  ;;  %v6466_v31 = vpop.f32.mrb[5].mxu0 }
 0xa67   : > { %7561 = vst [vmem:[%s13191_s19 + $0x3a8] sm:$0xff] %v7337_v53  ;;  %v7120_v45 = vadd.f32 %v9854_v62, %v6896_v19  ;;  %v6467_v26 = vadd.f32 %v6466_v31, %v13755_v23  ;;  %v9863_v19 = vld [vmem:[%s10758_s18 + $0x4f0] sm:$0xff] }
 0xa68   : > { %v7343_v58 = vmax.f32 %v7119_v38, 0.0  ;;  %v6902_v18 = vmul.f32 0.17, %v6465_v41  ;;  %v9864_v41 = vld [vmem:[%s10758_s18 + $0x4f8] sm:$0xff] }
 0xa69   : > { %v7344_v30 = vmax.f32 %v7120_v45, 0.0  ;;  %v6903_v9 = vmul.f32 0.17, %v6467_v26  ;;  %v6470_v15 = vpop.f32.mrb[6].mxu0 }
 0xa6a   : > { %7567 = vst [vmem:[%s13191_s19 + $0x3d8] sm:$0xff] %v7343_v58  ;;  %v7126_v16 = vadd.f32 %v9855_v3, %v6902_v18  ;;  %v6471_v13 = vadd.f32 %v6470_v15, %v13749_v56  ;;  %v6472_v10 = vpop.f32.mrb[7].mxu0 }
 0xa6b   : > { %7568 = vst [vmem:[%s13191_s19 + $0x3e0] sm:$0xff] %v7344_v30  ;;  %v7127_v54 = vadd.f32 %v9856_v20, %v6903_v9  ;;  %v6473_v44 = vadd.f32 %v6472_v10, %v13755_v23  ;;  %v9865_v9 = vld [vmem:[%s10758_s18 + $0x528] sm:$0xff] }
 0xa6c   : > { %v7350_v7 = vmax.f32 %v7126_v16, 0.0  ;;  %v6909_v57 = vmul.f32 0.17, %v6471_v13  ;;  %v9866_v13 = vld [vmem:[%s10758_s18 + $0x530] sm:$0xff] }
 0xa6d   : > { %v7351_v49 = vmax.f32 %v7127_v54, 0.0  ;;  %v6910_v33 = vmul.f32 0.17, %v6473_v44  ;;  %v6476_v8 = vpop.f32.mrb[8].mxu0 }
 0xa6e   : > { %7574 = vst [vmem:[%s13191_s19 + $0x410] sm:$0xff] %v7350_v7  ;;  %v7133_v50 = vadd.f32 %v9857_v51, %v6909_v57  ;;  %v6477_v36 = vadd.f32 %v6476_v8, %v13749_v56  ;;  %v6478_v61 = vpop.f32.mrb[9].mxu0 }
 0xa6f   : > { %7575 = vst [vmem:[%s13191_s19 + $0x418] sm:$0xff] %v7351_v49  ;;  %v7134_v4 = vadd.f32 %v9858_v21, %v6910_v33  ;;  %v6479_v5 = vadd.f32 %v6478_v61, %v13755_v23  ;;  %v9867_v33 = vld [vmem:[%s10758_s18 + $0x560] sm:$0xff] }
 0xa70   : > { %v7357_v47 = vmax.f32 %v7133_v50, 0.0  ;;  %v6916_v39 = vmul.f32 0.17, %v6477_v36  ;;  %v9868_v36 = vld [vmem:[%s10758_s18 + $0x568] sm:$0xff] }
 0xa71   : > { %v7358_v43 = vmax.f32 %v7134_v4, 0.0  ;;  %v6917_v48 = vmul.f32 0.17, %v6479_v5  ;;  %v6482_v40 = vpop.f32.mrb[10].mxu0 }
 0xa72   : > { %7581 = vst [vmem:[%s13191_s19 + $0x448] sm:$0xff] %v7357_v47  ;;  %v7140_v2 = vadd.f32 %v9859_v0, %v6916_v39  ;;  %v6483_v6 = vadd.f32 %v6482_v40, %v13749_v56  ;;  %v6484_v14 = vpop.f32.mrb[11].mxu0 }
 0xa73   : > { %7582 = vst [vmem:[%s13191_s19 + $0x450] sm:$0xff] %v7358_v43  ;;  %v7141_v42 = vadd.f32 %v9860_v24, %v6917_v48  ;;  %v6485_v63 = vadd.f32 %v6484_v14, %v13755_v23  ;;  %v9869_v48 = vld [vmem:[%s10758_s18 + $0x598] sm:$0xff] }
 0xa74   : > { %v7364_v27 = vmax.f32 %v7140_v2, 0.0  ;;  %v6923_v11 = vmul.f32 0.17, %v6483_v6  ;;  %v9870_v6 = vld [vmem:[%s10758_s18 + $0x5a0] sm:$0xff] }
 0xa75   : > { %v7365_v35 = vmax.f32 %v7141_v42, 0.0  ;;  %v6924_v46 = vmul.f32 0.17, %v6485_v63  ;;  %v6488_v29 = vpop.f32.mrb[12].mxu0 }
 0xa76   : > { %7588 = vst [vmem:[%s13191_s19 + $0x480] sm:$0xff] %v7364_v27  ;;  %v7147_v17 = vadd.f32 %v9861_v60, %v6923_v11  ;;  %v6489_v37 = vadd.f32 %v6488_v29, %v13749_v56  ;;  %v6490_v22 = vpop.f32.mrb[13].mxu0 }
 0xa77   : > { %7589 = vst [vmem:[%s13191_s19 + $0x488] sm:$0xff] %v7365_v35  ;;  %v7148_v34 = vadd.f32 %v9862_v32, %v6924_v46  ;;  %v6491_v55 = vadd.f32 %v6490_v22, %v13755_v23  ;;  %v9871_v46 = vld [vmem:[%s10758_s18 + $0x5d0] sm:$0xff] }
 0xa78   : > { %v7371_v1 = vmax.f32 %v7147_v17, 0.0  ;;  %v6930_v59 = vmul.f32 0.17, %v6489_v37  ;;  %v9872_v37 = vld [vmem:[%s10758_s18 + $0x5d8] sm:$0xff] }
 0xa79   : > { %v7372_v12 = vmax.f32 %v7148_v34, 0.0  ;;  %v6931_v52 = vmul.f32 0.17, %v6491_v55  ;;  %v6494_v53 = vpop.f32.mrb[14].mxu0 }
 0xa7a   : > { %7595 = vst [vmem:[%s13191_s19 + $0x4b8] sm:$0xff] %v7371_v1  ;;  %v7154_v25 = vadd.f32 %v9863_v19, %v6930_v59  ;;  %v6495_v28 = vadd.f32 %v6494_v53, %v13749_v56  ;;  %v6496_v38 = vpop.f32.mrb[15].mxu0 }
 0xa7b   : > { %7596 = vst [vmem:[%s13191_s19 + $0x4c0] sm:$0xff] %v7372_v12  ;;  %v7155_v31 = vadd.f32 %v9864_v41, %v6931_v52  ;;  %v6497_v62 = vadd.f32 %v6496_v38, %v13755_v23  ;;  %v9873_v52 = vld [vmem:[%s10758_s18 + $0x608] sm:$0xff] }
 0xa7c   : > { %v7378_v45 = vmax.f32 %v7154_v25, 0.0  ;;  %v6937_v26 = vmul.f32 0.17, %v6495_v28  ;;  %v9874_v28 = vld [vmem:[%s10758_s18 + $0x610] sm:$0xff] }
 0xa7d   : > { %v7379_v58 = vmax.f32 %v7155_v31, 0.0  ;;  %v6938_v18 = vmul.f32 0.17, %v6497_v62  ;;  %v6500_v30 = vpop.f32.mrb[16].mxu0 }
 0xa7e   : > { %7602 = vst [vmem:[%s13191_s19 + $0x4f0] sm:$0xff] %v7378_v45  ;;  %v7161_v15 = vadd.f32 %v9865_v9, %v6937_v26  ;;  %v6501_v3 = vadd.f32 %v6500_v30, %v13749_v56  ;;  %v6502_v16 = vpop.f32.mrb[17].mxu0 }
 0xa7f   : > { %7603 = vst [vmem:[%s13191_s19 + $0x4f8] sm:$0xff] %v7379_v58  ;;  %v7162_v10 = vadd.f32 %v9866_v13, %v6938_v18  ;;  %v6503_v20 = vadd.f32 %v6502_v16, %v13755_v23  ;;  %v9875_v18 = vld [vmem:[%s10758_s18 + $0x640] sm:$0xff] }
 0xa80   : > { %v7385_v54 = vmax.f32 %v7161_v15, 0.0  ;;  %v6944_v44 = vmul.f32 0.17, %v6501_v3  ;;  %v9876_v3 = vld [vmem:[%s10758_s18 + $0x648] sm:$0xff] }
 0xa81   : > { %v7386_v7 = vmax.f32 %v7162_v10, 0.0  ;;  %v6945_v57 = vmul.f32 0.17, %v6503_v20  ;;  %v6506_v49 = vpop.f32.mrb[18].mxu0 }
 0xa82   : > { %7609 = vst [vmem:[%s13191_s19 + $0x528] sm:$0xff] %v7385_v54  ;;  %v7168_v8 = vadd.f32 %v9867_v33, %v6944_v44  ;;  %v6507_v51 = vadd.f32 %v6506_v49, %v13749_v56  ;;  %v6508_v50 = vpop.f32.mrb[19].mxu0 }
 0xa83   : > { %7610 = vst [vmem:[%s13191_s19 + $0x530] sm:$0xff] %v7386_v7  ;;  %v7169_v61 = vadd.f32 %v9868_v36, %v6945_v57  ;;  %v6509_v21 = vadd.f32 %v6508_v50, %v13755_v23  ;;  %v9877_v57 = vld [vmem:[%s10758_s18 + $0x678] sm:$0xff] }
 0xa84   : > { %v7392_v4 = vmax.f32 %v7168_v8, 0.0  ;;  %v6951_v5 = vmul.f32 0.17, %v6507_v51  ;;  %v9878_v51 = vld [vmem:[%s10758_s18 + $0x680] sm:$0xff] }
 0xa85   : > { %v7393_v47 = vmax.f32 %v7169_v61, 0.0  ;;  %v6952_v39 = vmul.f32 0.17, %v6509_v21  ;;  %v6512_v43 = vpop.f32.mrb[20].mxu0 }
 0xa86   : > { %7616 = vst [vmem:[%s13191_s19 + $0x560] sm:$0xff] %v7392_v4  ;;  %v7175_v40 = vadd.f32 %v9869_v48, %v6951_v5  ;;  %v6513_v0 = vadd.f32 %v6512_v43, %v13749_v56  ;;  %v6514_v2 = vpop.f32.mrb[21].mxu0 }
 0xa87   : > { %7617 = vst [vmem:[%s13191_s19 + $0x568] sm:$0xff] %v7393_v47  ;;  %v7176_v14 = vadd.f32 %v9870_v6, %v6952_v39  ;;  %v6515_v24 = vadd.f32 %v6514_v2, %v13755_v23  ;;  %v9879_v39 = vld [vmem:[%s10758_s18 + $0x6b0] sm:$0xff] }
 0xa88   : > { %v7399_v42 = vmax.f32 %v7175_v40, 0.0  ;;  %v6958_v63 = vmul.f32 0.17, %v6513_v0  ;;  %v9880_v0 = vld [vmem:[%s10758_s18 + $0x6b8] sm:$0xff] }
 0xa89   : > { %v7400_v27 = vmax.f32 %v7176_v14, 0.0  ;;  %v6959_v11 = vmul.f32 0.17, %v6515_v24  ;;  %v6518_v35 = vpop.f32.mrb[22].mxu0 }
 0xa8a   : > { %7623 = vst [vmem:[%s13191_s19 + $0x598] sm:$0xff] %v7399_v42  ;;  %v7182_v29 = vadd.f32 %v9871_v46, %v6958_v63  ;;  %v6519_v60 = vadd.f32 %v6518_v35, %v13749_v56  ;;  %v6520_v17 = vpop.f32.mrb[23].mxu0 }
 0xa8b   : > { %7624 = vst [vmem:[%s13191_s19 + $0x5a0] sm:$0xff] %v7400_v27  ;;  %v7183_v22 = vadd.f32 %v9872_v37, %v6959_v11  ;;  %v6521_v32 = vadd.f32 %v6520_v17, %v13755_v23  ;;  %v9881_v27 = vld [vmem:[%s10758_s18 + $0x6e8] sm:$0xff] }
 0xa8c   : > { %v7406_v34 = vmax.f32 %v7182_v29, 0.0  ;;  %v6965_v55 = vmul.f32 0.17, %v6519_v60 }
 0xa8d   : > { %v7407_v1 = vmax.f32 %v7183_v22, 0.0  ;;  %v6966_v59 = vmul.f32 0.17, %v6521_v32  ;;  %v6524_v12 = vpop.f32.mrb[24].mxu0 }
 0xa8e   : > { %7630 = vst [vmem:[%s13191_s19 + $0x5d0] sm:$0xff] %v7406_v34  ;;  %v7189_v53 = vadd.f32 %v9873_v52, %v6965_v55  ;;  %v6525_v19 = vadd.f32 %v6524_v12, %v13749_v56  ;;  %v6526_v25 = vpop.f32.mrb[25].mxu0 }
 0xa8f   : > { %7631 = vst [vmem:[%s13191_s19 + $0x5d8] sm:$0xff] %v7407_v1  ;;  %v7190_v38 = vadd.f32 %v9874_v28, %v6966_v59  ;;  %v6527_v41 = vadd.f32 %v6526_v25, %v13755_v23 }
 0xa90   : > { %v7413_v31 = vmax.f32 %v7189_v53, 0.0  ;;  %v6972_v62 = vmul.f32 0.17, %v6525_v19 }
 0xa91   : > { %v7414_v45 = vmax.f32 %v7190_v38, 0.0  ;;  %v6973_v26 = vmul.f32 0.17, %v6527_v41  ;;  %v6530_v58 = vpop.f32.mrb[26].mxu0 }
 0xa92   : > { %7637 = vst [vmem:[%s13191_s19 + $0x608] sm:$0xff] %v7413_v31  ;;  %v7196_v30 = vadd.f32 %v9875_v18, %v6972_v62  ;;  %v6531_v9 = vadd.f32 %v6530_v58, %v13749_v56  ;;  %v6532_v15 = vpop.f32.mrb[27].mxu0 }
 0xa93   : > { %7638 = vst [vmem:[%s13191_s19 + $0x610] sm:$0xff] %v7414_v45  ;;  %v7197_v16 = vadd.f32 %v9876_v3, %v6973_v26  ;;  %v6533_v13 = vadd.f32 %v6532_v15, %v13755_v23 }
 0xa94   : > { %v7420_v10 = vmax.f32 %v7196_v30, 0.0  ;;  %v6979_v20 = vmul.f32 0.17, %v6531_v9 }
 0xa95   : > { %v7421_v54 = vmax.f32 %v7197_v16, 0.0  ;;  %v6980_v44 = vmul.f32 0.17, %v6533_v13  ;;  %v6536_v7 = vpop.f32.mrb[28].mxu0 }
 0xa96   : > { %7644 = vst [vmem:[%s13191_s19 + $0x640] sm:$0xff] %v7420_v10  ;;  %v7203_v49 = vadd.f32 %v9877_v57, %v6979_v20  ;;  %v6537_v33 = vadd.f32 %v6536_v7, %v13749_v56  ;;  %v6538_v8 = vpop.f32.mrb[29].mxu0 }
 0xa97   : > { %7645 = vst [vmem:[%s13191_s19 + $0x648] sm:$0xff] %v7421_v54  ;;  %v7204_v50 = vadd.f32 %v9878_v51, %v6980_v44  ;;  %v6539_v36 = vadd.f32 %v6538_v8, %v13755_v23 }
 0xa98   : > { %v7427_v61 = vmax.f32 %v7203_v49, 0.0  ;;  %v6986_v21 = vmul.f32 0.17, %v6537_v33 }
 0xa99   : > { %v7428_v4 = vmax.f32 %v7204_v50, 0.0  ;;  %v6987_v5 = vmul.f32 0.17, %v6539_v36  ;;  %v6542_v47 = vpop.f32.mrb[30].mxu0 }
 0xa9a   : > { %7651 = vst [vmem:[%s13191_s19 + $0x678] sm:$0xff] %v7427_v61  ;;  %v7210_v43 = vadd.f32 %v9879_v39, %v6986_v21  ;;  %v6543_v48 = vadd.f32 %v6542_v47, %v13749_v56  ;;  %v6544_v40 = vpop.f32.mrb[31].mxu0  ;;  %v9882_v56 = vld [vmem:[%s10758_s18 + $0x6f0] sm:$0xff]  ;;  %s10227_s18 = scalar_lea.vmem %s10226_s30, 57344 }
 0xa9b   : > { %7652 = vst [vmem:[%s13191_s19 + $0x680] sm:$0xff] %v7428_v4  ;;  %v7211_v2 = vadd.f32 %v9880_v0, %v6987_v5  ;;  %v6545_v6 = vadd.f32 %v6544_v40, %v13755_v23  ;;  %p10229_p3 = scmp.lt.s32.totalorder %s10227_s18, %s10221_s29 }
 0xa9c   : > { %v7434_v14 = vmax.f32 %v7210_v43, 0.0  ;;  %v6993_v24 = vmul.f32 0.17, %v6543_v48 }
 0xa9d   : > { %v7435_v42 = vmax.f32 %v7211_v2, 0.0  ;;  %v6994_v63 = vmul.f32 0.17, %v6545_v6  ;;  %p10230_p4 = por %p10229_p3, %p10228_p11 }
 0xa9e   : > { %7658 = vst [vmem:[%s13191_s19 + $0x6b0] sm:$0xff] %v7434_v14  ;;  %v7217_v11 = vadd.f32 %v9881_v27, %v6993_v24 }
 0xa9f   : > { %7659 = vst [vmem:[%s13191_s19 + $0x6b8] sm:$0xff] %v7435_v42  ;;  %v7218_v35 = vadd.f32 %v9882_v56, %v6994_v63  ;;  %p10231_p8 = pnand %p10230_p4, %p10224_p10 }
 0xaa0   : > { %v7441_v46 = vmax.f32 %v7217_v11, 0.0 }
 0xaa1   : > { %v7442_v23 = vmax.f32 %v7218_v35, 0.0 }
 0xaa2   : > { %7665 = vst [vmem:[%s13191_s19 + $0x6e8] sm:$0xff] %v7441_v46 }
 0xaa3   : > { %7666 = vst [vmem:[%s13191_s19 + $0x6f0] sm:$0xff] %v7442_v23 }
 0xaa4   : > { %10234 = shalt.err (!%p10231_p8)
}
 0xaa5   : > { %s10235_s12 = scalar_lea.hbm %s13958_s3, 28672  ;;  %s10239_s15 = scalar_lea.hbm %s14430_s2, 114688 }
 0xaa6   : > { %p10236_p6 = scmp.ne.s32.totalorder %s13958_s3, %s10235_s12  ;;  %p10240_p1 = scmp.lt.u32.totalorder %s13958_s3, %s14430_s2 }
 0xaa7   : > { %p10241_p13 = scmp.lt.u32.totalorder %s10239_s15, %s10235_s12  ;;  %p10243_p2 = scmp.lt.u32.totalorder %s10235_s12, %s13958_s3 }
 0xaa8   : > { %p10237_p9 = pnand %p10236_p6, %p14431_p7 }
 0xaa9   : > { %p10242_p0 = por %p10241_p13, %p10240_p1 }
 0xaaa   : > { %p10238_p12 = pneg %p10237_p9 }
 0xaab   : > { %p10244_p5 = por %p10243_p2, %p10242_p0 }
 0xaad   : > { %p10245_p10 = pnand %p10244_p5, %p10238_p12 }
 0xaaf   : > { %10248 = shalt.err (!%p10245_p10)
}
 0xab0   : > { %s10334_s29 = smov 896   ;;  %s10335_s30 = smov 56  }
 0xab1   : > { %9533 = dma.vmem_to_hbm [thread:$0]  (%p14431_p7), %s13960_s1, 28672, %s13958_s3, %s7669_s0, %s10334_s29, %s10334_s29, %s10335_s30  }
 0xab2 PF: > { %p9600_p11 = scmp.ge.s32.totalorder %s10311_s24, 2  ;;  %s7698_s18 = sand.u32 1, %s10299_s21  }
 0xab3   : > { %p14432_p3 = scmp.ne.s32.totalorder %s14177_s14, 0  ;;  %s7699_s12 = scalar_lea.sflag [#allocation4], %s7698_s18 }
 0xab5   : > { %p9574_p4 = pnand %p9600_p11, %p14432_p3 }
 0xab7   : > { %10294 = dma.done.wait (!%p9574_p4), %s7699_s12, 28672  }
 0xab8   : > { %10296 = vsyncadd (!%p9574_p4), %s7699_s12, 4294938624  ;;  %p31_p8 = scmp.ge.s32.totalorder %s10676_s13, 6   ;;  %s14433_s21 = smov %s10303_s22 }
 0xab9   : > { %s14434_s22 = smov %s10307_s23  ;;  %s14435_s23 = smov %s10688_s17 }
 0xaba   : > { %s14436_s24 = smov %s10676_s13  ;;  %33 = sbr.rel (!%p31_p8) target bundleno = 17 (0x11), region = 157 }
 0xac1   :  { %7704 = vsyncpa [#allocation3], 1 }
 0xac2   :  { %7706 = vsyncpa [#allocation3 + $0x1], 1 }
 0xac3   :  { %7707 = vsyncpa [#allocation6], 1 }
 0xac4   :  { %7708 = vsyncpa [#allocation9], 1 }
 0xac5   :  { %7709 = vsyncpa [#allocation12], 1 }
 0xac6   :  { %7710 = vsyncpa [#allocation15], 1 }
 0xac7   :  { %7711 = vsyncpa [#allocation18], 1 }
 0xac8   :  { %7712 = vsyncpa [#allocation21], 1 }
 0xac9   :  { %7713 = vsyncpa [#allocation4], 1 }
 0xaca   :  { %7715 = vsyncpa [#allocation4 + $0x1], 1 }

</bundles_post_ra>
